<compile_context>
chip_gen: v5e
topology: v5e:2x2
jax: 0.10.0
libtpu: 0.0.40
codegen_flags: <defaults>
</compile_context>

<pallas_src>
import functools

import jax
import jax.numpy as jnp
from jax.experimental import pallas as pl
from jax.experimental.pallas import tpu as pltpu


# ---------------------------------------------------------------------------
# Per-generation VMEM budget
# ---------------------------------------------------------------------------

_VMEM_LIMIT_CACHE = None


def _vmem_limit_bytes():
    """Scoped-VMEM limit per chip generation: leave headroom on v7x (64 MiB is the
    entire physical VMEM there), exploit the 128 MiB on v5e/v6e."""
    global _VMEM_LIMIT_CACHE
    if _VMEM_LIMIT_CACHE is not None:
        return _VMEM_LIMIT_CACHE
    cap = 128 * 1024 * 1024
    try:
        info = pltpu.get_tpu_info()
        cap = int(getattr(info, "vmem_capacity_bytes", cap) or cap)
    except Exception:
        pass
    if cap <= 64 * 1024 * 1024:          # v7x: keep ~16 MiB margin for Mosaic scratch
        limit = max(cap - 16 * 1024 * 1024, 32 * 1024 * 1024)
    else:                                # v5e / v6e
        limit = min(cap - 24 * 1024 * 1024, 112 * 1024 * 1024)
    _VMEM_LIMIT_CACHE = limit
    return limit


# ---------------------------------------------------------------------------
# Tiling helpers
# ---------------------------------------------------------------------------

def _tile(total, desired, align):
    """Block size satisfying Mosaic's rule: the full dim, or an `align`-multiple dividing `total`."""
    if total <= desired:
        return total
    t = (desired // align) * align
    while t >= align:
        if total % t == 0:
            return t
        t -= align
    return total


def _ensure_parallel(M, tm, N, tn):
    """Shrink tiles until the parallel (i, j) grid has >= 2 iterations so both v7x
    TensorCores get work; no-op on an already non-degenerate grid."""
    def shrink(total, t, align):
        c = (t // 2 // align) * align
        while c >= align:
            if total % c == 0:
                return c
            c -= align
        return t

    for _ in range(8):
        if (M // tm) * (N // tn) >= 2:
            break
        new_tm = shrink(M, tm, 8)
        if new_tm != tm:
            tm = new_tm
            continue
        new_tn = shrink(N, tn, 128)
        if new_tn != tn:
            tn = new_tn
            continue
        break
    return tm, tn


def _gelu_tanh(x):
    # TODO(synk): PyTorch nn.GELU() default is the exact erf formulation; the tanh
    # approximation is used because erf lowering inside Mosaic kernels is not guaranteed.
    c = jnp.float32(0.7978845608028654)  # sqrt(2/pi)
    return 0.5 * x * (1.0 + jnp.tanh(c * (x + 0.044715 * x * x * x)))


# ---------------------------------------------------------------------------
# Fused (LayerNorm?) -> matmul -> (+bias / GELU / +residual) kernels
# ---------------------------------------------------------------------------

def _matmul_direct_kernel(*refs, ln, cache_ln, has_bias, act, has_res):
    """Single-K-block path: dot result + epilogue written straight to o_ref
    (no accumulator round trip).  Grid is (M//tm, N//tn)."""
    refs = list(refs)
    x_ref = refs.pop(0)
    w_ref = refs.pop(0)
    g_ref = refs.pop(0) if ln else None
    gb_ref = refs.pop(0) if ln else None
    b_ref = refs.pop(0) if has_bias else None
    r_ref = refs.pop(0) if has_res else None
    o_ref = refs.pop(0)
    xn_ref = refs.pop(0) if (ln and cache_ln) else None

    if ln:
        def _norm():
            x = x_ref[...].astype(jnp.float32)
            mean = jnp.mean(x, axis=-1, keepdims=True)
            var = jnp.mean(jnp.square(x - mean), axis=-1, keepdims=True)
            xn = (x - mean) * jax.lax.rsqrt(var + jnp.float32(1e-5))
            xn = xn * g_ref[...].astype(jnp.float32) + gb_ref[...].astype(jnp.float32)
            return xn.astype(jnp.bfloat16)

        if cache_ln:
            # Compute LN once per row tile (j == 0) and reuse for every N tile.
            @pl.when(pl.program_id(1) == 0)
            def _():
                xn_ref[...] = _norm()
            xin = xn_ref[...]
        else:
            xin = _norm()
    else:
        xin = x_ref[...].astype(jnp.bfloat16)

    acc = jnp.dot(xin, w_ref[...], preferred_element_type=jnp.float32)
    if has_bias:
        acc = acc + b_ref[...].astype(jnp.float32)
    if act == "gelu":
        acc = _gelu_tanh(acc)
    if has_res:
        acc = acc + r_ref[...].astype(jnp.float32)
    o_ref[...] = acc.astype(o_ref.dtype)


def _matmul_acc_kernel(*refs, has_bias, act, has_res):
    """Multi-K-block path: f32 VMEM accumulator with pl.when init/finalize.
    Grid is (M//tm, N//tn, K//tk) with K innermost ("arbitrary")."""
    refs = list(refs)
    x_ref = refs.pop(0)
    w_ref = refs.pop(0)
    b_ref = refs.pop(0) if has_bias else None
    r_ref = refs.pop(0) if has_res else None
    o_ref = refs.pop(0)
    acc_ref = refs.pop(0)

    k_idx = pl.program_id(2)

    @pl.when(k_idx == 0)
    def _():
        acc_ref[...] = jnp.zeros(acc_ref.shape, acc_ref.dtype)

    acc_ref[...] += jnp.dot(x_ref[...].astype(jnp.bfloat16), w_ref[...],
                            preferred_element_type=jnp.float32)

    @pl.when(k_idx == pl.num_programs(2) - 1)
    def _():
        acc = acc_ref[...]
        if has_bias:
            acc = acc + b_ref[...].astype(jnp.float32)
        if act == "gelu":
            acc = _gelu_tanh(acc)
        if has_res:
            acc = acc + r_ref[...].astype(jnp.float32)
        o_ref[...] = acc.astype(o_ref.dtype)


def fused_matmul(x, w, *, ln_params=None, bias=None, act="none", residual=None,
                 res_index_map=None, row_block=None, out_dtype=jnp.float32,
                 tm_desired=512, tn_desired=512, tk_desired=1024):
    """(M, K) @ (K, N) with optional fused LayerNorm prologue and bias/GELU/residual
    epilogue.  Weights hit the MXU in bf16; accumulation stays f32.
    `res_index_map(i, j)` may override the residual row-tile mapping."""
    M, K = x.shape
    K2, N = w.shape
    assert K == K2
    if w.dtype != jnp.bfloat16:
        w = w.astype(jnp.bfloat16)          # weights should already be pre-cast at init
    ln = ln_params is not None
    has_bias = bias is not None
    has_res = residual is not None

    if row_block is not None:
        assert M % row_block == 0
        tm = row_block
    else:
        tm = _tile(M, tm_desired, 8)
    tn = _tile(N, tn_desired, 128)
    tk = K if ln else _tile(K, tk_desired, 128)   # LN needs the full feature row in one block
    if row_block is None:
        tm, tn = _ensure_parallel(M, tm, N, tn)

    single_k = (K // tk == 1)
    cache_ln = ln and (N // tn > 1)               # only cache LN when it is reused across N tiles
    vmem_limit = _vmem_limit_bytes()

    cost = pl.CostEstimate(
        flops=2 * M * N * K,
        transcendentals=(M * N if act == "gelu" else 0),
        bytes_accessed=(x.size * x.dtype.itemsize + w.size * 2
                        + M * N * jnp.dtype(out_dtype).itemsize
                        + (residual.size * residual.dtype.itemsize if has_res else 0)))

    if single_k:
        grid = (M // tm, N // tn)
        in_specs = [pl.BlockSpec((tm, K), lambda i, j: (i, 0)),
                    pl.BlockSpec((K, tn), lambda i, j: (0, j))]
        args = [x, w]
        if ln:
            gamma, beta = ln_params
            in_specs += [pl.BlockSpec((1, K), lambda i, j: (0, 0)),
                         pl.BlockSpec((1, K), lambda i, j: (0, 0))]
            args += [gamma.reshape(1, K), beta.reshape(1, K)]
        if has_bias:
            in_specs.append(pl.BlockSpec((1, tn), lambda i, j: (0, j)))
            args.append(bias.reshape(1, N))
        if has_res:
            rmap = res_index_map if res_index_map is not None else (lambda i, j: (i, j))
            in_specs.append(pl.BlockSpec((tm, tn), rmap))
            args.append(residual)
        scratch = [pltpu.VMEM((tm, K), jnp.bfloat16)] if cache_ln else []
        kernel = functools.partial(_matmul_direct_kernel, ln=ln, cache_ln=cache_ln,
                                   has_bias=has_bias, act=act, has_res=has_res)
        # With LN caching the j axis must stay on-core ("arbitrary") so every core sees
        # its own j==0 and never reads an uninitialized normalized-row scratch.
        dims = ("parallel", "arbitrary") if cache_ln else ("parallel", "parallel")
        return pl.pallas_call(
            kernel,
            out_shape=jax.ShapeDtypeStruct((M, N), out_dtype),
            grid=grid,
            in_specs=in_specs,
            out_specs=pl.BlockSpec((tm, tn), lambda i, j: (i, j)),
            scratch_shapes=scratch,
            compiler_params=pltpu.CompilerParams(
                dimension_semantics=dims, vmem_limit_bytes=vmem_limit),
            cost_estimate=cost,
        )(*args)

    # ---- multi-K accumulation path (never used with ln=True) ----
    grid = (M // tm, N // tn, K // tk)
    in_specs = [pl.BlockSpec((tm, tk), lambda i, j, k: (i, k)),
                pl.BlockSpec((tk, tn), lambda i, j, k: (k, j))]
    args = [x, w]
    if has_bias:
        in_specs.append(pl.BlockSpec((1, tn), lambda i, j, k: (0, j)))
        args.append(bias.reshape(1, N))
    if has_res:
        if res_index_map is not None:
            rmap = lambda i, j, k: res_index_map(i, j)
        else:
            rmap = lambda i, j, k: (i, j)
        in_specs.append(pl.BlockSpec((tm, tn), rmap))
        args.append(residual)
    kernel = functools.partial(_matmul_acc_kernel, has_bias=has_bias, act=act,
                               has_res=has_res)
    return pl.pallas_call(
        kernel,
        out_shape=jax.ShapeDtypeStruct((M, N), out_dtype),
        grid=grid,
        in_specs=in_specs,
        out_specs=pl.BlockSpec((tm, tn), lambda i, j, k: (i, j)),
        scratch_shapes=[pltpu.VMEM((tm, tn), jnp.float32)],
        compiler_params=pltpu.CompilerParams(
            dimension_semantics=("parallel", "parallel", "arbitrary"),
            vmem_limit_bytes=vmem_limit),
        cost_estimate=cost,
    )(*args)


# ---------------------------------------------------------------------------
# Head-packed flash attention (online softmax over kv tiles, packed qkv input)
# ---------------------------------------------------------------------------

def _flash_attention_kernel(q_ref, k_ref, v_ref, o_ref, m_sc, l_sc, acc_sc,
                            *, heads, dim_head, scale):
    kv_idx = pl.program_id(2)

    @pl.when(kv_idx == 0)
    def _():
        m_sc[...] = jnp.full(m_sc.shape, -jnp.inf, m_sc.dtype)
        l_sc[...] = jnp.zeros(l_sc.shape, l_sc.dtype)
        acc_sc[...] = jnp.zeros(acc_sc.shape, acc_sc.dtype)

    dn = (((1,), (1,)), ((), ()))   # contract last dims of q_h / k_h (no k.T relayout)
    # TODO(synk): for large head counts (>=8) switch to lax.fori_loop / a heads grid
    # axis so live ranges are bounded; a static unroll is fine for small `heads`.
    for h in range(heads):
        lo, hi = h * dim_head, (h + 1) * dim_head
        # Fold the softmax scale into q (tq*dim_head muls instead of tq*tkv).
        q_h = (q_ref[0, :, lo:hi].astype(jnp.float32) * scale).astype(jnp.bfloat16)
        k_h = k_ref[0, :, lo:hi].astype(jnp.bfloat16)
        v_h = v_ref[0, :, lo:hi].astype(jnp.bfloat16)

        s = jax.lax.dot_general(q_h, k_h, dn,
                                preferred_element_type=jnp.float32)   # (tq, tkv)
        m_prev = m_sc[h]                                              # (tq, 1)
        m_new = jnp.maximum(m_prev, jnp.max(s, axis=-1, keepdims=True))
        alpha = jnp.exp(m_prev - m_new)
        p = jnp.exp(s - m_new)
        l_sc[h] = alpha * l_sc[h] + jnp.sum(p, axis=-1, keepdims=True)
        pv = jnp.dot(p.astype(jnp.bfloat16), v_h, preferred_element_type=jnp.float32)
        acc_sc[h] = alpha * acc_sc[h] + pv                            # full-extent scratch RMW
        m_sc[h] = m_new

    @pl.when(kv_idx == pl.num_programs(2) - 1)
    def _():
        # Normalize per head, assemble once, then a single lane-dense (tq, inner) store.
        outs = []
        for h in range(heads):
            inv = pl.reciprocal(l_sc[h], approx=True)
            outs.append(acc_sc[h] * inv)
        o_ref[0] = jnp.concatenate(outs, axis=-1).astype(o_ref.dtype)


def flash_attention(qkv, *, heads, dim_head, scale, out_dtype=jnp.bfloat16,
                    tq_desired=512, tkv_desired=512):
    """Flash attention over a packed (B, N, 3*inner) qkv tensor (heads stay packed)."""
    B, N, three_inner = qkv.shape
    inner = heads * dim_head
    assert three_inner == 3 * inner
    tq = _tile(N, tq_desired, 8)
    tkv = _tile(N, tkv_desired, 8)
    # Keep >= 2 parallel grid iterations so both v7x TensorCores get work when B == 1.
    while B * (N // tq) < 2 and tq >= 16 and (tq // 2) % 8 == 0 and N % (tq // 2) == 0:
        tq //= 2
    grid = (B, N // tq, N // tkv)

    if inner % 128 == 0:
        # Slice q/k/v straight out of packed qkv via last-axis block indices 0/1/2
        # (no XLA split, no extra HBM round trip of qkv).
        in_specs = [pl.BlockSpec((1, tq, inner), lambda b, qi, ki: (b, qi, 0)),
                    pl.BlockSpec((1, tkv, inner), lambda b, qi, ki: (b, ki, 1)),
                    pl.BlockSpec((1, tkv, inner), lambda b, qi, ki: (b, ki, 2))]
        args = (qkv, qkv, qkv)
    else:
        # inner not lane-aligned: last-axis sub-blocks of the packed tensor would be
        # illegal, so fall back to an XLA split (each array's last dim is then "full").
        q, k, v = jnp.split(qkv, 3, axis=-1)
        in_specs = [pl.BlockSpec((1, tq, inner), lambda b, qi, ki: (b, qi, 0)),
                    pl.BlockSpec((1, tkv, inner), lambda b, qi, ki: (b, ki, 0)),
                    pl.BlockSpec((1, tkv, inner), lambda b, qi, ki: (b, ki, 0))]
        args = (q, k, v)

    ebytes = jnp.dtype(qkv.dtype).itemsize
    cost = pl.CostEstimate(
        flops=4 * B * N * N * inner,
        transcendentals=B * heads * N * N,
        bytes_accessed=ebytes * B * N * inner * (1 + 2 * (N // tq))
                       + B * N * inner * jnp.dtype(out_dtype).itemsize)

    kernel = functools.partial(_flash_attention_kernel, heads=heads,
                               dim_head=dim_head, scale=scale)
    return pl.pallas_call(
        kernel,
        out_shape=jax.ShapeDtypeStruct((B, N, inner), out_dtype),
        grid=grid,
        in_specs=in_specs,
        out_specs=pl.BlockSpec((1, tq, inner), lambda b, qi, ki: (b, qi, 0)),
        scratch_shapes=[pltpu.VMEM((heads, tq, 1), jnp.float32),          # running max
                        pltpu.VMEM((heads, tq, 1), jnp.float32),          # running denom
                        pltpu.VMEM((heads, tq, dim_head), jnp.float32)],  # per-head acc
        compiler_params=pltpu.CompilerParams(
            dimension_semantics=("parallel", "parallel", "arbitrary"),
            vmem_limit_bytes=_vmem_limit_bytes()),
        cost_estimate=cost,
    )(*args)


# ---------------------------------------------------------------------------
# Conv3d patch embedding (+bias, +pos_emb fused) and model glue
# ---------------------------------------------------------------------------

def conv3d_to_tokens(img, w_mat, b, pos_emb):
    """Conv3d(C->dim, k=3, s=1, p=1), 'b c h w d -> b (h w d) c', then + pos_emb.
    `w_mat` is the conv weight pre-reshaped to (27*C, dim) and pre-cast to bf16."""
    B, C, H, W, D = img.shape
    dim = w_mat.shape[1]
    n_tok = H * W * D
    x = img.transpose(0, 2, 3, 4, 1).astype(jnp.bfloat16)   # channels-last, bf16 im2col
    xp = jnp.pad(x, ((0, 0), (1, 1), (1, 1), (1, 1), (0, 0)))
    # TODO(synk): replace XLA im2col with in-kernel tap accumulation (27 shifted (C,dim)
    # matmuls over a pl.ANY HBM ref) to avoid materializing the 27x patch tensor.
    taps = [xp[:, kh:kh + H, kw:kw + W, kd:kd + D, :]
            for kh in range(3) for kw in range(3) for kd in range(3)]
    p = jnp.concatenate(taps, axis=-1).reshape(B * n_tok, 27 * C)

    tm = _tile(n_tok, 256, 8)
    if n_tok % 8 != 0:
        # Odd token count: cannot pick a batch-aligned, sublane-aligned row tile -> add in XLA.
        y = fused_matmul(p, w_mat, bias=b)
        return (y.reshape(B, n_tok, dim) + pos_emb.reshape(1, n_tok, dim)).reshape(B * n_tok, dim)
    tiles_per_img = n_tok // tm
    return fused_matmul(p, w_mat, bias=b,
                        residual=pos_emb.reshape(n_tok, dim).astype(jnp.float32),
                        res_index_map=lambda i, j: (i % tiles_per_img, j),
                        row_block=tm)


def transformer_unit_forward(img, params, *, heads, dim_head):
    B, C, H, W, D = img.shape
    n_tok = H * W * D
    dim = params["conv_w"].shape[1]
    inner = heads * dim_head
    scale = float(dim_head) ** (-0.5)

    # Patch embedding + bias + positional embedding (fused); emb_dropout is identity.
    x = conv3d_to_tokens(img, params["conv_w"], params["conv_b"], params["pos_emb"])  # (B*N, dim) f32

    for layer in params["layers"]:
        # --- PreNorm(Attention) + residual ---
        qkv = fused_matmul(x, layer["w_qkv"],
                           ln_params=(layer["ln1_g"], layer["ln1_b"]),
                           out_dtype=jnp.bfloat16)                      # to_qkv: no bias
        o = flash_attention(qkv.reshape(B, n_tok, 3 * inner),
                            heads=heads, dim_head=dim_head, scale=scale)
        x = fused_matmul(o.reshape(B * n_tok, inner), layer["w_out"],
                         bias=layer["b_out"], residual=x)               # residual stream f32

        # --- PreNorm(FeedForward) + residual ---
        h1 = fused_matmul(x, layer["w_ff1"],
                          ln_params=(layer["ln2_g"], layer["ln2_b"]),
                          bias=layer["b_ff1"], act="gelu",
                          out_dtype=jnp.bfloat16)
        x = fused_matmul(h1, layer["w_ff2"], bias=layer["b_ff2"], residual=x)

    # from_patch_embedding: 'b (h w d) c -> b c h w d'
    return x.reshape(B, H, W, D, dim).transpose(0, 4, 1, 2, 3)


# --------------------------- deterministic params ---------------------------

def init_params(key, *, channels, dim, depth, heads, dim_head, mlp_dim, length):
    inner = heads * dim_head
    keys = jax.random.split(key, 3 + depth)

    def nrm(k, shape, s=0.02):
        return (s * jax.random.normal(k, shape)).astype(jnp.float32)

    conv_w = nrm(keys[0], (dim, channels, 3, 3, 3))
    params = {
        # conv weight pre-reshaped to im2col layout (rows ordered kh,kw,kd,c) and pre-cast
        # to bf16 once here so no per-call convert re-reads the f32 weight from HBM.
        "conv_w": conv_w.transpose(2, 3, 4, 1, 0).reshape(27 * channels, dim).astype(jnp.bfloat16),
        "conv_b": nrm(keys[1], (dim,)),
        "pos_emb": nrm(keys[2], (1, length, dim), s=1.0),
        "layers": [],
    }
    for li in range(depth):
        lk = jax.random.split(keys[3 + li], 6)
        params["layers"].append({
            "ln1_g": jnp.ones((dim,), jnp.float32),
            "ln1_b": jnp.zeros((dim,), jnp.float32),
            "w_qkv": nrm(lk[0], (dim, 3 * inner)).astype(jnp.bfloat16),   # (in, out), pre-cast
            "w_out": nrm(lk[1], (inner, dim)).astype(jnp.bfloat16),
            "b_out": nrm(lk[2], (dim,)),
            "ln2_g": jnp.ones((dim,), jnp.float32),
            "ln2_b": jnp.zeros((dim,), jnp.float32),
            "w_ff1": nrm(lk[3], (dim, mlp_dim)).astype(jnp.bfloat16),
            "b_ff1": nrm(lk[4], (mlp_dim,)),
            "w_ff2": nrm(lk[5], (mlp_dim, dim)).astype(jnp.bfloat16),
            "b_ff2": jnp.zeros((dim,), jnp.float32),
        })
    return params


if __name__ == "__main__":
    # Small shapes consistent with the module: image_size=(4,4,4), channels=4,
    # dim=128, depth=2, heads=4, dim_head=32 (inner=128, lane-aligned), mlp_dim=256.
    B, C = 2, 4
    H = W = D = 4
    dim, depth, heads, dim_head, mlp_dim = 128, 2, 4, 32, 256
    length = H * W * D

    key = jax.random.PRNGKey(0)
    kimg, kpar = jax.random.split(key)
    img = jax.random.normal(kimg, (B, C, H, W, D), dtype=jnp.float32)
    params = init_params(kpar, channels=C, dim=dim, depth=depth, heads=heads,
                         dim_head=dim_head, mlp_dim=mlp_dim, length=length)

    fwd = jax.jit(functools.partial(transformer_unit_forward,
                                    heads=heads, dim_head=dim_head))
    out = fwd(img, params)
    jax.block_until_ready(out)

    assert out.shape == (B, dim, H, W, D), out.shape
    assert bool(jnp.isfinite(out).all())
    print("KERNEL_OK")
</pallas_src>

<mosaic_0001>
module attributes {stable_mosaic.version = 11 : i64} {
  func.func @_matmul_direct_kernel(%arg0: i32, %arg1: i32, %arg2: memref<64x108xbf16, #tpu.memory_space<vmem>>, %arg3: memref<108x128xbf16, #tpu.memory_space<vmem>>, %arg4: memref<1x128xf32, #tpu.memory_space<vmem>>, %arg5: memref<64x128xf32, #tpu.memory_space<vmem>>, %arg6: memref<64x128xf32, #tpu.memory_space<vmem>>) attributes {dimension_semantics = [#tpu.dimension_semantics<parallel>, #tpu.dimension_semantics<parallel>], iteration_bounds = array<i64: 2, 1>, scalar_prefetch = 0 : i64, scratch_operands = 0 : i64, tpu.core_type = #tpu.core_type<tc>, window_params = [{transform_indices = @transform_0, window_bounds = array<i64: 64, 108>}, {transform_indices = @transform_1, window_bounds = array<i64: 108, 128>}, {transform_indices = @transform_2, window_bounds = array<i64: 1, 128>}, {transform_indices = @transform_3, window_bounds = array<i64: 64, 128>}, {transform_indices = @transform_4, window_bounds = array<i64: 64, 128>}]} {
    %c0 = arith.constant 0 : index
    %c0_0 = arith.constant 0 : index
    %0 = vector.load %arg2[%c0, %c0_0] : memref<64x108xbf16, #tpu.memory_space<vmem>>, vector<64x108xbf16>
    %c0_1 = arith.constant 0 : index
    %c0_2 = arith.constant 0 : index
    %1 = vector.load %arg3[%c0_1, %c0_2] : memref<108x128xbf16, #tpu.memory_space<vmem>>, vector<108x128xbf16>
    %cst = arith.constant dense<0.000000e+00> : vector<64x128xf32>
    %2 = tpu.matmul %0, %1, %cst {dimension_numbers = #tpu.dot_dimension_numbers<[1], [0], [0], [1], [0, 0, 1, 1], [], []>} : vector<64x108xbf16>, vector<108x128xbf16>, vector<64x128xf32> -> vector<64x128xf32>
    %c0_3 = arith.constant 0 : index
    %c0_4 = arith.constant 0 : index
    %3 = vector.load %arg4[%c0_3, %c0_4] : memref<1x128xf32, #tpu.memory_space<vmem>>, vector<1x128xf32>
    %4 = vector.broadcast %3 : vector<1x128xf32> to vector<64x128xf32>
    %5 = arith.addf %2, %4 : vector<64x128xf32>
    %c0_5 = arith.constant 0 : index
    %c0_6 = arith.constant 0 : index
    %6 = vector.load %arg5[%c0_5, %c0_6] : memref<64x128xf32, #tpu.memory_space<vmem>>, vector<64x128xf32>
    %7 = arith.addf %5, %6 : vector<64x128xf32>
    %c0_7 = arith.constant 0 : index
    %c0_8 = arith.constant 0 : index
    %8 = vector.load %arg6[%c0_7, %c0_8] : memref<64x128xf32, #tpu.memory_space<vmem>>, vector<64x128xf32>
    tpu.vector_store %arg6[%c0_7, %c0_8], %7 {strides = array<i32>} : memref<64x128xf32, #tpu.memory_space<vmem>>, vector<64x128xf32>,
    return
  }
  func.func @transform_0(%arg0: i32, %arg1: i32) -> (i32, i32) {
    %c0_i32 = arith.constant 0 : i32
    %c0_i32_0 = arith.constant 0 : i32
    return %arg0, %c0_i32 : i32, i32
  }
  func.func @transform_1(%arg0: i32, %arg1: i32) -> (i32, i32) {
    %c0_i32 = arith.constant 0 : i32
    %c0_i32_0 = arith.constant 0 : i32
    return %c0_i32, %arg1 : i32, i32
  }
  func.func @transform_2(%arg0: i32, %arg1: i32) -> (i32, i32) {
    %c0_i32 = arith.constant 0 : i32
    %c0_i32_0 = arith.constant 0 : i32
    return %c0_i32, %arg1 : i32, i32
  }
  func.func @transform_3(%arg0: i32, %arg1: i32) -> (i32, i32) {
    %c1_i32 = arith.constant 1 : i32
    %c0_i32 = arith.constant 0 : i32
    %0 = arith.cmpi eq, %c1_i32, %c0_i32 : i32
    %c1_i32_0 = arith.constant 1 : i32
    %1 = arith.select %0, %c1_i32_0, %c1_i32 : i32
    %2 = arith.remsi %arg0, %1 : i32
    %c0_i32_1 = arith.constant 0 : i32
    %3 = arith.cmpi ne, %2, %c0_i32_1 : i32
    %c0_i32_2 = arith.constant 0 : i32
    %4 = arith.cmpi slt, %2, %c0_i32_2 : i32
    %c0_i32_3 = arith.constant 0 : i32
    %5 = arith.cmpi slt, %1, %c0_i32_3 : i32
    %6 = arith.xori %4, %5 : i1
    %7 = arith.andi %6, %3 : i1
    %8 = arith.addi %2, %1 : i32
    %9 = arith.select %7, %8, %2 : i32
    %c0_i32_4 = arith.constant 0 : i32
    return %9, %arg1 : i32, i32
  }
  func.func @transform_4(%arg0: i32, %arg1: i32) -> (i32, i32) {
    %c0_i32 = arith.constant 0 : i32
    return %arg0, %arg1 : i32, i32
  }
}

module attributes {stable_mosaic.version = 11 : i64} {
  func.func @_matmul_direct_kernel(%arg0: i32, %arg1: i32, %arg2: memref<64x128xf32, #tpu.memory_space<vmem>>, %arg3: memref<128x384xbf16, #tpu.memory_space<vmem>>, %arg4: memref<1x128xf32, #tpu.memory_space<vmem>>, %arg5: memref<1x128xf32, #tpu.memory_space<vmem>>, %arg6: memref<64x384xbf16, #tpu.memory_space<vmem>>) attributes {dimension_semantics = [#tpu.dimension_semantics<parallel>, #tpu.dimension_semantics<parallel>], iteration_bounds = array<i64: 2, 1>, scalar_prefetch = 0 : i64, scratch_operands = 0 : i64, tpu.core_type = #tpu.core_type<tc>, window_params = [{transform_indices = @transform_0, window_bounds = array<i64: 64, 128>}, {transform_indices = @transform_1, window_bounds = array<i64: 128, 384>}, {pipeline_mode = #tpu.pipeline_mode<synchronous>, transform_indices = @transform_2, window_bounds = array<i64: 1, 128>}, {pipeline_mode = #tpu.pipeline_mode<synchronous>, transform_indices = @transform_3, window_bounds = array<i64: 1, 128>}, {transform_indices = @transform_4, window_bounds = array<i64: 64, 384>}]} {
    %c0 = arith.constant 0 : index
    %c0_0 = arith.constant 0 : index
    %0 = vector.load %arg2[%c0, %c0_0] : memref<64x128xf32, #tpu.memory_space<vmem>>, vector<64x128xf32>
    %cst = arith.constant dense<0.000000e+00> : vector<64xf32>
    %1 = vector.multi_reduction <add>, %0, %cst [1] : vector<64x128xf32> to vector<64xf32>
    %2 = vector.shape_cast %1 : vector<64xf32> to vector<64x1xf32>
    %cst_1 = arith.constant 1.280000e+02 : f32
    %3 = vector.broadcast %cst_1 : f32 to vector<64x1xf32>
    %4 = arith.divf %2, %3 : vector<64x1xf32>
    %5 = vector.broadcast %4 : vector<64x1xf32> to vector<64x128xf32>
    %6 = arith.subf %0, %5 : vector<64x128xf32>
    %7 = arith.mulf %6, %6 : vector<64x128xf32>
    %cst_2 = arith.constant dense<0.000000e+00> : vector<64xf32>
    %8 = vector.multi_reduction <add>, %7, %cst_2 [1] : vector<64x128xf32> to vector<64xf32>
    %9 = vector.shape_cast %8 : vector<64xf32> to vector<64x1xf32>
    %cst_3 = arith.constant 1.280000e+02 : f32
    %10 = vector.broadcast %cst_3 : f32 to vector<64x1xf32>
    %11 = arith.divf %9, %10 : vector<64x1xf32>
    %12 = vector.broadcast %4 : vector<64x1xf32> to vector<64x128xf32>
    %13 = arith.subf %0, %12 : vector<64x128xf32>
    %cst_4 = arith.constant 9.99999974E-6 : f32
    %14 = vector.broadcast %cst_4 : f32 to vector<64x1xf32>
    %15 = arith.addf %11, %14 : vector<64x1xf32>
    %16 = math.rsqrt %15 : vector<64x1xf32>
    %17 = vector.broadcast %16 : vector<64x1xf32> to vector<64x128xf32>
    %18 = arith.mulf %13, %17 : vector<64x128xf32>
    %c0_5 = arith.constant 0 : index
    %c0_6 = arith.constant 0 : index
    %19 = vector.load %arg4[%c0_5, %c0_6] : memref<1x128xf32, #tpu.memory_space<vmem>>, vector<1x128xf32>
    %20 = vector.broadcast %19 : vector<1x128xf32> to vector<64x128xf32>
    %21 = arith.mulf %18, %20 : vector<64x128xf32>
    %c0_7 = arith.constant 0 : index
    %c0_8 = arith.constant 0 : index
    %22 = vector.load %arg5[%c0_7, %c0_8] : memref<1x128xf32, #tpu.memory_space<vmem>>, vector<1x128xf32>
    %23 = vector.broadcast %22 : vector<1x128xf32> to vector<64x128xf32>
    %24 = arith.addf %21, %23 : vector<64x128xf32>
    %25 = arith.truncf %24 : vector<64x128xf32> to vector<64x128xbf16>
    %c0_9 = arith.constant 0 : index
    %c0_10 = arith.constant 0 : index
    %26 = vector.load %arg3[%c0_9, %c0_10] : memref<128x384xbf16, #tpu.memory_space<vmem>>, vector<128x384xbf16>
    %cst_11 = arith.constant dense<0.000000e+00> : vector<64x384xf32>
    %27 = tpu.matmul %25, %26, %cst_11 {dimension_numbers = #tpu.dot_dimension_numbers<[1], [0], [0], [1], [0, 0, 1, 1], [], []>} : vector<64x128xbf16>, vector<128x384xbf16>, vector<64x384xf32> -> vector<64x384xf32>
    %28 = arith.truncf %27 : vector<64x384xf32> to vector<64x384xbf16>
    %c0_12 = arith.constant 0 : index
    %c0_13 = arith.constant 0 : index
    %29 = vector.load %arg6[%c0_12, %c0_13] : memref<64x384xbf16, #tpu.memory_space<vmem>>, vector<64x384xbf16>
    tpu.vector_store %arg6[%c0_12, %c0_13], %28 {strides = array<i32>} : memref<64x384xbf16, #tpu.memory_space<vmem>>, vector<64x384xbf16>,
    return
  }
  func.func @transform_0(%arg0: i32, %arg1: i32) -> (i32, i32) {
    %c0_i32 = arith.constant 0 : i32
    %c0_i32_0 = arith.constant 0 : i32
    return %arg0, %c0_i32 : i32, i32
  }
  func.func @transform_1(%arg0: i32, %arg1: i32) -> (i32, i32) {
    %c0_i32 = arith.constant 0 : i32
    %c0_i32_0 = arith.constant 0 : i32
    return %c0_i32, %arg1 : i32, i32
  }
  func.func @transform_2(%arg0: i32, %arg1: i32) -> (i32, i32) {
    %c0_i32 = arith.constant 0 : i32
    %c0_i32_0 = arith.constant 0 : i32
    %c0_i32_1 = arith.constant 0 : i32
    return %c0_i32, %c0_i32_0 : i32, i32
  }
  func.func @transform_3(%arg0: i32, %arg1: i32) -> (i32, i32) {
    %c0_i32 = arith.constant 0 : i32
    %c0_i32_0 = arith.constant 0 : i32
    %c0_i32_1 = arith.constant 0 : i32
    return %c0_i32, %c0_i32_0 : i32, i32
  }
  func.func @transform_4(%arg0: i32, %arg1: i32) -> (i32, i32) {
    %c0_i32 = arith.constant 0 : i32
    return %arg0, %arg1 : i32, i32
  }
}

module attributes {stable_mosaic.version = 11 : i64} {
  func.func @_flash_attention_kernel(%arg0: i32, %arg1: i32, %arg2: i32, %arg3: memref<1x64x128xbf16, #tpu.memory_space<vmem>>, %arg4: memref<1x64x128xbf16, #tpu.memory_space<vmem>>, %arg5: memref<1x64x128xbf16, #tpu.memory_space<vmem>>, %arg6: memref<1x64x128xbf16, #tpu.memory_space<vmem>>, %arg7: memref<4x64x1xf32, #tpu.memory_space<vmem>>, %arg8: memref<4x64x1xf32, #tpu.memory_space<vmem>>, %arg9: memref<4x64x32xf32, #tpu.memory_space<vmem>>) attributes {dimension_semantics = [#tpu.dimension_semantics<parallel>, #tpu.dimension_semantics<parallel>, #tpu.dimension_semantics<arbitrary>], iteration_bounds = array<i64: 2, 1, 1>, scalar_prefetch = 0 : i64, scratch_operands = 3 : i64, tpu.core_type = #tpu.core_type<tc>, window_params = [{transform_indices = @transform_0, window_bounds = array<i64: 1, 64, 128>}, {transform_indices = @transform_1, window_bounds = array<i64: 1, 64, 128>}, {transform_indices = @transform_2, window_bounds = array<i64: 1, 64, 128>}, {transform_indices = @transform_3, window_bounds = array<i64: 1, 64, 128>}]} {
    %c0_i32 = arith.constant 0 : i32
    %0 = arith.cmpi eq, %arg2, %c0_i32 : i32
    %1 = arith.extui %0 : i1 to i32
    %c0_i32_0 = arith.constant 0 : i32
    %2 = arith.cmpi ne, %1, %c0_i32_0 : i32
    scf.if %2 {
      %cst_123 = arith.constant 0xFF800000 : f32
      %178 = vector.broadcast %cst_123 : f32 to vector<4x64x1xf32>
      %c0_124 = arith.constant 0 : index
      %c0_125 = arith.constant 0 : index
      %c0_126 = arith.constant 0 : index
      %179 = vector.load %arg7[%c0_124, %c0_125, %c0_126] : memref<4x64x1xf32, #tpu.memory_space<vmem>>, vector<4x64x1xf32>
      tpu.vector_store %arg7[%c0_124, %c0_125, %c0_126], %178 {strides = array<i32>} : memref<4x64x1xf32, #tpu.memory_space<vmem>>, vector<4x64x1xf32>,
      %cst_127 = arith.constant 0.000000e+00 : f32
      %180 = vector.broadcast %cst_127 : f32 to vector<4x64x1xf32>
      %c0_128 = arith.constant 0 : index
      %c0_129 = arith.constant 0 : index
      %c0_130 = arith.constant 0 : index
      %181 = vector.load %arg8[%c0_128, %c0_129, %c0_130] : memref<4x64x1xf32, #tpu.memory_space<vmem>>, vector<4x64x1xf32>
      tpu.vector_store %arg8[%c0_128, %c0_129, %c0_130], %180 {strides = array<i32>} : memref<4x64x1xf32, #tpu.memory_space<vmem>>, vector<4x64x1xf32>,
      %cst_131 = arith.constant 0.000000e+00 : f32
      %182 = vector.broadcast %cst_131 : f32 to vector<4x64x32xf32>
      %c0_132 = arith.constant 0 : index
      %c0_133 = arith.constant 0 : index
      %c0_134 = arith.constant 0 : index
      %183 = vector.load %arg9[%c0_132, %c0_133, %c0_134] : memref<4x64x32xf32, #tpu.memory_space<vmem>>, vector<4x64x32xf32>
      tpu.vector_store %arg9[%c0_132, %c0_133, %c0_134], %182 {strides = array<i32>} : memref<4x64x32xf32, #tpu.memory_space<vmem>>, vector<4x64x32xf32>,
    } else {
    }
    %c0 = arith.constant 0 : index
    %c0_1 = arith.constant 0 : index
    %c0_2 = arith.constant 0 : index
    %3 = vector.load %arg3[%c0, %c0_1, %c0_2] : memref<1x64x128xbf16, #tpu.memory_space<vmem>>, vector<1x64x32xbf16>
    %4 = vector.shape_cast %3 : vector<1x64x32xbf16> to vector<64x32xbf16>
    %5 = arith.extf %4 : vector<64x32xbf16> to vector<64x32xf32>
    %cst = arith.constant 0.176776692 : f32
    %6 = vector.broadcast %cst : f32 to vector<64x32xf32>
    %7 = arith.mulf %5, %6 : vector<64x32xf32>
    %8 = arith.truncf %7 : vector<64x32xf32> to vector<64x32xbf16>
    %c0_3 = arith.constant 0 : index
    %c0_4 = arith.constant 0 : index
    %c0_5 = arith.constant 0 : index
    %9 = vector.load %arg4[%c0_3, %c0_4, %c0_5] : memref<1x64x128xbf16, #tpu.memory_space<vmem>>, vector<1x64x32xbf16>
    %10 = vector.shape_cast %9 : vector<1x64x32xbf16> to vector<64x32xbf16>
    %c0_6 = arith.constant 0 : index
    %c0_7 = arith.constant 0 : index
    %c0_8 = arith.constant 0 : index
    %11 = vector.load %arg5[%c0_6, %c0_7, %c0_8] : memref<1x64x128xbf16, #tpu.memory_space<vmem>>, vector<1x64x32xbf16>
    %12 = vector.shape_cast %11 : vector<1x64x32xbf16> to vector<64x32xbf16>
    %cst_9 = arith.constant dense<0.000000e+00> : vector<64x64xf32>
    %13 = tpu.matmul %8, %10, %cst_9 {dimension_numbers = #tpu.dot_dimension_numbers<[1], [1], [0], [0], [0, 0, 1, 0], [], []>} : vector<64x32xbf16>, vector<64x32xbf16>, vector<64x64xf32> -> vector<64x64xf32>
    %c0_10 = arith.constant 0 : index
    %c0_11 = arith.constant 0 : index
    %c0_12 = arith.constant 0 : index
    %14 = vector.load %arg7[%c0_10, %c0_11, %c0_12] : memref<4x64x1xf32, #tpu.memory_space<vmem>>, vector<1x64x1xf32>
    %15 = vector.shape_cast %14 : vector<1x64x1xf32> to vector<64x1xf32>
    %cst_13 = arith.constant dense<0xFF800000> : vector<64xf32>
    %16 = vector.multi_reduction <maximumf>, %13, %cst_13 [1] : vector<64x64xf32> to vector<64xf32>
    %17 = vector.shape_cast %16 : vector<64xf32> to vector<64x1xf32>
    %18 = arith.maximumf %15, %17 : vector<64x1xf32>
    %19 = arith.subf %15, %18 : vector<64x1xf32>
    %20 = math.exp %19 : vector<64x1xf32>
    %21 = vector.broadcast %18 : vector<64x1xf32> to vector<64x64xf32>
    %22 = arith.subf %13, %21 : vector<64x64xf32>
    %23 = math.exp %22 : vector<64x64xf32>
    %c0_14 = arith.constant 0 : index
    %c0_15 = arith.constant 0 : index
    %c0_16 = arith.constant 0 : index
    %24 = vector.load %arg8[%c0_14, %c0_15, %c0_16] : memref<4x64x1xf32, #tpu.memory_space<vmem>>, vector<1x64x1xf32>
    %25 = vector.shape_cast %24 : vector<1x64x1xf32> to vector<64x1xf32>
    %26 = arith.mulf %20, %25 : vector<64x1xf32>
    %cst_17 = arith.constant dense<0.000000e+00> : vector<64xf32>
    %27 = vector.multi_reduction <add>, %23, %cst_17 [1] : vector<64x64xf32> to vector<64xf32>
    %28 = vector.shape_cast %27 : vector<64xf32> to vector<64x1xf32>
    %29 = arith.addf %26, %28 : vector<64x1xf32>
    %c0_18 = arith.constant 0 : index
    %c0_19 = arith.constant 0 : index
    %c0_20 = arith.constant 0 : index
    %30 = vector.load %arg8[%c0_18, %c0_19, %c0_20] : memref<4x64x1xf32, #tpu.memory_space<vmem>>, vector<1x64x1xf32>
    %31 = vector.shape_cast %30 : vector<1x64x1xf32> to vector<64x1xf32>
    %32 = vector.shape_cast %29 : vector<64x1xf32> to vector<1x64x1xf32>
    tpu.vector_store %arg8[%c0_18, %c0_19, %c0_20], %32 {strides = array<i32>} : memref<4x64x1xf32, #tpu.memory_space<vmem>>, vector<1x64x1xf32>,
    %33 = arith.truncf %23 : vector<64x64xf32> to vector<64x64xbf16>
    %cst_21 = arith.constant dense<0.000000e+00> : vector<64x32xf32>
    %34 = tpu.matmul %33, %12, %cst_21 {dimension_numbers = #tpu.dot_dimension_numbers<[1], [0], [0], [1], [0, 0, 1, 1], [], []>} : vector<64x64xbf16>, vector<64x32xbf16>, vector<64x32xf32> -> vector<64x32xf32>
    %c0_22 = arith.constant 0 : index
    %c0_23 = arith.constant 0 : index
    %c0_24 = arith.constant 0 : index
    %35 = vector.load %arg9[%c0_22, %c0_23, %c0_24] : memref<4x64x32xf32, #tpu.memory_space<vmem>>, vector<1x64x32xf32>
    %36 = vector.shape_cast %35 : vector<1x64x32xf32> to vector<64x32xf32>
    %37 = vector.broadcast %20 : vector<64x1xf32> to vector<64x32xf32>
    %38 = arith.mulf %37, %36 : vector<64x32xf32>
    %39 = arith.addf %38, %34 : vector<64x32xf32>
    %c0_25 = arith.constant 0 : index
    %c0_26 = arith.constant 0 : index
    %c0_27 = arith.constant 0 : index
    %40 = vector.load %arg9[%c0_25, %c0_26, %c0_27] : memref<4x64x32xf32, #tpu.memory_space<vmem>>, vector<1x64x32xf32>
    %41 = vector.shape_cast %40 : vector<1x64x32xf32> to vector<64x32xf32>
    %42 = vector.shape_cast %39 : vector<64x32xf32> to vector<1x64x32xf32>
    tpu.vector_store %arg9[%c0_25, %c0_26, %c0_27], %42 {strides = array<i32>} : memref<4x64x32xf32, #tpu.memory_space<vmem>>, vector<1x64x32xf32>,
    %c0_28 = arith.constant 0 : index
    %c0_29 = arith.constant 0 : index
    %c0_30 = arith.constant 0 : index
    %43 = vector.load %arg7[%c0_28, %c0_29, %c0_30] : memref<4x64x1xf32, #tpu.memory_space<vmem>>, vector<1x64x1xf32>
    %44 = vector.shape_cast %43 : vector<1x64x1xf32> to vector<64x1xf32>
    %45 = vector.shape_cast %18 : vector<64x1xf32> to vector<1x64x1xf32>
    tpu.vector_store %arg7[%c0_28, %c0_29, %c0_30], %45 {strides = array<i32>} : memref<4x64x1xf32, #tpu.memory_space<vmem>>, vector<1x64x1xf32>,
    %c0_31 = arith.constant 0 : index
    %c0_32 = arith.constant 0 : index
    %c32 = arith.constant 32 : index
    %46 = vector.load %arg3[%c0_31, %c0_32, %c32] : memref<1x64x128xbf16, #tpu.memory_space<vmem>>, vector<1x64x32xbf16>
    %47 = vector.shape_cast %46 : vector<1x64x32xbf16> to vector<64x32xbf16>
    %48 = arith.extf %47 : vector<64x32xbf16> to vector<64x32xf32>
    %cst_33 = arith.constant 0.176776692 : f32
    %49 = vector.broadcast %cst_33 : f32 to vector<64x32xf32>
    %50 = arith.mulf %48, %49 : vector<64x32xf32>
    %51 = arith.truncf %50 : vector<64x32xf32> to vector<64x32xbf16>
    %c0_34 = arith.constant 0 : index
    %c0_35 = arith.constant 0 : index
    %c32_36 = arith.constant 32 : index
    %52 = vector.load %arg4[%c0_34, %c0_35, %c32_36] : memref<1x64x128xbf16, #tpu.memory_space<vmem>>, vector<1x64x32xbf16>
    %53 = vector.shape_cast %52 : vector<1x64x32xbf16> to vector<64x32xbf16>
    %c0_37 = arith.constant 0 : index
    %c0_38 = arith.constant 0 : index
    %c32_39 = arith.constant 32 : index
    %54 = vector.load %arg5[%c0_37, %c0_38, %c32_39] : memref<1x64x128xbf16, #tpu.memory_space<vmem>>, vector<1x64x32xbf16>
    %55 = vector.shape_cast %54 : vector<1x64x32xbf16> to vector<64x32xbf16>
    %cst_40 = arith.constant dense<0.000000e+00> : vector<64x64xf32>
    %56 = tpu.matmul %51, %53, %cst_40 {dimension_numbers = #tpu.dot_dimension_numbers<[1], [1], [0], [0], [0, 0, 1, 0], [], []>} : vector<64x32xbf16>, vector<64x32xbf16>, vector<64x64xf32> -> vector<64x64xf32>
    %c1 = arith.constant 1 : index
    %c0_41 = arith.constant 0 : index
    %c0_42 = arith.constant 0 : index
    %57 = vector.load %arg7[%c1, %c0_41, %c0_42] : memref<4x64x1xf32, #tpu.memory_space<vmem>>, vector<1x64x1xf32>
    %58 = vector.shape_cast %57 : vector<1x64x1xf32> to vector<64x1xf32>
    %cst_43 = arith.constant dense<0xFF800000> : vector<64xf32>
    %59 = vector.multi_reduction <maximumf>, %56, %cst_43 [1] : vector<64x64xf32> to vector<64xf32>
    %60 = vector.shape_cast %59 : vector<64xf32> to vector<64x1xf32>
    %61 = arith.maximumf %58, %60 : vector<64x1xf32>
    %62 = arith.subf %58, %61 : vector<64x1xf32>
    %63 = math.exp %62 : vector<64x1xf32>
    %64 = vector.broadcast %61 : vector<64x1xf32> to vector<64x64xf32>
    %65 = arith.subf %56, %64 : vector<64x64xf32>
    %66 = math.exp %65 : vector<64x64xf32>
    %c1_44 = arith.constant 1 : index
    %c0_45 = arith.constant 0 : index
    %c0_46 = arith.constant 0 : index
    %67 = vector.load %arg8[%c1_44, %c0_45, %c0_46] : memref<4x64x1xf32, #tpu.memory_space<vmem>>, vector<1x64x1xf32>
    %68 = vector.shape_cast %67 : vector<1x64x1xf32> to vector<64x1xf32>
    %69 = arith.mulf %63, %68 : vector<64x1xf32>
    %cst_47 = arith.constant dense<0.000000e+00> : vector<64xf32>
    %70 = vector.multi_reduction <add>, %66, %cst_47 [1] : vector<64x64xf32> to vector<64xf32>
    %71 = vector.shape_cast %70 : vector<64xf32> to vector<64x1xf32>
    %72 = arith.addf %69, %71 : vector<64x1xf32>
    %c1_48 = arith.constant 1 : index
    %c0_49 = arith.constant 0 : index
    %c0_50 = arith.constant 0 : index
    %73 = vector.load %arg8[%c1_48, %c0_49, %c0_50] : memref<4x64x1xf32, #tpu.memory_space<vmem>>, vector<1x64x1xf32>
    %74 = vector.shape_cast %73 : vector<1x64x1xf32> to vector<64x1xf32>
    %75 = vector.shape_cast %72 : vector<64x1xf32> to vector<1x64x1xf32>
    tpu.vector_store %arg8[%c1_48, %c0_49, %c0_50], %75 {strides = array<i32>} : memref<4x64x1xf32, #tpu.memory_space<vmem>>, vector<1x64x1xf32>,
    %76 = arith.truncf %66 : vector<64x64xf32> to vector<64x64xbf16>
    %cst_51 = arith.constant dense<0.000000e+00> : vector<64x32xf32>
    %77 = tpu.matmul %76, %55, %cst_51 {dimension_numbers = #tpu.dot_dimension_numbers<[1], [0], [0], [1], [0, 0, 1, 1], [], []>} : vector<64x64xbf16>, vector<64x32xbf16>, vector<64x32xf32> -> vector<64x32xf32>
    %c1_52 = arith.constant 1 : index
    %c0_53 = arith.constant 0 : index
    %c0_54 = arith.constant 0 : index
    %78 = vector.load %arg9[%c1_52, %c0_53, %c0_54] : memref<4x64x32xf32, #tpu.memory_space<vmem>>, vector<1x64x32xf32>
    %79 = vector.shape_cast %78 : vector<1x64x32xf32> to vector<64x32xf32>
    %80 = vector.broadcast %63 : vector<64x1xf32> to vector<64x32xf32>
    %81 = arith.mulf %80, %79 : vector<64x32xf32>
    %82 = arith.addf %81, %77 : vector<64x32xf32>
    %c1_55 = arith.constant 1 : index
    %c0_56 = arith.constant 0 : index
    %c0_57 = arith.constant 0 : index
    %83 = vector.load %arg9[%c1_55, %c0_56, %c0_57] : memref<4x64x32xf32, #tpu.memory_space<vmem>>, vector<1x64x32xf32>
    %84 = vector.shape_cast %83 : vector<1x64x32xf32> to vector<64x32xf32>
    %85 = vector.shape_cast %82 : vector<64x32xf32> to vector<1x64x32xf32>
    tpu.vector_store %arg9[%c1_55, %c0_56, %c0_57], %85 {strides = array<i32>} : memref<4x64x32xf32, #tpu.memory_space<vmem>>, vector<1x64x32xf32>,
    %c1_58 = arith.constant 1 : index
    %c0_59 = arith.constant 0 : index
    %c0_60 = arith.constant 0 : index
    %86 = vector.load %arg7[%c1_58, %c0_59, %c0_60] : memref<4x64x1xf32, #tpu.memory_space<vmem>>, vector<1x64x1xf32>
    %87 = vector.shape_cast %86 : vector<1x64x1xf32> to vector<64x1xf32>
    %88 = vector.shape_cast %61 : vector<64x1xf32> to vector<1x64x1xf32>
    tpu.vector_store %arg7[%c1_58, %c0_59, %c0_60], %88 {strides = array<i32>} : memref<4x64x1xf32, #tpu.memory_space<vmem>>, vector<1x64x1xf32>,
    %c0_61 = arith.constant 0 : index
    %c0_62 = arith.constant 0 : index
    %c64 = arith.constant 64 : index
    %89 = vector.load %arg3[%c0_61, %c0_62, %c64] : memref<1x64x128xbf16, #tpu.memory_space<vmem>>, vector<1x64x32xbf16>
    %90 = vector.shape_cast %89 : vector<1x64x32xbf16> to vector<64x32xbf16>
    %91 = arith.extf %90 : vector<64x32xbf16> to vector<64x32xf32>
    %cst_63 = arith.constant 0.176776692 : f32
    %92 = vector.broadcast %cst_63 : f32 to vector<64x32xf32>
    %93 = arith.mulf %91, %92 : vector<64x32xf32>
    %94 = arith.truncf %93 : vector<64x32xf32> to vector<64x32xbf16>
    %c0_64 = arith.constant 0 : index
    %c0_65 = arith.constant 0 : index
    %c64_66 = arith.constant 64 : index
    %95 = vector.load %arg4[%c0_64, %c0_65, %c64_66] : memref<1x64x128xbf16, #tpu.memory_space<vmem>>, vector<1x64x32xbf16>
    %96 = vector.shape_cast %95 : vector<1x64x32xbf16> to vector<64x32xbf16>
    %c0_67 = arith.constant 0 : index
    %c0_68 = arith.constant 0 : index
    %c64_69 = arith.constant 64 : index
    %97 = vector.load %arg5[%c0_67, %c0_68, %c64_69] : memref<1x64x128xbf16, #tpu.memory_space<vmem>>, vector<1x64x32xbf16>
    %98 = vector.shape_cast %97 : vector<1x64x32xbf16> to vector<64x32xbf16>
    %cst_70 = arith.constant dense<0.000000e+00> : vector<64x64xf32>
    %99 = tpu.matmul %94, %96, %cst_70 {dimension_numbers = #tpu.dot_dimension_numbers<[1], [1], [0], [0], [0, 0, 1, 0], [], []>} : vector<64x32xbf16>, vector<64x32xbf16>, vector<64x64xf32> -> vector<64x64xf32>
    %c2 = arith.constant 2 : index
    %c0_71 = arith.constant 0 : index
    %c0_72 = arith.constant 0 : index
    %100 = vector.load %arg7[%c2, %c0_71, %c0_72] : memref<4x64x1xf32, #tpu.memory_space<vmem>>, vector<1x64x1xf32>
    %101 = vector.shape_cast %100 : vector<1x64x1xf32> to vector<64x1xf32>
    %cst_73 = arith.constant dense<0xFF800000> : vector<64xf32>
    %102 = vector.multi_reduction <maximumf>, %99, %cst_73 [1] : vector<64x64xf32> to vector<64xf32>
    %103 = vector.shape_cast %102 : vector<64xf32> to vector<64x1xf32>
    %104 = arith.maximumf %101, %103 : vector<64x1xf32>
    %105 = arith.subf %101, %104 : vector<64x1xf32>
    %106 = math.exp %105 : vector<64x1xf32>
    %107 = vector.broadcast %104 : vector<64x1xf32> to vector<64x64xf32>
    %108 = arith.subf %99, %107 : vector<64x64xf32>
    %109 = math.exp %108 : vector<64x64xf32>
    %c2_74 = arith.constant 2 : index
    %c0_75 = arith.constant 0 : index
    %c0_76 = arith.constant 0 : index
    %110 = vector.load %arg8[%c2_74, %c0_75, %c0_76] : memref<4x64x1xf32, #tpu.memory_space<vmem>>, vector<1x64x1xf32>
    %111 = vector.shape_cast %110 : vector<1x64x1xf32> to vector<64x1xf32>
    %112 = arith.mulf %106, %111 : vector<64x1xf32>
    %cst_77 = arith.constant dense<0.000000e+00> : vector<64xf32>
    %113 = vector.multi_reduction <add>, %109, %cst_77 [1] : vector<64x64xf32> to vector<64xf32>
    %114 = vector.shape_cast %113 : vector<64xf32> to vector<64x1xf32>
    %115 = arith.addf %112, %114 : vector<64x1xf32>
    %c2_78 = arith.constant 2 : index
    %c0_79 = arith.constant 0 : index
    %c0_80 = arith.constant 0 : index
    %116 = vector.load %arg8[%c2_78, %c0_79, %c0_80] : memref<4x64x1xf32, #tpu.memory_space<vmem>>, vector<1x64x1xf32>
    %117 = vector.shape_cast %116 : vector<1x64x1xf32> to vector<64x1xf32>
    %118 = vector.shape_cast %115 : vector<64x1xf32> to vector<1x64x1xf32>
    tpu.vector_store %arg8[%c2_78, %c0_79, %c0_80], %118 {strides = array<i32>} : memref<4x64x1xf32, #tpu.memory_space<vmem>>, vector<1x64x1xf32>,
    %119 = arith.truncf %109 : vector<64x64xf32> to vector<64x64xbf16>
    %cst_81 = arith.constant dense<0.000000e+00> : vector<64x32xf32>
    %120 = tpu.matmul %119, %98, %cst_81 {dimension_numbers = #tpu.dot_dimension_numbers<[1], [0], [0], [1], [0, 0, 1, 1], [], []>} : vector<64x64xbf16>, vector<64x32xbf16>, vector<64x32xf32> -> vector<64x32xf32>
    %c2_82 = arith.constant 2 : index
    %c0_83 = arith.constant 0 : index
    %c0_84 = arith.constant 0 : index
    %121 = vector.load %arg9[%c2_82, %c0_83, %c0_84] : memref<4x64x32xf32, #tpu.memory_space<vmem>>, vector<1x64x32xf32>
    %122 = vector.shape_cast %121 : vector<1x64x32xf32> to vector<64x32xf32>
    %123 = vector.broadcast %106 : vector<64x1xf32> to vector<64x32xf32>
    %124 = arith.mulf %123, %122 : vector<64x32xf32>
    %125 = arith.addf %124, %120 : vector<64x32xf32>
    %c2_85 = arith.constant 2 : index
    %c0_86 = arith.constant 0 : index
    %c0_87 = arith.constant 0 : index
    %126 = vector.load %arg9[%c2_85, %c0_86, %c0_87] : memref<4x64x32xf32, #tpu.memory_space<vmem>>, vector<1x64x32xf32>
    %127 = vector.shape_cast %126 : vector<1x64x32xf32> to vector<64x32xf32>
    %128 = vector.shape_cast %125 : vector<64x32xf32> to vector<1x64x32xf32>
    tpu.vector_store %arg9[%c2_85, %c0_86, %c0_87], %128 {strides = array<i32>} : memref<4x64x32xf32, #tpu.memory_space<vmem>>, vector<1x64x32xf32>,
    %c2_88 = arith.constant 2 : index
    %c0_89 = arith.constant 0 : index
    %c0_90 = arith.constant 0 : index
    %129 = vector.load %arg7[%c2_88, %c0_89, %c0_90] : memref<4x64x1xf32, #tpu.memory_space<vmem>>, vector<1x64x1xf32>
    %130 = vector.shape_cast %129 : vector<1x64x1xf32> to vector<64x1xf32>
    %131 = vector.shape_cast %104 : vector<64x1xf32> to vector<1x64x1xf32>
    tpu.vector_store %arg7[%c2_88, %c0_89, %c0_90], %131 {strides = array<i32>} : memref<4x64x1xf32, #tpu.memory_space<vmem>>, vector<1x64x1xf32>,
    %c0_91 = arith.constant 0 : index
    %c0_92 = arith.constant 0 : index
    %c96 = arith.constant 96 : index
    %132 = vector.load %arg3[%c0_91, %c0_92, %c96] : memref<1x64x128xbf16, #tpu.memory_space<vmem>>, vector<1x64x32xbf16>
    %133 = vector.shape_cast %132 : vector<1x64x32xbf16> to vector<64x32xbf16>
    %134 = arith.extf %133 : vector<64x32xbf16> to vector<64x32xf32>
    %cst_93 = arith.constant 0.176776692 : f32
    %135 = vector.broadcast %cst_93 : f32 to vector<64x32xf32>
    %136 = arith.mulf %134, %135 : vector<64x32xf32>
    %137 = arith.truncf %136 : vector<64x32xf32> to vector<64x32xbf16>
    %c0_94 = arith.constant 0 : index
    %c0_95 = arith.constant 0 : index
    %c96_96 = arith.constant 96 : index
    %138 = vector.load %arg4[%c0_94, %c0_95, %c96_96] : memref<1x64x128xbf16, #tpu.memory_space<vmem>>, vector<1x64x32xbf16>
    %139 = vector.shape_cast %138 : vector<1x64x32xbf16> to vector<64x32xbf16>
    %c0_97 = arith.constant 0 : index
    %c0_98 = arith.constant 0 : index
    %c96_99 = arith.constant 96 : index
    %140 = vector.load %arg5[%c0_97, %c0_98, %c96_99] : memref<1x64x128xbf16, #tpu.memory_space<vmem>>, vector<1x64x32xbf16>
    %141 = vector.shape_cast %140 : vector<1x64x32xbf16> to vector<64x32xbf16>
    %cst_100 = arith.constant dense<0.000000e+00> : vector<64x64xf32>
    %142 = tpu.matmul %137, %139, %cst_100 {dimension_numbers = #tpu.dot_dimension_numbers<[1], [1], [0], [0], [0, 0, 1, 0], [], []>} : vector<64x32xbf16>, vector<64x32xbf16>, vector<64x64xf32> -> vector<64x64xf32>
    %c3 = arith.constant 3 : index
    %c0_101 = arith.constant 0 : index
    %c0_102 = arith.constant 0 : index
    %143 = vector.load %arg7[%c3, %c0_101, %c0_102] : memref<4x64x1xf32, #tpu.memory_space<vmem>>, vector<1x64x1xf32>
    %144 = vector.shape_cast %143 : vector<1x64x1xf32> to vector<64x1xf32>
    %cst_103 = arith.constant dense<0xFF800000> : vector<64xf32>
    %145 = vector.multi_reduction <maximumf>, %142, %cst_103 [1] : vector<64x64xf32> to vector<64xf32>
    %146 = vector.shape_cast %145 : vector<64xf32> to vector<64x1xf32>
    %147 = arith.maximumf %144, %146 : vector<64x1xf32>
    %148 = arith.subf %144, %147 : vector<64x1xf32>
    %149 = math.exp %148 : vector<64x1xf32>
    %150 = vector.broadcast %147 : vector<64x1xf32> to vector<64x64xf32>
    %151 = arith.subf %142, %150 : vector<64x64xf32>
    %152 = math.exp %151 : vector<64x64xf32>
    %c3_104 = arith.constant 3 : index
    %c0_105 = arith.constant 0 : index
    %c0_106 = arith.constant 0 : index
    %153 = vector.load %arg8[%c3_104, %c0_105, %c0_106] : memref<4x64x1xf32, #tpu.memory_space<vmem>>, vector<1x64x1xf32>
    %154 = vector.shape_cast %153 : vector<1x64x1xf32> to vector<64x1xf32>
    %155 = arith.mulf %149, %154 : vector<64x1xf32>
    %cst_107 = arith.constant dense<0.000000e+00> : vector<64xf32>
    %156 = vector.multi_reduction <add>, %152, %cst_107 [1] : vector<64x64xf32> to vector<64xf32>
    %157 = vector.shape_cast %156 : vector<64xf32> to vector<64x1xf32>
    %158 = arith.addf %155, %157 : vector<64x1xf32>
    %c3_108 = arith.constant 3 : index
    %c0_109 = arith.constant 0 : index
    %c0_110 = arith.constant 0 : index
    %159 = vector.load %arg8[%c3_108, %c0_109, %c0_110] : memref<4x64x1xf32, #tpu.memory_space<vmem>>, vector<1x64x1xf32>
    %160 = vector.shape_cast %159 : vector<1x64x1xf32> to vector<64x1xf32>
    %161 = vector.shape_cast %158 : vector<64x1xf32> to vector<1x64x1xf32>
    tpu.vector_store %arg8[%c3_108, %c0_109, %c0_110], %161 {strides = array<i32>} : memref<4x64x1xf32, #tpu.memory_space<vmem>>, vector<1x64x1xf32>,
    %162 = arith.truncf %152 : vector<64x64xf32> to vector<64x64xbf16>
    %cst_111 = arith.constant dense<0.000000e+00> : vector<64x32xf32>
    %163 = tpu.matmul %162, %141, %cst_111 {dimension_numbers = #tpu.dot_dimension_numbers<[1], [0], [0], [1], [0, 0, 1, 1], [], []>} : vector<64x64xbf16>, vector<64x32xbf16>, vector<64x32xf32> -> vector<64x32xf32>
    %c3_112 = arith.constant 3 : index
    %c0_113 = arith.constant 0 : index
    %c0_114 = arith.constant 0 : index
    %164 = vector.load %arg9[%c3_112, %c0_113, %c0_114] : memref<4x64x32xf32, #tpu.memory_space<vmem>>, vector<1x64x32xf32>
    %165 = vector.shape_cast %164 : vector<1x64x32xf32> to vector<64x32xf32>
    %166 = vector.broadcast %149 : vector<64x1xf32> to vector<64x32xf32>
    %167 = arith.mulf %166, %165 : vector<64x32xf32>
    %168 = arith.addf %167, %163 : vector<64x32xf32>
    %c3_115 = arith.constant 3 : index
    %c0_116 = arith.constant 0 : index
    %c0_117 = arith.constant 0 : index
    %169 = vector.load %arg9[%c3_115, %c0_116, %c0_117] : memref<4x64x32xf32, #tpu.memory_space<vmem>>, vector<1x64x32xf32>
    %170 = vector.shape_cast %169 : vector<1x64x32xf32> to vector<64x32xf32>
    %171 = vector.shape_cast %168 : vector<64x32xf32> to vector<1x64x32xf32>
    tpu.vector_store %arg9[%c3_115, %c0_116, %c0_117], %171 {strides = array<i32>} : memref<4x64x32xf32, #tpu.memory_space<vmem>>, vector<1x64x32xf32>,
    %c3_118 = arith.constant 3 : index
    %c0_119 = arith.constant 0 : index
    %c0_120 = arith.constant 0 : index
    %172 = vector.load %arg7[%c3_118, %c0_119, %c0_120] : memref<4x64x1xf32, #tpu.memory_space<vmem>>, vector<1x64x1xf32>
    %173 = vector.shape_cast %172 : vector<1x64x1xf32> to vector<64x1xf32>
    %174 = vector.shape_cast %147 : vector<64x1xf32> to vector<1x64x1xf32>
    tpu.vector_store %arg7[%c3_118, %c0_119, %c0_120], %174 {strides = array<i32>} : memref<4x64x1xf32, #tpu.memory_space<vmem>>, vector<1x64x1xf32>,
    %c0_i32_121 = arith.constant 0 : i32
    %175 = arith.cmpi eq, %arg2, %c0_i32_121 : i32
    %176 = arith.extui %175 : i1 to i32
    %c0_i32_122 = arith.constant 0 : i32
    %177 = arith.cmpi ne, %176, %c0_i32_122 : i32
    scf.if %177 {
      %c0_123 = arith.constant 0 : index
      %c0_124 = arith.constant 0 : index
      %c0_125 = arith.constant 0 : index
      %178 = vector.load %arg8[%c0_123, %c0_124, %c0_125] : memref<4x64x1xf32, #tpu.memory_space<vmem>>, vector<1x64x1xf32>
      %179 = vector.shape_cast %178 : vector<1x64x1xf32> to vector<64x1xf32>
      %180 = tpu.reciprocal %179 {approx = true} : vector<64x1xf32> -> vector<64x1xf32>
      %c0_126 = arith.constant 0 : index
      %c0_127 = arith.constant 0 : index
      %c0_128 = arith.constant 0 : index
      %181 = vector.load %arg9[%c0_126, %c0_127, %c0_128] : memref<4x64x32xf32, #tpu.memory_space<vmem>>, vector<1x64x32xf32>
      %182 = vector.shape_cast %181 : vector<1x64x32xf32> to vector<64x32xf32>
      %183 = vector.broadcast %180 : vector<64x1xf32> to vector<64x32xf32>
      %184 = arith.mulf %182, %183 : vector<64x32xf32>
      %c1_129 = arith.constant 1 : index
      %c0_130 = arith.constant 0 : index
      %c0_131 = arith.constant 0 : index
      %185 = vector.load %arg8[%c1_129, %c0_130, %c0_131] : memref<4x64x1xf32, #tpu.memory_space<vmem>>, vector<1x64x1xf32>
      %186 = vector.shape_cast %185 : vector<1x64x1xf32> to vector<64x1xf32>
      %187 = tpu.reciprocal %186 {approx = true} : vector<64x1xf32> -> vector<64x1xf32>
      %c1_132 = arith.constant 1 : index
      %c0_133 = arith.constant 0 : index
      %c0_134 = arith.constant 0 : index
      %188 = vector.load %arg9[%c1_132, %c0_133, %c0_134] : memref<4x64x32xf32, #tpu.memory_space<vmem>>, vector<1x64x32xf32>
      %189 = vector.shape_cast %188 : vector<1x64x32xf32> to vector<64x32xf32>
      %190 = vector.broadcast %187 : vector<64x1xf32> to vector<64x32xf32>
      %191 = arith.mulf %189, %190 : vector<64x32xf32>
      %c2_135 = arith.constant 2 : index
      %c0_136 = arith.constant 0 : index
      %c0_137 = arith.constant 0 : index
      %192 = vector.load %arg8[%c2_135, %c0_136, %c0_137] : memref<4x64x1xf32, #tpu.memory_space<vmem>>, vector<1x64x1xf32>
      %193 = vector.shape_cast %192 : vector<1x64x1xf32> to vector<64x1xf32>
      %194 = tpu.reciprocal %193 {approx = true} : vector<64x1xf32> -> vector<64x1xf32>
      %c2_138 = arith.constant 2 : index
      %c0_139 = arith.constant 0 : index
      %c0_140 = arith.constant 0 : index
      %195 = vector.load %arg9[%c2_138, %c0_139, %c0_140] : memref<4x64x32xf32, #tpu.memory_space<vmem>>, vector<1x64x32xf32>
      %196 = vector.shape_cast %195 : vector<1x64x32xf32> to vector<64x32xf32>
      %197 = vector.broadcast %194 : vector<64x1xf32> to vector<64x32xf32>
      %198 = arith.mulf %196, %197 : vector<64x32xf32>
      %c3_141 = arith.constant 3 : index
      %c0_142 = arith.constant 0 : index
      %c0_143 = arith.constant 0 : index
      %199 = vector.load %arg8[%c3_141, %c0_142, %c0_143] : memref<4x64x1xf32, #tpu.memory_space<vmem>>, vector<1x64x1xf32>
      %200 = vector.shape_cast %199 : vector<1x64x1xf32> to vector<64x1xf32>
      %201 = tpu.reciprocal %200 {approx = true} : vector<64x1xf32> -> vector<64x1xf32>
      %c3_144 = arith.constant 3 : index
      %c0_145 = arith.constant 0 : index
      %c0_146 = arith.constant 0 : index
      %202 = vector.load %arg9[%c3_144, %c0_145, %c0_146] : memref<4x64x32xf32, #tpu.memory_space<vmem>>, vector<1x64x32xf32>
      %203 = vector.shape_cast %202 : vector<1x64x32xf32> to vector<64x32xf32>
      %204 = vector.broadcast %201 : vector<64x1xf32> to vector<64x32xf32>
      %205 = arith.mulf %203, %204 : vector<64x32xf32>
      %206 = tpu.concatenate %184, %191, %198, %205 in 1 : vector<64x32xf32>, vector<64x32xf32>, vector<64x32xf32>, vector<64x32xf32> -> vector<64x128xf32>
      %207 = arith.truncf %206 : vector<64x128xf32> to vector<64x128xbf16>
      %c0_147 = arith.constant 0 : index
      %c0_148 = arith.constant 0 : index
      %c0_149 = arith.constant 0 : index
      %208 = vector.load %arg6[%c0_147, %c0_148, %c0_149] : memref<1x64x128xbf16, #tpu.memory_space<vmem>>, vector<1x64x128xbf16>
      %209 = vector.shape_cast %208 : vector<1x64x128xbf16> to vector<64x128xbf16>
      %210 = vector.shape_cast %207 : vector<64x128xbf16> to vector<1x64x128xbf16>
      tpu.vector_store %arg6[%c0_147, %c0_148, %c0_149], %210 {strides = array<i32>} : memref<1x64x128xbf16, #tpu.memory_space<vmem>>, vector<1x64x128xbf16>,
    } else {
    }
    return
  }
  func.func @transform_0(%arg0: i32, %arg1: i32, %arg2: i32) -> (i32, i32, i32) {
    %c0_i32 = arith.constant 0 : i32
    %c0_i32_0 = arith.constant 0 : i32
    return %arg0, %arg1, %c0_i32 : i32, i32, i32
  }
  func.func @transform_1(%arg0: i32, %arg1: i32, %arg2: i32) -> (i32, i32, i32) {
    %c1_i32 = arith.constant 1 : i32
    %c0_i32 = arith.constant 0 : i32
    return %arg0, %arg2, %c1_i32 : i32, i32, i32
  }
  func.func @transform_2(%arg0: i32, %arg1: i32, %arg2: i32) -> (i32, i32, i32) {
    %c2_i32 = arith.constant 2 : i32
    %c0_i32 = arith.constant 0 : i32
    return %arg0, %arg2, %c2_i32 : i32, i32, i32
  }
  func.func @transform_3(%arg0: i32, %arg1: i32, %arg2: i32) -> (i32, i32, i32) {
    %c0_i32 = arith.constant 0 : i32
    %c0_i32_0 = arith.constant 0 : i32
    return %arg0, %arg1, %c0_i32 : i32, i32, i32
  }
}

module attributes {stable_mosaic.version = 11 : i64} {
  func.func @_matmul_direct_kernel(%arg0: i32, %arg1: i32, %arg2: memref<64x128xbf16, #tpu.memory_space<vmem>>, %arg3: memref<128x128xbf16, #tpu.memory_space<vmem>>, %arg4: memref<1x128xf32, #tpu.memory_space<vmem>>, %arg5: memref<64x128xf32, #tpu.memory_space<vmem>>, %arg6: memref<64x128xf32, #tpu.memory_space<vmem>>) attributes {dimension_semantics = [#tpu.dimension_semantics<parallel>, #tpu.dimension_semantics<parallel>], iteration_bounds = array<i64: 2, 1>, scalar_prefetch = 0 : i64, scratch_operands = 0 : i64, tpu.core_type = #tpu.core_type<tc>, window_params = [{transform_indices = @transform_0, window_bounds = array<i64: 64, 128>}, {transform_indices = @transform_1, window_bounds = array<i64: 128, 128>}, {transform_indices = @transform_2, window_bounds = array<i64: 1, 128>}, {transform_indices = @transform_3, window_bounds = array<i64: 64, 128>}, {transform_indices = @transform_4, window_bounds = array<i64: 64, 128>}]} {
    %c0 = arith.constant 0 : index
    %c0_0 = arith.constant 0 : index
    %0 = vector.load %arg2[%c0, %c0_0] : memref<64x128xbf16, #tpu.memory_space<vmem>>, vector<64x128xbf16>
    %c0_1 = arith.constant 0 : index
    %c0_2 = arith.constant 0 : index
    %1 = vector.load %arg3[%c0_1, %c0_2] : memref<128x128xbf16, #tpu.memory_space<vmem>>, vector<128x128xbf16>
    %cst = arith.constant dense<0.000000e+00> : vector<64x128xf32>
    %2 = tpu.matmul %0, %1, %cst {dimension_numbers = #tpu.dot_dimension_numbers<[1], [0], [0], [1], [0, 0, 1, 1], [], []>} : vector<64x128xbf16>, vector<128x128xbf16>, vector<64x128xf32> -> vector<64x128xf32>
    %c0_3 = arith.constant 0 : index
    %c0_4 = arith.constant 0 : index
    %3 = vector.load %arg4[%c0_3, %c0_4] : memref<1x128xf32, #tpu.memory_space<vmem>>, vector<1x128xf32>
    %4 = vector.broadcast %3 : vector<1x128xf32> to vector<64x128xf32>
    %5 = arith.addf %2, %4 : vector<64x128xf32>
    %c0_5 = arith.constant 0 : index
    %c0_6 = arith.constant 0 : index
    %6 = vector.load %arg5[%c0_5, %c0_6] : memref<64x128xf32, #tpu.memory_space<vmem>>, vector<64x128xf32>
    %7 = arith.addf %5, %6 : vector<64x128xf32>
    %c0_7 = arith.constant 0 : index
    %c0_8 = arith.constant 0 : index
    %8 = vector.load %arg6[%c0_7, %c0_8] : memref<64x128xf32, #tpu.memory_space<vmem>>, vector<64x128xf32>
    tpu.vector_store %arg6[%c0_7, %c0_8], %7 {strides = array<i32>} : memref<64x128xf32, #tpu.memory_space<vmem>>, vector<64x128xf32>,
    return
  }
  func.func @transform_0(%arg0: i32, %arg1: i32) -> (i32, i32) {
    %c0_i32 = arith.constant 0 : i32
    %c0_i32_0 = arith.constant 0 : i32
    return %arg0, %c0_i32 : i32, i32
  }
  func.func @transform_1(%arg0: i32, %arg1: i32) -> (i32, i32) {
    %c0_i32 = arith.constant 0 : i32
    %c0_i32_0 = arith.constant 0 : i32
    return %c0_i32, %arg1 : i32, i32
  }
  func.func @transform_2(%arg0: i32, %arg1: i32) -> (i32, i32) {
    %c0_i32 = arith.constant 0 : i32
    %c0_i32_0 = arith.constant 0 : i32
    return %c0_i32, %arg1 : i32, i32
  }
  func.func @transform_3(%arg0: i32, %arg1: i32) -> (i32, i32) {
    %c0_i32 = arith.constant 0 : i32
    return %arg0, %arg1 : i32, i32
  }
  func.func @transform_4(%arg0: i32, %arg1: i32) -> (i32, i32) {
    %c0_i32 = arith.constant 0 : i32
    return %arg0, %arg1 : i32, i32
  }
}

module attributes {stable_mosaic.version = 11 : i64} {
  func.func @_matmul_direct_kernel(%arg0: i32, %arg1: i32, %arg2: memref<64x256xbf16, #tpu.memory_space<vmem>>, %arg3: memref<256x128xbf16, #tpu.memory_space<vmem>>, %arg4: memref<1x128xf32, #tpu.memory_space<vmem>>, %arg5: memref<64x128xf32, #tpu.memory_space<vmem>>, %arg6: memref<64x128xf32, #tpu.memory_space<vmem>>) attributes {dimension_semantics = [#tpu.dimension_semantics<parallel>, #tpu.dimension_semantics<parallel>], iteration_bounds = array<i64: 2, 1>, scalar_prefetch = 0 : i64, scratch_operands = 0 : i64, tpu.core_type = #tpu.core_type<tc>, window_params = [{transform_indices = @transform_0, window_bounds = array<i64: 64, 256>}, {transform_indices = @transform_1, window_bounds = array<i64: 256, 128>}, {transform_indices = @transform_2, window_bounds = array<i64: 1, 128>}, {transform_indices = @transform_3, window_bounds = array<i64: 64, 128>}, {transform_indices = @transform_4, window_bounds = array<i64: 64, 128>}]} {
    %c0 = arith.constant 0 : index
    %c0_0 = arith.constant 0 : index
    %0 = vector.load %arg2[%c0, %c0_0] : memref<64x256xbf16, #tpu.memory_space<vmem>>, vector<64x256xbf16>
    %c0_1 = arith.constant 0 : index
    %c0_2 = arith.constant 0 : index
    %1 = vector.load %arg3[%c0_1, %c0_2] : memref<256x128xbf16, #tpu.memory_space<vmem>>, vector<256x128xbf16>
    %cst = arith.constant dense<0.000000e+00> : vector<64x128xf32>
    %2 = tpu.matmul %0, %1, %cst {dimension_numbers = #tpu.dot_dimension_numbers<[1], [0], [0], [1], [0, 0, 1, 1], [], []>} : vector<64x256xbf16>, vector<256x128xbf16>, vector<64x128xf32> -> vector<64x128xf32>
    %c0_3 = arith.constant 0 : index
    %c0_4 = arith.constant 0 : index
    %3 = vector.load %arg4[%c0_3, %c0_4] : memref<1x128xf32, #tpu.memory_space<vmem>>, vector<1x128xf32>
    %4 = vector.broadcast %3 : vector<1x128xf32> to vector<64x128xf32>
    %5 = arith.addf %2, %4 : vector<64x128xf32>
    %c0_5 = arith.constant 0 : index
    %c0_6 = arith.constant 0 : index
    %6 = vector.load %arg5[%c0_5, %c0_6] : memref<64x128xf32, #tpu.memory_space<vmem>>, vector<64x128xf32>
    %7 = arith.addf %5, %6 : vector<64x128xf32>
    %c0_7 = arith.constant 0 : index
    %c0_8 = arith.constant 0 : index
    %8 = vector.load %arg6[%c0_7, %c0_8] : memref<64x128xf32, #tpu.memory_space<vmem>>, vector<64x128xf32>
    tpu.vector_store %arg6[%c0_7, %c0_8], %7 {strides = array<i32>} : memref<64x128xf32, #tpu.memory_space<vmem>>, vector<64x128xf32>,
    return
  }
  func.func @transform_0(%arg0: i32, %arg1: i32) -> (i32, i32) {
    %c0_i32 = arith.constant 0 : i32
    %c0_i32_0 = arith.constant 0 : i32
    return %arg0, %c0_i32 : i32, i32
  }
  func.func @transform_1(%arg0: i32, %arg1: i32) -> (i32, i32) {
    %c0_i32 = arith.constant 0 : i32
    %c0_i32_0 = arith.constant 0 : i32
    return %c0_i32, %arg1 : i32, i32
  }
  func.func @transform_2(%arg0: i32, %arg1: i32) -> (i32, i32) {
    %c0_i32 = arith.constant 0 : i32
    %c0_i32_0 = arith.constant 0 : i32
    return %c0_i32, %arg1 : i32, i32
  }
  func.func @transform_3(%arg0: i32, %arg1: i32) -> (i32, i32) {
    %c0_i32 = arith.constant 0 : i32
    return %arg0, %arg1 : i32, i32
  }
  func.func @transform_4(%arg0: i32, %arg1: i32) -> (i32, i32) {
    %c0_i32 = arith.constant 0 : i32
    return %arg0, %arg1 : i32, i32
  }
}

module attributes {stable_mosaic.version = 11 : i64} {
  func.func @_matmul_direct_kernel(%arg0: i32, %arg1: i32, %arg2: memref<64x128xf32, #tpu.memory_space<vmem>>, %arg3: memref<128x256xbf16, #tpu.memory_space<vmem>>, %arg4: memref<1x128xf32, #tpu.memory_space<vmem>>, %arg5: memref<1x128xf32, #tpu.memory_space<vmem>>, %arg6: memref<1x256xf32, #tpu.memory_space<vmem>>, %arg7: memref<64x256xbf16, #tpu.memory_space<vmem>>) attributes {dimension_semantics = [#tpu.dimension_semantics<parallel>, #tpu.dimension_semantics<parallel>], iteration_bounds = array<i64: 2, 1>, scalar_prefetch = 0 : i64, scratch_operands = 0 : i64, tpu.core_type = #tpu.core_type<tc>, window_params = [{transform_indices = @transform_0, window_bounds = array<i64: 64, 128>}, {transform_indices = @transform_1, window_bounds = array<i64: 128, 256>}, {pipeline_mode = #tpu.pipeline_mode<synchronous>, transform_indices = @transform_2, window_bounds = array<i64: 1, 128>}, {pipeline_mode = #tpu.pipeline_mode<synchronous>, transform_indices = @transform_3, window_bounds = array<i64: 1, 128>}, {transform_indices = @transform_4, window_bounds = array<i64: 1, 256>}, {transform_indices = @transform_5, window_bounds = array<i64: 64, 256>}]} {
    %c0 = arith.constant 0 : index
    %c0_0 = arith.constant 0 : index
    %0 = vector.load %arg2[%c0, %c0_0] : memref<64x128xf32, #tpu.memory_space<vmem>>, vector<64x128xf32>
    %cst = arith.constant dense<0.000000e+00> : vector<64xf32>
    %1 = vector.multi_reduction <add>, %0, %cst [1] : vector<64x128xf32> to vector<64xf32>
    %2 = vector.shape_cast %1 : vector<64xf32> to vector<64x1xf32>
    %cst_1 = arith.constant 1.280000e+02 : f32
    %3 = vector.broadcast %cst_1 : f32 to vector<64x1xf32>
    %4 = arith.divf %2, %3 : vector<64x1xf32>
    %5 = vector.broadcast %4 : vector<64x1xf32> to vector<64x128xf32>
    %6 = arith.subf %0, %5 : vector<64x128xf32>
    %7 = arith.mulf %6, %6 : vector<64x128xf32>
    %cst_2 = arith.constant dense<0.000000e+00> : vector<64xf32>
    %8 = vector.multi_reduction <add>, %7, %cst_2 [1] : vector<64x128xf32> to vector<64xf32>
    %9 = vector.shape_cast %8 : vector<64xf32> to vector<64x1xf32>
    %cst_3 = arith.constant 1.280000e+02 : f32
    %10 = vector.broadcast %cst_3 : f32 to vector<64x1xf32>
    %11 = arith.divf %9, %10 : vector<64x1xf32>
    %12 = vector.broadcast %4 : vector<64x1xf32> to vector<64x128xf32>
    %13 = arith.subf %0, %12 : vector<64x128xf32>
    %cst_4 = arith.constant 9.99999974E-6 : f32
    %14 = vector.broadcast %cst_4 : f32 to vector<64x1xf32>
    %15 = arith.addf %11, %14 : vector<64x1xf32>
    %16 = math.rsqrt %15 : vector<64x1xf32>
    %17 = vector.broadcast %16 : vector<64x1xf32> to vector<64x128xf32>
    %18 = arith.mulf %13, %17 : vector<64x128xf32>
    %c0_5 = arith.constant 0 : index
    %c0_6 = arith.constant 0 : index
    %19 = vector.load %arg4[%c0_5, %c0_6] : memref<1x128xf32, #tpu.memory_space<vmem>>, vector<1x128xf32>
    %20 = vector.broadcast %19 : vector<1x128xf32> to vector<64x128xf32>
    %21 = arith.mulf %18, %20 : vector<64x128xf32>
    %c0_7 = arith.constant 0 : index
    %c0_8 = arith.constant 0 : index
    %22 = vector.load %arg5[%c0_7, %c0_8] : memref<1x128xf32, #tpu.memory_space<vmem>>, vector<1x128xf32>
    %23 = vector.broadcast %22 : vector<1x128xf32> to vector<64x128xf32>
    %24 = arith.addf %21, %23 : vector<64x128xf32>
    %25 = arith.truncf %24 : vector<64x128xf32> to vector<64x128xbf16>
    %c0_9 = arith.constant 0 : index
    %c0_10 = arith.constant 0 : index
    %26 = vector.load %arg3[%c0_9, %c0_10] : memref<128x256xbf16, #tpu.memory_space<vmem>>, vector<128x256xbf16>
    %cst_11 = arith.constant dense<0.000000e+00> : vector<64x256xf32>
    %27 = tpu.matmul %25, %26, %cst_11 {dimension_numbers = #tpu.dot_dimension_numbers<[1], [0], [0], [1], [0, 0, 1, 1], [], []>} : vector<64x128xbf16>, vector<128x256xbf16>, vector<64x256xf32> -> vector<64x256xf32>
    %c0_12 = arith.constant 0 : index
    %c0_13 = arith.constant 0 : index
    %28 = vector.load %arg6[%c0_12, %c0_13] : memref<1x256xf32, #tpu.memory_space<vmem>>, vector<1x256xf32>
    %29 = vector.broadcast %28 : vector<1x256xf32> to vector<64x256xf32>
    %30 = arith.addf %27, %29 : vector<64x256xf32>
    %cst_14 = arith.constant 5.000000e-01 : f32
    %31 = vector.broadcast %cst_14 : f32 to vector<64x256xf32>
    %32 = arith.mulf %31, %30 : vector<64x256xf32>
    %cst_15 = arith.constant 4.471500e-02 : f32
    %33 = vector.broadcast %cst_15 : f32 to vector<64x256xf32>
    %34 = arith.mulf %33, %30 : vector<64x256xf32>
    %35 = arith.mulf %34, %30 : vector<64x256xf32>
    %36 = arith.mulf %35, %30 : vector<64x256xf32>
    %37 = arith.addf %30, %36 : vector<64x256xf32>
    %cst_16 = arith.constant 0.797884583 : f32
    %38 = vector.broadcast %cst_16 : f32 to vector<64x256xf32>
    %39 = arith.mulf %38, %37 : vector<64x256xf32>
    %40 = math.tanh %39 : vector<64x256xf32>
    %cst_17 = arith.constant 1.000000e+00 : f32
    %41 = vector.broadcast %cst_17 : f32 to vector<64x256xf32>
    %42 = arith.addf %41, %40 : vector<64x256xf32>
    %43 = arith.mulf %32, %42 : vector<64x256xf32>
    %44 = arith.truncf %43 : vector<64x256xf32> to vector<64x256xbf16>
    %c0_18 = arith.constant 0 : index
    %c0_19 = arith.constant 0 : index
    %45 = vector.load %arg7[%c0_18, %c0_19] : memref<64x256xbf16, #tpu.memory_space<vmem>>, vector<64x256xbf16>
    tpu.vector_store %arg7[%c0_18, %c0_19], %44 {strides = array<i32>} : memref<64x256xbf16, #tpu.memory_space<vmem>>, vector<64x256xbf16>,
    return
  }
  func.func @transform_0(%arg0: i32, %arg1: i32) -> (i32, i32) {
    %c0_i32 = arith.constant 0 : i32
    %c0_i32_0 = arith.constant 0 : i32
    return %arg0, %c0_i32 : i32, i32
  }
  func.func @transform_1(%arg0: i32, %arg1: i32) -> (i32, i32) {
    %c0_i32 = arith.constant 0 : i32
    %c0_i32_0 = arith.constant 0 : i32
    return %c0_i32, %arg1 : i32, i32
  }
  func.func @transform_2(%arg0: i32, %arg1: i32) -> (i32, i32) {
    %c0_i32 = arith.constant 0 : i32
    %c0_i32_0 = arith.constant 0 : i32
    %c0_i32_1 = arith.constant 0 : i32
    return %c0_i32, %c0_i32_0 : i32, i32
  }
  func.func @transform_3(%arg0: i32, %arg1: i32) -> (i32, i32) {
    %c0_i32 = arith.constant 0 : i32
    %c0_i32_0 = arith.constant 0 : i32
    %c0_i32_1 = arith.constant 0 : i32
    return %c0_i32, %c0_i32_0 : i32, i32
  }
  func.func @transform_4(%arg0: i32, %arg1: i32) -> (i32, i32) {
    %c0_i32 = arith.constant 0 : i32
    %c0_i32_0 = arith.constant 0 : i32
    return %c0_i32, %arg1 : i32, i32
  }
  func.func @transform_5(%arg0: i32, %arg1: i32) -> (i32, i32) {
    %c0_i32 = arith.constant 0 : i32
    return %arg0, %arg1 : i32, i32
  }
}

module attributes {stable_mosaic.version = 11 : i64} {
  func.func @_matmul_direct_kernel(%arg0: i32, %arg1: i32, %arg2: memref<64x256xbf16, #tpu.memory_space<vmem>>, %arg3: memref<256x128xbf16, #tpu.memory_space<vmem>>, %arg4: memref<1x128xf32, #tpu.memory_space<vmem>>, %arg5: memref<64x128xf32, #tpu.memory_space<vmem>>, %arg6: memref<64x128xf32, #tpu.memory_space<vmem>>) attributes {dimension_semantics = [#tpu.dimension_semantics<parallel>, #tpu.dimension_semantics<parallel>], iteration_bounds = array<i64: 2, 1>, scalar_prefetch = 0 : i64, scratch_operands = 0 : i64, tpu.core_type = #tpu.core_type<tc>, window_params = [{transform_indices = @transform_0, window_bounds = array<i64: 64, 256>}, {transform_indices = @transform_1, window_bounds = array<i64: 256, 128>}, {transform_indices = @transform_2, window_bounds = array<i64: 1, 128>}, {transform_indices = @transform_3, window_bounds = array<i64: 64, 128>}, {transform_indices = @transform_4, window_bounds = array<i64: 64, 128>}]} {
    %c0 = arith.constant 0 : index
    %c0_0 = arith.constant 0 : index
    %0 = vector.load %arg2[%c0, %c0_0] : memref<64x256xbf16, #tpu.memory_space<vmem>>, vector<64x256xbf16>
    %c0_1 = arith.constant 0 : index
    %c0_2 = arith.constant 0 : index
    %1 = vector.load %arg3[%c0_1, %c0_2] : memref<256x128xbf16, #tpu.memory_space<vmem>>, vector<256x128xbf16>
    %cst = arith.constant dense<0.000000e+00> : vector<64x128xf32>
    %2 = tpu.matmul %0, %1, %cst {dimension_numbers = #tpu.dot_dimension_numbers<[1], [0], [0], [1], [0, 0, 1, 1], [], []>} : vector<64x256xbf16>, vector<256x128xbf16>, vector<64x128xf32> -> vector<64x128xf32>
    %c0_3 = arith.constant 0 : index
    %c0_4 = arith.constant 0 : index
    %3 = vector.load %arg4[%c0_3, %c0_4] : memref<1x128xf32, #tpu.memory_space<vmem>>, vector<1x128xf32>
    %4 = vector.broadcast %3 : vector<1x128xf32> to vector<64x128xf32>
    %5 = arith.addf %2, %4 : vector<64x128xf32>
    %c0_5 = arith.constant 0 : index
    %c0_6 = arith.constant 0 : index
    %6 = vector.load %arg5[%c0_5, %c0_6] : memref<64x128xf32, #tpu.memory_space<vmem>>, vector<64x128xf32>
    %7 = arith.addf %5, %6 : vector<64x128xf32>
    %c0_7 = arith.constant 0 : index
    %c0_8 = arith.constant 0 : index
    %8 = vector.load %arg6[%c0_7, %c0_8] : memref<64x128xf32, #tpu.memory_space<vmem>>, vector<64x128xf32>
    tpu.vector_store %arg6[%c0_7, %c0_8], %7 {strides = array<i32>} : memref<64x128xf32, #tpu.memory_space<vmem>>, vector<64x128xf32>,
    return
  }
  func.func @transform_0(%arg0: i32, %arg1: i32) -> (i32, i32) {
    %c0_i32 = arith.constant 0 : i32
    %c0_i32_0 = arith.constant 0 : i32
    return %arg0, %c0_i32 : i32, i32
  }
  func.func @transform_1(%arg0: i32, %arg1: i32) -> (i32, i32) {
    %c0_i32 = arith.constant 0 : i32
    %c0_i32_0 = arith.constant 0 : i32
    return %c0_i32, %arg1 : i32, i32
  }
  func.func @transform_2(%arg0: i32, %arg1: i32) -> (i32, i32) {
    %c0_i32 = arith.constant 0 : i32
    %c0_i32_0 = arith.constant 0 : i32
    return %c0_i32, %arg1 : i32, i32
  }
  func.func @transform_3(%arg0: i32, %arg1: i32) -> (i32, i32) {
    %c0_i32 = arith.constant 0 : i32
    return %arg0, %arg1 : i32, i32
  }
  func.func @transform_4(%arg0: i32, %arg1: i32) -> (i32, i32) {
    %c0_i32 = arith.constant 0 : i32
    return %arg0, %arg1 : i32, i32
  }
}

</mosaic_0001>

<bundles_post_ra>
// kernel: transformer_unit_forward.11
= control target key start
LH: loop header
LB: loop body
LE: loop exit
PB: predicated region body
PF: predicated region fallthrough
CT: control target
= control target key end

     0   :  { %s712_s15 = smov 0   ;;  %s714_s16 = smov 0   ;;  %s813_s0 = inlined_call_operand.vmem [shape: bf16[128,108], index: 0, kind: input, shape index: {}]   ;;  %s814_s1 = inlined_call_operand.vmem [shape: bf16[108,128], index: 1, kind: input, shape index: {}]   ;;  %s815_s2 = inlined_call_operand.vmem [shape: f32[1,128], index: 2, kind: input, shape index: {}]   ;;  %s816_s3 = inlined_call_operand.vmem [shape: f32[64,128], index: 3, kind: input, shape index: {}]   ;;  %s817_s4 = inlined_call_operand.vmem [shape: f32[128,128], index: 4, kind: output, shape index: {}]  }
   0x1   :  { %s716_s17 = smov 0  }
   0x2 LB: > { %s26_s18 = sadd.s32 1, %s681_s16  ;;  %p551_p0 = scmp.ge.s32.totalorder %s685_s17, 1  ;;  %s685_s17 = sphi %s716_s17, %s14_s17   ;;  %s681_s16 = sphi %s714_s16, %s819_s16   ;;  %s677_s15 = sphi %s712_s15, %s818_s15  }
   0x3   : > { %p28_p1 = scmp.ge.s32.totalorder %s26_s18, 2  ;;  %p203_p2 = scmp.lt.s32.totalorder %s685_s17, 3 }
   0x5   : > { %s821_s18 = smov (%p28_p1, %s26_s18), 0  ;;  %p204_p3 = pnand %p551_p0, %p203_p2 }
   0x6   : > { %s552_s27 = sshll.u32 (!%p204_p3), %s677_s15, 3 }
   0x7   : > { %207 = sbr.rel (%p204_p3) target bundleno = 190 (0xbe), region = 36  ;;  %p244_p4 = scmp.lt.s32.totalorder (!%p204_p3), %s552_s27, 15 }
   0xc   : > { %v598_v0 = vld [vmem:[%s814_s1 + $0x30] sm:$0xf]  ;;  %v616_v1 = vld [vmem:[%s814_s1 + $0x30] sm:$0x30]  ;;  %vm370_vm0 = vcmask 1045504   ;;  %v615_v4 = vld [vmem:[%s814_s1 + $0x28] sm:$0xff] }
   0xd   : > { %v599_v2 = vor.u32 %v616_v1, %v598_v0  ;;  %v614_v5 = vld [vmem:[%s814_s1 + $0x20] sm:$0xff]  ;;  %v613_v6 = vld [vmem:[%s814_s1 + $0x18] sm:$0xff]  ;;  %v612_v7 = vld [vmem:[%s814_s1 + $0x10] sm:$0xff]  ;;  %s823_s27 = smov (!%p244_p4, %s552_s27), 15  ;;  %vm357_vm1 = vcmask 883712  }
   0xe   : > { %v611_v8 = vld [vmem:[%s814_s1 + $0x8] sm:$0xff]  ;;  %s553_s8 = sshll.u32 %s823_s27, 2  ;;  %v610_v9 = vld [vmem:[%s814_s1] sm:$0xff]  ;;  %s555_s19 = sshll.u32 %s823_s27, 3  ;;  %v405_v18 = vld [vmem:[%s816_s3 + $0x10] sm:$0xff] }
   0xf   : > { %v372_v3 = vsel %vm370_vm0, %v599_v2, 0  ;;  %s247_s13 = scalar_lea.vmem %s813_s0, %s553_s8  ;;  %v662_v14 = vld [vmem:[%s815_s2] ss:$0 sm:$0xff]  ;;  %s776_s26 = scalar_lea.vmem %s817_s4, %s555_s19  ;;  %v409_v26 = vld [vmem:[%s816_s3 + $0x30] sm:$0xff]  ;;  %v404_v30 = vld [vmem:[%s816_s3 + $0x8] sm:$0xff] }
  0x10   : > { %375 = vmatpush.bf16.msra.mxu0 %v372_v3  ;;  %617 = vmatpush.bf16.msra.mxu1 %v372_v3  ;;  %v606_v10 = vld [vmem:[%s247_s13] sm:$0xff]  ;;  %v607_v11 = vld [vmem:[%s247_s13 + $0x8] sm:$0xff]  ;;  %v608_v12 = vld [vmem:[%s247_s13 + $0x10] sm:$0xff] }
  0x11   : > { %618 = vmatpush.bf16.msra.mxu2 %v372_v3  ;;  %619 = vmatpush.bf16.msra.mxu3 %v372_v3  ;;  %v609_v13 = vld [vmem:[%s247_s13 + $0x18] sm:$0xff]  ;;  %v403_v16 = vld [vmem:[%s816_s3] sm:$0xff]  ;;  %v408_v40 = vld [vmem:[%s816_s3 + $0x28] sm:$0xff] }
  0x12   : > { %v407_v24 = vld [vmem:[%s816_s3 + $0x20] sm:$0xff]  ;;  %v406_v32 = vld [vmem:[%s816_s3 + $0x18] sm:$0xff] }
  0x13   : > { %v410_v42 = vld [vmem:[%s816_s3 + $0x38] sm:$0xff] }
  0x14   : > { %376 = vmatpush.bf16.msra.mxu0 %v615_v4  ;;  %620 = vmatpush.bf16.msra.mxu1 %v615_v4 }
  0x15   : > { %621 = vmatpush.bf16.msra.mxu2 %v615_v4  ;;  %622 = vmatpush.bf16.msra.mxu3 %v615_v4 }
  0x18   : > { %377 = vmatpush.bf16.msra.mxu0 %v614_v5  ;;  %623 = vmatpush.bf16.msra.mxu1 %v614_v5 }
  0x19   : > { %624 = vmatpush.bf16.msra.mxu2 %v614_v5  ;;  %625 = vmatpush.bf16.msra.mxu3 %v614_v5 }
  0x1c   : > { %378 = vmatpush.bf16.msra.mxu0 %v613_v6  ;;  %626 = vmatpush.bf16.msra.mxu1 %v613_v6 }
  0x1d   : > { %627 = vmatpush.bf16.msra.mxu2 %v613_v6  ;;  %628 = vmatpush.bf16.msra.mxu3 %v613_v6 }
  0x20   : > { %379 = vmatpush.bf16.msra.mxu0 %v612_v7  ;;  %629 = vmatpush.bf16.msra.mxu1 %v612_v7 }
  0x21   : > { %630 = vmatpush.bf16.msra.mxu2 %v612_v7  ;;  %631 = vmatpush.bf16.msra.mxu3 %v612_v7 }
  0x24   : > { %380 = vmatpush.bf16.msra.mxu0 %v611_v8  ;;  %632 = vmatpush.bf16.msra.mxu1 %v611_v8 }
  0x25   : > { %633 = vmatpush.bf16.msra.mxu2 %v611_v8  ;;  %634 = vmatpush.bf16.msra.mxu3 %v611_v8 }
  0x28   : > { %381 = vmatpush.bf16.msra.mxu0 %v610_v9  ;;  %635 = vmatpush.bf16.msra.mxu1 %v610_v9 }
  0x29   : > { %636 = vmatpush.bf16.msra.mxu2 %v610_v9  ;;  %637 = vmatpush.bf16.msra.mxu3 %v610_v9 }
  0x2b   : > { %600 = vmatmul.msk.bf16.vlgmr.msra.gmra.mxu0 %vm357_vm1, %v606_v10  ;;  %601 = vmatmul.msk.bf16.vlgmr.msra.gmra.mxu1 %vm357_vm1, %v607_v11 }
  0x2c   : > { %602 = vmatmul.msk.bf16.vlgmr.msra.gmra.mxu2 %vm357_vm1, %v608_v12  ;;  %603 = vmatmul.msk.bf16.vlgmr.msra.gmra.mxu3 %vm357_vm1, %v609_v13 }
  0xa8   : > { %v383_v15 = vpop.f32.mrf.mxu0  ;;  %v388_v17 = vpop.f32.mrf.mxu1 }
  0xa9   : > { %v384_v19 = vadd.f32 %v662_v14, %v383_v15  ;;  %v389_v20 = vadd.f32 %v662_v14, %v388_v17 }
  0xab   : > { %v411_v21 = vadd.f32 %v403_v16, %v384_v19  ;;  %v413_v22 = vadd.f32 %v405_v18, %v389_v20 }
  0xad   : > { %419 = vst [vmem:[%s776_s26] sm:$0xff] %v411_v21 }
  0xae   : > { %421 = vst [vmem:[%s776_s26 + $0x10] sm:$0xff] %v413_v22 }
  0xaf   : > { %v393_v23 = vpop.f32.mrf.mxu2  ;;  %v398_v25 = vpop.f32.mrf.mxu3 }
  0xb0   : > { %v394_v27 = vadd.f32 %v662_v14, %v393_v23  ;;  %v399_v28 = vadd.f32 %v662_v14, %v398_v25  ;;  %v385_v29 = vpop.f32.mrf.mxu0  ;;  %v390_v31 = vpop.f32.mrf.mxu1 }
  0xb1   : > { %v386_v33 = vadd.f32 %v662_v14, %v385_v29  ;;  %v391_v34 = vadd.f32 %v662_v14, %v390_v31 }
  0xb2   : > { %v415_v35 = vadd.f32 %v407_v24, %v394_v27  ;;  %v417_v36 = vadd.f32 %v409_v26, %v399_v28 }
  0xb3   : > { %v412_v37 = vadd.f32 %v404_v30, %v386_v33  ;;  %v414_v38 = vadd.f32 %v406_v32, %v391_v34 }
  0xb4   : > { %423 = vst [vmem:[%s776_s26 + $0x20] sm:$0xff] %v415_v35 }
  0xb5   : > { %425 = vst [vmem:[%s776_s26 + $0x30] sm:$0xff] %v417_v36 }
  0xb6   : > { %420 = vst [vmem:[%s776_s26 + $0x8] sm:$0xff] %v412_v37 }
  0xb7   : > { %422 = vst [vmem:[%s776_s26 + $0x18] sm:$0xff] %v414_v38  ;;  %v395_v39 = vpop.f32.mrf.mxu2  ;;  %v400_v41 = vpop.f32.mrf.mxu3 }
  0xb8   : > { %v396_v43 = vadd.f32 %v662_v14, %v395_v39  ;;  %v401_v44 = vadd.f32 %v662_v14, %v400_v41 }
  0xba   : > { %v416_v45 = vadd.f32 %v408_v40, %v396_v43  ;;  %v418_v46 = vadd.f32 %v410_v42, %v401_v44 }
  0xbc   : > { %424 = vst [vmem:[%s776_s26 + $0x28] sm:$0xff] %v416_v45 }
  0xbd   : > { %426 = vst [vmem:[%s776_s26 + $0x38] sm:$0xff] %v418_v46 }
  0xbe PF: > { %s14_s17 = sadd.s32 1, %s685_s17   ;;  %s818_s15 = smov %s681_s16 }
  0xbf   : > { %p11_p5 = scmp.ge.s32.totalorder %s14_s17, 4   ;;  %s819_s16 = smov %s821_s18 }
  0xc1   :  { %13 = sbr.rel (!%p11_p5) target bundleno = 2 (0x2), region = 75 }

// kernel: transformer_unit_forward.12
= control target key start
LH: loop header
LB: loop body
LE: loop exit
PB: predicated region body
PF: predicated region fallthrough
CT: control target
= control target key end

     0   :  { %s1065_s15 = smov 0   ;;  %s1067_s16 = smov 0   ;;  %s1367_s0 = inlined_call_operand.vmem [shape: f32[128,128], index: 0, kind: input, shape index: {}]   ;;  %s1368_s1 = inlined_call_operand.vmem [shape: bf16[128,384], index: 1, kind: input, shape index: {}]   ;;  %s1369_s2 = inlined_call_operand.vmem [shape: f32[1,128], index: 2, kind: input, shape index: {}]   ;;  %s1370_s3 = inlined_call_operand.vmem [shape: f32[1,128], index: 3, kind: input, shape index: {}]   ;;  %s1371_s4 = inlined_call_operand.vmem [shape: bf16[128,384], index: 4, kind: output, shape index: {}]  }
   0x1   :  { %s1069_s17 = smov 0  }
   0x2 LB: > { %s26_s18 = sadd.s32 1, %s1033_s16  ;;  %p834_p0 = scmp.ge.s32.totalorder %s1037_s17, 1  ;;  %s1037_s17 = sphi %s1069_s17, %s14_s17   ;;  %s1033_s16 = sphi %s1067_s16, %s1373_s16   ;;  %s1029_s15 = sphi %s1065_s15, %s1372_s15  }
   0x3   : > { %p28_p1 = scmp.ge.s32.totalorder %s26_s18, 2  ;;  %p188_p2 = scmp.lt.s32.totalorder %s1037_s17, 3 }
   0x5   : > { %s1375_s18 = smov (%p28_p1, %s26_s18), 0  ;;  %p189_p3 = pnand %p834_p0, %p188_p2 }
   0x6   : > { %s835_s19 = sshll.u32 (!%p189_p3), %s1029_s15, 3 }
   0x7   : > { %192 = sbr.rel (%p189_p3) target bundleno = 559 (0x22f), region = 36  ;;  %p225_p4 = scmp.lt.s32.totalorder (!%p189_p3), %s835_s19, 15 }
   0xc   : > { %s1377_s19 = smov (!%p225_p4, %s835_s19), 15  ;;  %v1039_v7 = vmov 128.0   ;;  %v925_v43 = vld [vmem:[%s1368_s1 + $0xa8] sm:$0xf]  ;;  %v959_v44 = vld [vmem:[%s1368_s1 + $0xb0] sm:$0xf0] }
   0xd   : > { %s836_s20 = sshll.u32 %s1377_s19, 3  ;;  %997 = vrcp.f32 %v1039_v7  ;;  %v958_v45 = vld [vmem:[%s1368_s1 + $0xac] sm:$0xf]  ;;  %v926_v46 = vor.u32 %v959_v44, %v925_v43  ;;  %v927_v47 = vld [vmem:[%s1368_s1 + $0xb4] sm:$0xf0]  ;;  %s969_s10 = smul.u32 12, %s1377_s19 }
   0xe   : > { %s1089_s23 = scalar_lea.vmem %s1367_s0, %s836_s20  ;;  %v933_v48 = vld [vmem:[%s1368_s1 + $0xb0] sm:$0xf]  ;;  %v960_v49 = vld [vmem:[%s1368_s1 + $0xb8] sm:$0xf0]  ;;  %v930_v50 = vor.u32 %v958_v45, %v927_v47  ;;  %v955_v54 = vld [vmem:[%s1368_s1 + $0x94] sm:$0xf] }
   0xf   : > { %v252_v0 = vld [vmem:[%s1089_s23 + $0x20] sm:$0xff]  ;;  %v250_v1 = vld [vmem:[%s1089_s23 + $0x10] sm:$0xff]  ;;  %v253_v3 = vld [vmem:[%s1089_s23 + $0x28] sm:$0xff]  ;;  %v934_v51 = vor.u32 %v960_v49, %v933_v48  ;;  %611 = vmatpush.bf16.msra.mxu0 %v926_v46  ;;  %961 = vmatpush.bf16.msra.mxu3 %v926_v46  ;;  %s1340_s13 = scalar_lea.vmem %s1371_s4, %s969_s10 }
  0x10   : > { %v248_v2 = vld [vmem:[%s1089_s23] sm:$0xff]  ;;  %264 = vadd.xlane.f32.xlu2 %v252_v0  ;;  %260 = vadd.xlane.f32.xlu1 %v250_v1  ;;  %v251_v4 = vld [vmem:[%s1089_s23 + $0x18] sm:$0xff]  ;;  %v249_v5 = vld [vmem:[%s1089_s23 + $0x8] sm:$0xff] }
  0x11   : > { %256 = vadd.xlane.f32.xlu0 %v248_v2  ;;  %v254_v6 = vld [vmem:[%s1089_s23 + $0x30] sm:$0xff]  ;;  %v1116_v30 = vld [vmem:[%s1089_s23 + $0x38] sm:$0xff]  ;;  %640 = vmatpush.bf16.msra.mxu1 %v930_v50  ;;  %v915_v56 = vld [vmem:[%s1368_s1 + $0x9c] sm:$0xf0] }
  0x12   : > { %669 = vmatpush.bf16.msra.mxu2 %v934_v51  ;;  %v913_v52 = vld [vmem:[%s1368_s1 + $0x90] sm:$0xf]  ;;  %v956_v53 = vld [vmem:[%s1368_s1 + $0x98] sm:$0xf0]  ;;  %v921_v57 = vld [vmem:[%s1368_s1 + $0x98] sm:$0xf]  ;;  %v918_v59 = vor.u32 %v955_v54, %v915_v56 }
  0x13   : > { %v998_v8 = vpop.eup %997  ;;  %v914_v55 = vor.u32 %v956_v53, %v913_v52  ;;  %v957_v58 = vld [vmem:[%s1368_s1 + $0xa0] sm:$0xf0]  ;;  %v901_v61 = vld [vmem:[%s1368_s1 + $0x78] sm:$0xf]  ;;  %v952_v63 = vld [vmem:[%s1368_s1 + $0x7c] sm:$0xf] }
  0x14   : > { %v273_v9 = vmul.f32 128.0, %v998_v8  ;;  %vm277_vm0 = vweird.f32 %v998_v8  ;;  %v922_v60 = vor.u32 %v957_v58, %v921_v57  ;;  %v953_v62 = vld [vmem:[%s1368_s1 + $0x80] sm:$0xf0]  ;;  %v950_v7 = vld [vmem:[%s1368_s1 + $0x68] sm:$0xf0] }
  0x15   : > { %612 = vmatpush.bf16.msra.mxu0 %v914_v55  ;;  %962 = vmatpush.bf16.msra.mxu3 %v914_v55  ;;  %v941_v43 = vld [vmem:[%s1368_s1 + $0x20] sm:$0xf0]  ;;  %v940_v44 = vld [vmem:[%s1368_s1 + $0x1c] sm:$0xf]  ;;  %v855_v46 = vld [vmem:[%s1368_s1 + $0x24] sm:$0xf0] }
  0x16   : > { %v274_v10 = vsub.f32 1.0, %v273_v9  ;;  %641 = vmatpush.bf16.msra.mxu1 %v918_v59  ;;  %670 = vmatpush.bf16.msra.mxu2 %v922_v60  ;;  %v861_v47 = vld [vmem:[%s1368_s1 + $0x20] sm:$0xf]  ;;  %v942_v48 = vld [vmem:[%s1368_s1 + $0x28] sm:$0xf0]  ;;  %v858_v50 = vor.u32 %v940_v44, %v855_v46 }
  0x17   : > { %v862_v51 = vor.u32 %v942_v48, %v861_v47  ;;  %v841_v53 = vld [vmem:[%s1368_s1] sm:$0xf]  ;;  %v938_v54 = vld [vmem:[%s1368_s1 + $0x8] sm:$0xf0]  ;;  %v937_v55 = vld [vmem:[%s1368_s1 + $0x4] sm:$0xf] }
  0x18   : > { %266 = vadd.xlane.f32.xlu2 %v253_v3  ;;  %262 = vadd.xlane.f32.xlu1 %v251_v4  ;;  %v275_v11 = vmul.f32 %v998_v8, %v274_v10  ;;  %v891_v10 = vld [vmem:[%s1368_s1 + $0x6c] sm:$0xf0]  ;;  %v842_v57 = vor.u32 %v938_v54, %v841_v53  ;;  %v849_v59 = vld [vmem:[%s1368_s1 + $0x8] sm:$0xf] }
  0x19   : > { %258 = vadd.xlane.f32.xlu0 %v249_v5  ;;  %v843_v58 = vld [vmem:[%s1368_s1 + $0xc] sm:$0xf0] }
  0x1a   : > { %v276_v12 = vadd.f32 %v998_v8, %v275_v11  ;;  %v897_v11 = vld [vmem:[%s1368_s1 + $0x68] sm:$0xf]  ;;  %v846_v60 = vor.u32 %v937_v55, %v843_v58 }
  0x1c   : > { %v1098_v13 = vsel %vm277_vm0, %v998_v8, %v276_v12  ;;  %v949_v8 = vld [vmem:[%s1368_s1 + $0x64] sm:$0xf]  ;;  %v951_v12 = vld [vmem:[%s1368_s1 + $0x70] sm:$0xf0] }
  0x20   : > { %268 = vadd.xlane.f32.xlu2 %v254_v6 }
  0x83   : > { %v265_v14 = vpop.xlane.xlu2 %264  ;;  %v261_v15 = vpop.xlane.xlu1 %260 }
  0x84   : > { %v257_v16 = vpop.xlane.xlu0 %256  ;;  %v283_v26 = vmul.f32 %v1098_v13, %v265_v14  ;;  %v281_v27 = vmul.f32 %v1098_v13, %v261_v15  ;;  %v894_v14 = vor.u32 %v949_v8, %v891_v10  ;;  %v898_v15 = vor.u32 %v951_v12, %v897_v11 }
  0x85   : > { %v279_v17 = vmul.f32 %v1098_v13, %v257_v16  ;;  %v877_v16 = vld [vmem:[%s1368_s1 + $0x48] sm:$0xf] }
  0x86   : > { %v1120_v32 = vsub.f32 %v252_v0, %v283_v26  ;;  %v1122_v33 = vsub.f32 %v250_v1, %v281_v27  ;;  %v902_v0 = vor.u32 %v953_v62, %v901_v61  ;;  %v903_v1 = vld [vmem:[%s1368_s1 + $0x84] sm:$0xf0]  ;;  %v865_v27 = vld [vmem:[%s1368_s1 + $0x30] sm:$0xf]  ;;  %v939_v61 = vld [vmem:[%s1368_s1 + $0x10] sm:$0xf0] }
  0x87   : > { %v1101_v18 = vsub.f32 %v248_v2, %v279_v17  ;;  %v909_v2 = vld [vmem:[%s1368_s1 + $0x80] sm:$0xf]  ;;  %v947_v17 = vld [vmem:[%s1368_s1 + $0x50] sm:$0xf0]  ;;  %v850_v62 = vor.u32 %v939_v61, %v849_v59 }
  0x88   : > { %v299_v38 = vmul.f32 %v1120_v32, %v1120_v32  ;;  %v297_v39 = vmul.f32 %v1122_v33, %v1122_v33  ;;  %613 = vmatpush.bf16.msra.mxu0 %v902_v0  ;;  %963 = vmatpush.bf16.msra.mxu3 %v902_v0 }
  0x89   : > { %v295_v19 = vmul.f32 %v1101_v18, %v1101_v18 }
  0x8b   : > { %303 = vadd.xlane.f32.xlu0 %v295_v19  ;;  %v267_v20 = vpop.xlane.xlu2 %266  ;;  %v263_v21 = vpop.xlane.xlu1 %262  ;;  %v946_v19 = vld [vmem:[%s1368_s1 + $0x4c] sm:$0xf] }
  0x8c   : > { %v282_v22 = vmul.f32 %v1098_v13, %v263_v21  ;;  %v259_v23 = vpop.xlane.xlu0 %258  ;;  %v284_v37 = vmul.f32 %v1098_v13, %v267_v20  ;;  %v878_v20 = vor.u32 %v947_v17, %v877_v16  ;;  %v879_v21 = vld [vmem:[%s1368_s1 + $0x54] sm:$0xf0] }
  0x8d   : > { %v280_v24 = vmul.f32 %v1098_v13, %v259_v23  ;;  %v948_v23 = vld [vmem:[%s1368_s1 + $0x58] sm:$0xf0] }
  0x8e   : > { %v1107_v25 = vsub.f32 %v251_v4, %v282_v22  ;;  %v1135_v41 = vsub.f32 %v253_v3, %v284_v37  ;;  %v954_v3 = vld [vmem:[%s1368_s1 + $0x88] sm:$0xf0]  ;;  %v906_v4 = vor.u32 %v952_v63, %v903_v1  ;;  %v885_v22 = vld [vmem:[%s1368_s1 + $0x50] sm:$0xf]  ;;  %v873_v37 = vld [vmem:[%s1368_s1 + $0x38] sm:$0xf] }
  0x8f   : > { %v1111_v28 = vsub.f32 %v249_v5, %v280_v24  ;;  %v910_v5 = vor.u32 %v954_v3, %v909_v2  ;;  %v882_v24 = vor.u32 %v946_v19, %v879_v21  ;;  %v886_v26 = vor.u32 %v948_v23, %v885_v22 }
  0x90   : > { %v298_v29 = vmul.f32 %v1107_v25, %v1107_v25  ;;  %v300_v42 = vmul.f32 %v1135_v41, %v1135_v41  ;;  %642 = vmatpush.bf16.msra.mxu1 %v906_v4 }
  0x91   : > { %v296_v31 = vmul.f32 %v1111_v28, %v1111_v28  ;;  %671 = vmatpush.bf16.msra.mxu2 %v910_v5 }
  0x92   : > { %309 = vadd.xlane.f32.xlu2 %v298_v29  ;;  %v944_v29 = vld [vmem:[%s1368_s1 + $0x38] sm:$0xf0] }
  0x93   : > { %270 = vadd.xlane.f32.xlu0 %v1116_v30  ;;  %305 = vadd.xlane.f32.xlu1 %v296_v31  ;;  %v269_v34 = vpop.xlane.xlu2 %268  ;;  %v943_v31 = vld [vmem:[%s1368_s1 + $0x34] sm:$0xf] }
  0x94   : > { %v285_v35 = vmul.f32 %v1098_v13, %v269_v34  ;;  %643 = vmatpush.bf16.msra.mxu1 %v894_v14  ;;  %v866_v34 = vor.u32 %v944_v29, %v865_v27 }
  0x95   : > { %672 = vmatpush.bf16.msra.mxu2 %v898_v15 }
  0x96   : > { %v1126_v36 = vsub.f32 %v254_v6, %v285_v35  ;;  %v889_v6 = vld [vmem:[%s1368_s1 + $0x60] sm:$0xf] }
  0x97   : > { %v890_v9 = vor.u32 %v950_v7, %v889_v6  ;;  %v867_v35 = vld [vmem:[%s1368_s1 + $0x3c] sm:$0xf0] }
  0x98   : > { %v301_v40 = vmul.f32 %v1126_v36, %v1126_v36  ;;  %644 = vmatpush.bf16.msra.mxu1 %v882_v24 }
  0x99   : > { %614 = vmatpush.bf16.msra.mxu0 %v890_v9  ;;  %964 = vmatpush.bf16.msra.mxu3 %v890_v9 }
  0x9a   : > { %315 = vadd.xlane.f32.xlu2 %v301_v40  ;;  %673 = vmatpush.bf16.msra.mxu2 %v886_v26 }
  0x9b   : > { %311 = vadd.xlane.f32.xlu0 %v299_v38  ;;  %307 = vadd.xlane.f32.xlu1 %v297_v39  ;;  %v945_v38 = vld [vmem:[%s1368_s1 + $0x40] sm:$0xf0]  ;;  %v870_v39 = vor.u32 %v943_v31, %v867_v35 }
  0x9c   : > { %v874_v40 = vor.u32 %v945_v38, %v873_v37 }
  0x9d   : > { %615 = vmatpush.bf16.msra.mxu0 %v878_v20  ;;  %965 = vmatpush.bf16.msra.mxu3 %v878_v20 }
  0x9e   : > { %645 = vmatpush.bf16.msra.mxu1 %v870_v39  ;;  %674 = vmatpush.bf16.msra.mxu2 %v874_v40 }
  0xa1   : > { %616 = vmatpush.bf16.msra.mxu0 %v866_v34  ;;  %966 = vmatpush.bf16.msra.mxu3 %v866_v34 }
  0xa2   : > { %646 = vmatpush.bf16.msra.mxu1 %v858_v50  ;;  %675 = vmatpush.bf16.msra.mxu2 %v862_v51 }
  0xa3   : > { %313 = vadd.xlane.f32.xlu1 %v300_v42  ;;  %v853_v42 = vld [vmem:[%s1368_s1 + $0x18] sm:$0xf] }
  0xa4   : > { %v854_v45 = vor.u32 %v941_v43, %v853_v42 }
  0xa6   : > { %617 = vmatpush.bf16.msra.mxu0 %v854_v45  ;;  %967 = vmatpush.bf16.msra.mxu3 %v854_v45  ;;  %v1302_v45 = vld [vmem:[%s1369_s2] ss:$0 sm:$0xff] }
  0xa7   : > { %647 = vmatpush.bf16.msra.mxu1 %v846_v60  ;;  %676 = vmatpush.bf16.msra.mxu2 %v850_v62 }
  0xaa   : > { %618 = vmatpush.bf16.msra.mxu0 %v842_v57  ;;  %968 = vmatpush.bf16.msra.mxu3 %v842_v57  ;;  %v1310_v57 = vld [vmem:[%s1370_s3] ss:$0 sm:$0xff] }
  0xfe   : > { %v304_v49 = vpop.xlane.xlu0 %303 }
  0xff   : > { %v319_v52 = vmul.f32 %v304_v49, %v1098_v13 }
 0x101   : > { %v327_v56 = vadd.f32 1e-05, %v319_v52 }
 0x103   : > { %999 = vrsqrt.f32 %v327_v56  ;;  %vm341_vm2 = vweird.f32 %v327_v56 }
 0x105   : > { %v310_v63 = vpop.xlane.xlu2 %309 }
 0x106   : > { %v322_v0 = vmul.f32 %v310_v63, %v1098_v13  ;;  %v306_v1 = vpop.xlane.xlu1 %305  ;;  %v271_v2 = vpop.xlane.xlu0 %270 }
 0x107   : > { %v320_v3 = vmul.f32 %v306_v1, %v1098_v13  ;;  %v286_v4 = vmul.f32 %v1098_v13, %v271_v2 }
 0x108   : > { %v330_v5 = vadd.f32 1e-05, %v322_v0 }
 0x109   : > { %v1000_v6 = vpop.eup %999  ;;  %v328_v7 = vadd.f32 1e-05, %v320_v3  ;;  %v1288_v8 = vsub.f32 %v1116_v30, %v286_v4 }
 0x10a   : > { %v336_v9 = vmul.f32 %v1000_v6, %v327_v56  ;;  %1001 = vrsqrt.f32 %v330_v5  ;;  %vm342_vm1 = vweird.f32 %v1000_v6  ;;  %vm371_vm6 = vweird.f32 %v330_v5 }
 0x10b   : > { %1003 = vrsqrt.f32 %v328_v7  ;;  %v302_v10 = vmul.f32 %v1288_v8, %v1288_v8  ;;  %vm343_vm3 = vmor %vm341_vm2, %vm342_vm1  ;;  %vm351_vm4 = vweird.f32 %v328_v7 }
 0x10c   : > { %v337_v11 = vmul.f32 %v1000_v6, %v336_v9 }
 0x10d   : > { %317 = vadd.xlane.f32.xlu0 %v302_v10 }
 0x10e   : > { %v338_v12 = vmul.f32 0.5, %v337_v11  ;;  %v308_v14 = vpop.xlane.xlu1 %307  ;;  %v312_v15 = vpop.xlane.xlu0 %311 }
 0x10f   : > { %v321_v16 = vmul.f32 %v308_v14, %v1098_v13  ;;  %v323_v17 = vmul.f32 %v312_v15, %v1098_v13 }
 0x110   : > { %v1002_v19 = vpop.eup %1001  ;;  %v339_v20 = vsub.f32 1.5, %v338_v12 }
 0x111   : > { %v1004_v21 = vpop.eup %1003  ;;  %v366_v30 = vmul.f32 %v1002_v19, %v330_v5  ;;  %v329_v22 = vadd.f32 1e-05, %v321_v16  ;;  %v1294_v23 = vadd.f32 1e-05, %v323_v17  ;;  %vm372_vm7 = vweird.f32 %v1002_v19 }
 0x112   : > { %v340_v24 = vmul.f32 %v1000_v6, %v339_v20  ;;  %v346_v26 = vmul.f32 %v1004_v21, %v328_v7  ;;  %vm352_vm5 = vweird.f32 %v1004_v21  ;;  %vm373_vm9 = vmor %vm371_vm6, %vm372_vm7 }
 0x113   : > { %v367_v27 = vmul.f32 %v1002_v19, %v366_v30  ;;  %1005 = vrsqrt.f32 %v329_v22  ;;  %vm353_vm8 = vmor %vm351_vm4, %vm352_vm5  ;;  %vm361_vm10 = vweird.f32 %v329_v22  ;;  %vm381_vm15 = vweird.f32 %v1294_v23 }
 0x114   : > { %v347_v29 = vmul.f32 %v1004_v21, %v346_v26  ;;  %1007 = vrsqrt.f32 %v1294_v23  ;;  %v344_v34 = vsel %vm343_vm3, %v1000_v6, %v340_v24  ;;  %v316_v26 = vpop.xlane.xlu2 %315 }
 0x115   : > { %v368_v31 = vmul.f32 0.5, %v367_v27  ;;  %v415_v43 = vmul.f32 %v344_v34, %v1101_v18  ;;  %v325_v27 = vmul.f32 %v316_v26, %v1098_v13 }
 0x116   : > { %v348_v35 = vmul.f32 0.5, %v347_v29  ;;  %v314_v37 = vpop.xlane.xlu1 %313 }
 0x117   : > { %v369_v38 = vsub.f32 1.5, %v368_v31  ;;  %v324_v39 = vmul.f32 %v314_v37, %v1098_v13  ;;  %v427_v18 = vmul.f32 %v1302_v45, %v415_v43 }
 0x118   : > { %v349_v40 = vsub.f32 1.5, %v348_v35 }
 0x119   : > { %v1006_v42 = vpop.eup %1005  ;;  %v332_v44 = vadd.f32 1e-05, %v324_v39  ;;  %v370_v47 = vmul.f32 %v1002_v19, %v369_v38  ;;  %v439_v0 = vadd.f32 %v1310_v57, %v427_v18 }
 0x11a   : > { %v1008_v46 = vpop.eup %1007  ;;  %v350_v48 = vmul.f32 %v1004_v21, %v349_v40  ;;  %v356_v49 = vmul.f32 %v1006_v42, %v329_v22  ;;  %vm362_vm11 = vweird.f32 %v1006_v42 }
 0x11b   : > { %v376_v50 = vmul.f32 %v1008_v46, %v1294_v23  ;;  %1009 = vrsqrt.f32 %v332_v44  ;;  %v374_v54 = vsel %vm373_vm9, %v1002_v19, %v370_v47  ;;  %vm363_vm12 = vmor %vm361_vm10, %vm362_vm11  ;;  %vm391_vm13 = vweird.f32 %v332_v44 }
 0x11c   : > { %v354_v51 = vsel %vm353_vm8, %v1004_v21, %v350_v48  ;;  %v357_v52 = vmul.f32 %v1006_v42, %v356_v49  ;;  %v418_v60 = vmul.f32 %v374_v54, %v1107_v25  ;;  %vm382_vm0 = vweird.f32 %v1008_v46 }
 0x11d   : > { %v416_v53 = vmul.f32 %v354_v51, %v1111_v28  ;;  %v377_v56 = vmul.f32 %v1008_v46, %v376_v50  ;;  %vm383_vm2 = vmor %vm381_vm15, %vm382_vm0 }
 0x11e   : > { %v358_v55 = vmul.f32 0.5, %v357_v52  ;;  %v430_v6 = vmul.f32 %v1302_v45, %v418_v60 }
 0x11f   : > { %v428_v58 = vmul.f32 %v1302_v45, %v416_v53  ;;  %v378_v63 = vmul.f32 0.5, %v377_v56 }
 0x120   : > { %v359_v59 = vsub.f32 1.5, %v358_v55 }
 0x121   : > { %v440_v28 = vadd.f32 %v1310_v57, %v428_v58  ;;  %v1010_v61 = vpop.eup %1009  ;;  %v379_v7 = vsub.f32 1.5, %v378_v63 }
 0x122   : > { %v360_v62 = vmul.f32 %v1006_v42, %v359_v59  ;;  %v386_v1 = vmul.f32 %v1010_v61, %v332_v44  ;;  %vm392_vm14 = vweird.f32 %v1010_v61 }
 0x123   : > { %v447_v3 = vpack.c.bf16 %v440_v28, %v439_v0  ;;  %v380_v12 = vmul.f32 %v1008_v46, %v379_v7  ;;  %vm393_vm1 = vmor %vm391_vm13, %vm392_vm14 }
 0x124   : > { %v364_v2 = vsel %vm363_vm12, %v1006_v42, %v360_v62  ;;  %v387_v5 = vmul.f32 %v1010_v61, %v386_v1 }
 0x125   : > { %v417_v4 = vmul.f32 %v364_v2, %v1122_v33  ;;  %619 = vmatmul.bf16.vlgmr.msra.gmra.mxu0 %v447_v3  ;;  %648 = vmatmul.bf16.vlgmr.msra.gmra.mxu1 %v447_v3  ;;  %v442_v33 = vadd.f32 %v1310_v57, %v430_v6  ;;  %v384_v17 = vsel %vm383_vm2, %v1008_v46, %v380_v12 }
 0x126   : > { %v388_v25 = vmul.f32 0.5, %v387_v5  ;;  %677 = vmatmul.bf16.vlgmr.msra.gmra.mxu2 %v447_v3  ;;  %v419_v20 = vmul.f32 %v384_v17, %v1120_v32 }
 0x127   : > { %v429_v9 = vmul.f32 %v1302_v45, %v417_v4 }
 0x128   : > { %v389_v10 = vsub.f32 1.5, %v388_v25  ;;  %v431_v30 = vmul.f32 %v1302_v45, %v419_v20 }
 0x129   : > { %v441_v11 = vadd.f32 %v1310_v57, %v429_v9 }
 0x12a   : > { %v390_v14 = vmul.f32 %v1010_v61, %v389_v10  ;;  %v443_v23 = vadd.f32 %v1310_v57, %v431_v30 }
 0x12b   : > { %v448_v15 = vpack.c.bf16 %v442_v33, %v441_v11 }
 0x12c   : > { %v394_v16 = vsel %vm393_vm1, %v1010_v61, %v390_v14 }
 0x12d   : > { %624 = vmatmul.bf16.vlgmr.msra.gmra.mxu3 %v448_v15  ;;  %v420_v19 = vmul.f32 %v394_v16, %v1135_v41  ;;  %v333_v41 = vadd.f32 1e-05, %v325_v27 }
 0x12f   : > { %v432_v21 = vmul.f32 %v1302_v45, %v420_v19  ;;  %1011 = vrsqrt.f32 %v333_v41  ;;  %vm401_vm3 = vweird.f32 %v333_v41 }
 0x131   : > { %v444_v22 = vadd.f32 %v1310_v57, %v432_v21 }
 0x133   : > { %v449_v24 = vpack.c.bf16 %v444_v22, %v443_v23 }
 0x135   : > { %653 = vmatmul.bf16.gmra.mxu1 %v448_v15  ;;  %v1012_v32 = vpop.eup %1011 }
 0x136   : > { %682 = vmatmul.bf16.gmra.mxu2 %v448_v15  ;;  %v396_v29 = vmul.f32 %v1012_v32, %v333_v41  ;;  %vm402_vm4 = vweird.f32 %v1012_v32 }
 0x137   : > { %vm403_vm5 = vmor %vm401_vm3, %vm402_vm4 }
 0x138   : > { %v397_v31 = vmul.f32 %v1012_v32, %v396_v29 }
 0x13a   : > { %v398_v38 = vmul.f32 0.5, %v397_v31 }
 0x13c   : > { %v399_v39 = vsub.f32 1.5, %v398_v38 }
 0x13d   : > { %629 = vmatmul.bf16.gmra.mxu3 %v449_v24 }
 0x13e   : > { %v400_v42 = vmul.f32 %v1012_v32, %v399_v39 }
 0x140   : > { %v404_v46 = vsel %vm403_vm5, %v1012_v32, %v400_v42 }
 0x141   : > { %v421_v49 = vmul.f32 %v404_v46, %v1126_v36 }
 0x143   : > { %v433_v52 = vmul.f32 %v1302_v45, %v421_v49 }
 0x145   : > { %658 = vmatmul.bf16.gmra.mxu1 %v449_v24  ;;  %v445_v18 = vadd.f32 %v1310_v57, %v433_v52 }
 0x146   : > { %687 = vmatmul.bf16.gmra.mxu2 %v449_v24 }
 0x180   : > { %v318_v34 = vpop.xlane.xlu0 %317 }
 0x181   : > { %v326_v35 = vmul.f32 %v318_v34, %v1098_v13 }
 0x183   : > { %v334_v37 = vadd.f32 1e-05, %v326_v35 }
 0x185   : > { %1013 = vrsqrt.f32 %v334_v37  ;;  %vm411_vm7 = vweird.f32 %v334_v37 }
 0x18b   : > { %v1014_v40 = vpop.eup %1013 }
 0x18c   : > { %v406_v43 = vmul.f32 %v1014_v40, %v334_v37  ;;  %vm412_vm6 = vweird.f32 %v1014_v40 }
 0x18d   : > { %vm413_vm8 = vmor %vm411_vm7, %vm412_vm6 }
 0x18e   : > { %v407_v44 = vmul.f32 %v1014_v40, %v406_v43 }
 0x190   : > { %v408_v47 = vmul.f32 0.5, %v407_v44 }
 0x192   : > { %v409_v48 = vsub.f32 1.5, %v408_v47 }
 0x194   : > { %v410_v50 = vmul.f32 %v1014_v40, %v409_v48 }
 0x196   : > { %v414_v13 = vsel %vm413_vm8, %v1014_v40, %v410_v50 }
 0x197   : > { %v422_v51 = vmul.f32 %v414_v13, %v1288_v8 }
 0x199   : > { %v434_v53 = vmul.f32 %v1302_v45, %v422_v51 }
 0x19b   : > { %v446_v54 = vadd.f32 %v1310_v57, %v434_v53 }
 0x19d   : > { %v450_v55 = vpack.c.bf16 %v446_v54, %v445_v18 }
 0x19f   : > { %634 = vmatmul.bf16.gmra.mxu3 %v450_v55  ;;  %663 = vmatmul.bf16.gmra.mxu1 %v450_v55 }
 0x1a0   : > { %692 = vmatmul.bf16.gmra.mxu2 %v450_v55 }
 0x1a2   : > { %v620_v36 = vpop.f32.mrf.mxu0  ;;  %v649_v8 = vpop.f32.mrf.mxu1 }
 0x1a3   : > { %v698_v45 = vpack.c.bf16 %v649_v8, %v620_v36 }
 0x1a5   : > { %714 = vst [vmem:[%s1340_s13] sm:$0xff] %v698_v45 }
 0x1a9   : > { %v678_v56 = vpop.f32.mrf.mxu2 }
 0x1aa   : > { %v699_v57 = vpack.c.bf16 %v678_v56, %v678_v56  ;;  %v622_v58 = vpop.f32.mrf.mxu0  ;;  %v651_v59 = vpop.f32.mrf.mxu1 }
 0x1ab   : > { %v700_v60 = vpack.c.bf16 %v651_v59, %v622_v58 }
 0x1ac   : > { %715 = vst [vmem:[%s1340_s13 + $0x8] sm:$0xf] %v699_v57 }
 0x1ad   : > { %716 = vst [vmem:[%s1340_s13 + $0xc] sm:$0xff] %v700_v60 }
 0x1b0   : > { %v625_v28 = vpop.f32.mrf.mxu3 }
 0x1b1   : > { %v680_v61 = vpop.f32.mrf.mxu2 }
 0x1b2   : > { %v701_v62 = vpack.c.bf16 %v680_v61, %v680_v61  ;;  %v654_v63 = vpop.f32.mrf.mxu1 }
 0x1b3   : > { %v702_v0 = vpack.c.bf16 %v654_v63, %v625_v28 }
 0x1b4   : > { %717 = vst [vmem:[%s1340_s13 + $0x14] sm:$0xf] %v701_v62 }
 0x1b5   : > { %718 = vst [vmem:[%s1340_s13 + $0x18] sm:$0xff] %v702_v0 }
 0x1b8   : > { %v627_v1 = vpop.f32.mrf.mxu3 }
 0x1b9   : > { %v683_v2 = vpop.f32.mrf.mxu2 }
 0x1ba   : > { %v703_v3 = vpack.c.bf16 %v683_v2, %v683_v2  ;;  %v656_v4 = vpop.f32.mrf.mxu1 }
 0x1bb   : > { %v704_v5 = vpack.c.bf16 %v656_v4, %v627_v1 }
 0x1bc   : > { %719 = vst [vmem:[%s1340_s13 + $0x20] sm:$0xf] %v703_v3 }
 0x1bd   : > { %720 = vst [vmem:[%s1340_s13 + $0x24] sm:$0xff] %v704_v5 }
 0x1c0   : > { %v630_v6 = vpop.f32.mrf.mxu3 }
 0x1c1   : > { %v685_v7 = vpop.f32.mrf.mxu2 }
 0x1c2   : > { %v705_v25 = vpack.c.bf16 %v685_v7, %v685_v7  ;;  %v659_v9 = vpop.f32.mrf.mxu1 }
 0x1c3   : > { %v706_v10 = vpack.c.bf16 %v659_v9, %v630_v6 }
 0x1c4   : > { %721 = vst [vmem:[%s1340_s13 + $0x2c] sm:$0xf] %v705_v25 }
 0x1c5   : > { %722 = vst [vmem:[%s1340_s13 + $0x30] sm:$0xff] %v706_v10 }
 0x1c8   : > { %v632_v33 = vpop.f32.mrf.mxu3 }
 0x1c9   : > { %v688_v11 = vpop.f32.mrf.mxu2 }
 0x1ca   : > { %v707_v12 = vpack.c.bf16 %v688_v11, %v688_v11  ;;  %v661_v14 = vpop.f32.mrf.mxu1 }
 0x1cb   : > { %v708_v15 = vpack.c.bf16 %v661_v14, %v632_v33 }
 0x1cc   : > { %723 = vst [vmem:[%s1340_s13 + $0x38] sm:$0xf] %v707_v12 }
 0x1cd   : > { %724 = vst [vmem:[%s1340_s13 + $0x3c] sm:$0xff] %v708_v15 }
 0x1d1   : > { %v690_v16 = vpop.f32.mrf.mxu2 }
 0x1d2   : > { %v709_v17 = vpack.c.bf16 %v690_v16, %v690_v16 }
 0x1d4   : > { %725 = vst [vmem:[%s1340_s13 + $0x44] sm:$0xf] %v709_v17 }
 0x21c   : > { %v664_v19 = vpop.f32.mrf.mxu1 }
 0x222   : > { %v635_v20 = vpop.f32.mrf.mxu3 }
 0x223   : > { %v710_v21 = vpack.c.bf16 %v664_v19, %v635_v20  ;;  %v693_v30 = vpop.f32.mrf.mxu2 }
 0x224   : > { %v711_v22 = vpack.c.bf16 %v693_v30, %v693_v30  ;;  %v666_v23 = vpop.f32.mrf.mxu1 }
 0x225   : > { %726 = vst [vmem:[%s1340_s13 + $0x48] sm:$0xff] %v710_v21 }
 0x226   : > { %727 = vst [vmem:[%s1340_s13 + $0x50] sm:$0xf] %v711_v22 }
 0x22a   : > { %v637_v24 = vpop.f32.mrf.mxu3 }
 0x22b   : > { %v712_v26 = vpack.c.bf16 %v666_v23, %v637_v24  ;;  %v695_v27 = vpop.f32.mrf.mxu2 }
 0x22c   : > { %v713_v41 = vpack.c.bf16 %v695_v27, %v695_v27 }
 0x22d   : > { %728 = vst [vmem:[%s1340_s13 + $0x54] sm:$0xff] %v712_v26 }
 0x22e   : > { %729 = vst [vmem:[%s1340_s13 + $0x5c] sm:$0xf] %v713_v41 }
 0x22f PF: > { %s14_s17 = sadd.s32 1, %s1037_s17   ;;  %s1372_s15 = smov %s1033_s16 }
 0x230   : > { %p11_p5 = scmp.ge.s32.totalorder %s14_s17, 4   ;;  %s1373_s16 = smov %s1375_s18 }
 0x232   :  { %13 = sbr.rel (!%p11_p5) target bundleno = 2 (0x2), region = 69 }

// kernel: transformer_unit_forward.14
= control target key start
LH: loop header
LB: loop body
LE: loop exit
PB: predicated region body
PF: predicated region fallthrough
CT: control target
= control target key end

     0   :  { %s728_s15 = smov 0   ;;  %s730_s16 = smov 0   ;;  %s818_s0 = inlined_call_operand.vmem [shape: bf16[128,128], index: 0, kind: input, shape index: {}]   ;;  %s819_s1 = inlined_call_operand.vmem [shape: bf16[128,128], index: 1, kind: input, shape index: {}]   ;;  %s820_s2 = inlined_call_operand.vmem [shape: f32[1,128], index: 2, kind: input, shape index: {}]   ;;  %s821_s3 = inlined_call_operand.vmem [shape: f32[128,128], index: 3, kind: input, shape index: {}]   ;;  %s822_s4 = inlined_call_operand.vmem [shape: f32[128,128], index: 4, kind: output, shape index: {}]  }
   0x1   :  { %s732_s17 = smov 0  }
   0x2 LB: > { %s26_s18 = sadd.s32 1, %s697_s16  ;;  %p561_p0 = scmp.ge.s32.totalorder %s701_s17, 1  ;;  %s701_s17 = sphi %s732_s17, %s14_s17   ;;  %s697_s16 = sphi %s730_s16, %s824_s16   ;;  %s693_s15 = sphi %s728_s15, %s823_s15  }
   0x3   : > { %p28_p1 = scmp.ge.s32.totalorder %s26_s18, 2  ;;  %p210_p2 = scmp.lt.s32.totalorder %s701_s17, 3 }
   0x5   : > { %s826_s18 = smov (%p28_p1, %s26_s18), 0  ;;  %p211_p3 = pnand %p561_p0, %p210_p2 }
   0x6   : > { %s562_s27 = sshll.u32 (!%p211_p3), %s693_s15, 3 }
   0x7   : > { %214 = sbr.rel (%p211_p3) target bundleno = 191 (0xbf), region = 36  ;;  %p255_p4 = scmp.lt.s32.totalorder (!%p211_p3), %s562_s27, 15 }
   0xc   : > { %v629_v0 = vld [vmem:[%s819_s1 + $0x38] sm:$0xff]  ;;  %v628_v1 = vld [vmem:[%s819_s1 + $0x30] sm:$0xff]  ;;  %v627_v2 = vld [vmem:[%s819_s1 + $0x28] sm:$0xff]  ;;  %s828_s27 = smov (!%p255_p4, %s562_s27), 15 }
   0xd   : > { %385 = vmatpush.bf16.msra.mxu0 %v629_v0  ;;  %630 = vmatpush.bf16.msra.mxu1 %v629_v0  ;;  %v626_v3 = vld [vmem:[%s819_s1 + $0x20] sm:$0xff]  ;;  %v625_v4 = vld [vmem:[%s819_s1 + $0x18] sm:$0xff]  ;;  %v624_v5 = vld [vmem:[%s819_s1 + $0x10] sm:$0xff]  ;;  %s563_s8 = sshll.u32 %s828_s27, 2  ;;  %s565_s14 = sshll.u32 %s828_s27, 3 }
   0xe   : > { %631 = vmatpush.bf16.msra.mxu2 %v629_v0  ;;  %632 = vmatpush.bf16.msra.mxu3 %v629_v0  ;;  %v623_v6 = vld [vmem:[%s819_s1 + $0x8] sm:$0xff]  ;;  %v622_v7 = vld [vmem:[%s819_s1] sm:$0xff]  ;;  %s258_s13 = scalar_lea.vmem %s818_s0, %s563_s8  ;;  %s783_s20 = scalar_lea.vmem %s821_s3, %s565_s14 }
   0xf   : > { %v618_v8 = vld [vmem:[%s258_s13] sm:$0xff]  ;;  %v619_v9 = vld [vmem:[%s258_s13 + $0x8] sm:$0xff]  ;;  %v620_v10 = vld [vmem:[%s258_s13 + $0x10] sm:$0xff]  ;;  %s793_s25 = scalar_lea.vmem %s822_s4, %s565_s14 }
  0x10   : > { %v621_v11 = vld [vmem:[%s258_s13 + $0x18] sm:$0xff]  ;;  %v678_v12 = vld [vmem:[%s820_s2] ss:$0 sm:$0xff]  ;;  %v416_v16 = vld [vmem:[%s783_s20 + $0x10] sm:$0xff] }
  0x11   : > { %386 = vmatpush.bf16.msra.mxu0 %v628_v1  ;;  %633 = vmatpush.bf16.msra.mxu1 %v628_v1  ;;  %v414_v14 = vld [vmem:[%s783_s20] sm:$0xff]  ;;  %v420_v24 = vld [vmem:[%s783_s20 + $0x30] sm:$0xff]  ;;  %v415_v28 = vld [vmem:[%s783_s20 + $0x8] sm:$0xff] }
  0x12   : > { %634 = vmatpush.bf16.msra.mxu2 %v628_v1  ;;  %635 = vmatpush.bf16.msra.mxu3 %v628_v1  ;;  %v418_v22 = vld [vmem:[%s783_s20 + $0x20] sm:$0xff]  ;;  %v417_v30 = vld [vmem:[%s783_s20 + $0x18] sm:$0xff]  ;;  %v419_v38 = vld [vmem:[%s783_s20 + $0x28] sm:$0xff] }
  0x13   : > { %v421_v40 = vld [vmem:[%s783_s20 + $0x38] sm:$0xff] }
  0x15   : > { %387 = vmatpush.bf16.msra.mxu0 %v627_v2  ;;  %636 = vmatpush.bf16.msra.mxu1 %v627_v2 }
  0x16   : > { %637 = vmatpush.bf16.msra.mxu2 %v627_v2  ;;  %638 = vmatpush.bf16.msra.mxu3 %v627_v2 }
  0x19   : > { %388 = vmatpush.bf16.msra.mxu0 %v626_v3  ;;  %639 = vmatpush.bf16.msra.mxu1 %v626_v3 }
  0x1a   : > { %640 = vmatpush.bf16.msra.mxu2 %v626_v3  ;;  %641 = vmatpush.bf16.msra.mxu3 %v626_v3 }
  0x1d   : > { %389 = vmatpush.bf16.msra.mxu0 %v625_v4  ;;  %642 = vmatpush.bf16.msra.mxu1 %v625_v4 }
  0x1e   : > { %643 = vmatpush.bf16.msra.mxu2 %v625_v4  ;;  %644 = vmatpush.bf16.msra.mxu3 %v625_v4 }
  0x21   : > { %390 = vmatpush.bf16.msra.mxu0 %v624_v5  ;;  %645 = vmatpush.bf16.msra.mxu1 %v624_v5 }
  0x22   : > { %646 = vmatpush.bf16.msra.mxu2 %v624_v5  ;;  %647 = vmatpush.bf16.msra.mxu3 %v624_v5 }
  0x25   : > { %391 = vmatpush.bf16.msra.mxu0 %v623_v6  ;;  %648 = vmatpush.bf16.msra.mxu1 %v623_v6 }
  0x26   : > { %649 = vmatpush.bf16.msra.mxu2 %v623_v6  ;;  %650 = vmatpush.bf16.msra.mxu3 %v623_v6 }
  0x29   : > { %392 = vmatpush.bf16.msra.mxu0 %v622_v7  ;;  %651 = vmatpush.bf16.msra.mxu1 %v622_v7 }
  0x2a   : > { %652 = vmatpush.bf16.msra.mxu2 %v622_v7  ;;  %653 = vmatpush.bf16.msra.mxu3 %v622_v7 }
  0x2c   : > { %393 = vmatmul.bf16.vlgmr.msra.gmra.mxu0 %v618_v8  ;;  %398 = vmatmul.bf16.vlgmr.msra.gmra.mxu1 %v619_v9 }
  0x2d   : > { %403 = vmatmul.bf16.vlgmr.msra.gmra.mxu2 %v620_v10  ;;  %408 = vmatmul.bf16.vlgmr.msra.gmra.mxu3 %v621_v11 }
  0xa9   : > { %v394_v13 = vpop.f32.mrf.mxu0  ;;  %v399_v15 = vpop.f32.mrf.mxu1 }
  0xaa   : > { %v395_v17 = vadd.f32 %v678_v12, %v394_v13  ;;  %v400_v18 = vadd.f32 %v678_v12, %v399_v15 }
  0xac   : > { %v422_v19 = vadd.f32 %v414_v14, %v395_v17  ;;  %v424_v20 = vadd.f32 %v416_v16, %v400_v18 }
  0xae   : > { %430 = vst [vmem:[%s793_s25] sm:$0xff] %v422_v19 }
  0xaf   : > { %432 = vst [vmem:[%s793_s25 + $0x10] sm:$0xff] %v424_v20 }
  0xb0   : > { %v404_v21 = vpop.f32.mrf.mxu2  ;;  %v409_v23 = vpop.f32.mrf.mxu3 }
  0xb1   : > { %v405_v25 = vadd.f32 %v678_v12, %v404_v21  ;;  %v410_v26 = vadd.f32 %v678_v12, %v409_v23  ;;  %v396_v27 = vpop.f32.mrf.mxu0  ;;  %v401_v29 = vpop.f32.mrf.mxu1 }
  0xb2   : > { %v397_v31 = vadd.f32 %v678_v12, %v396_v27  ;;  %v402_v32 = vadd.f32 %v678_v12, %v401_v29 }
  0xb3   : > { %v426_v33 = vadd.f32 %v418_v22, %v405_v25  ;;  %v428_v34 = vadd.f32 %v420_v24, %v410_v26 }
  0xb4   : > { %v423_v35 = vadd.f32 %v415_v28, %v397_v31  ;;  %v425_v36 = vadd.f32 %v417_v30, %v402_v32 }
  0xb5   : > { %434 = vst [vmem:[%s793_s25 + $0x20] sm:$0xff] %v426_v33 }
  0xb6   : > { %436 = vst [vmem:[%s793_s25 + $0x30] sm:$0xff] %v428_v34 }
  0xb7   : > { %431 = vst [vmem:[%s793_s25 + $0x8] sm:$0xff] %v423_v35 }
  0xb8   : > { %433 = vst [vmem:[%s793_s25 + $0x18] sm:$0xff] %v425_v36  ;;  %v406_v37 = vpop.f32.mrf.mxu2  ;;  %v411_v39 = vpop.f32.mrf.mxu3 }
  0xb9   : > { %v407_v41 = vadd.f32 %v678_v12, %v406_v37  ;;  %v412_v42 = vadd.f32 %v678_v12, %v411_v39 }
  0xbb   : > { %v427_v43 = vadd.f32 %v419_v38, %v407_v41  ;;  %v429_v44 = vadd.f32 %v421_v40, %v412_v42 }
  0xbd   : > { %435 = vst [vmem:[%s793_s25 + $0x28] sm:$0xff] %v427_v43 }
  0xbe   : > { %437 = vst [vmem:[%s793_s25 + $0x38] sm:$0xff] %v429_v44 }
  0xbf PF: > { %s14_s17 = sadd.s32 1, %s701_s17   ;;  %s823_s15 = smov %s697_s16 }
  0xc0   : > { %p11_p5 = scmp.ge.s32.totalorder %s14_s17, 4   ;;  %s824_s16 = smov %s826_s18 }
  0xc2   :  { %13 = sbr.rel (!%p11_p5) target bundleno = 2 (0x2), region = 75 }

// kernel: transformer_unit_forward.16
= control target key start
LH: loop header
LB: loop body
LE: loop exit
PB: predicated region body
PF: predicated region fallthrough
CT: control target
= control target key end

     0   :  { %s894_s15 = smov 0   ;;  %s896_s16 = smov 0   ;;  %s1027_s0 = inlined_call_operand.vmem [shape: bf16[128,256], index: 0, kind: input, shape index: {}]   ;;  %s1028_s1 = inlined_call_operand.vmem [shape: bf16[256,128], index: 1, kind: input, shape index: {}]   ;;  %s1029_s2 = inlined_call_operand.vmem [shape: f32[1,128], index: 2, kind: input, shape index: {}]   ;;  %s1030_s3 = inlined_call_operand.vmem [shape: f32[128,128], index: 3, kind: input, shape index: {}]   ;;  %s1031_s4 = inlined_call_operand.vmem [shape: f32[128,128], index: 4, kind: output, shape index: {}]  }
   0x1   :  { %s898_s17 = smov 0  }
   0x2 LB: > { %s26_s18 = sadd.s32 1, %s863_s16  ;;  %p673_p0 = scmp.ge.s32.totalorder %s867_s17, 1  ;;  %s867_s17 = sphi %s898_s17, %s14_s17   ;;  %s863_s16 = sphi %s896_s16, %s1033_s16   ;;  %s859_s15 = sphi %s894_s15, %s1032_s15  }
   0x3   : > { %p28_p1 = scmp.ge.s32.totalorder %s26_s18, 2  ;;  %p211_p2 = scmp.lt.s32.totalorder %s867_s17, 3 }
   0x5   : > { %s1035_s18 = smov (%p28_p1, %s26_s18), 0  ;;  %p212_p3 = pnand %p673_p0, %p211_p2 }
   0x6   : > { %s674_s5 = sshll.u32 (!%p212_p3), %s859_s15, 3 }
   0x7   : > { %215 = sbr.rel (%p212_p3) target bundleno = 207 (0xcf), region = 36  ;;  %p257_p4 = scmp.lt.s32.totalorder (!%p212_p3), %s674_s5, 15 }
   0xc   : > { %v795_v0 = vld [vmem:[%s1028_s1 + $0x38] sm:$0xff]  ;;  %v794_v2 = vld [vmem:[%s1028_s1 + $0x30] sm:$0xff]  ;;  %v793_v4 = vld [vmem:[%s1028_s1 + $0x28] sm:$0xff]  ;;  %s1037_s5 = smov (!%p257_p4, %s674_s5), 15 }
   0xd   : > { %v803_v1 = vld [vmem:[%s1028_s1 + $0x78] sm:$0xff]  ;;  %468 = vmatpush.bf16.msra.mxu0 %v795_v0  ;;  %804 = vmatpush.bf16.msra.mxu2 %v795_v0  ;;  %v802_v3 = vld [vmem:[%s1028_s1 + $0x70] sm:$0xff]  ;;  %v801_v5 = vld [vmem:[%s1028_s1 + $0x68] sm:$0xff]  ;;  %s951_s21 = sshll.u32 %s1037_s5, 3 }
   0xe   : > { %497 = vmatpush.bf16.msra.mxu1 %v803_v1  ;;  %812 = vmatpush.bf16.msra.mxu3 %v803_v1  ;;  %v792_v6 = vld [vmem:[%s1028_s1 + $0x20] sm:$0xff]  ;;  %v791_v8 = vld [vmem:[%s1028_s1 + $0x18] sm:$0xff]  ;;  %v790_v10 = vld [vmem:[%s1028_s1 + $0x10] sm:$0xff]  ;;  %s960_s26 = scalar_lea.vmem %s1027_s0, %s951_s21  ;;  %s994_s11 = scalar_lea.vmem %s1030_s3, %s951_s21 }
   0xf   : > { %v800_v7 = vld [vmem:[%s1028_s1 + $0x60] sm:$0xff]  ;;  %v799_v9 = vld [vmem:[%s1028_s1 + $0x58] sm:$0xff]  ;;  %v798_v11 = vld [vmem:[%s1028_s1 + $0x50] sm:$0xff]  ;;  %s1001_s14 = scalar_lea.vmem %s1031_s4, %s951_s21 }
  0x10   : > { %v789_v12 = vld [vmem:[%s1028_s1 + $0x8] sm:$0xff]  ;;  %v788_v14 = vld [vmem:[%s1028_s1] sm:$0xff]  ;;  %v691_v28 = vld [vmem:[%s960_s26 + $0x10] sm:$0xf] }
  0x11   : > { %469 = vmatpush.bf16.msra.mxu0 %v794_v2  ;;  %805 = vmatpush.bf16.msra.mxu2 %v794_v2  ;;  %v797_v13 = vld [vmem:[%s1028_s1 + $0x48] sm:$0xff]  ;;  %v796_v15 = vld [vmem:[%s1028_s1 + $0x40] sm:$0xff]  ;;  %v783_v29 = vld [vmem:[%s960_s26 + $0x14] sm:$0xf0] }
  0x12   : > { %498 = vmatpush.bf16.msra.mxu1 %v802_v3  ;;  %813 = vmatpush.bf16.msra.mxu3 %v802_v3  ;;  %v683_v16 = vld [vmem:[%s960_s26] sm:$0xf]  ;;  %v781_v17 = vld [vmem:[%s960_s26 + $0x4] sm:$0xf0]  ;;  %v780_v20 = vld [vmem:[%s960_s26 + $0x4] sm:$0xf]  ;;  %v692_v36 = vor.u32 %v783_v29, %v691_v28 }
  0x13   : > { %v699_v18 = vld [vmem:[%s960_s26 + $0x20] sm:$0xf]  ;;  %v785_v19 = vld [vmem:[%s960_s26 + $0x24] sm:$0xf0]  ;;  %v685_v21 = vld [vmem:[%s960_s26 + $0x8] sm:$0xf0]  ;;  %v684_v24 = vor.u32 %v781_v17, %v683_v16 }
  0x14   : > { %v784_v22 = vld [vmem:[%s960_s26 + $0x24] sm:$0xf]  ;;  %v701_v23 = vld [vmem:[%s960_s26 + $0x28] sm:$0xf0]  ;;  %v700_v25 = vor.u32 %v785_v19, %v699_v18  ;;  %v688_v26 = vor.u32 %v780_v20, %v685_v21  ;;  %v707_v30 = vld [vmem:[%s960_s26 + $0x30] sm:$0xf] }
  0x15   : > { %470 = vmatpush.bf16.msra.mxu0 %v793_v4  ;;  %806 = vmatpush.bf16.msra.mxu2 %v793_v4  ;;  %v704_v27 = vor.u32 %v784_v22, %v701_v23  ;;  %v787_v31 = vld [vmem:[%s960_s26 + $0x34] sm:$0xf0]  ;;  %v782_v32 = vld [vmem:[%s960_s26 + $0x14] sm:$0xf]  ;;  %v693_v33 = vld [vmem:[%s960_s26 + $0x18] sm:$0xf0] }
  0x16   : > { %499 = vmatpush.bf16.msra.mxu1 %v801_v5  ;;  %814 = vmatpush.bf16.msra.mxu3 %v801_v5  ;;  %v786_v34 = vld [vmem:[%s960_s26 + $0x34] sm:$0xf]  ;;  %v709_v35 = vld [vmem:[%s960_s26 + $0x38] sm:$0xf0]  ;;  %v708_v37 = vor.u32 %v787_v31, %v707_v30  ;;  %v696_v38 = vor.u32 %v782_v32, %v693_v33  ;;  %v844_v40 = vld [vmem:[%s1029_s2] ss:$0 sm:$0xff] }
  0x17   : > { %v712_v39 = vor.u32 %v786_v34, %v709_v35  ;;  %v526_v44 = vld [vmem:[%s994_s11] sm:$0xff]  ;;  %v527_v55 = vld [vmem:[%s994_s11 + $0x8] sm:$0xff]  ;;  %v528_v3 = vld [vmem:[%s994_s11 + $0x10] sm:$0xff] }
  0x18   : > { %v530_v50 = vld [vmem:[%s994_s11 + $0x20] sm:$0xff]  ;;  %v531_v62 = vld [vmem:[%s994_s11 + $0x28] sm:$0xff]  ;;  %v533_v22 = vld [vmem:[%s994_s11 + $0x38] sm:$0xff] }
  0x19   : > { %471 = vmatpush.bf16.msra.mxu0 %v792_v6  ;;  %807 = vmatpush.bf16.msra.mxu2 %v792_v6 }
  0x1a   : > { %500 = vmatpush.bf16.msra.mxu1 %v800_v7  ;;  %815 = vmatpush.bf16.msra.mxu3 %v800_v7 }
  0x1d   : > { %472 = vmatpush.bf16.msra.mxu0 %v791_v8  ;;  %808 = vmatpush.bf16.msra.mxu2 %v791_v8 }
  0x1e   : > { %501 = vmatpush.bf16.msra.mxu1 %v799_v9  ;;  %816 = vmatpush.bf16.msra.mxu3 %v799_v9 }
  0x21   : > { %473 = vmatpush.bf16.msra.mxu0 %v790_v10  ;;  %809 = vmatpush.bf16.msra.mxu2 %v790_v10  ;;  %v532_v10 = vld [vmem:[%s994_s11 + $0x30] sm:$0xff] }
  0x22   : > { %502 = vmatpush.bf16.msra.mxu1 %v798_v11  ;;  %817 = vmatpush.bf16.msra.mxu3 %v798_v11 }
  0x25   : > { %474 = vmatpush.bf16.msra.mxu0 %v789_v12  ;;  %810 = vmatpush.bf16.msra.mxu2 %v789_v12 }
  0x26   : > { %503 = vmatpush.bf16.msra.mxu1 %v797_v13  ;;  %818 = vmatpush.bf16.msra.mxu3 %v797_v13 }
  0x29   : > { %475 = vmatpush.bf16.msra.mxu0 %v788_v14  ;;  %811 = vmatpush.bf16.msra.mxu2 %v788_v14 }
  0x2a   : > { %504 = vmatpush.bf16.msra.mxu1 %v796_v15  ;;  %819 = vmatpush.bf16.msra.mxu3 %v796_v15  ;;  %v529_v15 = vld [vmem:[%s994_s11 + $0x18] sm:$0xff] }
  0x2c   : > { %476 = vmatmul.bf16.vlgmr.msra.gmra.mxu0 %v684_v24  ;;  %486 = vmatmul.bf16.vlgmr.msra.gmra.mxu2 %v700_v25 }
  0x2d   : > { %505 = vmatmul.bf16.vlgmr.msra.gmra.mxu1 %v688_v26  ;;  %515 = vmatmul.bf16.vlgmr.msra.gmra.mxu3 %v704_v27 }
  0x3c   : > { %481 = vmatmul.bf16.gmra.mxu0 %v692_v36  ;;  %491 = vmatmul.bf16.gmra.mxu2 %v708_v37 }
  0x3d   : > { %510 = vmatmul.bf16.gmra.mxu1 %v696_v38  ;;  %520 = vmatmul.bf16.gmra.mxu3 %v712_v39 }
  0xa9   : > { %v477_v41 = vpop.f32.mrf.mxu0 }
  0xaa   : > { %v478_v42 = vadd.f32 %v844_v40, %v477_v41  ;;  %v506_v43 = vpop.f32.mrf.mxu1 }
  0xac   : > { %v507_v45 = vadd.f32 %v506_v43, %v478_v42 }
  0xae   : > { %v534_v46 = vadd.f32 %v526_v44, %v507_v45 }
  0xaf   : > { %v487_v47 = vpop.f32.mrf.mxu2 }
  0xb0   : > { %542 = vst [vmem:[%s1001_s14] sm:$0xff] %v534_v46  ;;  %v488_v48 = vadd.f32 %v844_v40, %v487_v47  ;;  %v516_v49 = vpop.f32.mrf.mxu3 }
  0xb1   : > { %v479_v51 = vpop.f32.mrf.mxu0 }
  0xb2   : > { %v517_v52 = vadd.f32 %v516_v49, %v488_v48  ;;  %v480_v53 = vadd.f32 %v844_v40, %v479_v51  ;;  %v508_v54 = vpop.f32.mrf.mxu1 }
  0xb4   : > { %v538_v56 = vadd.f32 %v530_v50, %v517_v52  ;;  %v509_v57 = vadd.f32 %v508_v54, %v480_v53 }
  0xb6   : > { %546 = vst [vmem:[%s1001_s14 + $0x20] sm:$0xff] %v538_v56  ;;  %v535_v58 = vadd.f32 %v527_v55, %v509_v57 }
  0xb7   : > { %v489_v59 = vpop.f32.mrf.mxu2 }
  0xb8   : > { %543 = vst [vmem:[%s1001_s14 + $0x8] sm:$0xff] %v535_v58  ;;  %v490_v60 = vadd.f32 %v844_v40, %v489_v59  ;;  %v518_v61 = vpop.f32.mrf.mxu3 }
  0xb9   : > { %v482_v63 = vpop.f32.mrf.mxu0 }
  0xba   : > { %v519_v0 = vadd.f32 %v518_v61, %v490_v60  ;;  %v483_v1 = vadd.f32 %v844_v40, %v482_v63  ;;  %v511_v2 = vpop.f32.mrf.mxu1 }
  0xbc   : > { %v539_v4 = vadd.f32 %v531_v62, %v519_v0  ;;  %v512_v5 = vadd.f32 %v511_v2, %v483_v1 }
  0xbe   : > { %547 = vst [vmem:[%s1001_s14 + $0x28] sm:$0xff] %v539_v4  ;;  %v536_v6 = vadd.f32 %v528_v3, %v512_v5 }
  0xbf   : > { %v492_v7 = vpop.f32.mrf.mxu2 }
  0xc0   : > { %544 = vst [vmem:[%s1001_s14 + $0x10] sm:$0xff] %v536_v6  ;;  %v493_v8 = vadd.f32 %v844_v40, %v492_v7  ;;  %v521_v9 = vpop.f32.mrf.mxu3 }
  0xc1   : > { %v484_v11 = vpop.f32.mrf.mxu0 }
  0xc2   : > { %v522_v12 = vadd.f32 %v521_v9, %v493_v8  ;;  %v485_v13 = vadd.f32 %v844_v40, %v484_v11  ;;  %v513_v14 = vpop.f32.mrf.mxu1 }
  0xc4   : > { %v540_v16 = vadd.f32 %v532_v10, %v522_v12  ;;  %v514_v17 = vadd.f32 %v513_v14, %v485_v13 }
  0xc6   : > { %548 = vst [vmem:[%s1001_s14 + $0x30] sm:$0xff] %v540_v16  ;;  %v537_v18 = vadd.f32 %v529_v15, %v514_v17 }
  0xc7   : > { %v494_v19 = vpop.f32.mrf.mxu2 }
  0xc8   : > { %545 = vst [vmem:[%s1001_s14 + $0x18] sm:$0xff] %v537_v18  ;;  %v495_v20 = vadd.f32 %v844_v40, %v494_v19  ;;  %v523_v21 = vpop.f32.mrf.mxu3 }
  0xca   : > { %v524_v23 = vadd.f32 %v523_v21, %v495_v20 }
  0xcc   : > { %v541_v24 = vadd.f32 %v533_v22, %v524_v23 }
  0xce   : > { %549 = vst [vmem:[%s1001_s14 + $0x38] sm:$0xff] %v541_v24 }
  0xcf PF: > { %s14_s17 = sadd.s32 1, %s867_s17   ;;  %s1032_s15 = smov %s863_s16 }
  0xd0   : > { %p11_p5 = scmp.ge.s32.totalorder %s14_s17, 4   ;;  %s1033_s16 = smov %s1035_s18 }
  0xd2   :  { %13 = sbr.rel (!%p11_p5) target bundleno = 2 (0x2), region = 75 }

// kernel: transformer_unit_forward.21
= control target key start
LH: loop header
LB: loop body
LE: loop exit
PB: predicated region body
PF: predicated region fallthrough
CT: control target
= control target key end

     0   :  { %9 = vsyncpa [#allocation3], 0  ;;  %s1194_s0 = inlined_call_operand.vmem [shape: bf16[128,256], index: 0, kind: input, shape index: {}]   ;;  %s1195_s1 = inlined_call_operand.vmem [shape: bf16[256,128], index: 1, kind: input, shape index: {}]   ;;  %s1196_s2 = inlined_call_operand.vmem [shape: f32[1,128], index: 2, kind: input, shape index: {}]   ;;  %s1197_s3 = inlined_call_operand.vmem [shape: f32[128,128], index: 3, kind: input, shape index: {}]   ;;  %s1198_s4 = inlined_call_operand.hbm [shape: f32[128,128], index: 4, kind: output, shape index: {}]  }
   0x1   :  { %11 = vsyncpa [#allocation3 + $0x1], 0  ;;  %s994_s15 = smov 0   ;;  %s996_s16 = smov 0  }
   0x2   :  { %s998_s17 = smov 0   ;;  %s1000_s18 = smov 0  }
   0x3   :  { %s1002_s19 = smov 0   ;;  %s1004_s20 = smov 0  }
   0x4 LB: > { %s673_s21 = sadd.s32 4294967295, %s965_s20   ;;  %s674_s22 = sadd.s32 4294967294, %s965_s20   ;;  %s965_s20 = sphi %s1004_s20, %s17_s20   ;;  %s961_s19 = sphi %s1002_s19, %s1205_s19   ;;  %s957_s18 = sphi %s1000_s18, %s1204_s18   ;;  %s953_s17 = sphi %s998_s17, %s1203_s17   ;;  %s949_s16 = sphi %s996_s16, %s1202_s16   ;;  %s945_s15 = sphi %s994_s15, %s1201_s15  }
   0x5   : > { %s29_s23 = sadd.s32 1, %s961_s19  ;;  %s144_s24 = sadd.s32 1, %s953_s17 }
   0x6   : > { %p31_p0 = scmp.ge.s32.totalorder %s29_s23, 2  ;;  %p154_p1 = scmp.ne.s32.totalorder %s953_s17, %s949_s16 }
   0x7   : > { %p155_p2 = scmp.eq.s32.totalorder %s673_s21, 1  ;;  %p160_p3 = scmp.ne.s32.totalorder %s949_s16, %s945_s15 }
   0x8   : > { %s1207_s23 = smov (%p31_p0, %s29_s23), 0  ;;  %p161_p5 = scmp.eq.s32.totalorder %s674_s22, 1 }
   0x9   : > { %p1034_p4 = por %p155_p2, %p154_p1  ;;  %s139_s26 = ssub.s32 %s961_s19, %s1207_s23 }
   0xa   : > { %p679_p6 = scmp.ge.s32.totalorder %s965_s20, 1  ;;  %p142_p7 = scmp.eq.s32.totalorder %s139_s26, 0 }
   0xb   : > { %p1041_p8 = por %p161_p5, %p160_p3  ;;  %p214_p9 = scmp.lt.s32.totalorder %s965_s20, 3 }
   0xc   : > { %s1047_s28 = scalar_select %p142_p7, %s953_s17, %s144_s24  }
   0xd   : > { %p215_p10 = pnand %p679_p6, %p214_p9 }
   0xe   : > { %s681_s21 = sshll.u32 (!%p215_p10), %s957_s18, 3  ;;  %s253_s11 = sand.u32 (!%p215_p10), 1, %s949_s16  }
   0xf   : > { %218 = sbr.rel (%p215_p10) target bundleno = 218 (0xda), region = 36  ;;  %p257_p11 = scmp.lt.s32.totalorder (!%p215_p10), %s681_s21, 15 }
  0x10   : > { %s680_s24 = sshll.u32 (!%p215_p10), %s253_s11, 6  ;;  %s907_s13 = scalar_lea.hbm (!%p215_p10), %s1198_s4, 128 }
  0x14   : > { %v803_v0 = vld [vmem:[%s1195_s1 + $0x38] sm:$0xff]  ;;  %v802_v2 = vld [vmem:[%s1195_s1 + $0x30] sm:$0xff]  ;;  %v801_v4 = vld [vmem:[%s1195_s1 + $0x28] sm:$0xff]  ;;  %s1209_s21 = smov (!%p257_p11, %s681_s21), 15 }
  0x15   : > { %v811_v1 = vld [vmem:[%s1195_s1 + $0x78] sm:$0xff]  ;;  %460 = vmatpush.bf16.msra.mxu0 %v803_v0  ;;  %813 = vmatpush.bf16.msra.mxu2 %v803_v0  ;;  %v810_v3 = vld [vmem:[%s1195_s1 + $0x70] sm:$0xff]  ;;  %v809_v5 = vld [vmem:[%s1195_s1 + $0x68] sm:$0xff]  ;;  %s787_s12 = sshll.u32 %s1209_s21, 3  ;;  %s812_s21 = sshll.u32 %s957_s18, 6 }
  0x16   : > { %489 = vmatpush.bf16.msra.mxu1 %v811_v1  ;;  %821 = vmatpush.bf16.msra.mxu3 %v811_v1  ;;  %v800_v6 = vld [vmem:[%s1195_s1 + $0x20] sm:$0xff]  ;;  %v799_v8 = vld [vmem:[%s1195_s1 + $0x18] sm:$0xff]  ;;  %v798_v10 = vld [vmem:[%s1195_s1 + $0x10] sm:$0xff]  ;;  %s1097_s26 = scalar_lea.vmem %s1194_s0, %s787_s12  ;;  %s1133_s22 = scalar_lea.vmem %s1197_s3, %s787_s12 }
  0x17   : > { %v808_v7 = vld [vmem:[%s1195_s1 + $0x60] sm:$0xff]  ;;  %v807_v9 = vld [vmem:[%s1195_s1 + $0x58] sm:$0xff]  ;;  %v806_v11 = vld [vmem:[%s1195_s1 + $0x50] sm:$0xff]  ;;  %s555_s30 = scalar_lea.hbm %s1198_s4, %s812_s21  ;;  %s543_s18 = scalar_lea.sflag [#allocation3], %s253_s11 }
  0x18   : > { %v797_v12 = vld [vmem:[%s1195_s1 + $0x8] sm:$0xff]  ;;  %v796_v14 = vld [vmem:[%s1195_s1] sm:$0xff]  ;;  %v696_v28 = vld [vmem:[%s1097_s26 + $0x10] sm:$0xf]  ;;  %s558_s6 = sshll.u32 %s555_s30, 4  ;;  %s559_s6 = int_to_ptr.hbm [resolvable:$true] %s558_s6 }
  0x19   : > { %461 = vmatpush.bf16.msra.mxu0 %v802_v2  ;;  %814 = vmatpush.bf16.msra.mxu2 %v802_v2  ;;  %v805_v13 = vld [vmem:[%s1195_s1 + $0x48] sm:$0xff]  ;;  %v804_v15 = vld [vmem:[%s1195_s1 + $0x40] sm:$0xff]  ;;  %v791_v29 = vld [vmem:[%s1097_s26 + $0x14] sm:$0xf0]  ;;  %s901_s7 = sshra.s32 %s559_s6, 4  ;;  %s902_s7 = int_to_ptr.hbm [resolvable:$true] %s901_s7 }
  0x1a   : > { %490 = vmatpush.bf16.msra.mxu1 %v810_v3  ;;  %822 = vmatpush.bf16.msra.mxu3 %v810_v3  ;;  %v688_v16 = vld [vmem:[%s1097_s26] sm:$0xf]  ;;  %v789_v17 = vld [vmem:[%s1097_s26 + $0x4] sm:$0xf0]  ;;  %v788_v20 = vld [vmem:[%s1097_s26 + $0x4] sm:$0xf]  ;;  %v697_v36 = vor.u32 %v791_v29, %v696_v28  ;;  %p908_p1 = scmp.lt.s32.totalorder %s902_s7, %s1198_s4 }
  0x1b   : > { %v704_v18 = vld [vmem:[%s1097_s26 + $0x20] sm:$0xf]  ;;  %v793_v19 = vld [vmem:[%s1097_s26 + $0x24] sm:$0xf0]  ;;  %v690_v21 = vld [vmem:[%s1097_s26 + $0x8] sm:$0xf0]  ;;  %v689_v24 = vor.u32 %v789_v17, %v688_v16 }
  0x1c   : > { %v792_v22 = vld [vmem:[%s1097_s26 + $0x24] sm:$0xf]  ;;  %v706_v23 = vld [vmem:[%s1097_s26 + $0x28] sm:$0xf0]  ;;  %v705_v25 = vor.u32 %v793_v19, %v704_v18  ;;  %v693_v26 = vor.u32 %v788_v20, %v690_v21  ;;  %v712_v30 = vld [vmem:[%s1097_s26 + $0x30] sm:$0xf] }
  0x1d   : > { %462 = vmatpush.bf16.msra.mxu0 %v801_v4  ;;  %815 = vmatpush.bf16.msra.mxu2 %v801_v4  ;;  %v709_v27 = vor.u32 %v792_v22, %v706_v23  ;;  %v795_v31 = vld [vmem:[%s1097_s26 + $0x34] sm:$0xf0]  ;;  %v790_v32 = vld [vmem:[%s1097_s26 + $0x14] sm:$0xf]  ;;  %v698_v33 = vld [vmem:[%s1097_s26 + $0x18] sm:$0xf0] }
  0x1e   : > { %491 = vmatpush.bf16.msra.mxu1 %v809_v5  ;;  %823 = vmatpush.bf16.msra.mxu3 %v809_v5  ;;  %v794_v34 = vld [vmem:[%s1097_s26 + $0x34] sm:$0xf]  ;;  %v714_v35 = vld [vmem:[%s1097_s26 + $0x38] sm:$0xf0]  ;;  %v713_v37 = vor.u32 %v795_v31, %v712_v30  ;;  %v701_v38 = vor.u32 %v790_v32, %v698_v33  ;;  %v886_v40 = vld [vmem:[%s1196_s2] ss:$0 sm:$0xff] }
  0x1f   : > { %v717_v39 = vor.u32 %v794_v34, %v714_v35  ;;  %v518_v44 = vld [vmem:[%s1133_s22] sm:$0xff]  ;;  %s1138_s26 = scalar_lea.vmem [#allocation2], %s680_s24  ;;  %v519_v55 = vld [vmem:[%s1133_s22 + $0x8] sm:$0xff]  ;;  %v520_v3 = vld [vmem:[%s1133_s22 + $0x10] sm:$0xff]  ;;  %s903_s8 = scalar_lea.hbm %s902_s7, 64 }
  0x20   : > { %v522_v50 = vld [vmem:[%s1133_s22 + $0x20] sm:$0xff]  ;;  %v523_v62 = vld [vmem:[%s1133_s22 + $0x28] sm:$0xff]  ;;  %s556_s5 = sshll.u32 %s1138_s26, 4  ;;  %v525_v22 = vld [vmem:[%s1133_s22 + $0x38] sm:$0xff]  ;;  %p904_p12 = scmp.ne.s32.totalorder %s902_s7, %s903_s8  ;;  %s557_s5 = int_to_ptr.vmem [resolvable:$true] %s556_s5 }
  0x21   : > { %463 = vmatpush.bf16.msra.mxu0 %v800_v6  ;;  %816 = vmatpush.bf16.msra.mxu2 %v800_v6  ;;  %p909_p2 = scmp.lt.s32.totalorder %s907_s13, %s903_s8 }
  0x22   : > { %492 = vmatpush.bf16.msra.mxu1 %v808_v7  ;;  %824 = vmatpush.bf16.msra.mxu3 %v808_v7  ;;  %p905_p13 = pnand %p904_p12, %p1034_p4 }
  0x23   : > { %p910_p3 = por %p909_p2, %p908_p1 }
  0x24   : > { %p906_p0 = pneg %p905_p13 }
  0x25   : > { %464 = vmatpush.bf16.msra.mxu0 %v799_v8  ;;  %817 = vmatpush.bf16.msra.mxu2 %v799_v8 }
  0x26   : > { %493 = vmatpush.bf16.msra.mxu1 %v807_v9  ;;  %825 = vmatpush.bf16.msra.mxu3 %v807_v9  ;;  %p911_p5 = pnand %p910_p3, %p906_p0 }
  0x29   : > { %465 = vmatpush.bf16.msra.mxu0 %v798_v10  ;;  %818 = vmatpush.bf16.msra.mxu2 %v798_v10  ;;  %v524_v10 = vld [vmem:[%s1133_s22 + $0x30] sm:$0xff] }
  0x2a   : > { %494 = vmatpush.bf16.msra.mxu1 %v806_v11  ;;  %826 = vmatpush.bf16.msra.mxu3 %v806_v11 }
  0x2d   : > { %466 = vmatpush.bf16.msra.mxu0 %v797_v12  ;;  %819 = vmatpush.bf16.msra.mxu2 %v797_v12 }
  0x2e   : > { %495 = vmatpush.bf16.msra.mxu1 %v805_v13  ;;  %827 = vmatpush.bf16.msra.mxu3 %v805_v13 }
  0x31   : > { %467 = vmatpush.bf16.msra.mxu0 %v796_v14  ;;  %820 = vmatpush.bf16.msra.mxu2 %v796_v14 }
  0x32   : > { %496 = vmatpush.bf16.msra.mxu1 %v804_v15  ;;  %828 = vmatpush.bf16.msra.mxu3 %v804_v15  ;;  %v521_v15 = vld [vmem:[%s1133_s22 + $0x18] sm:$0xff] }
  0x34   : > { %468 = vmatmul.bf16.vlgmr.msra.gmra.mxu0 %v689_v24  ;;  %478 = vmatmul.bf16.vlgmr.msra.gmra.mxu2 %v705_v25 }
  0x35   : > { %497 = vmatmul.bf16.vlgmr.msra.gmra.mxu1 %v693_v26  ;;  %507 = vmatmul.bf16.vlgmr.msra.gmra.mxu3 %v709_v27 }
  0x44   : > { %473 = vmatmul.bf16.gmra.mxu0 %v697_v36  ;;  %483 = vmatmul.bf16.gmra.mxu2 %v713_v37 }
  0x45   : > { %502 = vmatmul.bf16.gmra.mxu1 %v701_v38  ;;  %512 = vmatmul.bf16.gmra.mxu3 %v717_v39 }
  0xb1   : > { %v469_v41 = vpop.f32.mrf.mxu0 }
  0xb2   : > { %v470_v42 = vadd.f32 %v886_v40, %v469_v41  ;;  %v498_v43 = vpop.f32.mrf.mxu1 }
  0xb4   : > { %v499_v45 = vadd.f32 %v498_v43, %v470_v42 }
  0xb6   : > { %v526_v46 = vadd.f32 %v518_v44, %v499_v45 }
  0xb7   : > { %v479_v47 = vpop.f32.mrf.mxu2 }
  0xb8   : > { %534 = vst [vmem:[%s1138_s26] sm:$0xff] %v526_v46  ;;  %v480_v48 = vadd.f32 %v886_v40, %v479_v47  ;;  %v508_v49 = vpop.f32.mrf.mxu3 }
  0xb9   : > { %v471_v51 = vpop.f32.mrf.mxu0 }
  0xba   : > { %v509_v52 = vadd.f32 %v508_v49, %v480_v48  ;;  %v472_v53 = vadd.f32 %v886_v40, %v471_v51  ;;  %v500_v54 = vpop.f32.mrf.mxu1 }
  0xbc   : > { %v530_v56 = vadd.f32 %v522_v50, %v509_v52  ;;  %v501_v57 = vadd.f32 %v500_v54, %v472_v53 }
  0xbe   : > { %538 = vst [vmem:[%s1138_s26 + $0x20] sm:$0xff] %v530_v56  ;;  %v527_v58 = vadd.f32 %v519_v55, %v501_v57 }
  0xbf   : > { %v481_v59 = vpop.f32.mrf.mxu2 }
  0xc0   : > { %535 = vst [vmem:[%s1138_s26 + $0x8] sm:$0xff] %v527_v58  ;;  %v482_v60 = vadd.f32 %v886_v40, %v481_v59  ;;  %v510_v61 = vpop.f32.mrf.mxu3 }
  0xc1   : > { %v474_v63 = vpop.f32.mrf.mxu0 }
  0xc2   : > { %v511_v0 = vadd.f32 %v510_v61, %v482_v60  ;;  %v475_v1 = vadd.f32 %v886_v40, %v474_v63  ;;  %v503_v2 = vpop.f32.mrf.mxu1 }
  0xc4   : > { %v531_v4 = vadd.f32 %v523_v62, %v511_v0  ;;  %v504_v5 = vadd.f32 %v503_v2, %v475_v1 }
  0xc6   : > { %539 = vst [vmem:[%s1138_s26 + $0x28] sm:$0xff] %v531_v4  ;;  %v528_v6 = vadd.f32 %v520_v3, %v504_v5 }
  0xc7   : > { %v484_v7 = vpop.f32.mrf.mxu2 }
  0xc8   : > { %536 = vst [vmem:[%s1138_s26 + $0x10] sm:$0xff] %v528_v6  ;;  %v485_v8 = vadd.f32 %v886_v40, %v484_v7  ;;  %v513_v9 = vpop.f32.mrf.mxu3 }
  0xc9   : > { %v476_v11 = vpop.f32.mrf.mxu0 }
  0xca   : > { %v514_v12 = vadd.f32 %v513_v9, %v485_v8  ;;  %v477_v13 = vadd.f32 %v886_v40, %v476_v11  ;;  %v505_v14 = vpop.f32.mrf.mxu1 }
  0xcc   : > { %v532_v16 = vadd.f32 %v524_v10, %v514_v12  ;;  %v506_v17 = vadd.f32 %v505_v14, %v477_v13 }
  0xce   : > { %540 = vst [vmem:[%s1138_s26 + $0x30] sm:$0xff] %v532_v16  ;;  %v529_v18 = vadd.f32 %v521_v15, %v506_v17 }
  0xcf   : > { %v486_v19 = vpop.f32.mrf.mxu2 }
  0xd0   : > { %537 = vst [vmem:[%s1138_s26 + $0x18] sm:$0xff] %v529_v18  ;;  %v487_v20 = vadd.f32 %v886_v40, %v486_v19  ;;  %v515_v21 = vpop.f32.mrf.mxu3 }
  0xd2   : > { %v516_v23 = vadd.f32 %v515_v21, %v487_v20 }
  0xd4   : > { %v533_v24 = vadd.f32 %v525_v22, %v516_v23 }
  0xd6   : > { %541 = vst [vmem:[%s1138_s26 + $0x38] sm:$0xff] %v533_v24 }
  0xd7   : > { %914 = shalt.err (!%p911_p5)
}
  0xd8   : > { %s967_s11 = smov 128   ;;  %s968_s24 = smov 8  }
  0xd9   : > { %829 = dma.vmem_to_hbm [thread:$0]  (%p1034_p4), %s557_s5, 1024, %s559_s6, %s543_s18, %s967_s11, %s967_s11, %s968_s24  }
  0xda PF: > { %p835_p6 = scmp.ge.s32.totalorder %s965_s20, 2  ;;  %s573_s26 = sand.u32 1, %s945_s15  }
  0xdb   : > { %s574_s21 = scalar_lea.sflag [#allocation3], %s573_s26 }
  0xdc   : > { %p832_p7 = pnand %p835_p6, %p1041_p8 }
  0xde   : > { %p833_p9 = pneg %p832_p7 }
  0xe0   : > { %940 = dma.done.wait (%p833_p9), %s574_s21, 1024  }
  0xe1   : > { %942 = vsyncadd (%p833_p9), %s574_s21, 4294966272  ;;  %s17_s20 = sadd.s32 1, %s965_s20   ;;  %s1201_s15 = smov %s949_s16 }
  0xe2   : > { %p14_p10 = scmp.ge.s32.totalorder %s17_s20, 4   ;;  %s1202_s16 = smov %s953_s17 }
  0xe3   : > { %s1203_s17 = smov %s1047_s28  ;;  %s1204_s18 = smov %s961_s19 }
  0xe4   : > { %s1205_s19 = smov %s1207_s23  ;;  %16 = sbr.rel (!%p14_p10) target bundleno = 4 (0x4), region = 80 }
  0xe9   :  { %580 = vsyncpa [#allocation3], 1 }
  0xea   :  { %582 = vsyncpa [#allocation3 + $0x1], 1 }

// kernel: transformer_unit_forward.15
= control target key start
LH: loop header
LB: loop body
LE: loop exit
PB: predicated region body
PF: predicated region fallthrough
CT: control target
= control target key end

     0   :  { %s1171_s18 = smov 0   ;;  %s1173_s19 = smov 0   ;;  %s1548_s0 = inlined_call_operand.vmem [shape: f32[128,128], index: 0, kind: input, shape index: {}]   ;;  %s1549_s1 = inlined_call_operand.vmem [shape: bf16[128,256], index: 1, kind: input, shape index: {}]   ;;  %s1550_s2 = inlined_call_operand.vmem [shape: f32[1,128], index: 2, kind: input, shape index: {}]   ;;  %s1551_s3 = inlined_call_operand.vmem [shape: f32[1,128], index: 3, kind: input, shape index: {}]   ;;  %s1552_s4 = inlined_call_operand.vmem [shape: f32[1,256], index: 4, kind: input, shape index: {}]   ;;  %s1553_s5 = inlined_call_operand.vmem [shape: bf16[128,256], index: 5, kind: output, shape index: {}]  }
   0x1   :  { %s1175_s20 = smov 0  }
   0x2 LB: > { %s27_s21 = sadd.s32 1, %s1134_s19  ;;  %p934_p0 = scmp.ge.s32.totalorder %s1138_s20, 1  ;;  %s1138_s20 = sphi %s1175_s20, %s15_s20   ;;  %s1134_s19 = sphi %s1173_s19, %s1563_s19   ;;  %s1130_s18 = sphi %s1171_s18, %s1562_s18  }
   0x3   : > { %p29_p1 = scmp.ge.s32.totalorder %s27_s21, 2  ;;  %p223_p2 = scmp.lt.s32.totalorder %s1138_s20, 3 }
   0x5   : > { %s1565_s21 = smov (%p29_p1, %s27_s21), 0  ;;  %p224_p3 = pnand %p934_p0, %p223_p2 }
   0x6   : > { %s935_s22 = sshll.u32 (!%p224_p3), %s1130_s18, 3 }
   0x7   : > { %227 = sbr.rel (%p224_p3) target bundleno = 480 (0x1e0), region = 40  ;;  %p266_p4 = scmp.lt.s32.totalorder (!%p224_p3), %s935_s22, 15 }
   0xc   : > { %s1567_s22 = smov (!%p266_p4, %s935_s22), 15  ;;  %v1140_v8 = vmov 128.0   ;;  %v998_v47 = vld [vmem:[%s1549_s1 + $0x70] sm:$0xf]  ;;  %v1022_v48 = vld [vmem:[%s1549_s1 + $0x74] sm:$0xf0] }
   0xd   : > { %s936_s23 = sshll.u32 %s1567_s22, 3  ;;  %1066 = vrcp.f32 %v1140_v8  ;;  %v1021_v49 = vld [vmem:[%s1549_s1 + $0x74] sm:$0xf]  ;;  %v999_v50 = vor.u32 %v1022_v48, %v998_v47  ;;  %v1000_v51 = vld [vmem:[%s1549_s1 + $0x78] sm:$0xf0] }
   0xe   : > { %s269_s26 = scalar_lea.vmem %s1548_s0, %s936_s23  ;;  %v1003_v52 = vor.u32 %v1021_v49, %v1000_v51  ;;  %v990_v53 = vld [vmem:[%s1549_s1 + $0x60] sm:$0xf]  ;;  %v1020_v54 = vld [vmem:[%s1549_s1 + $0x64] sm:$0xf0]  ;;  %v1019_v55 = vld [vmem:[%s1549_s1 + $0x64] sm:$0xf]  ;;  %s1478_s14 = scalar_lea.vmem %s1553_s5, %s936_s23 }
   0xf   : > { %v300_v0 = vld [vmem:[%s269_s26 + $0x30] sm:$0xff]  ;;  %v298_v1 = vld [vmem:[%s269_s26 + $0x20] sm:$0xff]  ;;  %v301_v3 = vld [vmem:[%s269_s26 + $0x38] sm:$0xff]  ;;  %599 = vmatpush.bf16.msra.mxu0 %v999_v50  ;;  %1023 = vmatpush.bf16.msra.mxu2 %v999_v50  ;;  %v991_v56 = vor.u32 %v1020_v54, %v990_v53 }
  0x10   : > { %v294_v2 = vld [vmem:[%s269_s26] sm:$0xff]  ;;  %314 = vadd.xlane.f32.xlu2 %v300_v0  ;;  %310 = vadd.xlane.f32.xlu0 %v298_v1  ;;  %v299_v4 = vld [vmem:[%s269_s26 + $0x28] sm:$0xff]  ;;  %v296_v6 = vld [vmem:[%s269_s26 + $0x10] sm:$0xff] }
  0x11   : > { %302 = vadd.xlane.f32.xlu1 %v294_v2  ;;  %v295_v5 = vld [vmem:[%s269_s26 + $0x8] sm:$0xff]  ;;  %v297_v7 = vld [vmem:[%s269_s26 + $0x18] sm:$0xff]  ;;  %628 = vmatpush.bf16.msra.mxu1 %v1003_v52  ;;  %v982_v59 = vld [vmem:[%s1549_s1 + $0x50] sm:$0xf] }
  0x12   : > { %1031 = vmatpush.bf16.msra.mxu3 %v1003_v52  ;;  %v992_v57 = vld [vmem:[%s1549_s1 + $0x68] sm:$0xf0]  ;;  %v1018_v60 = vld [vmem:[%s1549_s1 + $0x54] sm:$0xf0]  ;;  %v1017_v61 = vld [vmem:[%s1549_s1 + $0x54] sm:$0xf] }
  0x13   : > { %v1067_v9 = vpop.eup %1066  ;;  %v995_v58 = vor.u32 %v1019_v55, %v992_v57  ;;  %600 = vmatpush.bf16.msra.mxu0 %v991_v56  ;;  %1024 = vmatpush.bf16.msra.mxu2 %v991_v56  ;;  %v983_v62 = vor.u32 %v1018_v60, %v982_v59  ;;  %v984_v63 = vld [vmem:[%s1549_s1 + $0x58] sm:$0xf0]  ;;  %v1014_v8 = vld [vmem:[%s1549_s1 + $0x34] sm:$0xf0] }
  0x14   : > { %v319_v10 = vmul.f32 128.0, %v1067_v9  ;;  %vm323_vm0 = vweird.f32 %v1067_v9 }
  0x15   : > { %629 = vmatpush.bf16.msra.mxu1 %v995_v58 }
  0x16   : > { %v320_v11 = vsub.f32 1.0, %v319_v10  ;;  %1032 = vmatpush.bf16.msra.mxu3 %v995_v58 }
  0x17   : > { %601 = vmatpush.bf16.msra.mxu0 %v983_v62  ;;  %1025 = vmatpush.bf16.msra.mxu2 %v983_v62 }
  0x18   : > { %316 = vadd.xlane.f32.xlu2 %v301_v3  ;;  %312 = vadd.xlane.f32.xlu0 %v299_v4  ;;  %v321_v12 = vmul.f32 %v1067_v9, %v320_v11  ;;  %v968_v11 = vld [vmem:[%s1549_s1 + $0x38] sm:$0xf0] }
  0x19   : > { %304 = vadd.xlane.f32.xlu1 %v295_v5 }
  0x1a   : > { %v322_v13 = vadd.f32 %v1067_v9, %v321_v12 }
  0x1c   : > { %v1197_v14 = vsel %vm323_vm0, %v1067_v9, %v322_v13  ;;  %v1013_v9 = vld [vmem:[%s1549_s1 + $0x34] sm:$0xf]  ;;  %v958_v13 = vld [vmem:[%s1549_s1 + $0x20] sm:$0xf] }
  0x1d   : > { %v971_v12 = vor.u32 %v1013_v9, %v968_v11 }
  0x20   : > { %306 = vadd.xlane.f32.xlu0 %v296_v6 }
  0x21   : > { %308 = vadd.xlane.f32.xlu1 %v297_v7 }
  0x83   : > { %v315_v15 = vpop.xlane.xlu2 %314  ;;  %v311_v16 = vpop.xlane.xlu0 %310 }
  0x84   : > { %v329_v17 = vmul.f32 %v1197_v14, %v311_v16  ;;  %v303_v18 = vpop.xlane.xlu1 %302  ;;  %v331_v30 = vmul.f32 %v1197_v14, %v315_v15  ;;  %v1012_v15 = vld [vmem:[%s1549_s1 + $0x24] sm:$0xf0]  ;;  %v1011_v16 = vld [vmem:[%s1549_s1 + $0x24] sm:$0xf] }
  0x85   : > { %v325_v19 = vmul.f32 %v1197_v14, %v303_v18  ;;  %v960_v18 = vld [vmem:[%s1549_s1 + $0x28] sm:$0xf0] }
  0x86   : > { %v1201_v20 = vsub.f32 %v298_v1, %v329_v17  ;;  %v1225_v37 = vsub.f32 %v300_v0, %v331_v30  ;;  %v987_v0 = vor.u32 %v1017_v61, %v984_v63  ;;  %v974_v1 = vld [vmem:[%s1549_s1 + $0x40] sm:$0xf]  ;;  %v959_v17 = vor.u32 %v1012_v15, %v958_v13 }
  0x87   : > { %v1203_v21 = vsub.f32 %v294_v2, %v325_v19  ;;  %v1016_v2 = vld [vmem:[%s1549_s1 + $0x44] sm:$0xf0]  ;;  %v963_v19 = vor.u32 %v1011_v16, %v960_v18 }
  0x88   : > { %v345_v22 = vmul.f32 %v1201_v20, %v1201_v20  ;;  %v347_v42 = vmul.f32 %v1225_v37, %v1225_v37  ;;  %630 = vmatpush.bf16.msra.mxu1 %v987_v0  ;;  %1033 = vmatpush.bf16.msra.mxu3 %v987_v0 }
  0x89   : > { %v341_v23 = vmul.f32 %v1203_v21, %v1203_v21 }
  0x8a   : > { %357 = vadd.xlane.f32.xlu2 %v345_v22  ;;  %v950_v22 = vld [vmem:[%s1549_s1 + $0x10] sm:$0xf] }
  0x8b   : > { %349 = vadd.xlane.f32.xlu1 %v341_v23  ;;  %v317_v24 = vpop.xlane.xlu2 %316  ;;  %v313_v25 = vpop.xlane.xlu0 %312  ;;  %v1010_v23 = vld [vmem:[%s1549_s1 + $0x14] sm:$0xf0] }
  0x8c   : > { %v332_v26 = vmul.f32 %v1197_v14, %v317_v24  ;;  %v330_v27 = vmul.f32 %v1197_v14, %v313_v25  ;;  %v305_v28 = vpop.xlane.xlu1 %304  ;;  %v1009_v24 = vld [vmem:[%s1549_s1 + $0x14] sm:$0xf] }
  0x8d   : > { %v326_v29 = vmul.f32 %v1197_v14, %v305_v28 }
  0x8e   : > { %v1213_v31 = vsub.f32 %v301_v3, %v332_v26  ;;  %v1215_v32 = vsub.f32 %v299_v4, %v330_v27  ;;  %v1015_v3 = vld [vmem:[%s1549_s1 + $0x44] sm:$0xf]  ;;  %v975_v4 = vor.u32 %v1016_v2, %v974_v1  ;;  %v951_v26 = vor.u32 %v1010_v23, %v950_v22  ;;  %v952_v27 = vld [vmem:[%s1549_s1 + $0x18] sm:$0xf0] }
  0x8f   : > { %v1217_v33 = vsub.f32 %v295_v5, %v326_v29  ;;  %v976_v5 = vld [vmem:[%s1549_s1 + $0x48] sm:$0xf0]  ;;  %v955_v30 = vor.u32 %v1009_v24, %v952_v27 }
  0x90   : > { %v346_v34 = vmul.f32 %v1215_v32, %v1215_v32  ;;  %v348_v35 = vmul.f32 %v1213_v31, %v1213_v31  ;;  %602 = vmatpush.bf16.msra.mxu0 %v975_v4  ;;  %1026 = vmatpush.bf16.msra.mxu2 %v975_v4 }
  0x91   : > { %v342_v36 = vmul.f32 %v1217_v33, %v1217_v33 }
  0x92   : > { %359 = vadd.xlane.f32.xlu0 %v346_v34 }
  0x93   : > { %363 = vadd.xlane.f32.xlu1 %v348_v35  ;;  %351 = vadd.xlane.f32.xlu2 %v342_v36  ;;  %v307_v38 = vpop.xlane.xlu0 %306  ;;  %v942_v36 = vld [vmem:[%s1549_s1] sm:$0xf] }
  0x94   : > { %v327_v39 = vmul.f32 %v1197_v14, %v307_v38  ;;  %v309_v40 = vpop.xlane.xlu1 %308  ;;  %v1008_v38 = vld [vmem:[%s1549_s1 + $0x4] sm:$0xf0] }
  0x95   : > { %v328_v43 = vmul.f32 %v1197_v14, %v309_v40  ;;  %v943_v40 = vor.u32 %v1008_v38, %v942_v36 }
  0x96   : > { %v1228_v41 = vsub.f32 %v296_v6, %v327_v39  ;;  %v979_v6 = vor.u32 %v1015_v3, %v976_v5 }
  0x97   : > { %v1235_v45 = vsub.f32 %v297_v7, %v328_v43  ;;  %v966_v7 = vld [vmem:[%s1549_s1 + $0x30] sm:$0xf]  ;;  %v944_v43 = vld [vmem:[%s1549_s1 + $0x8] sm:$0xf0] }
  0x98   : > { %v343_v44 = vmul.f32 %v1228_v41, %v1228_v41  ;;  %631 = vmatpush.bf16.msra.mxu1 %v979_v6  ;;  %1034 = vmatpush.bf16.msra.mxu3 %v979_v6  ;;  %v967_v10 = vor.u32 %v1014_v8, %v966_v7 }
  0x99   : > { %v344_v46 = vmul.f32 %v1235_v45, %v1235_v45 }
  0x9a   : > { %361 = vadd.xlane.f32.xlu0 %v347_v42  ;;  %603 = vmatpush.bf16.msra.mxu0 %v967_v10  ;;  %v1007_v42 = vld [vmem:[%s1549_s1 + $0x4] sm:$0xf] }
  0x9b   : > { %353 = vadd.xlane.f32.xlu2 %v343_v44  ;;  %1027 = vmatpush.bf16.msra.mxu2 %v967_v10  ;;  %v947_v44 = vor.u32 %v1007_v42, %v944_v43  ;;  %v1064_v43 = vld [vmem:[%s1550_s2] ss:$0 sm:$0xff] }
  0x9c   : > { %632 = vmatpush.bf16.msra.mxu1 %v971_v12  ;;  %1035 = vmatpush.bf16.msra.mxu3 %v971_v12 }
  0x9e   : > { %604 = vmatpush.bf16.msra.mxu0 %v959_v17 }
  0x9f   : > { %1028 = vmatpush.bf16.msra.mxu2 %v959_v17 }
  0xa0   : > { %633 = vmatpush.bf16.msra.mxu1 %v963_v19  ;;  %1036 = vmatpush.bf16.msra.mxu3 %v963_v19 }
  0xa2   : > { %355 = vadd.xlane.f32.xlu0 %v344_v46  ;;  %605 = vmatpush.bf16.msra.mxu0 %v951_v26 }
  0xa3   : > { %1029 = vmatpush.bf16.msra.mxu2 %v951_v26 }
  0xa4   : > { %634 = vmatpush.bf16.msra.mxu1 %v955_v30  ;;  %1037 = vmatpush.bf16.msra.mxu3 %v955_v30 }
  0xa6   : > { %606 = vmatpush.bf16.msra.mxu0 %v943_v40 }
  0xa7   : > { %1030 = vmatpush.bf16.msra.mxu2 %v943_v40 }
  0xa8   : > { %635 = vmatpush.bf16.msra.mxu1 %v947_v44  ;;  %1038 = vmatpush.bf16.msra.mxu3 %v947_v44 }
  0xfd   : > { %v358_v25 = vpop.xlane.xlu2 %357 }
  0xfe   : > { %v369_v28 = vmul.f32 %v358_v25, %v1197_v14  ;;  %v350_v29 = vpop.xlane.xlu1 %349 }
  0xff   : > { %v365_v34 = vmul.f32 %v350_v29, %v1197_v14 }
 0x100   : > { %v1325_v35 = vadd.f32 1e-05, %v369_v28 }
 0x101   : > { %v373_v39 = vadd.f32 1e-05, %v365_v34 }
 0x102   : > { %1068 = vrsqrt.f32 %v1325_v35  ;;  %vm427_vm4 = vweird.f32 %v1325_v35 }
 0x103   : > { %1070 = vrsqrt.f32 %v373_v39  ;;  %vm387_vm1 = vweird.f32 %v373_v39 }
 0x105   : > { %v360_v46 = vpop.xlane.xlu0 %359 }
 0x106   : > { %v370_v47 = vmul.f32 %v360_v46, %v1197_v14  ;;  %v352_v48 = vpop.xlane.xlu2 %351  ;;  %v364_v49 = vpop.xlane.xlu1 %363 }
 0x107   : > { %v366_v50 = vmul.f32 %v352_v48, %v1197_v14  ;;  %v372_v51 = vmul.f32 %v364_v49, %v1197_v14 }
 0x108   : > { %v1343_v52 = vpop.eup %1068  ;;  %v378_v53 = vadd.f32 1e-05, %v370_v47 }
 0x109   : > { %v1071_v54 = vpop.eup %1070  ;;  %v422_v55 = vmul.f32 %v1343_v52, %v1325_v35  ;;  %v374_v56 = vadd.f32 1e-05, %v366_v50  ;;  %v1347_v57 = vadd.f32 1e-05, %v372_v51  ;;  %vm428_vm3 = vweird.f32 %v1343_v52 }
 0x10a   : > { %v382_v58 = vmul.f32 %v1071_v54, %v373_v39  ;;  %1072 = vrsqrt.f32 %v378_v53  ;;  %vm388_vm2 = vweird.f32 %v1071_v54  ;;  %vm1371_vm6 = vmor %vm427_vm4, %vm428_vm3  ;;  %vm437_vm10 = vweird.f32 %v378_v53 }
 0x10b   : > { %v423_v59 = vmul.f32 %v1343_v52, %v422_v55  ;;  %1074 = vrsqrt.f32 %v374_v56  ;;  %vm1367_vm5 = vmor %vm387_vm1, %vm388_vm2  ;;  %vm397_vm8 = vweird.f32 %v374_v56  ;;  %vm457_vm15 = vweird.f32 %v1347_v57 }
 0x10c   : > { %v383_v60 = vmul.f32 %v1071_v54, %v382_v58  ;;  %1076 = vrsqrt.f32 %v1347_v57 }
 0x10d   : > { %v424_v61 = vmul.f32 0.5, %v423_v59  ;;  %v362_v62 = vpop.xlane.xlu0 %361 }
 0x10e   : > { %v384_v63 = vmul.f32 0.5, %v383_v60  ;;  %v371_v0 = vmul.f32 %v362_v62, %v1197_v14  ;;  %v354_v1 = vpop.xlane.xlu2 %353 }
 0x10f   : > { %v425_v2 = vsub.f32 1.5, %v424_v61  ;;  %v367_v3 = vmul.f32 %v354_v1, %v1197_v14 }
 0x110   : > { %v1073_v4 = vpop.eup %1072  ;;  %v385_v5 = vsub.f32 1.5, %v384_v63  ;;  %v1353_v6 = vadd.f32 1e-05, %v371_v0 }
 0x111   : > { %v1075_v7 = vpop.eup %1074  ;;  %v432_v8 = vmul.f32 %v1073_v4, %v378_v53  ;;  %v1355_v9 = vadd.f32 1e-05, %v367_v3  ;;  %v426_v13 = vmul.f32 %v1343_v52, %v425_v2  ;;  %vm438_vm7 = vweird.f32 %v1073_v4 }
 0x112   : > { %v1357_v10 = vpop.eup %1076  ;;  %v386_v11 = vmul.f32 %v1071_v54, %v385_v5  ;;  %v392_v12 = vmul.f32 %v1075_v7, %v374_v56  ;;  %1078 = vrsqrt.f32 %v1353_v6  ;;  %vm398_vm9 = vweird.f32 %v1075_v7  ;;  %vm439_vm11 = vmor %vm437_vm10, %vm438_vm7 }
 0x113   : > { %v433_v15 = vmul.f32 %v1073_v4, %v432_v8  ;;  %v452_v16 = vmul.f32 %v1357_v10, %v1347_v57  ;;  %1080 = vrsqrt.f32 %v1355_v9  ;;  %v430_v29 = vsel %vm1371_vm6, %v1343_v52, %v426_v13  ;;  %vm399_vm12 = vmor %vm397_vm8, %vm398_vm9 }
 0x114   : > { %v393_v17 = vmul.f32 %v1075_v7, %v392_v12  ;;  %v390_v27 = vsel %vm1367_vm5, %v1071_v54, %v386_v11  ;;  %v465_v44 = vmul.f32 %v430_v29, %v1201_v20  ;;  %vm407_vm13 = vweird.f32 %v1355_v9  ;;  %v1065_v20 = vld [vmem:[%s1551_s3] ss:$0 sm:$0xff] }
 0x115   : > { %v434_v19 = vmul.f32 0.5, %v433_v15  ;;  %v356_v22 = vpop.xlane.xlu0 %355  ;;  %v453_v25 = vmul.f32 %v1357_v10, %v452_v16  ;;  %v461_v38 = vmul.f32 %v390_v27, %v1203_v21  ;;  %vm458_vm0 = vweird.f32 %v1357_v10 }
 0x116   : > { %v394_v24 = vmul.f32 0.5, %v393_v17  ;;  %v368_v26 = vmul.f32 %v356_v22, %v1197_v14  ;;  %v477_v55 = vmul.f32 %v1064_v43, %v465_v44  ;;  %vm1415_vm3 = vmor %vm457_vm15, %vm458_vm0  ;;  %vm447_vm4 = vweird.f32 %v1353_v6 }
 0x117   : > { %v435_v28 = vsub.f32 1.5, %v434_v19  ;;  %v454_v42 = vmul.f32 0.5, %v453_v25  ;;  %v473_v54 = vmul.f32 %v1064_v43, %v461_v38 }
 0x118   : > { %v1382_v30 = vpop.eup %1078  ;;  %v395_v34 = vsub.f32 1.5, %v394_v24  ;;  %v1384_v35 = vadd.f32 1e-05, %v368_v26  ;;  %v489_v2 = vadd.f32 %v1065_v20, %v477_v55 }
 0x119   : > { %v436_v36 = vmul.f32 %v1073_v4, %v435_v28  ;;  %v442_v14 = vmul.f32 %v1382_v30, %v1353_v6  ;;  %v1081_v39 = vpop.eup %1080  ;;  %v455_v53 = vsub.f32 1.5, %v454_v42  ;;  %vm448_vm1 = vweird.f32 %v1382_v30 }
 0x11a   : > { %v396_v40 = vmul.f32 %v1075_v7, %v395_v34  ;;  %1082 = vrsqrt.f32 %v1384_v35  ;;  %v402_v47 = vmul.f32 %v1081_v39, %v1355_v9  ;;  %vm408_vm14 = vweird.f32 %v1081_v39  ;;  %vm449_vm5 = vmor %vm447_vm4, %vm448_vm1 }
 0x11b   : > { %v443_v46 = vmul.f32 %v1382_v30, %v442_v14  ;;  %v440_v48 = vsel %vm439_vm11, %v1073_v4, %v436_v36  ;;  %vm1410_vm2 = vmor %vm407_vm13, %vm408_vm14  ;;  %v485_v0 = vadd.f32 %v1065_v20, %v473_v54  ;;  %v456_v3 = vmul.f32 %v1357_v10, %v455_v53 }
 0x11c   : > { %v400_v21 = vsel %vm399_vm12, %v1075_v7, %v396_v40  ;;  %v403_v50 = vmul.f32 %v1081_v39, %v402_v47  ;;  %v466_v52 = vmul.f32 %v440_v48, %v1215_v32  ;;  %vm417_vm6 = vweird.f32 %v1384_v35 }
 0x11d   : > { %v444_v49 = vmul.f32 0.5, %v443_v46  ;;  %v462_v51 = vmul.f32 %v400_v21, %v1217_v33  ;;  %v460_v6 = vsel %vm1415_vm3, %v1357_v10, %v456_v3 }
 0x11e   : > { %v404_v58 = vmul.f32 0.5, %v403_v50  ;;  %v478_v60 = vmul.f32 %v1064_v43, %v466_v52  ;;  %v468_v19 = vmul.f32 %v460_v6, %v1213_v31  ;;  %v513_v31 = vld [vmem:[%s1552_s4] sm:$0x3] }
 0x11f   : > { %v445_v56 = vsub.f32 1.5, %v444_v49  ;;  %v474_v59 = vmul.f32 %v1064_v43, %v462_v51 }
 0x120   : > { %v1083_v61 = vpop.eup %1082  ;;  %v405_v32 = vsub.f32 1.5, %v404_v58  ;;  %v490_v57 = vadd.f32 %v1065_v20, %v478_v60  ;;  %v480_v27 = vmul.f32 %v1064_v43, %v468_v19 }
 0x121   : > { %v446_v33 = vmul.f32 %v1382_v30, %v445_v56  ;;  %v412_v62 = vmul.f32 %v1083_v61, %v1384_v35  ;;  %v486_v1 = vadd.f32 %v1065_v20, %v474_v59  ;;  %vm418_vm7 = vweird.f32 %v1083_v61 }
 0x122   : > { %v406_v5 = vmul.f32 %v1081_v39, %v405_v32  ;;  %v495_v9 = vpack.c.bf16 %v490_v57, %v489_v2  ;;  %vm419_vm8 = vmor %vm417_vm6, %vm418_vm7  ;;  %v492_v10 = vadd.f32 %v1065_v20, %v480_v27 }
 0x123   : > { %v413_v7 = vmul.f32 %v1083_v61, %v412_v62  ;;  %v493_v8 = vpack.c.bf16 %v486_v1, %v485_v0  ;;  %v450_v13 = vsel %vm449_vm5, %v1382_v30, %v446_v33 }
 0x124   : > { %v410_v12 = vsel %vm1410_vm2, %v1081_v39, %v406_v5  ;;  %617 = vmatmul.bf16.vlgmr.msra.gmra.mxu2 %v495_v9  ;;  %646 = vmatmul.bf16.vlgmr.msra.gmra.mxu3 %v495_v9  ;;  %v467_v17 = vmul.f32 %v450_v13, %v1225_v37  ;;  %v1434_v37 = vperm.slane %v513_v31, 0 }
 0x125   : > { %v414_v11 = vmul.f32 0.5, %v413_v7  ;;  %607 = vmatmul.bf16.vlgmr.msra.gmra.mxu0 %v493_v8  ;;  %636 = vmatmul.bf16.vlgmr.msra.gmra.mxu1 %v493_v8  ;;  %v463_v16 = vmul.f32 %v410_v12, %v1228_v41  ;;  %v1436_v41 = vperm.slane %v513_v31, 1 }
 0x126   : > { %v479_v25 = vmul.f32 %v1064_v43, %v467_v17 }
 0x127   : > { %v415_v15 = vsub.f32 1.5, %v414_v11  ;;  %v475_v24 = vmul.f32 %v1064_v43, %v463_v16 }
 0x128   : > { %v491_v30 = vadd.f32 %v1065_v20, %v479_v25 }
 0x129   : > { %v416_v18 = vmul.f32 %v1083_v61, %v415_v15  ;;  %v487_v28 = vadd.f32 %v1065_v20, %v475_v24 }
 0x12a   : > { %v496_v35 = vpack.c.bf16 %v492_v10, %v491_v30 }
 0x12b   : > { %v420_v22 = vsel %vm419_vm8, %v1083_v61, %v416_v18 }
 0x12c   : > { %v464_v23 = vmul.f32 %v420_v22, %v1235_v45 }
 0x12e   : > { %v476_v26 = vmul.f32 %v1064_v43, %v464_v23 }
 0x130   : > { %v488_v29 = vadd.f32 %v1065_v20, %v476_v26 }
 0x132   : > { %v494_v34 = vpack.c.bf16 %v488_v29, %v487_v28 }
 0x134   : > { %622 = vmatmul.bf16.gmra.mxu2 %v496_v35  ;;  %651 = vmatmul.bf16.gmra.mxu3 %v496_v35 }
 0x135   : > { %612 = vmatmul.bf16.gmra.mxu0 %v494_v34  ;;  %641 = vmatmul.bf16.gmra.mxu1 %v494_v34 }
 0x1a2   : > { %v608_v45 = vpop.f32.mrf.mxu0  ;;  %v637_v14 = vpop.f32.mrf.mxu1 }
 0x1a3   : > { %v609_v36 = vadd.f32 %v608_v45, %v1434_v37  ;;  %v638_v38 = vadd.f32 %v637_v14, %v1436_v41 }
 0x1a5   : > { %v673_v39 = vmul.f32 0.044715, %v609_v36  ;;  %v674_v40 = vmul.f32 0.044715, %v638_v38  ;;  %v657_v12 = vmul.f32 0.5, %v609_v36  ;;  %v658_v16 = vmul.f32 0.5, %v638_v38 }
 0x1a7   : > { %v689_v42 = vmul.f32 %v673_v39, %v609_v36  ;;  %v690_v43 = vmul.f32 %v674_v40, %v638_v38  ;;  %v618_v44 = vpop.f32.mrf.mxu2  ;;  %v647_v21 = vpop.f32.mrf.mxu3 }
 0x1a8   : > { %v619_v47 = vadd.f32 %v618_v44, %v1434_v37  ;;  %v1442_v49 = vadd.f32 %v647_v21, %v1436_v41 }
 0x1a9   : > { %v705_v46 = vmul.f32 %v689_v42, %v609_v36  ;;  %v706_v48 = vmul.f32 %v690_v43, %v638_v38 }
 0x1aa   : > { %v610_v50 = vpop.f32.mrf.mxu0  ;;  %v681_v52 = vmul.f32 0.044715, %v619_v47  ;;  %v639_v54 = vpop.f32.mrf.mxu1  ;;  %v682_v55 = vmul.f32 0.044715, %v1442_v49  ;;  %v665_v10 = vmul.f32 0.5, %v619_v47  ;;  %v666_v44 = vmul.f32 0.5, %v1442_v49 }
 0x1ab   : > { %v721_v51 = vadd.f32 %v705_v46, %v609_v36  ;;  %v611_v53 = vadd.f32 %v610_v50, %v1434_v37  ;;  %v722_v20 = vadd.f32 %v706_v48, %v638_v38  ;;  %v640_v56 = vadd.f32 %v639_v54, %v1436_v41 }
 0x1ac   : > { %v697_v59 = vmul.f32 %v681_v52, %v619_v47  ;;  %v698_v33 = vmul.f32 %v682_v55, %v1442_v49 }
 0x1ad   : > { %v737_v58 = vmul.f32 0.7978846, %v721_v51  ;;  %v675_v60 = vmul.f32 0.044715, %v611_v53  ;;  %v738_v61 = vmul.f32 0.7978846, %v722_v20 }
 0x1ae   : > { %v676_v32 = vmul.f32 0.044715, %v640_v56  ;;  %v713_v62 = vmul.f32 %v697_v59, %v619_v47  ;;  %v714_v0 = vmul.f32 %v698_v33, %v1442_v49  ;;  %v659_v46 = vmul.f32 0.5, %v611_v53 }
 0x1af   : > { %1084 = vtanh.f32 %v737_v58  ;;  %v691_v63 = vmul.f32 %v675_v60, %v611_v53  ;;  %v620_v2 = vpop.f32.mrf.mxu2  ;;  %v649_v5 = vpop.f32.mrf.mxu3  ;;  %v660_v51 = vmul.f32 0.5, %v640_v56 }
 0x1b0   : > { %1086 = vtanh.f32 %v738_v61  ;;  %v692_v1 = vmul.f32 %v676_v32, %v640_v56  ;;  %v729_v57 = vadd.f32 %v713_v62, %v619_v47  ;;  %v1450_v4 = vadd.f32 %v620_v2, %v1434_v37 }
 0x1b1   : > { %v707_v3 = vmul.f32 %v691_v63, %v611_v53  ;;  %v730_v7 = vadd.f32 %v714_v0, %v1442_v49  ;;  %v1454_v9 = vadd.f32 %v649_v5, %v1436_v41 }
 0x1b2   : > { %v708_v8 = vmul.f32 %v692_v1, %v640_v56  ;;  %v613_v11 = vpop.f32.mrf.mxu0  ;;  %v745_v13 = vmul.f32 0.7978846, %v729_v57  ;;  %v683_v6 = vmul.f32 0.044715, %v1450_v4  ;;  %v642_v26 = vpop.f32.mrf.mxu1 }
 0x1b3   : > { %v723_v15 = vadd.f32 %v707_v3, %v611_v53  ;;  %v746_v17 = vmul.f32 0.7978846, %v730_v7  ;;  %v684_v19 = vmul.f32 0.044715, %v1454_v9  ;;  %v1460_v25 = vadd.f32 %v613_v11, %v1434_v37 }
 0x1b4   : > { %v724_v18 = vadd.f32 %v708_v8, %v640_v56  ;;  %1088 = vtanh.f32 %v745_v13  ;;  %v699_v24 = vmul.f32 %v683_v6, %v1450_v4  ;;  %v1468_v40 = vadd.f32 %v642_v26, %v1436_v41 }
 0x1b5   : > { %v1085_v22 = vpop.eup %1084  ;;  %v739_v23 = vmul.f32 0.7978846, %v723_v15  ;;  %1090 = vtanh.f32 %v746_v17  ;;  %v700_v30 = vmul.f32 %v684_v19, %v1454_v9  ;;  %v677_v36 = vmul.f32 0.044715, %v1460_v25 }
 0x1b6   : > { %v1087_v27 = vpop.eup %1086  ;;  %v769_v28 = vadd.f32 1.0, %v1085_v22  ;;  %v740_v29 = vmul.f32 0.7978846, %v724_v18  ;;  %v715_v35 = vmul.f32 %v699_v24, %v1450_v4  ;;  %v678_v54 = vmul.f32 0.044715, %v1468_v40 }
 0x1b7   : > { %v770_v34 = vadd.f32 1.0, %v1087_v27  ;;  %1092 = vtanh.f32 %v739_v23  ;;  %v716_v45 = vmul.f32 %v700_v30, %v1454_v9  ;;  %v623_v14 = vpop.f32.mrf.mxu2  ;;  %v652_v43 = vpop.f32.mrf.mxu3  ;;  %v693_v21 = vmul.f32 %v677_v36, %v1460_v25 }
 0x1b8   : > { %v785_v31 = vmul.f32 %v769_v28, %v657_v12  ;;  %1094 = vtanh.f32 %v740_v29  ;;  %v731_v39 = vadd.f32 %v715_v35, %v1450_v4  ;;  %v1471_v42 = vadd.f32 %v623_v14, %v1434_v37 }
 0x1b9   : > { %v786_v38 = vmul.f32 %v770_v34, %v658_v16  ;;  %v732_v47 = vadd.f32 %v716_v45, %v1454_v9  ;;  %v709_v59 = vmul.f32 %v693_v21, %v1460_v25  ;;  %v1486_v60 = vadd.f32 %v652_v43, %v1436_v41 }
 0x1ba   : > { %v1089_v48 = vpop.eup %1088  ;;  %v747_v52 = vmul.f32 0.7978846, %v731_v39  ;;  %v694_v61 = vmul.f32 %v678_v54, %v1468_v40  ;;  %v685_v33 = vmul.f32 0.044715, %v1471_v42  ;;  %v615_v3 = vpop.f32.mrf.mxu0  ;;  %v667_v29 = vmul.f32 0.5, %v1450_v4 }
 0x1bb   : > { %v801_v50 = vpack.c.bf16 %v786_v38, %v785_v31  ;;  %v1091_v20 = vpop.eup %1090  ;;  %v777_v55 = vadd.f32 1.0, %v1089_v48  ;;  %v748_v58 = vmul.f32 0.7978846, %v732_v47  ;;  %v725_v63 = vadd.f32 %v709_v59, %v1460_v25  ;;  %v644_v5 = vpop.f32.mrf.mxu1 }
 0x1bc   : > { %v778_v53 = vadd.f32 1.0, %v1091_v20  ;;  %1096 = vtanh.f32 %v747_v52  ;;  %v710_v2 = vmul.f32 %v694_v61, %v1468_v40  ;;  %v701_v57 = vmul.f32 %v685_v33, %v1471_v42 }
 0x1bd   : > { %v1093_v49 = vpop.eup %1092  ;;  %809 = vst [vmem:[%s1478_s14] sm:$0xff] %v801_v50  ;;  %v793_v32 = vmul.f32 %v777_v55, %v665_v10  ;;  %1098 = vtanh.f32 %v748_v58  ;;  %v741_v8 = vmul.f32 0.7978846, %v725_v63  ;;  %v686_v11 = vmul.f32 0.044715, %v1486_v60 }
 0x1be   : > { %v1095_v56 = vpop.eup %1094  ;;  %v771_v62 = vadd.f32 1.0, %v1093_v49  ;;  %v794_v0 = vmul.f32 %v778_v53, %v666_v44  ;;  %v726_v6 = vadd.f32 %v710_v2, %v1468_v40  ;;  %v717_v16 = vmul.f32 %v701_v57, %v1471_v42 }
 0x1bf   : > { %v772_v1 = vadd.f32 1.0, %v1095_v56  ;;  %v625_v12 = vpop.f32.mrf.mxu2  ;;  %1100 = vtanh.f32 %v741_v8  ;;  %v702_v17 = vmul.f32 %v686_v11, %v1486_v60  ;;  %v1499_v18 = vadd.f32 %v615_v3, %v1434_v37  ;;  %v654_v36 = vpop.f32.mrf.mxu3 }
 0x1c0   : > { %v787_v7 = vmul.f32 %v771_v62, %v659_v46  ;;  %v805_v13 = vpack.c.bf16 %v794_v0, %v793_v32  ;;  %v1502_v19 = vadd.f32 %v644_v5, %v1436_v41  ;;  %v742_v24 = vmul.f32 0.7978846, %v726_v6 }
 0x1c1   : > { %v788_v15 = vmul.f32 %v772_v1, %v660_v51  ;;  %v733_v26 = vadd.f32 %v717_v16, %v1471_v42  ;;  %v1507_v27 = vadd.f32 %v625_v12, %v1434_v37  ;;  %v718_v34 = vmul.f32 %v702_v17, %v1486_v60 }
 0x1c2   : > { %v1097_v22 = vpop.eup %1096  ;;  %813 = vst [vmem:[%s1478_s14 + $0x20] sm:$0xff] %v805_v13  ;;  %v679_v10 = vmul.f32 0.044715, %v1499_v18  ;;  %v668_v35 = vmul.f32 0.5, %v1454_v9  ;;  %1102 = vtanh.f32 %v742_v24  ;;  %v680_v39 = vmul.f32 0.044715, %v1502_v19 }
 0x1c3   : > { %v802_v23 = vpack.c.bf16 %v788_v15, %v787_v7  ;;  %v1099_v28 = vpop.eup %1098  ;;  %v779_v30 = vadd.f32 1.0, %v1097_v22  ;;  %v749_v45 = vmul.f32 0.7978846, %v733_v26  ;;  %v734_v38 = vadd.f32 %v718_v34, %v1486_v60 }
 0x1c4   : > { %v780_v31 = vadd.f32 1.0, %v1099_v28  ;;  %v695_v37 = vmul.f32 %v679_v10, %v1499_v18  ;;  %v687_v43 = vmul.f32 0.044715, %v1507_v27  ;;  %v696_v47 = vmul.f32 %v680_v39, %v1502_v19 }
 0x1c5   : > { %810 = vst [vmem:[%s1478_s14 + $0x8] sm:$0xff] %v802_v23  ;;  %v795_v14 = vmul.f32 %v779_v30, %v667_v29  ;;  %1104 = vtanh.f32 %v749_v45  ;;  %v1101_v44 = vpop.eup %1100  ;;  %v750_v46 = vmul.f32 0.7978846, %v734_v38  ;;  %v655_v21 = vadd.f32 %v654_v36, %v1436_v41 }
 0x1c6   : > { %v796_v4 = vmul.f32 %v780_v31, %v668_v35  ;;  %v711_v9 = vmul.f32 %v695_v37, %v1499_v18  ;;  %v773_v50 = vadd.f32 1.0, %v1101_v44  ;;  %v703_v51 = vmul.f32 %v687_v43, %v1507_v27 }
 0x1c7   : > { %v661_v52 = vmul.f32 0.5, %v1460_v25  ;;  %1106 = vtanh.f32 %v750_v46  ;;  %v712_v20 = vmul.f32 %v696_v47, %v1502_v19  ;;  %v662_v58 = vmul.f32 0.5, %v1468_v40 }
 0x1c8   : > { %v806_v48 = vpack.c.bf16 %v796_v4, %v795_v14  ;;  %v727_v54 = vadd.f32 %v711_v9, %v1499_v18  ;;  %v1103_v55 = vpop.eup %1102  ;;  %v719_v59 = vmul.f32 %v703_v51, %v1507_v27  ;;  %v688_v49 = vmul.f32 0.044715, %v655_v21 }
 0x1c9   : > { %v789_v53 = vmul.f32 %v773_v50, %v661_v52  ;;  %v774_v41 = vadd.f32 1.0, %v1103_v55  ;;  %v728_v33 = vadd.f32 %v712_v20, %v1502_v19  ;;  %v669_v1 = vmul.f32 0.5, %v1471_v42 }
 0x1ca   : > { %814 = vst [vmem:[%s1478_s14 + $0x28] sm:$0xff] %v806_v48  ;;  %v743_v61 = vmul.f32 0.7978846, %v727_v54  ;;  %v735_v25 = vadd.f32 %v719_v59, %v1507_v27  ;;  %v704_v32 = vmul.f32 %v688_v49, %v655_v21  ;;  %v670_v5 = vmul.f32 0.5, %v1486_v60 }
 0x1cb   : > { %v1105_v56 = vpop.eup %1104  ;;  %v790_v62 = vmul.f32 %v774_v41, %v662_v58  ;;  %v744_v0 = vmul.f32 0.7978846, %v728_v33  ;;  %v663_v16 = vmul.f32 0.5, %v1499_v18  ;;  %v664_v23 = vmul.f32 0.5, %v1502_v19 }
 0x1cc   : > { %v781_v63 = vadd.f32 1.0, %v1105_v56  ;;  %1108 = vtanh.f32 %v743_v61  ;;  %v751_v40 = vmul.f32 0.7978846, %v735_v25  ;;  %v720_v2 = vmul.f32 %v704_v32, %v655_v21 }
 0x1cd   : > { %v1107_v57 = vpop.eup %1106  ;;  %v803_v3 = vpack.c.bf16 %v790_v62, %v789_v53  ;;  %1110 = vtanh.f32 %v744_v0  ;;  %v671_v29 = vmul.f32 0.5, %v1507_v27  ;;  %v672_v35 = vmul.f32 0.5, %v655_v21 }
 0x1ce   : > { %v797_v7 = vmul.f32 %v781_v63, %v669_v1  ;;  %v782_v8 = vadd.f32 1.0, %v1107_v57  ;;  %1112 = vtanh.f32 %v751_v40  ;;  %v736_v11 = vadd.f32 %v720_v2, %v655_v21 }
 0x1cf   : > { %811 = vst [vmem:[%s1478_s14 + $0x10] sm:$0xff] %v803_v3 }
 0x1d0   : > { %v798_v12 = vmul.f32 %v782_v8, %v670_v5  ;;  %v752_v13 = vmul.f32 0.7978846, %v736_v11 }
 0x1d2   : > { %v1109_v15 = vpop.eup %1108  ;;  %v807_v6 = vpack.c.bf16 %v798_v12, %v797_v7  ;;  %1114 = vtanh.f32 %v752_v13 }
 0x1d3   : > { %v775_v42 = vadd.f32 1.0, %v1109_v15  ;;  %v1111_v17 = vpop.eup %1110 }
 0x1d4   : > { %v1113_v22 = vpop.eup %1112  ;;  %815 = vst [vmem:[%s1478_s14 + $0x30] sm:$0xff] %v807_v6  ;;  %v776_v24 = vadd.f32 1.0, %v1111_v17 }
 0x1d5   : > { %v791_v60 = vmul.f32 %v775_v42, %v663_v16  ;;  %v783_v26 = vadd.f32 1.0, %v1113_v22 }
 0x1d6   : > { %v792_v28 = vmul.f32 %v776_v24, %v664_v23 }
 0x1d7   : > { %v799_v10 = vmul.f32 %v783_v26, %v671_v29 }
 0x1d8   : > { %v1115_v30 = vpop.eup %1114  ;;  %v804_v34 = vpack.c.bf16 %v792_v28, %v791_v60 }
 0x1d9   : > { %v784_v18 = vadd.f32 1.0, %v1115_v30 }
 0x1da   : > { %812 = vst [vmem:[%s1478_s14 + $0x18] sm:$0xff] %v804_v34 }
 0x1db   : > { %v800_v31 = vmul.f32 %v784_v18, %v672_v35 }
 0x1dd   : > { %v808_v45 = vpack.c.bf16 %v800_v31, %v799_v10 }
 0x1df   : > { %816 = vst [vmem:[%s1478_s14 + $0x38] sm:$0xff] %v808_v45 }
 0x1e0 PF: > { %s15_s20 = sadd.s32 1, %s1138_s20   ;;  %s1562_s18 = smov %s1134_s19 }
 0x1e1   : > { %p12_p5 = scmp.ge.s32.totalorder %s15_s20, 4   ;;  %s1563_s19 = smov %s1565_s21 }
 0x1e3   :  { %14 = sbr.rel (!%p12_p5) target bundleno = 2 (0x2), region = 76 }

// kernel: transformer_unit_forward.13
= control target key start
LH: loop header
LB: loop body
LE: loop exit
PB: predicated region body
PF: predicated region fallthrough
CT: control target
= control target key end

     0   :  { %s3735_s12 = smov 0   ;;  %s3737_s13 = smov 0   ;;  %s5115_s0 = inlined_call_operand.vmem [shape: bf16[2,64,384], index: 0, kind: input, shape index: {}, may-alias: {0,1,2}]   ;;  %s5116_s1 = inlined_call_operand.vmem [shape: bf16[2,64,384], index: 1, kind: input, shape index: {}, may-alias: {0,1,2}]   ;;  %s5117_s2 = inlined_call_operand.vmem [shape: bf16[2,64,384], index: 2, kind: input, shape index: {}, may-alias: {0,1,2}]   ;;  %s5118_s3 = inlined_call_operand.vmem [shape: bf16[2,64,128], index: 3, kind: output, shape index: {}]  }
   0x1   :  { %s3739_s14 = smov 0   ;;  %s3741_s15 = smov 0  }
   0x2   :  { %s3743_s16 = smov 0  }
   0x3 LB: > { %s32_s17 = sadd.s32 1, %s3703_s15  ;;  %p48_p1 = scmp.ne.s32.totalorder %s3695_s13, %s3691_s12  ;;  %s3707_s16 = sphi %s3743_s16, %s13_s16   ;;  %s3703_s15 = sphi %s3741_s15, %s5162_s15   ;;  %s3699_s14 = sphi %s3739_s14, %s5161_s14   ;;  %s3695_s13 = sphi %s3737_s13, %s5160_s13   ;;  %s3691_s12 = sphi %s3735_s12, %s5159_s12  }
   0x4   : > { %p34_p0 = scmp.ge.s32.totalorder %s32_s17, 2  ;;  %p49_p2 = scmp.eq.s32.totalorder %s3707_s16, 0 }
   0x5   : > { %s41_s20 = sadd.s32 1, %s3695_s13  ;;  %p3044_p5 = scmp.ge.s32.totalorder %s3707_s16, 2 }
   0x6   : > { %s5164_s17 = smov (%p34_p0, %s32_s17), 0  ;;  %p3766_p3 = por %p49_p2, %p48_p1 }
   0x7   : > { %s36_s19 = ssub.s32 %s3703_s15, %s5164_s17  ;;  %158 = sbr.rel (%p3044_p5) target bundleno = 51 (0x33), region = 16 }
   0x8   : > { %p39_p4 = scmp.eq.s32.totalorder %s36_s19, 0 }
   0xa   : > { %s3774_s21 = scalar_select %p39_p4, %s3695_s13, %s41_s20  }
   0xc   : > { %161 = sbr.rel (!%p3766_p3) target bundleno = 25 (0x19), region = 20  ;;  %s163_s22 = sand.u32 (%p3766_p3), 1, %s3695_s13  }
   0xd   : > { %s3367_s23 = smul.u32 (%p3766_p3), 96, %s3703_s15  ;;  %s3045_s24 = sshll.u32 (%p3766_p3), %s163_s22, 5 }
   0xe   : > { %s165_s28 = scalar_lea.vmem (%p3766_p3), [#allocation5], %s3045_s24 }
   0xf   : > { %s171_s27 = scalar_lea.vmem (%p3766_p3), %s5115_s0, %s3367_s23 }
  0x10   : > { %v188_v0 = vld [vmem:[%s171_s27] sm:$0xf] (%p3766_p3)  ;;  %v190_v1 = vld [vmem:[%s171_s27 + $0xc] sm:$0xf] (%p3766_p3)  ;;  %v192_v2 = vld [vmem:[%s171_s27 + $0x18] sm:$0xf] (%p3766_p3) }
  0x11   : > { %189 = vst [vmem:[%s165_s28] sm:$0xf] %v188_v0  ;;  %v194_v3 = vld [vmem:[%s171_s27 + $0x24] sm:$0xf]  ;;  %v196_v4 = vld [vmem:[%s171_s27 + $0x30] sm:$0xf] }
  0x12   : > { %191 = vst [vmem:[%s165_s28 + $0x4] sm:$0xf] %v190_v1  ;;  %v198_v5 = vld [vmem:[%s171_s27 + $0x3c] sm:$0xf]  ;;  %v200_v6 = vld [vmem:[%s171_s27 + $0x48] sm:$0xf] }
  0x13   : > { %193 = vst [vmem:[%s165_s28 + $0x8] sm:$0xf] %v192_v2  ;;  %v202_v7 = vld [vmem:[%s171_s27 + $0x54] sm:$0xf] }
  0x14   : > { %195 = vst [vmem:[%s165_s28 + $0xc] sm:$0xf] %v194_v3 }
  0x15   : > { %197 = vst [vmem:[%s165_s28 + $0x10] sm:$0xf] %v196_v4 }
  0x16   : > { %199 = vst [vmem:[%s165_s28 + $0x14] sm:$0xf] %v198_v5 }
  0x17   : > { %201 = vst [vmem:[%s165_s28 + $0x18] sm:$0xf] %v200_v6 }
  0x18   : > { %203 = vst [vmem:[%s165_s28 + $0x1c] sm:$0xf] %v202_v7 }
  0x19 PF: > { %243 = sbr.rel (!%p3766_p3) target bundleno = 38 (0x26), region = 61  ;;  %s245_s29 = sand.u32 (%p3766_p3), 1, %s3695_s13  }
  0x1a   : > { %s3048_s30 = smul.u32 (%p3766_p3), 96, %s3703_s15  ;;  %s3047_s4 = sshll.u32 (%p3766_p3), %s245_s29, 5 }
  0x1b   : > { %s247_s8 = scalar_lea.vmem (%p3766_p3), [#allocation6], %s3047_s4 }
  0x1c   : > { %s2947_s7 = scalar_lea.vmem (%p3766_p3), %s5116_s1, %s3048_s30 }
  0x1d   : > { %v3049_v8 = vld [vmem:[%s2947_s7 + $0x4] sm:$0xf] (%p3766_p3)  ;;  %v3050_v9 = vld [vmem:[%s2947_s7 + $0x10] sm:$0xf] (%p3766_p3)  ;;  %v3051_v10 = vld [vmem:[%s2947_s7 + $0x1c] sm:$0xf] (%p3766_p3) }
  0x1e   : > { %272 = vst [vmem:[%s247_s8] sm:$0xf] %v3049_v8  ;;  %v3052_v11 = vld [vmem:[%s2947_s7 + $0x28] sm:$0xf]  ;;  %v3053_v12 = vld [vmem:[%s2947_s7 + $0x34] sm:$0xf] }
  0x1f   : > { %274 = vst [vmem:[%s247_s8 + $0x4] sm:$0xf] %v3050_v9  ;;  %v3054_v13 = vld [vmem:[%s2947_s7 + $0x40] sm:$0xf]  ;;  %v3055_v14 = vld [vmem:[%s2947_s7 + $0x4c] sm:$0xf] }
  0x20   : > { %276 = vst [vmem:[%s247_s8 + $0x8] sm:$0xf] %v3051_v10  ;;  %v3056_v15 = vld [vmem:[%s2947_s7 + $0x58] sm:$0xf] }
  0x21   : > { %278 = vst [vmem:[%s247_s8 + $0xc] sm:$0xf] %v3052_v11 }
  0x22   : > { %280 = vst [vmem:[%s247_s8 + $0x10] sm:$0xf] %v3053_v12 }
  0x23   : > { %282 = vst [vmem:[%s247_s8 + $0x14] sm:$0xf] %v3054_v13 }
  0x24   : > { %284 = vst [vmem:[%s247_s8 + $0x18] sm:$0xf] %v3055_v14 }
  0x25   : > { %286 = vst [vmem:[%s247_s8 + $0x1c] sm:$0xf] %v3056_v15 }
  0x26 PF: > { %326 = sbr.rel (!%p3766_p3) target bundleno = 51 (0x33), region = 102  ;;  %s328_s9 = sand.u32 (%p3766_p3), 1, %s3695_s13  }
  0x27   : > { %s3058_s10 = smul.u32 (%p3766_p3), 96, %s3703_s15  ;;  %s3057_s11 = sshll.u32 (%p3766_p3), %s328_s9, 5 }
  0x28   : > { %s330_s23 = scalar_lea.vmem (%p3766_p3), [#allocation7], %s3057_s11 }
  0x29   : > { %s2955_s22 = scalar_lea.vmem (%p3766_p3), %s5117_s2, %s3058_s10 }
  0x2a   : > { %v3059_v16 = vld [vmem:[%s2955_s22 + $0x8] sm:$0xf] (%p3766_p3)  ;;  %v3060_v17 = vld [vmem:[%s2955_s22 + $0x14] sm:$0xf] (%p3766_p3)  ;;  %v3061_v18 = vld [vmem:[%s2955_s22 + $0x20] sm:$0xf] (%p3766_p3) }
  0x2b   : > { %355 = vst [vmem:[%s330_s23] sm:$0xf] %v3059_v16  ;;  %v3062_v19 = vld [vmem:[%s2955_s22 + $0x2c] sm:$0xf]  ;;  %v3063_v20 = vld [vmem:[%s2955_s22 + $0x38] sm:$0xf] }
  0x2c   : > { %357 = vst [vmem:[%s330_s23 + $0x4] sm:$0xf] %v3060_v17  ;;  %v3064_v21 = vld [vmem:[%s2955_s22 + $0x44] sm:$0xf]  ;;  %v3065_v22 = vld [vmem:[%s2955_s22 + $0x50] sm:$0xf] }
  0x2d   : > { %359 = vst [vmem:[%s330_s23 + $0x8] sm:$0xf] %v3061_v18  ;;  %v3066_v23 = vld [vmem:[%s2955_s22 + $0x5c] sm:$0xf] }
  0x2e   : > { %361 = vst [vmem:[%s330_s23 + $0xc] sm:$0xf] %v3062_v19 }
  0x2f   : > { %363 = vst [vmem:[%s330_s23 + $0x10] sm:$0xf] %v3063_v20 }
  0x30   : > { %365 = vst [vmem:[%s330_s23 + $0x14] sm:$0xf] %v3064_v21 }
  0x31   : > { %367 = vst [vmem:[%s330_s23 + $0x18] sm:$0xf] %v3065_v22 }
  0x32   : > { %369 = vst [vmem:[%s330_s23 + $0x1c] sm:$0xf] %v3066_v23 }
  0x33 PF: > { %p3067_p6 = scmp.ge.s32.totalorder %s3707_s16, 1  ;;  %p408_p7 = scmp.lt.s32.totalorder %s3707_s16, 3 }
  0x35   : > { %p409_p8 = pnand %p3067_p6, %p408_p7 }
  0x37   : > { %412 = sbr.rel (%p409_p8) target bundleno = 1695 (0x69f), region = 143 }
  0x3c   : > { %s415_s18 = sand.u32 1, %s3691_s12   ;;  %vm547_vm0 = vcmask 261120   ;;  %s3709_s12 = smov 96   ;;  %vm706_vm1 = vcmask 523264   ;;  %vm482_vm2 = vcmask 7168   ;;  %vm2879_vm3 = vcmask 785408  }
  0x3d   : > { %s3801_s24 = sshll.u32 %s415_s18, 5  ;;  %s3710_s28 = smov 64  }
  0x3e   : > { %s417_s25 = scalar_lea.vmem [#allocation5], %s3801_s24  ;;  %s3805_s26 = scalar_lea.vmem [#allocation6], %s3801_s24 }
  0x3f   : > { %v3356_v24 = vld [vmem:[%s417_s25 + $0x10] sm:$0xff]   ;;  %v3355_v25 = vld [vmem:[%s417_s25 + $0x8] sm:$0xff]   ;;  %v3239_v30 = vld [vmem:[%s3805_s26 + $0x18] sm:$0xff]  ;;  %s3830_s27 = scalar_lea.vmem [#allocation7], %s3801_s24  ;;  %s3711_s29 = smov 32  }
  0x40   : > { %v3294_v26 = vunpack.c.l.bf16 %v3356_v24  ;;  %v3295_v27 = vunpack.c.h.bf16 %v3356_v24  ;;  %v3290_v28 = vunpack.c.l.bf16 %v3355_v25  ;;  %v3291_v29 = vunpack.c.h.bf16 %v3355_v25  ;;  %v3285_v36 = vld [vmem:[%s417_s25] sm:$0xff]   ;;  %v3238_v41 = vld [vmem:[%s3805_s26 + $0x10] sm:$0xff]  ;;  %v3357_v45 = vld [vmem:[%s417_s25 + $0x18] sm:$0xff]   ;;  %p468_p9 = scmp.lt.s32.totalorder %s3699_s14, 1 }
  0x41   : > { %v667_v35 = vsel %vm547_vm0, %v3239_v30, 0  ;;  %v3286_v38 = vunpack.c.l.bf16 %v3285_v36  ;;  %v3287_v39 = vunpack.c.h.bf16 %v3285_v36  ;;  %v664_v46 = vsel %vm547_vm0, %v3238_v41, 0  ;;  %v3245_v49 = vld [vmem:[%s3805_s26 + $0x8] sm:$0xff]  ;;  %v3244_v50 = vld [vmem:[%s3805_s26] sm:$0xff]  ;;  %v3250_v56 = vld [vmem:[%s3830_s27 + $0x10] sm:$0xff] }
  0x42   : > { %v1053_v31 = vmul.f32 0.17677669, %v3294_v26  ;;  %v1054_v32 = vmul.f32 0.17677669, %v3295_v27  ;;  %v1051_v33 = vmul.f32 0.17677669, %v3290_v28  ;;  %673 = vmatpush.bf16.xpose.msra.mxu0 %v667_v35  ;;  %v3298_v47 = vunpack.c.l.bf16 %v3357_v45 }
  0x43   : > { %v1052_v34 = vmul.f32 0.17677669, %v3291_v29  ;;  %v1049_v42 = vmul.f32 0.17677669, %v3286_v38  ;;  %v1050_v43 = vmul.f32 0.17677669, %v3287_v39  ;;  %v3299_v48 = vunpack.c.h.bf16 %v3357_v45 }
  0x44   : > { %v3809_v37 = vpack.c.bf16 %v1054_v32, %v1053_v31  ;;  %v1055_v51 = vmul.f32 0.17677669, %v3298_v47  ;;  %v3237_v53 = vld [vmem:[%s3805_s26 + $0x8] sm:$0xff]  ;;  %v3247_v57 = vld [vmem:[%s3805_s26 + $0x18] sm:$0xff]  ;;  %v3236_v58 = vld [vmem:[%s3805_s26] sm:$0xff]  ;;  %s5166_s14 = smov (!%p468_p9, %s3699_s14), 1 }
  0x45   : > { %v3811_v40 = vpack.c.bf16 %v1052_v34, %v1051_v33  ;;  %v3818_v44 = vpack.c.bf16 %v1050_v43, %v1049_v42  ;;  %v1056_v52 = vmul.f32 0.17677669, %v3299_v48  ;;  %v661_v55 = vsel %vm547_vm0, %v3237_v53, 0  ;;  %v3246_v59 = vld [vmem:[%s3805_s26 + $0x10] sm:$0xff]  ;;  %v3251_v61 = vld [vmem:[%s3830_s27 + $0x18] sm:$0xff]  ;;  %v3248_v62 = vld [vmem:[%s3830_s27] sm:$0xff] }
  0x46   : > { %1085 = vrot.lane.b32.xlu0 %v3809_v37, %s3709_s12  ;;  %v658_v60 = vsel %vm547_vm0, %v3236_v58, 0  ;;  %v3249_v63 = vld [vmem:[%s3830_s27 + $0x8] sm:$0xff]  ;;  %v3252_v0 = vld [vmem:[%s3805_s26] sm:$0xff]  ;;  %v3254_v2 = vld [vmem:[%s3805_s26 + $0x10] sm:$0xff]  ;;  %s3235_s30 = sshll.u32 %s5166_s14, 5 }
  0x47   : > { %1083 = vrot.lane.b32.xlu1 %v3811_v40, %s3709_s12  ;;  %1081 = vrot.lane.b32.xlu2 %v3818_v44, %s3709_s12  ;;  %v1060_v54 = vpack.c.bf16 %v1056_v52, %v1055_v51  ;;  %v3253_v1 = vld [vmem:[%s3805_s26 + $0x8] sm:$0xff]  ;;  %v3255_v3 = vld [vmem:[%s3805_s26 + $0x18] sm:$0xff]  ;;  %s5064_s6 = scalar_lea.vmem %s5118_s3, %s3235_s30 }
  0x48   : > { %v3262_v4 = vld [vmem:[%s3805_s26 + $0x10] sm:$0xff]  ;;  %v3256_v5 = vld [vmem:[%s3830_s27] sm:$0xff]  ;;  %v3263_v6 = vld [vmem:[%s3805_s26 + $0x18] sm:$0xff] }
  0x49   : > { %v3258_v7 = vld [vmem:[%s3830_s27 + $0x10] sm:$0xff]  ;;  %v3257_v8 = vld [vmem:[%s3830_s27 + $0x8] sm:$0xff]  ;;  %v3259_v10 = vld [vmem:[%s3830_s27 + $0x18] sm:$0xff] }
  0x4a   : > { %674 = vmatpush.bf16.xpose.msra.mxu0 %v664_v46  ;;  %v3261_v9 = vld [vmem:[%s3805_s26 + $0x8] sm:$0xff]  ;;  %v3260_v11 = vld [vmem:[%s3805_s26] sm:$0xff]  ;;  %v3243_v15 = vld [vmem:[%s3830_s27 + $0x18] sm:$0xff] }
  0x4b   : > { %928 = vmatpush.bf16.msra.mxu1 %v3243_v15  ;;  %v3242_v17 = vld [vmem:[%s3830_s27 + $0x10] sm:$0xff]  ;;  %v3241_v20 = vld [vmem:[%s3830_s27 + $0x8] sm:$0xff]  ;;  %v3240_v22 = vld [vmem:[%s3830_s27] sm:$0xff]  ;;  %v3713_v15 = vmov 0  }
  0x4c   : > { %3416 = vset.pattern.permute.xlu1 %v3713_v15  ;;  %3414 = vset.pattern.permute.xlu2 %v3713_v15 }
  0x4d   : > { %3415 = vset.pattern.permute.xlu0 %v3713_v15 }
  0x4e   : > { %1111 = vrot.lane.b32.xlu0 %v3245_v49, %s3709_s12 }
  0x4f   : > { %1109 = vrot.lane.b32.xlu1 %v3244_v50, %s3709_s12  ;;  %1087 = vrot.lane.b32.xlu2 %v1060_v54, %s3709_s12 }
  0x50   : > { %929 = vmatpush.bf16.msra.mxu1 %v3242_v17 }
  0x52   : > { %675 = vmatpush.bf16.xpose.msra.mxu0 %v661_v55 }
  0x54   : > { %930 = vmatpush.bf16.msra.mxu1 %v3241_v20 }
  0x56   : > { %1384 = vrot.lane.b32.xlu0 %v3250_v56, %s3709_s12 }
  0x57   : > { %1115 = vrot.lane.b32.xlu1 %v3247_v57, %s3709_s12  ;;  %1113 = vrot.lane.b32.xlu2 %v3246_v59, %s3709_s12 }
  0x58   : > { %931 = vmatpush.bf16.msra.mxu1 %v3240_v22 }
  0x5a   : > { %676 = vmatpush.bf16.xpose.msra.mxu0 %v658_v60 }
  0x5e   : > { %1386 = vrot.lane.b32.xlu0 %v3251_v61, %s3709_s12 }
  0x5f   : > { %1380 = vrot.lane.b32.xlu1 %v3248_v62, %s3709_s12  ;;  %1382 = vrot.lane.b32.xlu2 %v3249_v63, %s3709_s12 }
  0x61   : > { %3089 = vmatmul.msk.bf16.vlgmr.msra.gmra.mxu0 %vm547_vm0, %v3818_v44 }
  0x66   : > { %1562 = vrot.lane.b32.xlu0 %v3818_v44, %s3710_s28 }
  0x67   : > { %1564 = vrot.lane.b32.xlu1 %v3811_v40, %s3710_s28  ;;  %1566 = vrot.lane.b32.xlu2 %v3809_v37, %s3710_s28 }
  0x6e   : > { %1568 = vrot.lane.b32.xlu0 %v1060_v54, %s3710_s28 }
  0x6f   : > { %1590 = vrot.lane.b32.xlu1 %v3252_v0, %s3710_s28  ;;  %1592 = vrot.lane.b32.xlu2 %v3253_v1, %s3710_s28  ;;  %v3712_v1 = vmov -inf  }
  0x70   : > { %483 = vst.msk [vmem:[#allocation2] sm:$0xff] %vm482_vm2, %v3712_v1 }
  0x71   : > { %3090 = vmatmul.msk.bf16.gmra.mxu0 %vm547_vm0, %v3811_v40  ;;  %484 = vst.msk [vmem:[#allocation2 + $0x8] sm:$0xff] %vm482_vm2, %v3712_v1 }
  0x72   : > { %485 = vst.msk [vmem:[#allocation2 + $0x10] sm:$0xff] %vm482_vm2, %v3712_v1 }
  0x73   : > { %486 = vst.msk [vmem:[#allocation2 + $0x18] sm:$0xff] %vm482_vm2, %v3712_v1 }
  0x74   : > { %487 = vst.msk [vmem:[#allocation2 + $0x20] sm:$0xff] %vm482_vm2, %v3712_v1 }
  0x75   : > { %488 = vst.msk [vmem:[#allocation2 + $0x28] sm:$0xff] %vm482_vm2, %v3712_v1 }
  0x76   : > { %1594 = vrot.lane.b32.xlu0 %v3254_v2, %s3710_s28  ;;  %489 = vst.msk [vmem:[#allocation2 + $0x30] sm:$0xff] %vm482_vm2, %v3712_v1 }
  0x77   : > { %1596 = vrot.lane.b32.xlu1 %v3255_v3, %s3710_s28  ;;  %2075 = vrot.lane.b32.xlu2 %v3262_v4, %s3711_s29  ;;  %490 = vst.msk [vmem:[#allocation2 + $0x38] sm:$0xff] %vm482_vm2, %v3712_v1 }
  0x78   : > { %491 = vst.msk [vmem:[#allocation2 + $0x40] sm:$0xff] %vm482_vm2, %v3712_v1  ;;  %v4006_v22 = vld [vmem:[#allocation2 + $0x8] sm:$0xff] }
  0x79   : > { %492 = vst.msk [vmem:[#allocation2 + $0x48] sm:$0xff] %vm482_vm2, %v3712_v1 }
  0x7a   : > { %493 = vst.msk [vmem:[#allocation2 + $0x50] sm:$0xff] %vm482_vm2, %v3712_v1 }
  0x7b   : > { %494 = vst.msk [vmem:[#allocation2 + $0x58] sm:$0xff] %vm482_vm2, %v3712_v1 }
  0x7c   : > { %495 = vst.msk [vmem:[#allocation2 + $0x60] sm:$0xff] %vm482_vm2, %v3712_v1 }
  0x7d   : > { %496 = vst.msk [vmem:[#allocation2 + $0x68] sm:$0xff] %vm482_vm2, %v3712_v1 }
  0x7e   : > { %1861 = vrot.lane.b32.xlu0 %v3256_v5, %s3710_s28  ;;  %497 = vst.msk [vmem:[#allocation2 + $0x70] sm:$0xff] %vm482_vm2, %v3712_v1 }
  0x7f   : > { %2077 = vrot.lane.b32.xlu1 %v3263_v6, %s3711_s29  ;;  %1865 = vrot.lane.b32.xlu2 %v3258_v7, %s3710_s28  ;;  %498 = vst.msk [vmem:[#allocation2 + $0x78] sm:$0xff] %vm482_vm2, %v3712_v1 }
  0x80   : > { %499 = vst.msk [vmem:[#allocation2 + $0x80] sm:$0xff] %vm482_vm2, %v3712_v1 }
  0x81   : > { %3091 = vmatmul.msk.bf16.gmra.mxu0 %vm547_vm0, %v3809_v37  ;;  %500 = vst.msk [vmem:[#allocation2 + $0x88] sm:$0xff] %vm482_vm2, %v3712_v1 }
  0x82   : > { %501 = vst.msk [vmem:[#allocation2 + $0x90] sm:$0xff] %vm482_vm2, %v3712_v1 }
  0x83   : > { %502 = vst.msk [vmem:[#allocation2 + $0x98] sm:$0xff] %vm482_vm2, %v3712_v1 }
  0x84   : > { %503 = vst.msk [vmem:[#allocation2 + $0xa0] sm:$0xff] %vm482_vm2, %v3712_v1 }
  0x85   : > { %504 = vst.msk [vmem:[#allocation2 + $0xa8] sm:$0xff] %vm482_vm2, %v3712_v1 }
  0x86   : > { %1863 = vrot.lane.b32.xlu0 %v3257_v8, %s3710_s28  ;;  %505 = vst.msk [vmem:[#allocation2 + $0xb0] sm:$0xff] %vm482_vm2, %v3712_v1 }
  0x87   : > { %2073 = vrot.lane.b32.xlu1 %v3261_v9, %s3711_s29  ;;  %506 = vst.msk [vmem:[#allocation2 + $0xb8] sm:$0xff] %vm482_vm2, %v3712_v1 }
  0x88   : > { %507 = vst.msk [vmem:[#allocation2 + $0xc0] sm:$0xff] %vm482_vm2, %v3712_v1 }
  0x89   : > { %508 = vst.msk [vmem:[#allocation2 + $0xc8] sm:$0xff] %vm482_vm2, %v3712_v1 }
  0x8a   : > { %509 = vst.msk [vmem:[#allocation2 + $0xd0] sm:$0xff] %vm482_vm2, %v3712_v1 }
  0x8b   : > { %510 = vst.msk [vmem:[#allocation2 + $0xd8] sm:$0xff] %vm482_vm2, %v3712_v1 }
  0x8c   : > { %511 = vst.msk [vmem:[#allocation2 + $0xe0] sm:$0xff] %vm482_vm2, %v3712_v1 }
  0x8d   : > { %512 = vst.msk [vmem:[#allocation2 + $0xe8] sm:$0xff] %vm482_vm2, %v3712_v1 }
  0x8e   : > { %1867 = vrot.lane.b32.xlu0 %v3259_v10, %s3710_s28  ;;  %513 = vst.msk [vmem:[#allocation2 + $0xf0] sm:$0xff] %vm482_vm2, %v3712_v1 }
  0x8f   : > { %2071 = vrot.lane.b32.xlu1 %v3260_v11, %s3711_s29  ;;  %514 = vst.msk [vmem:[#allocation2 + $0xf8] sm:$0xff] %vm482_vm2, %v3712_v1 }
  0x91   : > { %3092 = vmatmul.msk.bf16.gmra.mxu0 %vm547_vm0, %v1060_v54 }
  0x96   : > { %2043 = vrot.lane.b32.xlu0 %v3818_v44, %s3711_s29 }
  0x97   : > { %2049 = vrot.lane.b32.xlu1 %v1060_v54, %s3711_s29 }
  0x9e   : > { %2045 = vrot.lane.b32.xlu0 %v3811_v40, %s3711_s29 }
  0xa1   : > { %v1082_v13 = vpop.permute.xlu2 %1081 }
  0xa6   : > { %2047 = vrot.lane.b32.xlu0 %v3809_v37, %s3711_s29 }
  0xa9   : > { %v3896_v19 = vpop.permute.xlu2 %1087 }
  0xb1   : > { %v1114_v25 = vpop.permute.xlu2 %1113 }
  0xb2   : > { %v1136_v27 = vsel %vm547_vm0, %v1114_v25, 0 }
  0xb8   : > { %v3892_v12 = vpop.permute.xlu0 %1085 }
  0xb9   : > { %v1084_v14 = vpop.permute.xlu1 %1083  ;;  %v1383_v29 = vpop.permute.xlu2 %1382 }
  0xc0   : > { %v1112_v16 = vpop.permute.xlu0 %1111 }
  0xc1   : > { %v1110_v18 = vpop.permute.xlu1 %1109  ;;  %v1133_v32 = vsel %vm547_vm0, %v1112_v16, 0  ;;  %v3911_v36 = vpop.permute.xlu2 %1566 }
  0xc2   : > { %v1130_v38 = vsel %vm547_vm0, %v1110_v18, 0 }
  0xc8   : > { %v1385_v21 = vpop.permute.xlu0 %1384 }
  0xc9   : > { %v1116_v23 = vpop.permute.xlu1 %1115  ;;  %v1593_v42 = vpop.permute.xlu2 %1592 }
  0xca   : > { %v1139_v24 = vsel %vm547_vm0, %v1116_v23, 0  ;;  %v1614_v50 = vsel %vm547_vm0, %v1593_v42, 0 }
  0xcb   : > { %1145 = vmatpush.bf16.xpose.msra.mxu2 %v1139_v24  ;;  %v700_v24 = vld [vmem:[#allocation2 + $0x10] sm:$0xff] }
  0xd0   : > { %v1387_v26 = vpop.permute.xlu0 %1386 }
  0xd1   : > { %v1381_v28 = vpop.permute.xlu1 %1380  ;;  %1408 = vmatpush.bf16.msra.mxu3 %v1387_v26  ;;  %v2076_v47 = vpop.permute.xlu2 %2075 }
  0xd2   : > { %v2098_v48 = vsel %vm547_vm0, %v2076_v47, 0  ;;  %v4125_v47 = vld [vmem:[#allocation2 + $0x18] sm:$0xff] }
  0xd3   : > { %1146 = vmatpush.bf16.xpose.msra.mxu2 %v1136_v27 }
  0xd5   : > { %1409 = vmatpush.bf16.msra.mxu3 %v1385_v21 }
  0xd8   : > { %v3902_v30 = vpop.permute.xlu0 %1562 }
  0xd9   : > { %v3904_v31 = vpop.permute.xlu1 %1564  ;;  %1410 = vmatpush.bf16.msra.mxu3 %v1383_v29  ;;  %v1866_v55 = vpop.permute.xlu2 %1865  ;;  %v3714_v29 = vmov 0.0  }
  0xda   : > { %548 = vst.msk [vmem:[#allocation4] sm:$0xff] %vm547_vm0, %v3714_v29 }
  0xdb   : > { %1147 = vmatpush.bf16.xpose.msra.mxu2 %v1133_v32  ;;  %515 = vst.msk [vmem:[#allocation3] sm:$0xff] %vm482_vm2, %v3714_v29 }
  0xdc   : > { %516 = vst.msk [vmem:[#allocation3 + $0x8] sm:$0xff] %vm482_vm2, %v3714_v29 }
  0xdd   : > { %1411 = vmatpush.bf16.msra.mxu3 %v1381_v28  ;;  %517 = vst.msk [vmem:[#allocation3 + $0x10] sm:$0xff] %vm482_vm2, %v3714_v29 }
  0xde   : > { %v3909_v34 = vpop.f32.mrf.mxu0  ;;  %518 = vst.msk [vmem:[#allocation3 + $0x18] sm:$0xff] %vm482_vm2, %v3714_v29 }
  0xdf   : > { %v707_v37 = vsel %vm706_vm1, %v3909_v34, -inf  ;;  %519 = vst.msk [vmem:[#allocation3 + $0x20] sm:$0xff] %vm482_vm2, %v3714_v29 }
  0xe0   : > { %v3907_v33 = vpop.permute.xlu0 %1568  ;;  %708 = vmax.xlane.f32.xlu0 %v707_v37  ;;  %520 = vst.msk [vmem:[#allocation3 + $0x28] sm:$0xff] %vm482_vm2, %v3714_v29 }
  0xe1   : > { %v1591_v35 = vpop.permute.xlu1 %1590  ;;  %521 = vst.msk [vmem:[#allocation3 + $0x30] sm:$0xff] %vm482_vm2, %v3714_v29 }
  0xe2   : > { %v1611_v54 = vsel %vm547_vm0, %v1591_v35, 0  ;;  %522 = vst.msk [vmem:[#allocation3 + $0x38] sm:$0xff] %vm482_vm2, %v3714_v29 }
  0xe3   : > { %1148 = vmatpush.bf16.xpose.msra.mxu2 %v1130_v38  ;;  %523 = vst.msk [vmem:[#allocation3 + $0x40] sm:$0xff] %vm482_vm2, %v3714_v29 }
  0xe4   : > { %524 = vst.msk [vmem:[#allocation3 + $0x48] sm:$0xff] %vm482_vm2, %v3714_v29 }
  0xe5   : > { %525 = vst.msk [vmem:[#allocation3 + $0x50] sm:$0xff] %vm482_vm2, %v3714_v29 }
  0xe6   : > { %v3925_v56 = vpop.f32.mrf.mxu0  ;;  %526 = vst.msk [vmem:[#allocation3 + $0x58] sm:$0xff] %vm482_vm2, %v3714_v29 }
  0xe7   : > { %v710_v57 = vsel %vm706_vm1, %v3925_v56, -inf  ;;  %527 = vst.msk [vmem:[#allocation3 + $0x60] sm:$0xff] %vm482_vm2, %v3714_v29 }
  0xe8   : > { %v1595_v39 = vpop.permute.xlu0 %1594  ;;  %711 = vmax.xlane.f32.xlu0 %v710_v57  ;;  %528 = vst.msk [vmem:[#allocation3 + $0x68] sm:$0xff] %vm482_vm2, %v3714_v29 }
  0xe9   : > { %v1597_v40 = vpop.permute.xlu1 %1596  ;;  %v1617_v43 = vsel %vm547_vm0, %v1595_v39, 0  ;;  %529 = vst.msk [vmem:[#allocation3 + $0x70] sm:$0xff] %vm482_vm2, %v3714_v29 }
  0xea   : > { %3129 = vmatmul.msk.bf16.vlgmr.msra.gmra.mxu2 %vm547_vm0, %v1082_v13  ;;  %v1620_v41 = vsel %vm547_vm0, %v1597_v40, 0  ;;  %530 = vst.msk [vmem:[#allocation3 + $0x78] sm:$0xff] %vm482_vm2, %v3714_v29 }
  0xeb   : > { %1626 = vmatpush.bf16.xpose.msrb.mxu1 %v1620_v41  ;;  %531 = vst.msk [vmem:[#allocation3 + $0x80] sm:$0xff] %vm482_vm2, %v3714_v29 }
  0xec   : > { %532 = vst.msk [vmem:[#allocation3 + $0x88] sm:$0xff] %vm482_vm2, %v3714_v29 }
  0xed   : > { %533 = vst.msk [vmem:[#allocation3 + $0x90] sm:$0xff] %vm482_vm2, %v3714_v29 }
  0xee   : > { %v3932_v60 = vpop.f32.mrf.mxu0  ;;  %534 = vst.msk [vmem:[#allocation3 + $0x98] sm:$0xff] %vm482_vm2, %v3714_v29 }
  0xef   : > { %v713_v61 = vsel %vm706_vm1, %v3932_v60, -inf  ;;  %535 = vst.msk [vmem:[#allocation3 + $0xa0] sm:$0xff] %vm482_vm2, %v3714_v29 }
  0xf0   : > { %v1862_v44 = vpop.permute.xlu0 %1861  ;;  %714 = vmax.xlane.f32.xlu1 %v713_v61  ;;  %536 = vst.msk [vmem:[#allocation3 + $0xa8] sm:$0xff] %vm482_vm2, %v3714_v29  ;;  %v4197_v61 = vld [vmem:[#allocation2 + $0x38] sm:$0xff] }
  0xf1   : > { %v2078_v45 = vpop.permute.xlu1 %2077  ;;  %537 = vst.msk [vmem:[#allocation3 + $0xb0] sm:$0xff] %vm482_vm2, %v3714_v29 }
  0xf2   : > { %v2101_v46 = vsel %vm547_vm0, %v2078_v45, 0  ;;  %538 = vst.msk [vmem:[#allocation3 + $0xb8] sm:$0xff] %vm482_vm2, %v3714_v29 }
  0xf3   : > { %1627 = vmatpush.bf16.xpose.msrb.mxu1 %v1617_v43  ;;  %2107 = vmatpush.bf16.xpose.msrb.mxu0 %v2101_v46  ;;  %539 = vst.msk [vmem:[#allocation3 + $0xc0] sm:$0xff] %vm482_vm2, %v3714_v29 }
  0xf4   : > { %540 = vst.msk [vmem:[#allocation3 + $0xc8] sm:$0xff] %vm482_vm2, %v3714_v29 }
  0xf5   : > { %541 = vst.msk [vmem:[#allocation3 + $0xd0] sm:$0xff] %vm482_vm2, %v3714_v29 }
  0xf6   : > { %v3937_v63 = vpop.f32.mrf.mxu0  ;;  %542 = vst.msk [vmem:[#allocation3 + $0xd8] sm:$0xff] %vm482_vm2, %v3714_v29 }
  0xf7   : > { %v716_v0 = vsel %vm706_vm1, %v3937_v63, -inf  ;;  %543 = vst.msk [vmem:[#allocation3 + $0xe0] sm:$0xff] %vm482_vm2, %v3714_v29 }
  0xf8   : > { %v1864_v49 = vpop.permute.xlu0 %1863  ;;  %717 = vmax.xlane.f32.xlu1 %v716_v0  ;;  %544 = vst.msk [vmem:[#allocation3 + $0xe8] sm:$0xff] %vm482_vm2, %v3714_v29 }
  0xf9   : > { %v2074_v51 = vpop.permute.xlu1 %2073  ;;  %545 = vst.msk [vmem:[#allocation3 + $0xf0] sm:$0xff] %vm482_vm2, %v3714_v29 }
  0xfa   : > { %3130 = vmatmul.msk.bf16.gmra.mxu2 %vm547_vm0, %v1084_v14  ;;  %v2095_v52 = vsel %vm547_vm0, %v2074_v51, 0  ;;  %546 = vst.msk [vmem:[#allocation3 + $0xf8] sm:$0xff] %vm482_vm2, %v3714_v29  ;;  %v702_v51 = vld [vmem:[#allocation2 + $0x20] sm:$0xff] }
  0xfb   : > { %1628 = vmatpush.bf16.xpose.msrb.mxu1 %v1614_v50  ;;  %2108 = vmatpush.bf16.xpose.msrb.mxu0 %v2098_v48  ;;  %549 = vst.msk [vmem:[#allocation4 + $0x8] sm:$0xff] %vm547_vm0, %v3714_v29 }
  0xfc   : > { %550 = vst.msk [vmem:[#allocation4 + $0x10] sm:$0xff] %vm547_vm0, %v3714_v29 }
  0xfd   : > { %551 = vst.msk [vmem:[#allocation4 + $0x18] sm:$0xff] %vm547_vm0, %v3714_v29 }
  0xfe   : > { %v3948_v2 = vpop.f32.mrf.mxu0  ;;  %552 = vst.msk [vmem:[#allocation4 + $0x20] sm:$0xff] %vm547_vm0, %v3714_v29 }
  0xff   : > { %v719_v10 = vsel %vm706_vm1, %v3948_v2, -inf  ;;  %553 = vst.msk [vmem:[#allocation4 + $0x28] sm:$0xff] %vm547_vm0, %v3714_v29 }
 0x100   : > { %v1868_v53 = vpop.permute.xlu0 %1867  ;;  %720 = vmax.xlane.f32.xlu2 %v719_v10  ;;  %554 = vst.msk [vmem:[#allocation4 + $0x30] sm:$0xff] %vm547_vm0, %v3714_v29 }
 0x101   : > { %1889 = vmatpush.bf16.msrb.mxu3 %v1868_v53  ;;  %v2072_v58 = vpop.permute.xlu1 %2071  ;;  %555 = vst.msk [vmem:[#allocation4 + $0x38] sm:$0xff] %vm547_vm0, %v3714_v29 }
 0x102   : > { %v2092_v59 = vsel %vm547_vm0, %v2072_v58, 0  ;;  %556 = vst.msk [vmem:[#allocation4 + $0x40] sm:$0xff] %vm547_vm0, %v3714_v29 }
 0x103   : > { %1629 = vmatpush.bf16.xpose.msrb.mxu1 %v1611_v54  ;;  %2109 = vmatpush.bf16.xpose.msrb.mxu0 %v2095_v52  ;;  %557 = vst.msk [vmem:[#allocation4 + $0x48] sm:$0xff] %vm547_vm0, %v3714_v29  ;;  %v4164_v52 = vld [vmem:[#allocation2 + $0x28] sm:$0xff] }
 0x104   : > { %558 = vst.msk [vmem:[#allocation4 + $0x50] sm:$0xff] %vm547_vm0, %v3714_v29 }
 0x105   : > { %1890 = vmatpush.bf16.msrb.mxu3 %v1866_v55  ;;  %559 = vst.msk [vmem:[#allocation4 + $0x58] sm:$0xff] %vm547_vm0, %v3714_v29 }
 0x106   : > { %v3959_v4 = vpop.f32.mrf.mxu0  ;;  %560 = vst.msk [vmem:[#allocation4 + $0x60] sm:$0xff] %vm547_vm0, %v3714_v29 }
 0x107   : > { %v722_v11 = vsel %vm706_vm1, %v3959_v4, -inf  ;;  %561 = vst.msk [vmem:[#allocation4 + $0x68] sm:$0xff] %vm547_vm0, %v3714_v29 }
 0x108   : > { %v2044_v62 = vpop.permute.xlu0 %2043  ;;  %723 = vmax.xlane.f32.xlu2 %v722_v11  ;;  %562 = vst.msk [vmem:[#allocation4 + $0x70] sm:$0xff] %vm547_vm0, %v3714_v29 }
 0x109   : > { %1891 = vmatpush.bf16.msrb.mxu3 %v1864_v49  ;;  %v2050_v21 = vpop.permute.xlu1 %2049  ;;  %563 = vst.msk [vmem:[#allocation4 + $0x78] sm:$0xff] %vm547_vm0, %v3714_v29 }
 0x10a   : > { %3131 = vmatmul.msk.bf16.gmra.mxu2 %vm547_vm0, %v3892_v12  ;;  %v698_v12 = vld [vmem:[#allocation2] sm:$0xff]  ;;  %564 = vst.msk [vmem:[#allocation4 + $0x80] sm:$0xff] %vm547_vm0, %v3714_v29 }
 0x10b   : > { %2110 = vmatpush.bf16.xpose.msrb.mxu0 %v2092_v59  ;;  %565 = vst.msk [vmem:[#allocation4 + $0x88] sm:$0xff] %vm547_vm0, %v3714_v29 }
 0x10c   : > { %566 = vst.msk [vmem:[#allocation4 + $0x90] sm:$0xff] %vm547_vm0, %v3714_v29 }
 0x10d   : > { %1892 = vmatpush.bf16.msrb.mxu3 %v1862_v44  ;;  %v4116_v44 = vld [vmem:[#allocation2 + $0x30] sm:$0xff]  ;;  %567 = vst.msk [vmem:[#allocation4 + $0x98] sm:$0xff] %vm547_vm0, %v3714_v29 }
 0x10e   : > { %v3969_v5 = vpop.f32.mrf.mxu0  ;;  %568 = vst.msk [vmem:[#allocation4 + $0xa0] sm:$0xff] %vm547_vm0, %v3714_v29 }
 0x10f   : > { %v725_v6 = vsel %vm706_vm1, %v3969_v5, -inf  ;;  %569 = vst.msk [vmem:[#allocation4 + $0xa8] sm:$0xff] %vm547_vm0, %v3714_v29 }
 0x110   : > { %v2046_v3 = vpop.permute.xlu0 %2045  ;;  %726 = vmax.xlane.f32.xlu0 %v725_v6  ;;  %570 = vst.msk [vmem:[#allocation4 + $0xb0] sm:$0xff] %vm547_vm0, %v3714_v29 }
 0x111   : > { %571 = vst.msk [vmem:[#allocation4 + $0xb8] sm:$0xff] %vm547_vm0, %v3714_v29 }
 0x112   : > { %3209 = vmatmul.msk.bf16.vlgmr.msrb.gmra.mxu0 %vm547_vm0, %v2044_v62  ;;  %572 = vst.msk [vmem:[#allocation4 + $0xc0] sm:$0xff] %vm547_vm0, %v3714_v29 }
 0x113   : > { %573 = vst.msk [vmem:[#allocation4 + $0xc8] sm:$0xff] %vm547_vm0, %v3714_v29 }
 0x114   : > { %574 = vst.msk [vmem:[#allocation4 + $0xd0] sm:$0xff] %vm547_vm0, %v3714_v29 }
 0x115   : > { %575 = vst.msk [vmem:[#allocation4 + $0xd8] sm:$0xff] %vm547_vm0, %v3714_v29 }
 0x116   : > { %v3981_v8 = vpop.f32.mrf.mxu0  ;;  %576 = vst.msk [vmem:[#allocation4 + $0xe0] sm:$0xff] %vm547_vm0, %v3714_v29 }
 0x117   : > { %v728_v9 = vsel %vm706_vm1, %v3981_v8, -inf  ;;  %577 = vst.msk [vmem:[#allocation4 + $0xe8] sm:$0xff] %vm547_vm0, %v3714_v29 }
 0x118   : > { %v2048_v7 = vpop.permute.xlu0 %2047  ;;  %729 = vmax.xlane.f32.xlu1 %v728_v9  ;;  %578 = vst.msk [vmem:[#allocation4 + $0xf0] sm:$0xff] %vm547_vm0, %v3714_v29  ;;  %v4213_v9 = vld [vmem:[#allocation2 + $0x40] sm:$0xff] }
 0x119   : > { %579 = vst.msk [vmem:[#allocation4 + $0xf8] sm:$0xff] %vm547_vm0, %v3714_v29 }
 0x11a   : > { %3132 = vmatmul.msk.bf16.gmra.mxu2 %vm547_vm0, %v3896_v19 }
 0x122   : > { %3210 = vmatmul.msk.bf16.gmra.mxu0 %vm547_vm0, %v2046_v3 }
 0x132   : > { %3211 = vmatmul.msk.bf16.gmra.mxu0 %vm547_vm0, %v2048_v7 }
 0x142   : > { %3212 = vmatmul.msk.bf16.gmra.mxu0 %vm547_vm0, %v2050_v21 }
 0x153   : > { %v709_v13 = vpop.xlane.xlu0 %708 }
 0x154   : > { %v3993_v14 = vmax.f32 %v698_v12, %v709_v13 }
 0x156   : > { %v739_v16 = vsub.f32 %v698_v12, %v3993_v14  ;;  %1025 = vst.msk [vmem:[#allocation2] sm:$0xff] %vm482_vm2, %v3993_v14 }
 0x158   : > { %v747_v17 = vmul.f32 1.442695, %v739_v16 }
 0x15a   : > { %3477 = vpow2.f32 %v747_v17 }
 0x15b   : > { %v712_v23 = vpop.xlane.xlu0 %711 }
 0x15c   : > { %v4009_v26 = vmax.f32 %v4006_v22, %v712_v23 }
 0x15e   : > { %v740_v28 = vsub.f32 %v4006_v22, %v4009_v26  ;;  %1026 = vst.msk [vmem:[#allocation2 + $0x8] sm:$0xff] %vm482_vm2, %v4009_v26 }
 0x160   : > { %v3998_v18 = vpop.eup %3477  ;;  %v749_v7 = vmul.f32 1.442695, %v740_v28 }
 0x161   : > { %963 = vperm.xlu1 %3416, %v3998_v18  }
 0x163   : > { %v715_v25 = vpop.xlane.xlu1 %714 }
 0x164   : > { %v4011_v27 = vmax.f32 %v700_v24, %v715_v25 }
 0x166   : > { %1027 = vst.msk [vmem:[#allocation2 + $0x10] sm:$0xff] %vm482_vm2, %v4011_v27  ;;  %v741_v41 = vsub.f32 %v700_v24, %v4011_v27  ;;  %v4238_v24 = vld [vmem:[#allocation2 + $0xc0] sm:$0xff] }
 0x167   : > { %5133 = vst [vmem:[#allocation9_spill] sm:$0xff] %v4238_v24 }
 0x168   : > { %v751_v42 = vmul.f32 1.442695, %v741_v41  ;;  %v4258_v41 = vld [vmem:[#allocation2 + $0xd0] sm:$0xff] }
 0x169   : > { %5135 = vst [vmem:[#allocation11_spill] sm:$0xff] %v4258_v41 }
 0x16a   : > { %3479 = vpow2.f32 %v751_v42 }
 0x16b   : > { %v718_v48 = vpop.xlane.xlu1 %717  ;;  %3481 = vpow2.f32 %v749_v7 }
 0x16c   : > { %v4133_v49 = vmax.f32 %v4125_v47, %v718_v48 }
 0x16d   : > { %v4001_v19 = vpop.f32.mrf.mxu2 }
 0x16e   : > { %v1179_v20 = vsel %vm706_vm1, %v4001_v19, -inf  ;;  %1028 = vst.msk [vmem:[#allocation2 + $0x18] sm:$0xff] %vm482_vm2, %v4133_v49  ;;  %v742_v17 = vsub.f32 %v4125_v47, %v4133_v49 }
 0x16f   : > { %1180 = vmax.xlane.f32.xlu0 %v1179_v20 }
 0x170   : > { %v4114_v43 = vpop.eup %3479  ;;  %v753_v21 = vmul.f32 1.442695, %v742_v17 }
 0x171   : > { %v4226_v15 = vpop.eup %3481 }
 0x173   : > { %v721_v50 = vpop.xlane.xlu2 %720 }
 0x174   : > { %v4168_v54 = vmax.f32 %v702_v51, %v721_v50 }
 0x175   : > { %v4177_v57 = vpop.f32.mrf.mxu2 }
 0x176   : > { %1029 = vst.msk [vmem:[#allocation2 + $0x20] sm:$0xff] %vm482_vm2, %v4168_v54  ;;  %v1182_v59 = vsel %vm706_vm1, %v4177_v57, -inf  ;;  %v743_v16 = vsub.f32 %v702_v51, %v4168_v54 }
 0x178   : > { %v755_v20 = vmul.f32 1.442695, %v743_v16 }
 0x17a   : > { %3483 = vpow2.f32 %v755_v20 }
 0x17b   : > { %v724_v53 = vpop.xlane.xlu2 %723  ;;  %3485 = vpow2.f32 %v753_v21 }
 0x17c   : > { %v4171_v55 = vmax.f32 %v4164_v52, %v724_v53 }
 0x17d   : > { %v4193_v58 = vpop.f32.mrf.mxu2 }
 0x17e   : > { %1030 = vst.msk [vmem:[#allocation2 + $0x28] sm:$0xff] %vm482_vm2, %v4171_v55  ;;  %v1185_v13 = vsel %vm706_vm1, %v4193_v58, -inf }
 0x180   : > { %v4232_v22 = vpop.eup %3483 }
 0x181   : > { %v4235_v23 = vpop.eup %3485 }
 0x183   : > { %v727_v45 = vpop.xlane.xlu0 %726 }
 0x184   : > { %v4121_v46 = vmax.f32 %v4116_v44, %v727_v45 }
 0x185   : > { %v4206_v3 = vpop.f32.mrf.mxu2 }
 0x186   : > { %1031 = vst.msk [vmem:[#allocation2 + $0x30] sm:$0xff] %vm482_vm2, %v4121_v46  ;;  %v1188_v6 = vsel %vm706_vm1, %v4206_v3, -inf }
 0x18b   : > { %v730_v62 = vpop.xlane.xlu1 %729 }
 0x18c   : > { %v4200_v0 = vmax.f32 %v4197_v61, %v730_v62 }
 0x18e   : > { %1032 = vst.msk [vmem:[#allocation2 + $0x38] sm:$0xff] %vm482_vm2, %v4200_v0  ;;  %v746_v21 = vsub.f32 %v4197_v61, %v4200_v0 }
 0x18f   : > { %v4029_v32 = vpop.f32.mrf.mxu0 }
 0x190   : > { %v2141_v35 = vsel %vm706_vm1, %v4029_v32, -inf }
 0x191   : > { %2142 = vmax.xlane.f32.xlu2 %v2141_v35  ;;  %v4249_v35 = vpop.f32.mrf.mxu2 }
 0x197   : > { %v4049_v37 = vpop.f32.mrf.mxu0 }
 0x198   : > { %v2144_v38 = vsel %vm706_vm1, %v4049_v37, -inf }
 0x199   : > { %2145 = vmax.xlane.f32.xlu0 %v2144_v38  ;;  %v4265_v48 = vpop.f32.mrf.mxu2 }
 0x19f   : > { %v4069_v39 = vpop.f32.mrf.mxu0 }
 0x1a0   : > { %v2147_v40 = vsel %vm706_vm1, %v4069_v39, -inf }
 0x1a1   : > { %2148 = vmax.xlane.f32.xlu1 %v2147_v40  ;;  %v4273_v7 = vpop.f32.mrf.mxu2 }
 0x1a7   : > { %v4204_v1 = vpop.f32.mrf.mxu0 }
 0x1a8   : > { %5132 = vst [vmem:[#allocation8_spill] sm:$0xff] %v4204_v1  ;;  %v2150_v40 = vsel %vm706_vm1, %v4204_v1, -inf }
 0x1a9   : > { %765 = vperm.xlu2 %3414, %v3993_v14  }
 0x1ad   : > { %770 = vperm.xlu0 %3415, %v4009_v26  }
 0x1af   : > { %v4215_v10 = vpop.f32.mrf.mxu0 }
 0x1b0   : > { %v2153_v14 = vsel %vm706_vm1, %v4215_v10, -inf }
 0x1b5   : > { %973 = vperm.xlu0 %3415, %v4114_v43  }
 0x1b7   : > { %v4260_v45 = vpop.f32.mrf.mxu0 }
 0x1b8   : > { %5136 = vst [vmem:[#allocation12_spill] sm:$0xff] %v4260_v45 }
 0x1ba   : > { %775 = vperm.xlu1 %3416, %v4011_v27   ;;  %v4245_v27 = vld [vmem:[#allocation2 + $0xc8] sm:$0xff] }
 0x1bf   : > { %v4270_v53 = vpop.f32.mrf.mxu0 }
 0x1d2   : > { %1183 = vmax.xlane.f32.xlu2 %v1182_v59 }
 0x1d3   : > { %v4247_v28 = vpop.permute.xlu1 %963 }
 0x1df   : > { %1189 = vmax.xlane.f32.xlu0 %v1188_v6 }
 0x1e2   : > { %v1181_v11 = vpop.xlane.xlu0 %1180 }
 0x1e3   : > { %v4218_v12 = vmax.f32 %v4213_v9, %v1181_v11 }
 0x1e4   : > { %1186 = vmax.xlane.f32.xlu1 %v1185_v13  ;;  %v1197_v13 = vsel %vm706_vm1, %v4273_v7, -inf }
 0x1e5   : > { %1506 = vst.msk [vmem:[#allocation2 + $0x40] sm:$0xff] %vm482_vm2, %v4218_v12 }
 0x1e7   : > { %2154 = vmax.xlane.f32.xlu0 %v2153_v14  ;;  %v2156_v14 = vsel %vm706_vm1, %v4260_v45, -inf }
 0x1ea   : > { %968 = vperm.xlu2 %3414, %v4226_v15  }
 0x1fb   : > { %983 = vperm.xlu0 %3415, %v4232_v22  }
 0x1fd   : > { %978 = vperm.xlu1 %3416, %v4235_v23  }
 0x204   : > { %v2143_v25 = vpop.xlane.xlu2 %2142 }
 0x205   : > { %v4241_v26 = vmax.f32 %v4238_v24, %v2143_v25  ;;  %v761_v25 = vmul.f32 1.442695, %v746_v21  ;;  %v1191_v21 = vsel %vm706_vm1, %v4249_v35, -inf }
 0x207   : > { %5134 = vst [vmem:[#allocation10_spill] sm:$0xff] %v4241_v26 }
 0x208   : > { %2468 = vst.msk [vmem:[#allocation2 + $0xc0] sm:$0xff] %vm482_vm2, %v4241_v26 }
 0x20c   : > { %v2146_v29 = vpop.xlane.xlu0 %2145  ;;  %v766_v50 = vpop.permute.xlu2 %765 }
 0x20d   : > { %v4252_v38 = vmax.f32 %v4245_v27, %v2146_v29  ;;  %v803_v51 = vsub.f32 %v3909_v34, %v766_v50  ;;  %v4279_v34 = vpop.f32.mrf.mxu0  ;;  %v744_v50 = vsub.f32 %v4164_v52, %v4171_v55 }
 0x20f   : > { %2469 = vst.msk [vmem:[#allocation2 + $0xc8] sm:$0xff] %vm482_vm2, %v4252_v38  ;;  %v811_v59 = vmul.f32 1.442695, %v803_v51  ;;  %v4306_v51 = vld [vmem:[#allocation2 + $0x58] sm:$0xff] }
 0x211   : > { %3487 = vpow2.f32 %v811_v59 }
 0x213   : > { %2151 = vmax.xlane.f32.xlu2 %v2150_v40  ;;  %v4295_v40 = vld [vmem:[#allocation2 + $0x48] sm:$0xff] }
 0x214   : > { %v2149_v42 = vpop.xlane.xlu1 %2148 }
 0x215   : > { %v4263_v47 = vmax.f32 %v4258_v41, %v2149_v42 }
 0x217   : > { %2470 = vst.msk [vmem:[#allocation2 + $0xd0] sm:$0xff] %vm482_vm2, %v4263_v47  ;;  %v3488_v16 = vpop.eup %3487 }
 0x21f   : > { %v771_v62 = vpop.permute.xlu0 %770 }
 0x220   : > { %v804_v6 = vsub.f32 %v3925_v56, %v771_v62  ;;  %v2162_v56 = vsel %vm706_vm1, %v4279_v34, -inf }
 0x222   : > { %v813_v11 = vmul.f32 1.442695, %v804_v6 }
 0x224   : > { %3489 = vpow2.f32 %v813_v11  ;;  %v1173_v11 = vld [vmem:[#allocation2 + $0x50] sm:$0xff] }
 0x225   : > { %1198 = vmax.xlane.f32.xlu0 %v1197_v13  ;;  %3491 = vpow2.f32 %v761_v25 }
 0x227   : > { %2157 = vmax.xlane.f32.xlu1 %v2156_v14 }
 0x22a   : > { %v4281_v17 = vpop.eup %3489 }
 0x22b   : > { %780 = vperm.xlu2 %3414, %v4133_v49   ;;  %v884_v20 = vpack.c.bf16 %v4281_v17, %v3488_v16  ;;  %v4291_v29 = vpop.eup %3491 }
 0x22c   : > { %v776_v61 = vpop.permute.xlu1 %775 }
 0x22d   : > { %3109 = vmatmul.msk.bf16.vlgmr.msra.gmra.mxu1 %vm706_vm1, %v884_v20  ;;  %2163 = vmax.xlane.f32.xlu0 %v2162_v56  ;;  %v4317_v56 = vld [vmem:[#allocation2 + $0xe0] sm:$0xff] }
 0x22e   : > { %5137 = vst [vmem:[#allocation13_spill] sm:$0xff] %v4317_v56 }
 0x233   : > { %785 = vperm.xlu2 %3414, %v4168_v54   ;;  %v4304_v54 = vpop.permute.xlu0 %973 }
 0x240   : > { %790 = vperm.xlu1 %3416, %v4171_v55   ;;  %v4346_v55 = vld [vmem:[#allocation2 + $0xd8] sm:$0xff] }
 0x241   : > { %998 = vperm.xlu0 %3415, %v4291_v29   ;;  %5138 = vst [vmem:[#allocation14_spill] sm:$0xff] %v4346_v55 }
 0x245   : > { %v1184_v49 = vpop.xlane.xlu2 %1183 }
 0x246   : > { %v4298_v42 = vmax.f32 %v4295_v40, %v1184_v49  ;;  %v2159_v49 = vsel %vm706_vm1, %v4270_v53, -inf }
 0x248   : > { %1507 = vst.msk [vmem:[#allocation2 + $0x48] sm:$0xff] %vm482_vm2, %v4298_v42 }
 0x24d   : > { %v4338_v6 = vpop.permute.xlu2 %968 }
 0x252   : > { %v1190_v59 = vpop.xlane.xlu0 %1189 }
 0x253   : > { %v4309_v62 = vmax.f32 %v4306_v51, %v1190_v59  ;;  %v1194_v59 = vsel %vm706_vm1, %v4265_v48, -inf }
 0x255   : > { %1509 = vst.msk [vmem:[#allocation2 + $0x58] sm:$0xff] %vm482_vm2, %v4309_v62 }
 0x257   : > { %v1187_v13 = vpop.xlane.xlu1 %1186 }
 0x258   : > { %v4315_v14 = vmax.f32 %v1173_v11, %v1187_v13  ;;  %v843_v13 = vsel %vm706_vm1, %v3488_v16, 0.0 }
 0x25a   : > { %1508 = vst.msk [vmem:[#allocation2 + $0x50] sm:$0xff] %vm482_vm2, %v4315_v14  ;;  %v2155_v20 = vpop.xlane.xlu0 %2154 }
 0x25b   : > { %v4324_v25 = vmax.f32 %v4317_v56, %v2155_v20  ;;  %v757_v20 = vmul.f32 1.442695, %v744_v50 }
 0x25c   : > { %1192 = vmax.xlane.f32.xlu2 %v1191_v21  ;;  %v745_v21 = vsub.f32 %v4116_v44, %v4121_v46 }
 0x25d   : > { %2472 = vst.msk [vmem:[#allocation2 + $0xe0] sm:$0xff] %vm482_vm2, %v4324_v25  ;;  %3493 = vpow2.f32 %v757_v20 }
 0x263   : > { %v4342_v24 = vpop.eup %3493 }
 0x264   : > { %2160 = vmax.xlane.f32.xlu2 %v2159_v49  ;;  %v759_v49 = vmul.f32 1.442695, %v745_v21 }
 0x266   : > { %3495 = vpow2.f32 %v759_v49 }
 0x26a   : > { %1195 = vmax.xlane.f32.xlu1 %v1194_v59  ;;  %v1213_v59 = vsub.f32 %v1173_v11, %v4315_v14 }
 0x26b   : > { %844 = vadd.xlane.f32.xlu0 %v843_v13 }
 0x26c   : > { %v1223_v52 = vmul.f32 1.442695, %v1213_v59  ;;  %v4354_v16 = vpop.eup %3495 }
 0x26d   : > { %5139 = vst [vmem:[#allocation15_spill] sm:$0xff] %v4354_v16  ;;  %v4362_v21 = vpop.permute.xlu0 %983 }
 0x26e   : > { %3497 = vpow2.f32 %v1223_v52 }
 0x26f   : > { %v4364_v59 = vpop.permute.xlu1 %978 }
 0x274   : > { %v4358_v50 = vpop.eup %3497 }
 0x275   : > { %5140 = vst [vmem:[#allocation16_spill] sm:$0xff] %v4358_v50 }
 0x27c   : > { %795 = vperm.xlu2 %3414, %v4121_v46  }
 0x27f   : > { %1242 = vperm.xlu0 %3415, %v4298_v42  }
 0x283   : > { %800 = vperm.xlu1 %3416, %v4200_v0   ;;  %v805_v0 = vsub.f32 %v3932_v60, %v776_v61  ;;  %v1211_v60 = vsub.f32 %v4213_v9, %v4218_v12  ;;  %v4369_v61 = vld [vmem:[#allocation2 + $0x70] sm:$0xff] }
 0x284   : > { %988 = vperm.xlu2 %3414, %v4342_v24  }
 0x285   : > { %v815_v11 = vmul.f32 1.442695, %v805_v0 }
 0x286   : > { %v2152_v44 = vpop.xlane.xlu2 %2151 }
 0x287   : > { %v4349_v46 = vmax.f32 %v4346_v55, %v2152_v44  ;;  %1252 = vperm.xlu0 %3415, %v4309_v62   ;;  %3499 = vpow2.f32 %v815_v11  ;;  %v1219_v44 = vmul.f32 1.442695, %v1211_v60  ;;  %v4390_v60 = vld [vmem:[#allocation2 + $0xf8] sm:$0xff] }
 0x288   : > { %5142 = vst [vmem:[#allocation18_spill] sm:$0xff] %v4390_v60 }
 0x289   : > { %2471 = vst.msk [vmem:[#allocation2 + $0xd8] sm:$0xff] %vm482_vm2, %v4349_v46 }
 0x28b   : > { %993 = vperm.xlu1 %3416, %v4354_v16  }
 0x28d   : > { %v3500_v52 = vpop.eup %3499 }
 0x28e   : > { %v781_v13 = vpop.permute.xlu2 %780 }
 0x28f   : > { %v806_v20 = vsub.f32 %v3937_v63, %v781_v13  ;;  %1454 = vperm.xlu0 %3415, %v4358_v50   ;;  %v4371_v63 = vld [vmem:[#allocation2 + $0xe8] sm:$0xff] }
 0x290   : > { %5141 = vst [vmem:[#allocation17_spill] sm:$0xff] %v4371_v63 }
 0x291   : > { %v817_v49 = vmul.f32 1.442695, %v806_v20 }
 0x293   : > { %3501 = vpow2.f32 %v817_v49  ;;  %2199 = vperm.xlu1 %3416, %v4241_v26  }
 0x294   : > { %3503 = vpow2.f32 %v1219_v44  ;;  %v953_v44 = vld [vmem:[#allocation4] sm:$0xff] }
 0x298   : > { %v1199_v0 = vpop.xlane.xlu0 %1198 }
 0x299   : > { %v4373_v13 = vpop.eup %3501  ;;  %v4376_v20 = vmax.f32 %v4369_v61, %v1199_v0 }
 0x29a   : > { %v2158_v11 = vpop.xlane.xlu1 %2157  ;;  %v885_v49 = vpack.c.bf16 %v4373_v13, %v3500_v52  ;;  %v4395_v55 = vpop.eup %3503 }
 0x29b   : > { %1512 = vst.msk [vmem:[#allocation2 + $0x70] sm:$0xff] %vm482_vm2, %v4376_v20  ;;  %v4384_v9 = vmax.f32 %v4371_v63, %v2158_v11  ;;  %1237 = vperm.xlu1 %3416, %v4218_v12   ;;  %v786_v12 = vpop.permute.xlu2 %785  ;;  %v1001_v63 = vmul.f32 %v4247_v28, %v953_v44  ;;  %v827_v44 = vld [vmem:[#allocation3] sm:$0xff] }
 0x29c   : > { %3110 = vmatmul.msk.bf16.gmra.mxu1 %vm706_vm1, %v885_v49  ;;  %5143 = vst [vmem:[#allocation19_spill] sm:$0xff] %v4395_v55  ;;  %v807_v11 = vsub.f32 %v3948_v2, %v786_v12  ;;  %v4401_v49 = vpop.f32.mrf.mxu2 }
 0x29d   : > { %2473 = vst.msk [vmem:[#allocation2 + $0xe8] sm:$0xff] %vm482_vm2, %v4384_v9 }
 0x29e   : > { %v819_v41 = vmul.f32 1.442695, %v807_v11  ;;  %v1176_v11 = vld [vmem:[#allocation2 + $0x68] sm:$0xff] }
 0x2a0   : > { %v2164_v0 = vpop.xlane.xlu0 %2163  ;;  %3505 = vpow2.f32 %v819_v41  ;;  %v849_v41 = vsel %vm706_vm1, %v3500_v52, 0.0 }
 0x2a1   : > { %v4393_v26 = vmax.f32 %v4390_v60, %v2164_v0  ;;  %v1200_v0 = vsel %vm706_vm1, %v4401_v49, -inf }
 0x2a3   : > { %1444 = vperm.xlu1 %3416, %v4395_v55   ;;  %2475 = vst.msk [vmem:[#allocation2 + $0xf8] sm:$0xff] %vm482_vm2, %v4393_v26  ;;  %v954_v55 = vld [vmem:[#allocation4 + $0x8] sm:$0xff] }
 0x2a4   : > { %v1002_v60 = vmul.f32 %v4338_v6, %v954_v55 }
 0x2a6   : > { %v3506_v1 = vpop.eup %3505 }
 0x2aa   : > { %v933_v56 = vpop.f32.mrf.mxu1 }
 0x2ab   : > { %v1009_v45 = vadd.f32 %v1001_v63, %v933_v56  ;;  %v855_v56 = vsel %vm706_vm1, %v3506_v1, 0.0 }
 0x2ad   : > { %1017 = vst.msk [vmem:[#allocation4] sm:$0xff] %vm547_vm0, %v1009_v45  ;;  %1201 = vmax.xlane.f32.xlu2 %v1200_v0 }
 0x2b2   : > { %v935_v16 = vpop.f32.mrf.mxu1  ;;  %v791_v50 = vpop.permute.xlu1 %790 }
 0x2b3   : > { %v1010_v2 = vadd.f32 %v1002_v60, %v935_v16  ;;  %v808_v12 = vsub.f32 %v3959_v4, %v791_v50  ;;  %v4418_v4 = vld [vmem:[#allocation2 + $0x60] sm:$0xff]  ;;  %v4429_v50 = vpop.permute.xlu0 %998 }
 0x2b5   : > { %1018 = vst.msk [vmem:[#allocation4 + $0x8] sm:$0xff] %vm547_vm0, %v1010_v2  ;;  %v821_v28 = vmul.f32 1.442695, %v808_v12  ;;  %v835_v2 = vmul.f32 %v3998_v18, %v827_v44 }
 0x2b7   : > { %3507 = vpow2.f32 %v821_v28 }
 0x2b9   : > { %856 = vadd.xlane.f32.xlu0 %v855_v56 }
 0x2bd   : > { %v4411_v63 = vpop.eup %3507 }
 0x2be   : > { %v886_v45 = vpack.c.bf16 %v4411_v63, %v3506_v1  ;;  %v4427_v1 = vld [vmem:[#allocation2 + $0xf0] sm:$0xff] }
 0x2c0   : > { %3111 = vmatmul.msk.bf16.gmra.mxu1 %vm706_vm1, %v886_v45 }
 0x2c5   : > { %2204 = vperm.xlu2 %3414, %v4252_v38  }
 0x2cd   : > { %850 = vadd.xlane.f32.xlu1 %v849_v41  ;;  %1267 = vperm.xlu0 %3415, %v4376_v20  }
 0x2cf   : > { %v1193_v6 = vpop.xlane.xlu2 %1192 }
 0x2d0   : > { %v4421_v55 = vmax.f32 %v4418_v4, %v1193_v6  ;;  %v5144_v6 = vsub.f32 %v4306_v51, %v4309_v62 }
 0x2d2   : > { %v1215_v16 = vsub.f32 %v4418_v4, %v4421_v55  ;;  %1510 = vst.msk [vmem:[#allocation2 + $0x60] sm:$0xff] %vm482_vm2, %v4421_v55 }
 0x2d7   : > { %v2161_v52 = vpop.xlane.xlu2 %2160 }
 0x2d8   : > { %v4432_v60 = vmax.f32 %v4427_v1, %v2161_v52  ;;  %v1225_v52 = vmul.f32 1.442695, %v5144_v6 }
 0x2da   : > { %2474 = vst.msk [vmem:[#allocation2 + $0xf0] sm:$0xff] %vm482_vm2, %v4432_v60 }
 0x2dd   : > { %v1196_v0 = vpop.xlane.xlu1 %1195 }
 0x2de   : > { %v4437_v12 = vmax.f32 %v1176_v11, %v1196_v0  ;;  %v845_v28 = vpop.xlane.xlu0 %844 }
 0x2df   : > { %v867_v56 = vadd.f32 %v845_v28, %v835_v2  ;;  %v796_v0 = vpop.permute.xlu2 %795 }
 0x2e0   : > { %v1216_v45 = vsub.f32 %v1176_v11, %v4437_v12  ;;  %1511 = vst.msk [vmem:[#allocation2 + $0x68] sm:$0xff] %vm482_vm2, %v4437_v12  ;;  %v846_v11 = vsel %vm706_vm1, %v4281_v17, 0.0  ;;  %v809_v51 = vsub.f32 %v3969_v5, %v796_v0 }
 0x2e1   : > { %876 = vst.msk [vmem:[#allocation3] sm:$0xff] %vm482_vm2, %v867_v56 }
 0x2e2   : > { %v1229_v41 = vmul.f32 1.442695, %v1216_v45  ;;  %v823_v62 = vmul.f32 1.442695, %v809_v51 }
 0x2e4   : > { %3509 = vpow2.f32 %v1229_v41 }
 0x2e5   : > { %3511 = vpow2.f32 %v1225_v52  ;;  %v5145_v52 = vsub.f32 %v4295_v40, %v4298_v42  ;;  %v955_v40 = vld [vmem:[#allocation4 + $0x10] sm:$0xff] }
 0x2e6   : > { %1257 = vperm.xlu1 %3416, %v4421_v55   ;;  %3513 = vpow2.f32 %v823_v62 }
 0x2e7   : > { %v1221_v5 = vmul.f32 1.442695, %v5145_v52  ;;  %v989_v52 = vpop.permute.xlu2 %988 }
 0x2ea   : > { %v4447_v18 = vpop.eup %3509 }
 0x2eb   : > { %1469 = vperm.xlu0 %3415, %v4447_v18   ;;  %v4450_v44 = vpop.eup %3511 }
 0x2ec   : > { %v4460_v41 = vpop.eup %3513 }
 0x2ee   : > { %847 = vadd.xlane.f32.xlu2 %v846_v11  ;;  %1459 = vperm.xlu1 %3416, %v4450_v44  }
 0x2f1   : > { %v1243_v0 = vpop.permute.xlu0 %1242 }
 0x2f3   : > { %2209 = vperm.xlu0 %3415, %v4263_v47  }
 0x2f5   : > { %v801_v2 = vpop.permute.xlu1 %800 }
 0x2f6   : > { %v810_v28 = vsub.f32 %v3981_v8, %v801_v2  ;;  %v1276_v8 = vsub.f32 %v4177_v57, %v1243_v0  ;;  %v858_v57 = vsel %vm706_vm1, %v4411_v63, 0.0  ;;  %v956_v63 = vld [vmem:[#allocation4 + $0x18] sm:$0xff] }
 0x2f8   : > { %v825_v56 = vmul.f32 1.442695, %v810_v28  ;;  %v1285_v62 = vmul.f32 1.442695, %v1276_v8 }
 0x2f9   : > { %v4484_v0 = vpop.permute.xlu0 %1252 }
 0x2fa   : > { %3515 = vpow2.f32 %v825_v56  ;;  %v1278_v55 = vsub.f32 %v4206_v3, %v4484_v0 }
 0x2fb   : > { %3517 = vpow2.f32 %v1221_v5 }
 0x2fc   : > { %3519 = vpow2.f32 %v1285_v62  ;;  %v4489_v62 = vld [vmem:[#allocation2 + $0x78] sm:$0xff] }
 0x2fd   : > { %v4458_v45 = vpop.permute.xlu1 %993 }
 0x300   : > { %v3516_v17 = vpop.eup %3515 }
 0x301   : > { %v887_v6 = vpack.c.bf16 %v3516_v17, %v4460_v41  ;;  %v4469_v51 = vpop.eup %3517 }
 0x302   : > { %v4475_v42 = vpop.eup %3519 }
 0x303   : > { %3112 = vmatmul.msk.bf16.gmra.mxu1 %vm706_vm1, %v887_v6  ;;  %v1003_v6 = vmul.f32 %v4304_v54, %v955_v40  ;;  %v1004_v54 = vmul.f32 %v4364_v59, %v956_v63  ;;  %v1319_v4 = vsel %vm706_vm1, %v4475_v42, 0.0 }
 0x305   : > { %v2200_v11 = vpop.permute.xlu1 %2199 }
 0x306   : > { %1247 = vperm.xlu2 %3414, %v4315_v14  }
 0x30d   : > { %v1238_v2 = vpop.permute.xlu1 %1237 }
 0x30e   : > { %v1275_v28 = vsub.f32 %v4001_v19, %v1238_v2  ;;  %1449 = vperm.xlu2 %3414, %v4469_v51  }
 0x310   : > { %v1283_v56 = vmul.f32 1.442695, %v1275_v28 }
 0x312   : > { %3521 = vpow2.f32 %v1283_v56 }
 0x313   : > { %3169 = vmatmul.msk.bf16.vlgmr.msrb.gmra.mxu1 %vm547_vm0, %v3902_v30  ;;  %v864_v30 = vsel %vm706_vm1, %v3516_v17, 0.0  ;;  %v4501_v17 = vpop.permute.xlu0 %1454 }
 0x318   : > { %v4479_v14 = vpop.eup %3521  ;;  %859 = vadd.xlane.f32.xlu1 %v858_v57 }
 0x319   : > { %v938_v19 = vpop.f32.mrf.mxu1  ;;  %v1356_v5 = vpack.c.bf16 %v4475_v42, %v4479_v14 }
 0x31a   : > { %v1011_v8 = vadd.f32 %v1003_v6, %v938_v19  ;;  %v2237_v6 = vsub.f32 %v4029_v32, %v2200_v11  ;;  %v4525_v11 = vpop.permute.xlu1 %1444 }
 0x31b   : > { %3149 = vmatmul.msk.bf16.vlgmr.msra.gmra.mxu3 %vm706_vm1, %v1356_v5  ;;  %v831_v5 = vld [vmem:[#allocation3 + $0x20] sm:$0xff] }
 0x31c   : > { %1019 = vst.msk [vmem:[#allocation4 + $0x10] sm:$0xff] %vm547_vm0, %v1011_v8  ;;  %v2245_v59 = vmul.f32 1.442695, %v2237_v6  ;;  %v839_v63 = vmul.f32 %v4232_v22, %v831_v5 }
 0x31d   : > { %865 = vadd.xlane.f32.xlu0 %v864_v30 }
 0x31e   : > { %3523 = vpow2.f32 %v2245_v59  ;;  %v829_v59 = vld [vmem:[#allocation3 + $0x10] sm:$0xff] }
 0x31f   : > { %v837_v5 = vmul.f32 %v4114_v43, %v829_v59  ;;  %v1227_v43 = vmul.f32 1.442695, %v1215_v16 }
 0x320   : > { %v1202_v2 = vpop.xlane.xlu2 %1201 }
 0x321   : > { %v4493_v28 = vmax.f32 %v4489_v62, %v1202_v2  ;;  %v940_v56 = vpop.f32.mrf.mxu1 }
 0x322   : > { %v1012_v40 = vadd.f32 %v1004_v54, %v940_v56 }
 0x323   : > { %v1218_v57 = vsub.f32 %v4489_v62, %v4493_v28  ;;  %1513 = vst.msk [vmem:[#allocation2 + $0x78] sm:$0xff] %vm482_vm2, %v4493_v28  ;;  %3170 = vmatmul.msk.bf16.gmra.mxu1 %vm547_vm0, %v3904_v31  ;;  %v5146_v31 = vsub.f32 %v4369_v61, %v4376_v20  ;;  %v852_v61 = vsel %vm706_vm1, %v4373_v13, 0.0 }
 0x324   : > { %1020 = vst.msk [vmem:[#allocation4 + $0x18] sm:$0xff] %vm547_vm0, %v1012_v40  ;;  %v4513_v32 = vpop.eup %3523  ;;  %v957_v40 = vld [vmem:[#allocation4 + $0x20] sm:$0xff] }
 0x325   : > { %v1231_v56 = vmul.f32 1.442695, %v5146_v31  ;;  %v1005_v6 = vmul.f32 %v4362_v21, %v957_v40 }
 0x328   : > { %v2205_v19 = vpop.permute.xlu2 %2204 }
 0x329   : > { %v2238_v8 = vsub.f32 %v4049_v37, %v2205_v19 }
 0x32b   : > { %v2247_v30 = vmul.f32 1.442695, %v2238_v8  ;;  %v958_v8 = vld [vmem:[#allocation4 + $0x28] sm:$0xff] }
 0x32c   : > { %v857_v54 = vpop.xlane.xlu0 %856 }
 0x32d   : > { %3525 = vpow2.f32 %v2247_v30  ;;  %v871_v2 = vadd.f32 %v857_v54, %v839_v63  ;;  %v1006_v63 = vmul.f32 %v989_v52, %v958_v8 }
 0x32e   : > { %3527 = vpow2.f32 %v1231_v56  ;;  %v828_v56 = vld [vmem:[#allocation3 + $0x8] sm:$0xff] }
 0x32f   : > { %880 = vst.msk [vmem:[#allocation3 + $0x20] sm:$0xff] %vm482_vm2, %v871_v2  ;;  %3529 = vpow2.f32 %v1227_v43 }
 0x331   : > { %1272 = vperm.xlu1 %3416, %v4493_v28   ;;  %2219 = vperm.xlu0 %3415, %v4324_v25  }
 0x333   : > { %v4515_v37 = vpop.eup %3525  ;;  %3171 = vmatmul.msk.bf16.gmra.mxu1 %vm547_vm0, %v3911_v36 }
 0x334   : > { %v2318_v22 = vpack.c.bf16 %v4515_v37, %v4513_v32  ;;  %v4523_v20 = vpop.eup %3527 }
 0x335   : > { %v4542_v2 = vpop.eup %3529 }
 0x337   : > { %853 = vadd.xlane.f32.xlu2 %v852_v61  ;;  %v836_v61 = vmul.f32 %v4226_v15, %v828_v56 }
 0x339   : > { %1474 = vperm.xlu1 %3416, %v4523_v20   ;;  %2234 = vperm.xlu0 %3415, %v4393_v26  }
 0x33d   : > { %v943_v36 = vpop.f32.mrf.mxu1 }
 0x33e   : > { %v1013_v19 = vadd.f32 %v1005_v6, %v943_v36 }
 0x33f   : > { %v4561_v0 = vpop.permute.xlu0 %1267 }
 0x340   : > { %1021 = vst.msk [vmem:[#allocation4 + $0x20] sm:$0xff] %vm547_vm0, %v1013_v19  ;;  %v851_v13 = vpop.xlane.xlu1 %850 }
 0x341   : > { %v869_v30 = vadd.f32 %v851_v13, %v837_v5  ;;  %2214 = vperm.xlu1 %3416, %v4349_v46   ;;  %v2281_v13 = vsel %vm706_vm1, %v4515_v37, 0.0 }
 0x343   : > { %878 = vst.msk [vmem:[#allocation3 + $0x10] sm:$0xff] %vm482_vm2, %v869_v30  ;;  %3172 = vmatmul.msk.bf16.gmra.mxu1 %vm547_vm0, %v3907_v33 }
 0x345   : > { %v945_v54 = vpop.f32.mrf.mxu1 }
 0x346   : > { %v1014_v21 = vadd.f32 %v1006_v63, %v945_v54  ;;  %v861_v63 = vsel %vm706_vm1, %v4460_v41, 0.0 }
 0x348   : > { %1022 = vst.msk [vmem:[#allocation4 + $0x28] sm:$0xff] %vm547_vm0, %v1014_v21 }
 0x349   : > { %2229 = vperm.xlu1 %3416, %v4432_v60  }
 0x34f   : > { %1262 = vperm.xlu2 %3414, %v4437_v12   ;;  %v1289_v12 = vmul.f32 1.442695, %v1278_v55 }
 0x357   : > { %1464 = vperm.xlu2 %3414, %v4542_v2  }
 0x358   : > { %v1258_v31 = vpop.permute.xlu1 %1257 }
 0x359   : > { %v1279_v33 = vsub.f32 %v4249_v35, %v1258_v31  ;;  %v960_v31 = vld [vmem:[#allocation4 + $0x38] sm:$0xff] }
 0x35b   : > { %v1291_v52 = vmul.f32 1.442695, %v1279_v33  ;;  %v1008_v33 = vmul.f32 %v4429_v50, %v960_v31  ;;  %v1233_v50 = vmul.f32 1.442695, %v1218_v57 }
 0x35d   : > { %3531 = vpow2.f32 %v1291_v52  ;;  %v4566_v8 = vpop.permute.xlu0 %1469  ;;  %v832_v52 = vld [vmem:[#allocation3 + $0x28] sm:$0xff] }
 0x35e   : > { %3533 = vpow2.f32 %v1289_v12 }
 0x360   : > { %v4571_v43 = vpop.permute.xlu1 %1459 }
 0x361   : > { %v848_v40 = vpop.xlane.xlu2 %847 }
 0x362   : > { %v868_v6 = vadd.f32 %v848_v40, %v836_v61 }
 0x363   : > { %1320 = vadd.xlane.f32.xlu0 %v1319_v4  ;;  %v4552_v16 = vpop.eup %3531  ;;  %v834_v4 = vld [vmem:[#allocation3 + $0x38] sm:$0xff] }
 0x364   : > { %877 = vst.msk [vmem:[#allocation3 + $0x8] sm:$0xff] %vm482_vm2, %v868_v6  ;;  %v1328_v15 = vsel %vm706_vm1, %v4552_v16, 0.0  ;;  %v4557_v42 = vpop.eup %3533  ;;  %v840_v6 = vmul.f32 %v4342_v24, %v832_v52  ;;  %v842_v55 = vmul.f32 %v4291_v29, %v834_v4  ;;  %v1434_v24 = vld [vmem:[#allocation4 + $0x40] sm:$0xff]  ;;  %v1435_v29 = vld [vmem:[#allocation4 + $0x48] sm:$0xff] }
 0x365   : > { %v2210_v56 = vpop.permute.xlu0 %2209 }
 0x369   : > { %v1248_v35 = vpop.permute.xlu2 %1247 }
 0x36a   : > { %v1277_v59 = vsub.f32 %v4193_v58, %v1248_v35  ;;  %v959_v58 = vld [vmem:[#allocation4 + $0x30] sm:$0xff] }
 0x36b   : > { %1329 = vadd.xlane.f32.xlu0 %v1328_v15  ;;  %v1007_v30 = vmul.f32 %v4458_v45, %v959_v58 }
 0x36c   : > { %v1287_v36 = vmul.f32 1.442695, %v1277_v59  ;;  %v1482_v59 = vmul.f32 %v4525_v11, %v1434_v24 }
 0x36e   : > { %3535 = vpow2.f32 %v1287_v36 }
 0x36f   : > { %3537 = vpow2.f32 %v1233_v50 }
 0x374   : > { %v3536_v19 = vpop.eup %3535 }
 0x375   : > { %v1322_v5 = vsel %vm706_vm1, %v3536_v19, 0.0  ;;  %v1357_v3 = vpack.c.bf16 %v4557_v42, %v3536_v19  ;;  %v4585_v36 = vpop.eup %3537 }
 0x376   : > { %1323 = vadd.xlane.f32.xlu1 %v1322_v5  ;;  %v1450_v5 = vpop.permute.xlu2 %1449 }
 0x377   : > { %3150 = vmatmul.msk.bf16.gmra.mxu3 %vm706_vm1, %v1357_v3  ;;  %v1483_v28 = vmul.f32 %v1450_v5, %v1435_v29  ;;  %v1281_v5 = vsub.f32 %v4273_v7, %v4561_v0 }
 0x37e   : > { %2282 = vadd.xlane.f32.xlu1 %v2281_v13  ;;  %v830_v13 = vld [vmem:[#allocation3 + $0x18] sm:$0xff] }
 0x37f   : > { %v838_v11 = vmul.f32 %v4235_v23, %v830_v13 }
 0x380   : > { %862 = vadd.xlane.f32.xlu2 %v861_v63  ;;  %v948_v54 = vpop.f32.mrf.mxu1 }
 0x381   : > { %v1015_v21 = vadd.f32 %v1007_v30, %v948_v54 }
 0x383   : > { %1023 = vst.msk [vmem:[#allocation4 + $0x30] sm:$0xff] %vm547_vm0, %v1015_v21 }
 0x388   : > { %v950_v61 = vpop.f32.mrf.mxu1 }
 0x389   : > { %v1016_v40 = vadd.f32 %v1008_v33, %v950_v61 }
 0x38b   : > { %1024 = vst.msk [vmem:[#allocation4 + $0x38] sm:$0xff] %vm547_vm0, %v1016_v40  ;;  %v860_v45 = vpop.xlane.xlu1 %859 }
 0x38c   : > { %v872_v41 = vadd.f32 %v860_v45, %v840_v6 }
 0x38e   : > { %881 = vst.msk [vmem:[#allocation3 + $0x28] sm:$0xff] %vm482_vm2, %v872_v41 }
 0x390   : > { %v866_v12 = vpop.xlane.xlu0 %865  ;;  %v4590_v63 = vpop.f32.mrf.mxu1 }
 0x391   : > { %v874_v35 = vadd.f32 %v866_v12, %v842_v55 }
 0x393   : > { %883 = vst.msk [vmem:[#allocation3 + $0x38] sm:$0xff] %vm482_vm2, %v874_v35 }
 0x398   : > { %2224 = vperm.xlu2 %3414, %v4384_v9   ;;  %v4599_v45 = vpop.f32.mrf.mxu1 }
 0x39e   : > { %v1413_v15 = vpop.f32.mrf.mxu3 }
 0x39f   : > { %v1490_v19 = vadd.f32 %v1482_v59, %v1413_v15 }
 0x3a0   : > { %1479 = vperm.xlu2 %3414, %v4585_v36  }
 0x3a1   : > { %1498 = vst.msk [vmem:[#allocation4 + $0x40] sm:$0xff] %vm547_vm0, %v1490_v19  ;;  %v4611_v19 = vpop.f32.mrf.mxu1 }
 0x3a3   : > { %v1273_v3 = vpop.permute.xlu1 %1272  ;;  %v2220_v54 = vpop.permute.xlu0 %2219 }
 0x3a4   : > { %v1282_v62 = vsub.f32 %v4401_v49, %v1273_v3  ;;  %v2239_v49 = vsub.f32 %v4069_v39, %v2210_v56  ;;  %v2241_v55 = vsub.f32 %v4215_v10, %v2220_v54  ;;  %v1663_v39 = vsel %vm706_vm1, %v4599_v45, -inf }
 0x3a5   : > { %v1316_v54 = vsel %vm706_vm1, %v4479_v14, 0.0 }
 0x3a6   : > { %v1297_v57 = vmul.f32 1.442695, %v1282_v62  ;;  %v1415_v58 = vpop.f32.mrf.mxu3  ;;  %v2249_v40 = vmul.f32 1.442695, %v2239_v49  ;;  %v2253_v56 = vmul.f32 1.442695, %v2241_v55 }
 0x3a7   : > { %v1491_v30 = vadd.f32 %v1483_v28, %v1415_v58  ;;  %v1295_v62 = vmul.f32 1.442695, %v1281_v5  ;;  %v2278_v58 = vsel %vm706_vm1, %v4513_v32, 0.0  ;;  %v2263_v5 = vld [vmem:[#allocation3 + $0xc8] sm:$0xff] }
 0x3a8   : > { %3539 = vpow2.f32 %v1297_v57 }
 0x3a9   : > { %1499 = vst.msk [vmem:[#allocation4 + $0x48] sm:$0xff] %vm547_vm0, %v1491_v30  ;;  %3541 = vpow2.f32 %v2249_v40  ;;  %v4628_v7 = vpop.f32.mrf.mxu1  ;;  %v1666_v40 = vsel %vm706_vm1, %v4611_v19, -inf }
 0x3aa   : > { %v854_v21 = vpop.xlane.xlu2 %853 }
 0x3ab   : > { %v870_v31 = vadd.f32 %v854_v21, %v838_v11  ;;  %v4594_v33 = vpop.permute.xlu1 %1474  ;;  %v2235_v4 = vpop.permute.xlu0 %2234 }
 0x3ac   : > { %v2244_v35 = vsub.f32 %v4279_v34, %v2235_v4 }
 0x3ad   : > { %879 = vst.msk [vmem:[#allocation3 + $0x18] sm:$0xff] %vm482_vm2, %v870_v31  ;;  %v1301_v31 = vld [vmem:[#allocation3 + $0x48] sm:$0xff] }
 0x3ae   : > { %v3540_v52 = vpop.eup %3539  ;;  %v2259_v50 = vmul.f32 1.442695, %v2244_v35  ;;  %v1309_v49 = vmul.f32 %v4469_v51, %v1301_v31  ;;  %v2174_v51 = vsub.f32 %v4245_v27, %v4252_v38  ;;  %v5147_v35 = vld [vmem:[#allocation8_spill] sm:$0xff]  ;;  %v1660_v27 = vsel %vm706_vm1, %v4590_v63, -inf }
 0x3af   : > { %v1337_v61 = vsel %vm706_vm1, %v3540_v52, 0.0  ;;  %v4608_v59 = vpop.eup %3541  ;;  %v5148_v38 = vld [vmem:[#allocation16_spill] sm:$0xff] }
 0x3b0   : > { %1338 = vadd.xlane.f32.xlu0 %v1337_v61 }
 0x3b1   : > { %v4639_v21 = vpop.f32.mrf.mxu1 }
 0x3b2   : > { %v1263_v6 = vpop.permute.xlu2 %1262 }
 0x3b3   : > { %v1280_v41 = vsub.f32 %v4265_v48, %v1263_v6  ;;  %v4602_v23 = vpop.permute.xlu1 %2214 }
 0x3b5   : > { %v1293_v12 = vmul.f32 1.442695, %v1280_v41  ;;  %v1304_v41 = vld [vmem:[#allocation3 + $0x60] sm:$0xff] }
 0x3b6   : > { %v1312_v4 = vmul.f32 %v4542_v2, %v1304_v41  ;;  %v1302_v2 = vld [vmem:[#allocation3 + $0x50] sm:$0xff] }
 0x3b7   : > { %3543 = vpow2.f32 %v1293_v12 }
 0x3b8   : > { %1664 = vmax.xlane.f32.xlu0 %v1663_v39  ;;  %3545 = vpow2.f32 %v2253_v56  ;;  %v2240_v39 = vsub.f32 %v5147_v35, %v4602_v23  ;;  %v1669_v35 = vsel %vm706_vm1, %v4628_v7, -inf }
 0x3b9   : > { %3547 = vpow2.f32 %v2259_v50  ;;  %v4647_v14 = vpop.f32.mrf.mxu1  ;;  %v2183_v50 = vmul.f32 1.442695, %v2174_v51 }
 0x3ba   : > { %v1675_v12 = vsel %vm706_vm1, %v4647_v14, -inf }
 0x3bb   : > { %v2230_v24 = vpop.permute.xlu1 %2229 }
 0x3bc   : > { %v2243_v48 = vsub.f32 %v4270_v53, %v2230_v24  ;;  %v2284_v53 = vsel %vm706_vm1, %v4608_v59, 0.0  ;;  %v2251_v24 = vmul.f32 1.442695, %v2240_v39 }
 0x3bd   : > { %v3544_v15 = vpop.eup %3543 }
 0x3be   : > { %v2257_v10 = vmul.f32 1.442695, %v2243_v48  ;;  %v1331_v29 = vsel %vm706_vm1, %v3544_v15, 0.0  ;;  %v1358_v34 = vpack.c.bf16 %v3544_v15, %v4552_v16  ;;  %v4620_v3 = vpop.eup %3545  ;;  %v1310_v48 = vmul.f32 %v5148_v38, %v1302_v2 }
 0x3bf   : > { %1332 = vadd.xlane.f32.xlu1 %v1331_v29  ;;  %v4622_v28 = vpop.eup %3547  ;;  %v2290_v16 = vsel %vm706_vm1, %v4620_v3, 0.0 }
 0x3c0   : > { %3549 = vpow2.f32 %v2257_v10  ;;  %3151 = vmatmul.msk.bf16.gmra.mxu3 %vm706_vm1, %v1358_v34  ;;  %2285 = vadd.xlane.f32.xlu0 %v2284_v53  ;;  %v2299_v30 = vsel %vm706_vm1, %v4622_v28, 0.0  ;;  %v4661_v10 = vpop.permute.xlu2 %1464  ;;  %v833_v53 = vld [vmem:[#allocation3 + $0x30] sm:$0xff] }
 0x3c1   : > { %3551 = vpow2.f32 %v1295_v62 }
 0x3c2   : > { %3553 = vpow2.f32 %v2183_v50 }
 0x3c3   : > { %3555 = vpow2.f32 %v2251_v24 }
 0x3c6   : > { %v4624_v57 = vpop.eup %3549 }
 0x3c7   : > { %2291 = vadd.xlane.f32.xlu1 %v2290_v16  ;;  %v2321_v0 = vpack.c.bf16 %v4622_v28, %v4624_v57  ;;  %v3552_v13 = vpop.eup %3551 }
 0x3c8   : > { %v1359_v11 = vpack.c.bf16 %v3540_v52, %v3552_v13  ;;  %v1325_v52 = vsel %vm706_vm1, %v4557_v42, 0.0  ;;  %v1334_v42 = vsel %vm706_vm1, %v3552_v13, 0.0  ;;  %v4663_v29 = vpop.eup %3553 }
 0x3c9   : > { %2279 = vadd.xlane.f32.xlu2 %v2278_v58  ;;  %v4666_v34 = vpop.eup %3555  ;;  %v2271_v16 = vmul.f32 %v4663_v29, %v2263_v5 }
 0x3ca   : > { %v2287_v62 = vsel %vm706_vm1, %v4666_v34, 0.0 }
 0x3cf   : > { %2300 = vadd.xlane.f32.xlu1 %v2299_v30  ;;  %v5149_v30 = vld [vmem:[#allocation15_spill] sm:$0xff] }
 0x3d0   : > { %3152 = vmatmul.msk.bf16.gmra.mxu3 %vm706_vm1, %v1359_v11  ;;  %v841_v11 = vmul.f32 %v5149_v30, %v833_v53 }
 0x3d1   : > { %1317 = vadd.xlane.f32.xlu2 %v1316_v54 }
 0x3d6   : > { %v1321_v61 = vpop.xlane.xlu0 %1320 }
 0x3d7   : > { %v1341_v6 = vadd.f32 %v1321_v61, %v1309_v49  ;;  %1667 = vmax.xlane.f32.xlu1 %v1666_v40  ;;  %v1436_v49 = vld [vmem:[#allocation4 + $0x50] sm:$0xff]  ;;  %v2296_v61 = vsel %vm706_vm1, %v4624_v57, 0.0 }
 0x3d8   : > { %v1484_v40 = vmul.f32 %v4501_v17, %v1436_v49 }
 0x3d9   : > { %1349 = vst.msk [vmem:[#allocation3 + $0x48] sm:$0xff] %vm482_vm2, %v1341_v6  ;;  %1326 = vadd.xlane.f32.xlu2 %v1325_v52 }
 0x3de   : > { %v1330_v55 = vpop.xlane.xlu0 %1329 }
 0x3df   : > { %v1344_v56 = vadd.f32 %v1330_v55, %v1312_v4  ;;  %1676 = vmax.xlane.f32.xlu1 %v1675_v12  ;;  %v5150_v4 = vld [vmem:[#allocation12_spill] sm:$0xff]  ;;  %v1437_v55 = vld [vmem:[#allocation4 + $0x58] sm:$0xff] }
 0x3e0   : > { %v1485_v39 = vmul.f32 %v4571_v43, %v1437_v55  ;;  %v1672_v43 = vsel %vm706_vm1, %v4639_v21, -inf }
 0x3e1   : > { %1352 = vst.msk [vmem:[#allocation3 + $0x60] sm:$0xff] %vm482_vm2, %v1344_v56  ;;  %1335 = vadd.xlane.f32.xlu2 %v1334_v42  ;;  %v4682_v42 = vpop.f32.mrf.mxu1 }
 0x3e2   : > { %v1678_v2 = vsel %vm706_vm1, %v4682_v42, -inf }
 0x3e9   : > { %1661 = vmax.xlane.f32.xlu2 %v1660_v27  ;;  %v1324_v15 = vpop.xlane.xlu1 %1323  ;;  %v4693_v27 = vpop.f32.mrf.mxu1 }
 0x3ea   : > { %v1342_v23 = vadd.f32 %v1324_v15, %v1310_v48  ;;  %v1681_v38 = vsel %vm706_vm1, %v4693_v27, -inf  ;;  %v3265_v48 = vld [vmem:[%s3830_s27 + $0x8] sm:$0xff]  ;;  %v1307_v15 = vld [vmem:[#allocation3 + $0x78] sm:$0xff] }
 0x3eb   : > { %v1315_v53 = vmul.f32 %v4585_v36, %v1307_v15 }
 0x3ec   : > { %1350 = vst.msk [vmem:[#allocation3 + $0x50] sm:$0xff] %vm482_vm2, %v1342_v23  ;;  %v5151_v23 = vld [vmem:[#allocation11_spill] sm:$0xff] }
 0x3ed   : > { %v2175_v5 = vsub.f32 %v5151_v23, %v4263_v47 }
 0x3f1   : > { %2288 = vadd.xlane.f32.xlu2 %v2287_v62  ;;  %v2283_v58 = vpop.xlane.xlu1 %2282 }
 0x3f2   : > { %v2303_v13 = vadd.f32 %v2283_v58, %v2271_v16  ;;  %v2185_v58 = vmul.f32 1.442695, %v2175_v5 }
 0x3f3   : > { %v863_v54 = vpop.xlane.xlu2 %862 }
 0x3f4   : > { %2311 = vst.msk [vmem:[#allocation3 + $0xc8] sm:$0xff] %vm482_vm2, %v2303_v13  ;;  %v873_v31 = vadd.f32 %v863_v54, %v841_v11  ;;  %v5152_v13 = vld [vmem:[#allocation13_spill] sm:$0xff]  ;;  %v3264_v11 = vld [vmem:[%s3830_s27] sm:$0xff]  ;;  %v5153_v54 = vld [vmem:[#allocation10_spill] sm:$0xff] }
 0x3f5   : > { %v2177_v30 = vsub.f32 %v5152_v13, %v4324_v25  ;;  %v1438_v13 = vld [vmem:[#allocation4 + $0x60] sm:$0xff] }
 0x3f6   : > { %882 = vst.msk [vmem:[#allocation3 + $0x30] sm:$0xff] %vm482_vm2, %v873_v31  ;;  %v5154_v31 = vld [vmem:[#allocation9_spill] sm:$0xff] }
 0x3f7   : > { %v2173_v49 = vsub.f32 %v5154_v31, %v5153_v54  ;;  %v1486_v54 = vmul.f32 %v4661_v10, %v1438_v13 }
 0x3f9   : > { %2297 = vadd.xlane.f32.xlu2 %v2296_v61  ;;  %v4708_v61 = vld [vmem:[#allocation2 + $0x88] sm:$0xff]  ;;  %v2181_v36 = vmul.f32 1.442695, %v2173_v49 }
 0x3fa   : > { %v1418_v6 = vpop.f32.mrf.mxu3 }
 0x3fb   : > { %v1492_v52 = vadd.f32 %v1484_v40, %v1418_v6  ;;  %v2225_v41 = vpop.permute.xlu2 %2224  ;;  %v2189_v40 = vmul.f32 1.442695, %v2177_v30  ;;  %v1300_v30 = vld [vmem:[#allocation3 + $0x40] sm:$0xff] }
 0x3fc   : > { %v2242_v51 = vsub.f32 %v5150_v4, %v2225_v41  ;;  %v5155_v41 = vld [vmem:[#allocation18_spill] sm:$0xff] }
 0x3fd   : > { %1500 = vst.msk [vmem:[#allocation4 + $0x50] sm:$0xff] %vm547_vm0, %v1492_v52  ;;  %v1305_v52 = vld [vmem:[#allocation3 + $0x68] sm:$0xff]  ;;  %v2180_v4 = vsub.f32 %v5155_v41, %v4393_v26 }
 0x3fe   : > { %v2255_v12 = vmul.f32 1.442695, %v2242_v51  ;;  %v2264_v51 = vld [vmem:[#allocation3 + $0xd0] sm:$0xff]  ;;  %v1313_v55 = vmul.f32 %v4447_v18, %v1305_v52  ;;  %v2262_v18 = vld [vmem:[#allocation3 + $0xc0] sm:$0xff] }
 0x400   : > { %3557 = vpow2.f32 %v2255_v12 }
 0x401   : > { %1670 = vmax.xlane.f32.xlu2 %v1669_v35  ;;  %3559 = vpow2.f32 %v2185_v58  ;;  %v2269_v58 = vld [vmem:[#allocation3 + $0xf8] sm:$0xff] }
 0x402   : > { %v1420_v56 = vpop.f32.mrf.mxu3  ;;  %3561 = vpow2.f32 %v2189_v40 }
 0x403   : > { %v1493_v17 = vadd.f32 %v1485_v39, %v1420_v56  ;;  %3563 = vpow2.f32 %v2181_v36  ;;  %v2195_v56 = vmul.f32 1.442695, %v2180_v4 }
 0x405   : > { %1501 = vst.msk [vmem:[#allocation4 + $0x58] sm:$0xff] %vm547_vm0, %v1493_v17  ;;  %v4723_v17 = vpop.permute.xlu2 %1479  ;;  %3565 = vpow2.f32 %v2195_v56 }
 0x406   : > { %v4685_v50 = vpop.eup %3557 }
 0x407   : > { %v2293_v24 = vsel %vm706_vm1, %v4685_v50, 0.0  ;;  %v4717_v25 = vpop.eup %3559 }
 0x408   : > { %2294 = vadd.xlane.f32.xlu0 %v2293_v24  ;;  %v2272_v39 = vmul.f32 %v4717_v25, %v2264_v51  ;;  %v1439_v51 = vld [vmem:[#allocation4 + $0x68] sm:$0xff] }
 0x409   : > { %1679 = vmax.xlane.f32.xlu2 %v1678_v2  ;;  %v1487_v10 = vmul.f32 %v4566_v8, %v1439_v51  ;;  %v4755_v8 = vld [vmem:[#allocation2 + $0xa8] sm:$0xff] }
 0x410   : > { %1673 = vmax.xlane.f32.xlu0 %v1672_v43  ;;  %v4726_v43 = vpop.eup %3561 }
 0x411   : > { %v4729_v26 = vpop.eup %3563 }
 0x412   : > { %v2270_v5 = vmul.f32 %v4729_v26, %v2262_v18 }
 0x418   : > { %1682 = vmax.xlane.f32.xlu0 %v1681_v38  ;;  %v2266_v38 = vld [vmem:[#allocation3 + $0xe0] sm:$0xff] }
 0x421   : > { %2344 = vrot.lane.b32.xlu2 %v3265_v48, %s3711_s29  ;;  %v2274_v48 = vmul.f32 %v4726_v43, %v2266_v38 }
 0x423   : > { %v1339_v62 = vpop.xlane.xlu0 %1338 }
 0x424   : > { %v1347_v16 = vadd.f32 %v1339_v62, %v1315_v53 }
 0x426   : > { %1355 = vst.msk [vmem:[#allocation3 + $0x78] sm:$0xff] %vm482_vm2, %v1347_v16  ;;  %v4734_v16 = vpop.eup %3565 }
 0x42b   : > { %v1665_v6 = vpop.xlane.xlu0 %1664 }
 0x42c   : > { %2342 = vrot.lane.b32.xlu0 %v3264_v11, %s3711_s29  ;;  %v4712_v47 = vmax.f32 %v4708_v61, %v1665_v6  ;;  %v2277_v11 = vmul.f32 %v4734_v16, %v2269_v58  ;;  %v5156_v6 = vld [vmem:[#allocation19_spill] sm:$0xff] }
 0x42d   : > { %v1308_v36 = vmul.f32 %v5156_v6, %v1300_v30 }
 0x42e   : > { %1988 = vst.msk [vmem:[#allocation2 + $0x88] sm:$0xff] %vm482_vm2, %v4712_v47  ;;  %1723 = vperm.xlu2 %3414, %v4712_v47  }
 0x432   : > { %v1333_v12 = vpop.xlane.xlu1 %1332 }
 0x433   : > { %v1345_v35 = vadd.f32 %v1333_v12, %v1313_v55  ;;  %v2286_v24 = vpop.xlane.xlu0 %2285  ;;  %v4743_v55 = vld [vmem:[#allocation2 + $0x90] sm:$0xff]  ;;  %v1303_v12 = vld [vmem:[#allocation3 + $0x58] sm:$0xff] }
 0x434   : > { %v2304_v2 = vadd.f32 %v2286_v24, %v2272_v39  ;;  %v1311_v24 = vmul.f32 %v4450_v44, %v1303_v12 }
 0x435   : > { %1353 = vst.msk [vmem:[#allocation3 + $0x68] sm:$0xff] %vm482_vm2, %v1345_v35 }
 0x436   : > { %2312 = vst.msk [vmem:[#allocation3 + $0xd0] sm:$0xff] %vm482_vm2, %v2304_v2 }
 0x43a   : > { %v2292_v15 = vpop.xlane.xlu1 %2291 }
 0x43b   : > { %v2306_v23 = vadd.f32 %v2292_v15, %v2274_v48  ;;  %v1440_v48 = vld [vmem:[#allocation4 + $0x70] sm:$0xff] }
 0x43c   : > { %v2280_v53 = vpop.xlane.xlu2 %2279  ;;  %v1306_v15 = vld [vmem:[#allocation3 + $0x70] sm:$0xff] }
 0x43d   : > { %2314 = vst.msk [vmem:[#allocation3 + $0xe0] sm:$0xff] %vm482_vm2, %v2306_v23  ;;  %v2302_v62 = vadd.f32 %v2280_v53, %v2270_v5  ;;  %v3267_v23 = vld [vmem:[%s3830_s27 + $0x18] sm:$0xff]  ;;  %v5157_v5 = vld [vmem:[#allocation14_spill] sm:$0xff]  ;;  %v1488_v53 = vmul.f32 %v4594_v33, %v1440_v48  ;;  %v1314_v30 = vmul.f32 %v4523_v20, %v1306_v15  ;;  %v2179_v33 = vsub.f32 %v4427_v1, %v4432_v60 }
 0x43e   : > { %v2176_v44 = vsub.f32 %v5157_v5, %v4349_v46  ;;  %v1441_v46 = vld [vmem:[#allocation4 + $0x78] sm:$0xff]  ;;  %v1693_v1 = vsub.f32 %v4708_v61, %v4712_v47  ;;  %v2268_v61 = vld [vmem:[#allocation3 + $0xf0] sm:$0xff] }
 0x43f   : > { %2310 = vst.msk [vmem:[#allocation3 + $0xc0] sm:$0xff] %vm482_vm2, %v2302_v62  ;;  %v1489_v20 = vmul.f32 %v4723_v17, %v1441_v46  ;;  %v2265_v60 = vld [vmem:[#allocation3 + $0xd8] sm:$0xff] }
 0x442   : > { %v2301_v31 = vpop.xlane.xlu1 %2300 }
 0x443   : > { %v2309_v49 = vadd.f32 %v2301_v31, %v2277_v11  ;;  %v1423_v40 = vpop.f32.mrf.mxu3 }
 0x444   : > { %v1494_v52 = vadd.f32 %v1486_v54, %v1423_v40  ;;  %v1318_v41 = vpop.xlane.xlu2 %1317  ;;  %v1652_v40 = vld [vmem:[#allocation2 + $0x80] sm:$0xff] }
 0x445   : > { %2317 = vst.msk [vmem:[#allocation3 + $0xf8] sm:$0xff] %vm482_vm2, %v2309_v49  ;;  %v1340_v4 = vadd.f32 %v1318_v41, %v1308_v36  ;;  %v2187_v49 = vmul.f32 1.442695, %v2176_v44 }
 0x446   : > { %1502 = vst.msk [vmem:[#allocation4 + $0x60] sm:$0xff] %vm547_vm0, %v1494_v52 }
 0x447   : > { %1348 = vst.msk [vmem:[#allocation3 + $0x40] sm:$0xff] %vm482_vm2, %v1340_v4  ;;  %3567 = vpow2.f32 %v2187_v49  ;;  %v2193_v4 = vmul.f32 1.442695, %v2179_v33 }
 0x449   : > { %3569 = vpow2.f32 %v2193_v4 }
 0x44a   : > { %v1668_v35 = vpop.xlane.xlu1 %1667 }
 0x44b   : > { %v4747_v39 = vmax.f32 %v4743_v55, %v1668_v35  ;;  %v1425_v56 = vpop.f32.mrf.mxu3  ;;  %v3266_v35 = vld [vmem:[%s3830_s27 + $0x10] sm:$0xff] }
 0x44c   : > { %v1495_v2 = vadd.f32 %v1487_v10, %v1425_v56  ;;  %v1327_v38 = vpop.xlane.xlu2 %1326  ;;  %v1702_v56 = vmul.f32 1.442695, %v1693_v1 }
 0x44d   : > { %1989 = vst.msk [vmem:[#allocation2 + $0x90] sm:$0xff] %vm482_vm2, %v4747_v39  ;;  %v1343_v18 = vadd.f32 %v1327_v38, %v1311_v24  ;;  %1728 = vperm.xlu0 %3415, %v4747_v39   ;;  %v4776_v12 = vpop.eup %3567 }
 0x44e   : > { %1503 = vst.msk [vmem:[#allocation4 + $0x68] sm:$0xff] %vm547_vm0, %v1495_v2  ;;  %v2273_v10 = vmul.f32 %v4776_v12, %v2265_v60  ;;  %v2551_v4 = vld [vmem:[#allocation3 + $0x40] sm:$0xff] }
 0x44f   : > { %1351 = vst.msk [vmem:[#allocation3 + $0x58] sm:$0xff] %vm482_vm2, %v1343_v18  ;;  %v4785_v38 = vpop.eup %3569  ;;  %v5158_v18 = vld [vmem:[#allocation17_spill] sm:$0xff] }
 0x450   : > { %v2178_v48 = vsub.f32 %v5158_v18, %v4384_v9  ;;  %v2276_v15 = vmul.f32 %v4785_v38, %v2268_v61  ;;  %v1694_v9 = vsub.f32 %v4743_v55, %v4747_v39  ;;  %v2484_v55 = vld [vmem:[#allocation3 + $0x28] sm:$0xff] }
 0x452   : > { %v1677_v62 = vpop.xlane.xlu1 %1676  ;;  %v2191_v5 = vmul.f32 1.442695, %v2178_v48 }
 0x453   : > { %v4762_v58 = vmax.f32 %v4755_v8, %v1677_v62  ;;  %v1428_v13 = vpop.f32.mrf.mxu3  ;;  %v2481_v62 = vld [vmem:[#allocation3 + $0x10] sm:$0xff] }
 0x454   : > { %v1496_v11 = vadd.f32 %v1488_v53, %v1428_v13  ;;  %v1336_v54 = vpop.xlane.xlu2 %1335  ;;  %v1655_v53 = vld [vmem:[#allocation2 + $0x98] sm:$0xff] }
 0x455   : > { %1992 = vst.msk [vmem:[#allocation2 + $0xa8] sm:$0xff] %vm482_vm2, %v4762_v58  ;;  %v1346_v31 = vadd.f32 %v1336_v54, %v1314_v30  ;;  %2348 = vrot.lane.b32.xlu0 %v3267_v23, %s3711_s29  ;;  %v2267_v54 = vld [vmem:[#allocation3 + $0xe8] sm:$0xff] }
 0x456   : > { %1504 = vst.msk [vmem:[#allocation4 + $0x70] sm:$0xff] %vm547_vm0, %v1496_v11  ;;  %v1704_v11 = vmul.f32 1.442695, %v1694_v9 }
 0x457   : > { %1354 = vst.msk [vmem:[#allocation3 + $0x70] sm:$0xff] %vm482_vm2, %v1346_v31 }
 0x45b   : > { %v1430_v6 = vpop.f32.mrf.mxu3 }
 0x45c   : > { %v1497_v36 = vadd.f32 %v1489_v20, %v1430_v6  ;;  %v1662_v52 = vpop.xlane.xlu2 %1661 }
 0x45d   : > { %v1684_v41 = vmax.f32 %v1652_v40, %v1662_v52  ;;  %1743 = vperm.xlu0 %3415, %v4762_v58  }
 0x45e   : > { %1505 = vst.msk [vmem:[#allocation4 + $0x78] sm:$0xff] %vm547_vm0, %v1497_v36  ;;  %v1656_v36 = vld [vmem:[#allocation2 + $0xa0] sm:$0xff] }
 0x45f   : > { %v1692_v51 = vsub.f32 %v1652_v40, %v1684_v41  ;;  %1987 = vst.msk [vmem:[#allocation2 + $0x80] sm:$0xff] %vm482_vm2, %v1684_v41  ;;  %1718 = vperm.xlu1 %3416, %v1684_v41  }
 0x461   : > { %v1700_v17 = vmul.f32 1.442695, %v1692_v51 }
 0x463   : > { %3571 = vpow2.f32 %v1700_v17  ;;  %v1697_v17 = vsub.f32 %v4755_v8, %v4762_v58  ;;  %v2557_v8 = vld [vmem:[#allocation3 + $0x70] sm:$0xff] }
 0x464   : > { %v2289_v24 = vpop.xlane.xlu2 %2288  ;;  %3573 = vpow2.f32 %v1702_v56 }
 0x465   : > { %v2305_v2 = vadd.f32 %v2289_v24, %v2273_v10  ;;  %2411 = vperm.xlu0 %3415, %v4663_v29   ;;  %3575 = vpow2.f32 %v2191_v5  ;;  %v1710_v56 = vmul.f32 1.442695, %v1697_v17  ;;  %v2697_v5 = vld [vmem:[#allocation3 + $0xd0] sm:$0xff] }
 0x466   : > { %3577 = vrcp.f32 %v2481_v62 }
 0x467   : > { %2313 = vst.msk [vmem:[#allocation3 + $0xd8] sm:$0xff] %vm482_vm2, %v2305_v2  ;;  %2346 = vrot.lane.b32.xlu1 %v3266_v35, %s3711_s29  ;;  %3579 = vpow2.f32 %v1704_v11  ;;  %v1659_v35 = vld [vmem:[#allocation2 + $0xb8] sm:$0xff]  ;;  %v2479_v11 = vld [vmem:[#allocation3] sm:$0xff] }
 0x468   : > { %3581 = vrcp.f32 %v2484_v55  ;;  %v2554_v2 = vld [vmem:[#allocation3 + $0x58] sm:$0xff] }
 0x469   : > { %v4787_v47 = vpop.eup %3571  ;;  %3583 = vrcp.f32 %v2551_v4  ;;  %v2552_v4 = vld [vmem:[#allocation3 + $0x48] sm:$0xff] }
 0x46a   : > { %1925 = vperm.xlu2 %3414, %v4787_v47   ;;  %v4794_v44 = vpop.eup %3573 }
 0x46c   : > { %v2298_v23 = vpop.xlane.xlu2 %2297 }
 0x46d   : > { %v2308_v29 = vadd.f32 %v2298_v23, %v2276_v15  ;;  %2426 = vperm.xlu0 %3415, %v4726_v43   ;;  %v4802_v43 = vpop.eup %3575 }
 0x46e   : > { %v2275_v31 = vmul.f32 %v4802_v43, %v2267_v54  ;;  %v3578_v39 = vpop.eup %3577  ;;  %v2483_v54 = vld [vmem:[#allocation3 + $0x20] sm:$0xff] }
 0x46f   : > { %2316 = vst.msk [vmem:[#allocation3 + $0xf0] sm:$0xff] %vm482_vm2, %v2308_v29  ;;  %1930 = vperm.xlu1 %3416, %v4794_v44   ;;  %v4816_v6 = vpop.eup %3579 }
 0x470   : > { %v3582_v51 = vpop.eup %3581 }
 0x471   : > { %v3584_v61 = vpop.eup %3583 }
 0x472   : > { %2406 = vperm.xlu2 %3414, %v4729_v26   ;;  %v4806_v26 = vld [vmem:[#allocation2 + $0xb0] sm:$0xff] }
 0x474   : > { %v1671_v13 = vpop.xlane.xlu2 %1670 }
 0x475   : > { %v1687_v30 = vmax.f32 %v1655_v53, %v1671_v13  ;;  %2441 = vperm.xlu0 %3415, %v4734_v16   ;;  %v2480_v13 = vld [vmem:[#allocation3 + $0x8] sm:$0xff] }
 0x477   : > { %1990 = vst.msk [vmem:[#allocation2 + $0x98] sm:$0xff] %vm482_vm2, %v1687_v30  ;;  %v1695_v20 = vsub.f32 %v1655_v53, %v1687_v30 }
 0x479   : > { %v1706_v52 = vmul.f32 1.442695, %v1695_v20 }
 0x47a   : > { %1733 = vperm.xlu2 %3414, %v1687_v30  }
 0x47b   : > { %v2295_v49 = vpop.xlane.xlu0 %2294  ;;  %3585 = vpow2.f32 %v1706_v52 }
 0x47c   : > { %v2307_v46 = vadd.f32 %v2295_v49, %v2275_v31  ;;  %v1680_v33 = vpop.xlane.xlu2 %1679  ;;  %v2482_v49 = vld [vmem:[#allocation3 + $0x18] sm:$0xff] }
 0x47d   : > { %v4809_v16 = vmax.f32 %v4806_v26, %v1680_v33  ;;  %2515 = vperm.xlu0 %3415, %v3578_v39   ;;  %v2485_v33 = vld [vmem:[#allocation3 + $0x30] sm:$0xff] }
 0x47e   : > { %2315 = vst.msk [vmem:[#allocation3 + $0xe8] sm:$0xff] %vm482_vm2, %v2307_v46 }
 0x47f   : > { %v1698_v40 = vsub.f32 %v4806_v26, %v4809_v16  ;;  %1993 = vst.msk [vmem:[#allocation2 + $0xb0] sm:$0xff] %vm482_vm2, %v4809_v16 }
 0x481   : > { %v4822_v48 = vpop.eup %3585 }
 0x482   : > { %1935 = vperm.xlu2 %3414, %v4816_v6  }
 0x483   : > { %v1674_v41 = vpop.xlane.xlu0 %1673 }
 0x484   : > { %v1688_v1 = vmax.f32 %v1656_v36, %v1674_v41  ;;  %v4840_v31 = vpop.permute.xlu2 %2344 }
 0x485   : > { %2530 = vperm.xlu0 %3415, %v3582_v51  }
 0x486   : > { %v1696_v60 = vsub.f32 %v1656_v36, %v1688_v1  ;;  %1991 = vst.msk [vmem:[#allocation2 + $0xa0] sm:$0xff] %vm482_vm2, %v1688_v1  ;;  %1738 = vperm.xlu1 %3416, %v1688_v1   ;;  %v2553_v36 = vld [vmem:[#allocation3 + $0x50] sm:$0xff] }
 0x488   : > { %v1708_v10 = vmul.f32 1.442695, %v1696_v60  ;;  %v2556_v60 = vld [vmem:[#allocation3 + $0x68] sm:$0xff] }
 0x48a   : > { %3587 = vpow2.f32 %v1708_v10 }
 0x48b   : > { %v1683_v24 = vpop.xlane.xlu0 %1682  ;;  %3589 = vrcp.f32 %v2554_v2  ;;  %v2696_v2 = vld [vmem:[#allocation3 + $0xc8] sm:$0xff] }
 0x48c   : > { %v1691_v18 = vmax.f32 %v1659_v35, %v1683_v24  ;;  %3591 = vpow2.f32 %v1710_v56  ;;  %v1724_v46 = vpop.permute.xlu2 %1723 }
 0x48d   : > { %2577 = vperm.xlu0 %3415, %v3584_v61   ;;  %3593 = vrcp.f32 %v2557_v8  ;;  %v1757_v24 = vsub.f32 %v4599_v45, %v1724_v46  ;;  %v1712_v45 = vmul.f32 1.442695, %v1698_v40  ;;  %v2699_v40 = vld [vmem:[#allocation3 + $0xe0] sm:$0xff] }
 0x48e   : > { %1994 = vst.msk [vmem:[#allocation2 + $0xb8] sm:$0xff] %vm482_vm2, %v1691_v18  ;;  %1940 = vperm.xlu1 %3416, %v4822_v48   ;;  %v1699_v53 = vsub.f32 %v1659_v35, %v1691_v18  ;;  %3595 = vrcp.f32 %v2697_v5  ;;  %v2555_v35 = vld [vmem:[#allocation3 + $0x60] sm:$0xff] }
 0x490   : > { %v4826_v15 = vpop.eup %3587  ;;  %v1714_v9 = vmul.f32 1.442695, %v1699_v53  ;;  %v2558_v53 = vld [vmem:[#allocation3 + $0x78] sm:$0xff] }
 0x491   : > { %1945 = vperm.xlu2 %3414, %v4826_v15   ;;  %v3590_v58 = vpop.eup %3589 }
 0x492   : > { %v4829_v23 = vpop.eup %3591  ;;  %3597 = vpow2.f32 %v1714_v9 }
 0x493   : > { %v3594_v29 = vpop.eup %3593  ;;  %3599 = vrcp.f32 %v2480_v13 }
 0x494   : > { %v3596_v62 = vpop.eup %3595  ;;  %3601 = vrcp.f32 %v2479_v11 }
 0x495   : > { %2592 = vperm.xlu0 %3415, %v3590_v58   ;;  %3603 = vrcp.f32 %v2483_v54 }
 0x496   : > { %1950 = vperm.xlu1 %3416, %v4829_v23   ;;  %3605 = vrcp.f32 %v2482_v49 }
 0x498   : > { %v4836_v30 = vpop.eup %3597 }
 0x499   : > { %1748 = vperm.xlu2 %3414, %v4809_v16  }
 0x49d   : > { %2607 = vperm.xlu0 %3415, %v3594_v29  }
 0x49e   : > { %1753 = vperm.xlu1 %3416, %v1691_v18   ;;  %v4842_v55 = vpop.permute.xlu0 %2342  ;;  %v1766_v18 = vmul.f32 1.442695, %v1757_v24 }
 0x4a1   : > { %2421 = vperm.xlu2 %3414, %v4776_v12   ;;  %v3600_v12 = vpop.eup %3599 }
 0x4a5   : > { %2731 = vperm.xlu0 %3415, %v3596_v62  }
 0x4a6   : > { %2416 = vperm.xlu1 %3416, %v4717_v25   ;;  %v3602_v25 = vpop.eup %3601 }
 0x4a7   : > { %v3604_v39 = vpop.eup %3603 }
 0x4a9   : > { %2436 = vperm.xlu2 %3414, %v4785_v38   ;;  %v2486_v38 = vld [vmem:[#allocation3 + $0x38] sm:$0xff] }
 0x4aa   : > { %3607 = vrcp.f32 %v2486_v38 }
 0x4ab   : > { %3609 = vrcp.f32 %v2485_v33 }
 0x4ac   : > { %3611 = vrcp.f32 %v2553_v36 }
 0x4ad   : > { %1960 = vperm.xlu0 %3415, %v4836_v30   ;;  %3613 = vrcp.f32 %v2552_v4 }
 0x4ae   : > { %2431 = vperm.xlu1 %3416, %v4802_v43   ;;  %v3606_v43 = vpop.eup %3605  ;;  %3615 = vrcp.f32 %v2556_v60 }
 0x4af   : > { %3617 = vrcp.f32 %v2555_v35  ;;  %v2319_v35 = vpack.c.bf16 %v4666_v34, %v4608_v59 }
 0x4b0   : > { %v3608_v52 = vpop.eup %3607  ;;  %3619 = vrcp.f32 %v2696_v2 }
 0x4b1   : > { %2510 = vperm.xlu2 %3414, %v3600_v12   ;;  %v3610_v51 = vpop.eup %3609  ;;  %3621 = vpow2.f32 %v1766_v18 }
 0x4b2   : > { %v3612_v17 = vpop.eup %3611 }
 0x4b3   : > { %v3614_v56 = vpop.eup %3613 }
 0x4b4   : > { %v3616_v61 = vpop.eup %3615 }
 0x4b5   : > { %v3618_v9 = vpop.eup %3617 }
 0x4b6   : > { %2505 = vperm.xlu1 %3416, %v3602_v25   ;;  %v3620_v13 = vpop.eup %3619  ;;  %v2695_v25 = vld [vmem:[#allocation3 + $0xc0] sm:$0xff] }
 0x4b9   : > { %2525 = vperm.xlu2 %3414, %v3604_v39  }
 0x4be   : > { %2520 = vperm.xlu1 %3416, %v3606_v43  }
 0x4bf   : > { %v4844_v20 = vpop.permute.xlu0 %1728 }
 0x4c0   : > { %v1758_v16 = vsub.f32 %v4611_v19, %v4844_v20  ;;  %v2698_v19 = vld [vmem:[#allocation3 + $0xd8] sm:$0xff] }
 0x4c1   : > { %2540 = vperm.xlu2 %3414, %v3608_v52  }
 0x4c2   : > { %v1768_v46 = vmul.f32 1.442695, %v1758_v16 }
 0x4c4   : > { %v4846_v41 = vpop.permute.xlu2 %1925 }
 0x4c6   : > { %2535 = vperm.xlu1 %3416, %v3610_v51  }
 0x4c7   : > { %v2349_v1 = vpop.permute.xlu0 %2348 }
 0x4c8   : > { %2370 = vmatpush.bf16.msrb.mxu2 %v2349_v1 }
 0x4c9   : > { %2587 = vperm.xlu2 %3414, %v3612_v17  }
 0x4cc   : > { %v4848_v10 = vpop.permute.xlu2 %2406 }
 0x4ce   : > { %2582 = vperm.xlu1 %3416, %v3614_v56  }
 0x4cf   : > { %v1744_v12 = vpop.permute.xlu0 %1743 }
 0x4d1   : > { %2602 = vperm.xlu2 %3414, %v3616_v61   ;;  %v1719_v8 = vpop.permute.xlu1 %1718 }
 0x4d2   : > { %v1756_v58 = vsub.f32 %v4590_v63, %v1719_v8  ;;  %v4856_v63 = vpop.eup %3621 }
 0x4d4   : > { %v1764_v5 = vmul.f32 1.442695, %v1756_v58  ;;  %v1734_v29 = vpop.permute.xlu2 %1733 }
 0x4d5   : > { %v1759_v62 = vsub.f32 %v4628_v7, %v1734_v29 }
 0x4d6   : > { %3623 = vpow2.f32 %v1764_v5  ;;  %2597 = vperm.xlu1 %3416, %v3618_v9  }
 0x4d7   : > { %3625 = vrcp.f32 %v2558_v53  ;;  %v1770_v11 = vmul.f32 1.442695, %v1759_v62  ;;  %v4870_v36 = vpop.permute.xlu0 %2411 }
 0x4d8   : > { %3627 = vpow2.f32 %v1712_v45 }
 0x4d9   : > { %2726 = vperm.xlu2 %3414, %v3620_v13   ;;  %v2347_v54 = vpop.permute.xlu1 %2346  ;;  %3629 = vpow2.f32 %v1770_v11 }
 0x4da   : > { %2371 = vmatpush.bf16.msrb.mxu2 %v2347_v54  ;;  %3631 = vrcp.f32 %v2695_v25 }
 0x4db   : > { %3633 = vrcp.f32 %v2699_v40  ;;  %v2570_v40 = vld [vmem:[#allocation4 + $0x58] sm:$0xff] }
 0x4dc   : > { %v3624_v49 = vpop.eup %3623  ;;  %v4867_v43 = vpop.permute.xlu2 %1935  ;;  %3635 = vpow2.f32 %v1768_v46  ;;  %v2569_v46 = vld [vmem:[#allocation4 + $0x50] sm:$0xff] }
 0x4dd   : > { %v3626_v38 = vpop.eup %3625  ;;  %v1797_v7 = vsel %vm706_vm1, %v3624_v49, 0.0  ;;  %v1837_v26 = vpack.c.bf16 %v4856_v63, %v3624_v49  ;;  %3637 = vrcp.f32 %v2698_v19 }
 0x4de   : > { %2612 = vperm.xlu1 %3416, %v3626_v38   ;;  %1798 = vadd.xlane.f32.xlu0 %v1797_v7  ;;  %v4864_v39 = vpop.eup %3627 }
 0x4df   : > { %2372 = vmatpush.bf16.msrb.mxu2 %v4840_v31  ;;  %3189 = vmatmul.msk.bf16.vlgmr.msrb.gmra.mxu3 %vm706_vm1, %v1837_v26  ;;  %v3630_v33 = vpop.eup %3629  ;;  %v4879_v60 = vpop.permute.xlu0 %2426 }
 0x4e0   : > { %v3632_v20 = vpop.eup %3631  ;;  %v1806_v31 = vsel %vm706_vm1, %v3630_v33, 0.0 }
 0x4e1   : > { %1955 = vperm.xlu2 %3414, %v4864_v39   ;;  %v3634_v52 = vpop.eup %3633  ;;  %v4882_v32 = vpop.permute.xlu1 %1930 }
 0x4e3   : > { %2373 = vmatpush.bf16.msrb.mxu2 %v4842_v55  ;;  %v3636_v55 = vpop.eup %3635 }
 0x4e4   : > { %v3638_v51 = vpop.eup %3637  ;;  %v1838_v1 = vpack.c.bf16 %v3630_v33, %v3636_v55  ;;  %v1803_v25 = vsel %vm706_vm1, %v3636_v55, 0.0 }
 0x4e6   : > { %3229 = vmatmul.msk.bf16.vlgmr.msrb.gmra.mxu2 %vm706_vm1, %v2318_v22  ;;  %2721 = vperm.xlu1 %3416, %v3632_v20   ;;  %v1761_v22 = vsub.f32 %v4647_v14, %v1744_v12  ;;  %v1800_v12 = vsel %vm706_vm1, %v4856_v63, 0.0 }
 0x4e7   : > { %1807 = vadd.xlane.f32.xlu0 %v1806_v31  ;;  %v4889_v61 = vpop.permute.xlu0 %2441 }
 0x4e8   : > { %v1774_v24 = vmul.f32 1.442695, %v1761_v22  ;;  %v2567_v22 = vld [vmem:[#allocation4 + $0x40] sm:$0xff] }
 0x4e9   : > { %2741 = vperm.xlu2 %3414, %v3634_v52  }
 0x4eb   : > { %v4877_v4 = vpop.permute.xlu2 %1945 }
 0x4ee   : > { %2736 = vperm.xlu1 %3416, %v3638_v51  }
 0x4ef   : > { %3190 = vmatmul.msk.bf16.gmra.mxu3 %vm706_vm1, %v1838_v1  ;;  %v4897_v29 = vpop.permute.xlu0 %2515 }
 0x4f3   : > { %v1749_v37 = vpop.permute.xlu2 %1748 }
 0x4f4   : > { %v1762_v17 = vsub.f32 %v4682_v42, %v1749_v37 }
 0x4f6   : > { %v1776_v56 = vmul.f32 1.442695, %v1762_v17  ;;  %3230 = vmatmul.msk.bf16.gmra.mxu2 %vm706_vm1, %v2319_v35  ;;  %v2568_v17 = vld [vmem:[#allocation4 + $0x48] sm:$0xff] }
 0x4f7   : > { %v4909_v13 = vpop.permute.xlu0 %2530 }
 0x4f8   : > { %3639 = vpow2.f32 %v1776_v56  ;;  %v1739_v2 = vpop.permute.xlu1 %1738 }
 0x4f9   : > { %v1760_v18 = vsub.f32 %v4639_v21, %v1739_v2  ;;  %3641 = vpow2.f32 %v1774_v24  ;;  %v2320_v21 = vpack.c.bf16 %v4685_v50, %v4620_v3 }
 0x4fb   : > { %v1772_v8 = vmul.f32 1.442695, %v1760_v18  ;;  %v4892_v58 = vpop.permute.xlu2 %2421 }
 0x4fd   : > { %3643 = vpow2.f32 %v1772_v8 }
 0x4fe   : > { %v3640_v14 = vpop.eup %3639 }
 0x4ff   : > { %v1815_v42 = vsel %vm706_vm1, %v3640_v14, 0.0  ;;  %v3642_v34 = vpop.eup %3641  ;;  %v2578_v50 = vpop.permute.xlu0 %2577 }
 0x500   : > { %1816 = vadd.xlane.f32.xlu0 %v1815_v42  ;;  %v4895_v59 = vpop.permute.xlu1 %1940  ;;  %v1812_v16 = vsel %vm706_vm1, %v3642_v34, 0.0  ;;  %v4945_v56 = vmul.f32 %v2578_v50, %v2567_v22  ;;  %v2573_v42 = vld [vmem:[#allocation4 + $0x70] sm:$0xff]  ;;  %v1784_v50 = vld [vmem:[#allocation3 + $0x98] sm:$0xff] }
 0x503   : > { %v3644_v5 = vpop.eup %3643  ;;  %v4899_v53 = vpop.permute.xlu2 %2436 }
 0x504   : > { %v1839_v9 = vpack.c.bf16 %v3642_v34, %v3644_v5  ;;  %v2574_v34 = vld [vmem:[#allocation4 + $0x78] sm:$0xff] }
 0x506   : > { %3231 = vmatmul.msk.bf16.gmra.mxu2 %vm706_vm1, %v2320_v21  ;;  %3191 = vmatmul.msk.bf16.gmra.mxu3 %vm706_vm1, %v1839_v9 }
 0x507   : > { %v2593_v57 = vpop.permute.xlu0 %2592 }
 0x508   : > { %v4905_v62 = vpop.permute.xlu1 %1950  ;;  %v4931_v19 = vmul.f32 %v2593_v57, %v2570_v40 }
 0x50b   : > { %v4907_v45 = vpop.permute.xlu2 %2510 }
 0x50f   : > { %v2608_v51 = vpop.permute.xlu0 %2607 }
 0x510   : > { %v1754_v11 = vpop.permute.xlu1 %1753  ;;  %v4956_v9 = vmul.f32 %v2608_v51, %v2573_v42  ;;  %v2396_v51 = vld [vmem:[#allocation4 + $0xc0] sm:$0xff] }
 0x511   : > { %v1763_v54 = vsub.f32 %v4693_v27, %v1754_v11  ;;  %v1809_v27 = vsel %vm706_vm1, %v3644_v5, 0.0  ;;  %v2444_v22 = vmul.f32 %v4848_v10, %v2396_v51 }
 0x512   : > { %1801 = vadd.xlane.f32.xlu2 %v1800_v12 }
 0x513   : > { %v1778_v49 = vmul.f32 1.442695, %v1763_v54  ;;  %v4914_v3 = vpop.permute.xlu2 %2525 }
 0x515   : > { %3645 = vpow2.f32 %v1778_v49 }
 0x516   : > { %3232 = vmatmul.msk.bf16.gmra.mxu2 %vm706_vm1, %v2321_v0 }
 0x517   : > { %v4943_v37 = vpop.permute.xlu0 %2731 }
 0x518   : > { %1804 = vadd.xlane.f32.xlu1 %v1803_v25  ;;  %v4921_v38 = vpop.permute.xlu1 %2416  ;;  %v1792_v25 = vmul.f32 %v4822_v48, %v1784_v50  ;;  %v1916_v48 = vld [vmem:[#allocation4 + $0x88] sm:$0xff] }
 0x51a   : > { %1810 = vadd.xlane.f32.xlu2 %v1809_v27 }
 0x51b   : > { %v3646_v63 = vpop.eup %3645  ;;  %v4924_v7 = vpop.permute.xlu2 %2540 }
 0x51c   : > { %v1840_v26 = vpack.c.bf16 %v3646_v63, %v3640_v14  ;;  %v1818_v0 = vsel %vm706_vm1, %v3646_v63, 0.0  ;;  %v1781_v14 = vld [vmem:[#allocation3 + $0x80] sm:$0xff] }
 0x51d   : > { %v1789_v21 = vmul.f32 %v4787_v47, %v1781_v14  ;;  %v1915_v47 = vld [vmem:[#allocation4 + $0x80] sm:$0xff] }
 0x51e   : > { %3192 = vmatmul.msk.bf16.gmra.mxu3 %vm706_vm1, %v1840_v26  ;;  %v1963_v57 = vmul.f32 %v4846_v41, %v1915_v47 }
 0x51f   : > { %v4953_v8 = vpop.permute.xlu0 %1960 }
 0x520   : > { %1813 = vadd.xlane.f32.xlu1 %v1812_v16  ;;  %v4928_v28 = vpop.permute.xlu1 %2431 }
 0x522   : > { %1819 = vadd.xlane.f32.xlu2 %v1818_v0 }
 0x523   : > { %v2588_v33 = vpop.permute.xlu2 %2587 }
 0x524   : > { %v4933_v20 = vmul.f32 %v2588_v33, %v2569_v46 }
 0x526   : > { %v3422_v31 = vpack.i.bf16 %v4931_v19, %v4933_v20 }
 0x528   : > { %v4937_v52 = vpop.permute.xlu1 %2505 }
 0x52b   : > { %v4965_v16 = vpop.permute.xlu2 %2602 }
 0x530   : > { %v4939_v55 = vpop.permute.xlu1 %2520 }
 0x538   : > { %v4941_v1 = vpop.permute.xlu1 %2535 }
 0x540   : > { %v2583_v35 = vpop.permute.xlu1 %2582 }
 0x541   : > { %v4947_v24 = vmul.f32 %v2583_v35, %v2568_v17  ;;  %v1964_v17 = vmul.f32 %v4882_v32, %v1916_v48  ;;  %v4971_v35 = vpop.permute.xlu2 %2726 }
 0x543   : > { %v3417_v2 = vpack.i.bf16 %v4947_v24, %v4945_v56 }
 0x548   : > { %v4951_v18 = vpop.permute.xlu1 %2597 }
 0x550   : > { %v2613_v5 = vpop.permute.xlu1 %2612 }
 0x551   : > { %v4958_v11 = vmul.f32 %v2613_v5, %v2574_v34  ;;  %v1799_v54 = vpop.xlane.xlu0 %1798 }
 0x552   : > { %v1821_v12 = vadd.f32 %v1799_v54, %v1789_v21  ;;  %v2397_v21 = vld [vmem:[#allocation4 + $0xc8] sm:$0xff]  ;;  %v1917_v54 = vld [vmem:[#allocation4 + $0x90] sm:$0xff] }
 0x553   : > { %v3432_v49 = vpack.i.bf16 %v4958_v11, %v4956_v9  ;;  %v2445_v50 = vmul.f32 %v4870_v36, %v2397_v21  ;;  %v1965_v10 = vmul.f32 %v4867_v43, %v1917_v54  ;;  %v2702_v21 = vld [vmem:[#allocation3 + $0xf8] sm:$0xff] }
 0x554   : > { %1829 = vst.msk [vmem:[#allocation3 + $0x80] sm:$0xff] %vm482_vm2, %v1821_v12  ;;  %v1787_v12 = vld [vmem:[#allocation3 + $0xb0] sm:$0xff] }
 0x55a   : > { %v1808_v27 = vpop.xlane.xlu0 %1807 }
 0x55b   : > { %v1824_v63 = vadd.f32 %v1808_v27, %v1792_v25  ;;  %v2623_v26 = vld [vmem:[#allocation3 + $0x80] sm:$0xff] }
 0x55c   : > { %3647 = vrcp.f32 %v2623_v26  ;;  %v4978_v26 = vpop.permute.xlu2 %1955 }
 0x55d   : > { %1832 = vst.msk [vmem:[#allocation3 + $0x98] sm:$0xff] %vm482_vm2, %v1824_v63  ;;  %v1795_v63 = vmul.f32 %v4864_v39, %v1787_v12 }
 0x562   : > { %v3648_v0 = vpop.eup %3647  ;;  %v1894_v40 = vpop.f32.mrf.mxu3 }
 0x563   : > { %v1971_v46 = vadd.f32 %v1963_v57, %v1894_v40  ;;  %2649 = vperm.xlu2 %3414, %v3648_v0   ;;  %v2398_v40 = vld [vmem:[#allocation4 + $0xd0] sm:$0xff] }
 0x564   : > { %v2626_v33 = vld [vmem:[#allocation3 + $0x98] sm:$0xff]  ;;  %v2446_v43 = vmul.f32 %v4921_v38, %v2398_v40 }
 0x565   : > { %1979 = vst.msk [vmem:[#allocation4 + $0x80] sm:$0xff] %vm547_vm0, %v1971_v46  ;;  %3649 = vrcp.f32 %v2626_v33  ;;  %v1918_v46 = vld [vmem:[#allocation4 + $0x98] sm:$0xff]  ;;  %v4985_v33 = vpop.permute.xlu1 %2721 }
 0x566   : > { %v1966_v36 = vmul.f32 %v4895_v59, %v1918_v46 }
 0x569   : > { %v2375_v14 = vpop.f32.mrf.mxu2 }
 0x56a   : > { %v2452_v42 = vadd.f32 %v2444_v22, %v2375_v14  ;;  %v1896_v34 = vpop.f32.mrf.mxu3  ;;  %v4988_v14 = vpop.permute.xlu2 %2741 }
 0x56b   : > { %v3650_v41 = vpop.eup %3649  ;;  %v1972_v5 = vadd.f32 %v1964_v17, %v1896_v34  ;;  %v2399_v17 = vld [vmem:[#allocation4 + $0xd8] sm:$0xff] }
 0x56c   : > { %2460 = vst.msk [vmem:[#allocation4 + $0xc0] sm:$0xff] %vm547_vm0, %v2452_v42  ;;  %2664 = vperm.xlu2 %3414, %v3650_v41   ;;  %v2447_v34 = vmul.f32 %v4892_v58, %v2399_v17  ;;  %v1782_v41 = vld [vmem:[#allocation3 + $0x88] sm:$0xff] }
 0x56d   : > { %1980 = vst.msk [vmem:[#allocation4 + $0x88] sm:$0xff] %vm547_vm0, %v1972_v5  ;;  %v4992_v5 = vpop.permute.xlu1 %2736  ;;  %v1790_v12 = vmul.f32 %v4794_v44, %v1782_v41 }
 0x571   : > { %v2377_v32 = vpop.f32.mrf.mxu2 }
 0x572   : > { %v2453_v25 = vadd.f32 %v2445_v50, %v2377_v32  ;;  %v1899_v27 = vpop.f32.mrf.mxu3  ;;  %v2400_v50 = vld [vmem:[#allocation4 + $0xe0] sm:$0xff] }
 0x573   : > { %v1973_v47 = vadd.f32 %v1965_v10, %v1899_v27  ;;  %v1817_v57 = vpop.xlane.xlu0 %1816  ;;  %v1919_v10 = vld [vmem:[#allocation4 + $0xa0] sm:$0xff]  ;;  %v1783_v27 = vld [vmem:[#allocation3 + $0x90] sm:$0xff]  ;;  %v2448_v58 = vmul.f32 %v4879_v60, %v2400_v50  ;;  %v2401_v60 = vld [vmem:[#allocation4 + $0xe8] sm:$0xff] }
 0x574   : > { %2461 = vst.msk [vmem:[#allocation4 + $0xc8] sm:$0xff] %vm547_vm0, %v2453_v25  ;;  %v1827_v0 = vadd.f32 %v1817_v57, %v1795_v63  ;;  %v1967_v63 = vmul.f32 %v4877_v4, %v1919_v10  ;;  %v1791_v44 = vmul.f32 %v4816_v6, %v1783_v27  ;;  %v1786_v6 = vld [vmem:[#allocation3 + $0xa8] sm:$0xff]  ;;  %v2449_v41 = vmul.f32 %v4928_v28, %v2401_v60 }
 0x575   : > { %1981 = vst.msk [vmem:[#allocation4 + $0x90] sm:$0xff] %vm547_vm0, %v1973_v47 }
 0x576   : > { %1835 = vst.msk [vmem:[#allocation3 + $0xb0] sm:$0xff] %vm482_vm2, %v1827_v0  ;;  %v1785_v0 = vld [vmem:[#allocation3 + $0xa0] sm:$0xff] }
 0x579   : > { %v2380_v39 = vpop.f32.mrf.mxu2 }
 0x57a   : > { %v2454_v51 = vadd.f32 %v2446_v43, %v2380_v39  ;;  %v1901_v48 = vpop.f32.mrf.mxu3 }
 0x57b   : > { %v1974_v22 = vadd.f32 %v1966_v36, %v1901_v48  ;;  %v1920_v48 = vld [vmem:[#allocation4 + $0xa8] sm:$0xff] }
 0x57c   : > { %2462 = vst.msk [vmem:[#allocation4 + $0xd0] sm:$0xff] %vm547_vm0, %v2454_v51  ;;  %v1793_v51 = vmul.f32 %v4826_v15, %v1785_v0  ;;  %v2712_v27 = vld [vmem:[#allocation4 + $0xc8] sm:$0xff]  ;;  %v2641_v20 = vld [vmem:[#allocation4 + $0x90] sm:$0xff] }
 0x57d   : > { %1982 = vst.msk [vmem:[#allocation4 + $0x98] sm:$0xff] %vm547_vm0, %v1974_v22  ;;  %v2629_v42 = vld [vmem:[#allocation3 + $0xb0] sm:$0xff]  ;;  %v2571_v22 = vld [vmem:[#allocation4 + $0x60] sm:$0xff]  ;;  %v2760_v0 = vmul.f32 %v4971_v35, %v2712_v27 }
 0x57e   : > { %3651 = vrcp.f32 %v2629_v42  ;;  %v2619_v42 = vmul.f32 %v4951_v18, %v2571_v22 }
 0x57f   : > { %3653 = vrcp.f32 %v2702_v21 }
 0x581   : > { %v2382_v38 = vpop.f32.mrf.mxu2 }
 0x582   : > { %v2455_v59 = vadd.f32 %v2447_v34, %v2382_v38  ;;  %v1968_v38 = vmul.f32 %v4905_v62, %v1920_v48  ;;  %v1921_v48 = vld [vmem:[#allocation4 + $0xb0] sm:$0xff] }
 0x583   : > { %v1969_v22 = vmul.f32 %v4978_v26, %v1921_v48 }
 0x584   : > { %v3652_v54 = vpop.eup %3651  ;;  %2463 = vst.msk [vmem:[#allocation4 + $0xd8] sm:$0xff] %vm547_vm0, %v2455_v59  ;;  %v2572_v59 = vld [vmem:[#allocation4 + $0x68] sm:$0xff]  ;;  %v2642_v19 = vld [vmem:[#allocation4 + $0x98] sm:$0xff] }
 0x585   : > { %v1802_v32 = vpop.xlane.xlu2 %1801  ;;  %2679 = vperm.xlu2 %3414, %v3652_v54   ;;  %v3654_v36 = vpop.eup %3653  ;;  %v2620_v15 = vmul.f32 %v4965_v16, %v2572_v59  ;;  %v2700_v59 = vld [vmem:[#allocation3 + $0xe8] sm:$0xff] }
 0x586   : > { %v1822_v25 = vadd.f32 %v1802_v32, %v1790_v12  ;;  %v1788_v12 = vld [vmem:[#allocation3 + $0xb8] sm:$0xff]  ;;  %v1794_v32 = vmul.f32 %v4829_v23, %v1786_v6  ;;  %v2711_v23 = vld [vmem:[#allocation4 + $0xc0] sm:$0xff] }
 0x587   : > { %v3427_v18 = vpack.i.bf16 %v2620_v15, %v2619_v42  ;;  %v1796_v28 = vmul.f32 %v4836_v30, %v1788_v12 }
 0x588   : > { %1830 = vst.msk [vmem:[#allocation3 + $0x88] sm:$0xff] %vm482_vm2, %v1822_v25 }
 0x589   : > { %v2385_v47 = vpop.f32.mrf.mxu2  ;;  %v1904_v57 = vpop.f32.mrf.mxu3 }
 0x58a   : > { %v2456_v40 = vadd.f32 %v2448_v58, %v2385_v47  ;;  %v1975_v46 = vadd.f32 %v1967_v63, %v1904_v57  ;;  %v2402_v58 = vld [vmem:[#allocation4 + $0xf0] sm:$0xff] }
 0x58b   : > { %v1805_v43 = vpop.xlane.xlu1 %1804  ;;  %v2450_v30 = vmul.f32 %v4899_v53, %v2402_v58 }
 0x58c   : > { %2464 = vst.msk [vmem:[#allocation4 + $0xe0] sm:$0xff] %vm547_vm0, %v2456_v40  ;;  %v1823_v39 = vadd.f32 %v1805_v43, %v1791_v44  ;;  %v2759_v44 = vmul.f32 %v4985_v33, %v2711_v23 }
 0x58d   : > { %1983 = vst.msk [vmem:[#allocation4 + $0xa0] sm:$0xff] %vm547_vm0, %v1975_v46  ;;  %v1811_v4 = vpop.xlane.xlu2 %1810  ;;  %2756 = vperm.xlu2 %3414, %v3654_v36  }
 0x58e   : > { %1831 = vst.msk [vmem:[#allocation3 + $0x90] sm:$0xff] %vm482_vm2, %v1823_v39  ;;  %v1825_v17 = vadd.f32 %v1811_v4, %v1793_v51  ;;  %v3437_v36 = vpack.i.bf16 %v2760_v0, %v2759_v44  ;;  %v2403_v51 = vld [vmem:[#allocation4 + $0xf8] sm:$0xff] }
 0x58f   : > { %v2624_v34 = vld [vmem:[#allocation3 + $0x88] sm:$0xff]  ;;  %v2451_v4 = vmul.f32 %v4889_v61, %v2403_v51 }
 0x590   : > { %1833 = vst.msk [vmem:[#allocation3 + $0xa0] sm:$0xff] %vm482_vm2, %v1825_v17  ;;  %3655 = vrcp.f32 %v2624_v34  ;;  %v2701_v34 = vld [vmem:[#allocation3 + $0xf0] sm:$0xff] }
 0x591   : > { %v2387_v21 = vpop.f32.mrf.mxu2  ;;  %v1906_v54 = vpop.f32.mrf.mxu3 }
 0x592   : > { %v2457_v50 = vadd.f32 %v2449_v41, %v2387_v21  ;;  %v1976_v10 = vadd.f32 %v1968_v38, %v1906_v54  ;;  %v1922_v41 = vld [vmem:[#allocation4 + $0xb8] sm:$0xff] }
 0x593   : > { %v1814_v25 = vpop.xlane.xlu1 %1813  ;;  %v1970_v61 = vmul.f32 %v4953_v8, %v1922_v41 }
 0x594   : > { %2465 = vst.msk [vmem:[#allocation4 + $0xe8] sm:$0xff] %vm547_vm0, %v2457_v50  ;;  %v1826_v62 = vadd.f32 %v1814_v25, %v1794_v32  ;;  %v2639_v50 = vld [vmem:[#allocation4 + $0x80] sm:$0xff]  ;;  %v2640_v32 = vld [vmem:[#allocation4 + $0x88] sm:$0xff] }
 0x595   : > { %1984 = vst.msk [vmem:[#allocation4 + $0xa8] sm:$0xff] %vm547_vm0, %v1976_v10  ;;  %v1820_v63 = vpop.xlane.xlu2 %1819  ;;  %3428 = vrot.lane.b32.xlu2 %v3427_v18, %s3711_s29  ;;  %v2625_v16 = vld [vmem:[#allocation3 + $0x90] sm:$0xff]  ;;  %v2643_v9 = vld [vmem:[#allocation4 + $0xa0] sm:$0xff] }
 0x596   : > { %v3656_v47 = vpop.eup %3655  ;;  %1834 = vst.msk [vmem:[#allocation3 + $0xa8] sm:$0xff] %vm482_vm2, %v1826_v62  ;;  %v1828_v57 = vadd.f32 %v1820_v63, %v1796_v28  ;;  %3657 = vrcp.f32 %v2625_v16 }
 0x597   : > { %2654 = vperm.xlu0 %3415, %v3656_v47   ;;  %v2627_v40 = vld [vmem:[#allocation3 + $0xa0] sm:$0xff] }
 0x598   : > { %1836 = vst.msk [vmem:[#allocation3 + $0xb8] sm:$0xff] %vm482_vm2, %v1828_v57  ;;  %3659 = vrcp.f32 %v2627_v40 }
 0x599   : > { %v2390_v46 = vpop.f32.mrf.mxu2 }
 0x59a   : > { %v2458_v43 = vadd.f32 %v2450_v30, %v2390_v46  ;;  %v2714_v46 = vld [vmem:[#allocation4 + $0xd8] sm:$0xff] }
 0x59c   : > { %v3658_v39 = vpop.eup %3657  ;;  %2466 = vst.msk [vmem:[#allocation4 + $0xf0] sm:$0xff] %vm547_vm0, %v2458_v43  ;;  %v2644_v11 = vld [vmem:[#allocation4 + $0xa8] sm:$0xff] }
 0x59d   : > { %3438 = vrot.lane.b32.xlu2 %v3437_v36, %s3709_s12  ;;  %2659 = vperm.xlu1 %3416, %v3658_v39   ;;  %v2628_v35 = vld [vmem:[#allocation3 + $0xa8] sm:$0xff]  ;;  %v2713_v36 = vld [vmem:[#allocation4 + $0xd0] sm:$0xff]  ;;  %v2762_v39 = vmul.f32 %v4992_v5, %v2714_v46 }
 0x59e   : > { %v3660_v60 = vpop.eup %3659  ;;  %3661 = vrcp.f32 %v2628_v35 }
 0x59f   : > { %2669 = vperm.xlu0 %3415, %v3660_v60   ;;  %v2630_v53 = vld [vmem:[#allocation3 + $0xb8] sm:$0xff]  ;;  %v2715_v60 = vld [vmem:[#allocation4 + $0xe0] sm:$0xff] }
 0x5a0   : > { %3663 = vrcp.f32 %v2630_v53 }
 0x5a1   : > { %v2392_v33 = vpop.f32.mrf.mxu2  ;;  %v1909_v17 = vpop.f32.mrf.mxu3  ;;  %3665 = vrcp.f32 %v2701_v34 }
 0x5a2   : > { %v2459_v42 = vadd.f32 %v2451_v4, %v2392_v33  ;;  %v1977_v6 = vadd.f32 %v1969_v22, %v1909_v17  ;;  %3667 = vrcp.f32 %v2700_v59  ;;  %v2761_v22 = vmul.f32 %v4943_v37, %v2713_v36  ;;  %v2716_v17 = vld [vmem:[#allocation4 + $0xe8] sm:$0xff] }
 0x5a3   : > { %v2717_v48 = vld [vmem:[#allocation4 + $0xf0] sm:$0xff] }
 0x5a4   : > { %v3662_v38 = vpop.eup %3661  ;;  %2467 = vst.msk [vmem:[#allocation4 + $0xf8] sm:$0xff] %vm547_vm0, %v2459_v42 }
 0x5a5   : > { %1985 = vst.msk [vmem:[#allocation4 + $0xb0] sm:$0xff] %vm547_vm0, %v1977_v6  ;;  %2674 = vperm.xlu1 %3416, %v3662_v38   ;;  %v2763_v6 = vmul.f32 %v4988_v14, %v2715_v60  ;;  %v3462_v38 = vpack.i.bf16 %v2762_v39, %v2761_v22  ;;  %v2495_v14 = vld [vmem:[#allocation4] sm:$0xff]  ;;  %v2497_v39 = vld [vmem:[#allocation4 + $0x10] sm:$0xff]  ;;  %v2500_v22 = vld [vmem:[#allocation4 + $0x28] sm:$0xff] }
 0x5a6   : > { %v3664_v15 = vpop.eup %3663 }
 0x5a7   : > { %2684 = vperm.xlu0 %3415, %v3664_v15   ;;  %v3666_v54 = vpop.eup %3665 }
 0x5a8   : > { %v3668_v12 = vpop.eup %3667 }
 0x5a9   : > { %v1911_v26 = vpop.f32.mrf.mxu3 }
 0x5aa   : > { %v1978_v21 = vadd.f32 %v1970_v61, %v1911_v26  ;;  %v2496_v26 = vld [vmem:[#allocation4 + $0x8] sm:$0xff] }
 0x5ab   : > { %v2718_v51 = vld [vmem:[#allocation4 + $0xf8] sm:$0xff] }
 0x5ac   : > { %1986 = vst.msk [vmem:[#allocation4 + $0xb8] sm:$0xff] %vm547_vm0, %v1978_v21  ;;  %v2645_v47 = vld [vmem:[#allocation4 + $0xb0] sm:$0xff] }
 0x5ad   : > { %2751 = vperm.xlu1 %3416, %v3666_v54   ;;  %v2544_v54 = vmul.f32 %v4907_v45, %v2496_v26 }
 0x5af   : > { %2746 = vperm.xlu0 %3415, %v3668_v12   ;;  %v2543_v12 = vmul.f32 %v4937_v52, %v2495_v14 }
 0x5b3   : > { %v2646_v57 = vld [vmem:[#allocation4 + $0xb8] sm:$0xff] }
 0x5b5   : > { %3423 = vrot.lane.b32.xlu1 %v3422_v31, %s3711_s29 }
 0x5b7   : > { %3418 = vrot.lane.b32.xlu0 %v3417_v2, %s3711_s29 }
 0x5bd   : > { %v2650_v8 = vpop.permute.xlu2 %2649 }
 0x5be   : > { %v2687_v18 = vmul.f32 %v2650_v8, %v2639_v50 }
 0x5bf   : > { %3433 = vrot.lane.b32.xlu0 %v3432_v49, %s3711_s29 }
 0x5c6   : > { %v2665_v62 = vpop.permute.xlu2 %2664 }
 0x5c7   : > { %v2690_v56 = vmul.f32 %v2665_v62, %v2642_v19 }
 0x5df   : > { %v2680_v58 = vpop.permute.xlu2 %2679 }
 0x5e0   : > { %v2693_v0 = vmul.f32 %v2680_v58, %v2645_v47  ;;  %v2502_v58 = vld [vmem:[#allocation4 + $0x38] sm:$0xff] }
 0x5e7   : > { %v2757_v43 = vpop.permute.xlu2 %2756 }
 0x5e8   : > { %v2766_v53 = vmul.f32 %v2757_v43, %v2718_v51  ;;  %v2498_v51 = vld [vmem:[#allocation4 + $0x18] sm:$0xff] }
 0x5ef   : > { %v5049_v5 = vpop.permute.xlu2 %3428 }
 0x5f0   : > { %v3431_v47 = vunpack.i.h.bf16 %v5049_v5 }
 0x5f7   : > { %v3439_v21 = vpop.permute.xlu2 %3438 }
 0x609   : > { %v2655_v10 = vpop.permute.xlu0 %2654 }
 0x60a   : > { %v2688_v25 = vmul.f32 %v2655_v10, %v2640_v32  ;;  %v3441_v32 = vunpack.i.h.bf16 %v3439_v21 }
 0x60c   : > { %v3442_v28 = vpack.i.bf16 %v2688_v25, %v2687_v18  ;;  %v3440_v18 = vunpack.i.l.bf16 %v3439_v21 }
 0x60e   : > { %3443 = vrot.lane.b32.xlu1 %v3442_v28, %s3710_s28 }
 0x60f   : > { %v2660_v31 = vpop.permute.xlu1 %2659 }
 0x610   : > { %v2689_v24 = vmul.f32 %v2660_v31, %v2641_v20 }
 0x611   : > { %v2670_v2 = vpop.permute.xlu0 %2669 }
 0x612   : > { %v3447_v27 = vpack.i.bf16 %v2690_v56, %v2689_v24  ;;  %v2691_v63 = vmul.f32 %v2670_v2, %v2643_v9  ;;  %v2501_v9 = vld [vmem:[#allocation4 + $0x30] sm:$0xff] }
 0x614   : > { %3448 = vrot.lane.b32.xlu2 %v3447_v27, %s3710_s28 }
 0x617   : > { %v2675_v49 = vpop.permute.xlu1 %2674 }
 0x618   : > { %v2692_v16 = vmul.f32 %v2675_v49, %v2644_v11  ;;  %v2550_v49 = vmul.f32 %v4924_v7, %v2502_v58 }
 0x619   : > { %v2685_v23 = vpop.permute.xlu0 %2684 }
 0x61a   : > { %v3452_v40 = vpack.i.bf16 %v2692_v16, %v2691_v63  ;;  %v2694_v30 = vmul.f32 %v2685_v23, %v2646_v57  ;;  %v2549_v63 = vmul.f32 %v4941_v1, %v2501_v9  ;;  %v3430_v57 = vunpack.i.l.bf16 %v5049_v5 }
 0x61c   : > { %v3457_v44 = vpack.i.bf16 %v2694_v30, %v2693_v0  ;;  %3453 = vrot.lane.b32.xlu0 %v3452_v40, %s3710_s28 }
 0x61e   : > { %3458 = vrot.lane.b32.xlu1 %v3457_v44, %s3710_s28 }
 0x61f   : > { %v2752_v35 = vpop.permute.xlu1 %2751 }
 0x620   : > { %v2765_v4 = vmul.f32 %v2752_v35, %v2717_v48 }
 0x621   : > { %v2747_v33 = vpop.permute.xlu0 %2746 }
 0x622   : > { %v3472_v42 = vpack.i.bf16 %v2766_v53, %v2765_v4  ;;  %v2764_v34 = vmul.f32 %v2747_v33, %v2716_v17  ;;  %v2545_v4 = vmul.f32 %v4897_v29, %v2497_v39  ;;  %v2499_v33 = vld [vmem:[#allocation4 + $0x20] sm:$0xff]  ;;  %v2546_v17 = vmul.f32 %v4939_v55, %v2498_v51 }
 0x624   : > { %v3467_v41 = vpack.i.bf16 %v2764_v34, %v2763_v6  ;;  %3463 = vrot.lane.b32.xlu0 %v3462_v38, %s3709_s12  ;;  %3473 = vrot.lane.b32.xlu2 %v3472_v42, %s3709_s12  ;;  %v2548_v6 = vmul.f32 %v4909_v13, %v2500_v22  ;;  %v2547_v34 = vmul.f32 %v4914_v3, %v2499_v33 }
 0x626   : > { %3468 = vrot.lane.b32.xlu1 %v3467_v41, %s3709_s12  ;;  %v2867_v55 = vsel %vm547_vm0, %v2547_v34, %v3430_v57 }
 0x627   : > { %v5051_v59 = vpop.permute.xlu1 %3423 }
 0x628   : > { %v3426_v43 = vunpack.i.h.bf16 %v5051_v59  ;;  %v3425_v36 = vunpack.i.l.bf16 %v5051_v59 }
 0x629   : > { %v3419_v37 = vpop.permute.xlu0 %3418 }
 0x62a   : > { %v3421_v15 = vunpack.i.h.bf16 %v3419_v37  ;;  %v3420_v61 = vunpack.i.l.bf16 %v3419_v37  ;;  %v2866_v59 = vsel %vm547_vm0, %v2546_v17, %v3426_v43  ;;  %v2865_v37 = vsel %vm547_vm0, %v2545_v4, %v3425_v36 }
 0x62c   : > { %v2864_v25 = vsel %vm547_vm0, %v2544_v54, %v3421_v15  ;;  %v2863_v62 = vsel %vm547_vm0, %v2543_v12, %v3420_v61  ;;  %v2868_v61 = vsel %vm547_vm0, %v2548_v6, %v3431_v47 }
 0x631   : > { %v3434_v31 = vpop.permute.xlu0 %3433 }
 0x632   : > { %v3436_v24 = vunpack.i.h.bf16 %v3434_v31  ;;  %v3435_v2 = vunpack.i.l.bf16 %v3434_v31 }
 0x634   : > { %v2870_v40 = vsel %vm547_vm0, %v2550_v49, %v3436_v24  ;;  %v2869_v30 = vsel %vm547_vm0, %v2549_v63, %v3435_v2 }
 0x66e   : > { %v3449_v56 = vpop.permute.xlu2 %3448 }
 0x66f   : > { %v3451_v48 = vunpack.i.h.bf16 %v3449_v56  ;;  %v3450_v35 = vunpack.i.l.bf16 %v3449_v56 }
 0x671   : > { %v2873_v13 = vsel %vm706_vm1, %v2865_v37, %v3450_v35  ;;  %v2874_v3 = vsel %vm706_vm1, %v2866_v59, %v3451_v48 }
 0x67e   : > { %v3474_v11 = vpop.permute.xlu2 %3473 }
 0x67f   : > { %v3476_v46 = vunpack.i.h.bf16 %v3474_v11  ;;  %v3475_v44 = vunpack.i.l.bf16 %v3474_v11 }
 0x680   : > { %v3444_v8 = vpop.permute.xlu1 %3443 }
 0x681   : > { %v3446_v50 = vunpack.i.h.bf16 %v3444_v8  ;;  %v3445_v10 = vunpack.i.l.bf16 %v3444_v8 }
 0x683   : > { %v2872_v28 = vsel %vm706_vm1, %v2864_v25, %v3446_v50  ;;  %v2871_v19 = vsel %vm706_vm1, %v2863_v62, %v3445_v10 }
 0x684   : > { %v2881_v45 = vsel %vm2879_vm3, %v2872_v28, %v3441_v32  ;;  %v2880_v52 = vsel %vm2879_vm3, %v2871_v19, %v3440_v18 }
 0x685   : > { %v3335_v20 = vpack.c.bf16 %v2881_v45, %v2880_v52 }
 0x687   : > { %3336 = vst [vmem:[%s5064_s6] sm:$0xff] %v3335_v20  }
 0x68e   : > { %v3454_v27 = vpop.permute.xlu0 %3453 }
 0x68f   : > { %v3456_v38 = vunpack.i.h.bf16 %v3454_v27  ;;  %v3455_v41 = vunpack.i.l.bf16 %v3454_v27 }
 0x690   : > { %v3459_v16 = vpop.permute.xlu1 %3458 }
 0x691   : > { %v3461_v23 = vunpack.i.h.bf16 %v3459_v16  ;;  %v3460_v0 = vunpack.i.l.bf16 %v3459_v16  ;;  %v2876_v8 = vsel %vm706_vm1, %v2868_v61, %v3456_v38  ;;  %v2875_v50 = vsel %vm706_vm1, %v2867_v55, %v3455_v41 }
 0x693   : > { %v2878_v7 = vsel %vm706_vm1, %v2870_v40, %v3461_v23  ;;  %v2877_v1 = vsel %vm706_vm1, %v2869_v30, %v3460_v0 }
 0x694   : > { %v2887_v60 = vsel %vm2879_vm3, %v2878_v7, %v3476_v46  ;;  %v2886_v53 = vsel %vm2879_vm3, %v2877_v1, %v3475_v44 }
 0x695   : > { %v3350_v42 = vpack.c.bf16 %v2887_v60, %v2886_v53 }
 0x696   : > { %v3464_v5 = vpop.permute.xlu0 %3463 }
 0x697   : > { %3366 = vst [vmem:[%s5064_s6 + $0x18] sm:$0xff] %v3350_v42   ;;  %v3466_v15 = vunpack.i.h.bf16 %v3464_v5  ;;  %v3465_v29 = vunpack.i.l.bf16 %v3464_v5 }
 0x698   : > { %v3469_v26 = vpop.permute.xlu1 %3468 }
 0x699   : > { %v2882_v14 = vsel %vm2879_vm3, %v2873_v13, %v3465_v29  ;;  %v2883_v21 = vsel %vm2879_vm3, %v2874_v3, %v3466_v15  ;;  %v3471_v54 = vunpack.i.h.bf16 %v3469_v26  ;;  %v3470_v12 = vunpack.i.l.bf16 %v3469_v26 }
 0x69a   : > { %v3340_v10 = vpack.c.bf16 %v2883_v21, %v2882_v14 }
 0x69b   : > { %v2885_v32 = vsel %vm2879_vm3, %v2876_v8, %v3471_v54  ;;  %v2884_v18 = vsel %vm2879_vm3, %v2875_v50, %v3470_v12 }
 0x69c   : > { %3364 = vst [vmem:[%s5064_s6 + $0x8] sm:$0xff] %v3340_v10   ;;  %v3345_v25 = vpack.c.bf16 %v2885_v32, %v2884_v18 }
 0x69e   : > { %3365 = vst [vmem:[%s5064_s6 + $0x10] sm:$0xff] %v3345_v25  }
 0x69f PF: > { %s13_s16 = sadd.s32 1, %s3707_s16   ;;  %s5159_s12 = smov %s3695_s13 }
 0x6a0   : > { %p10_p10 = scmp.ge.s32.totalorder %s13_s16, 4   ;;  %s5160_s13 = smov %s3774_s21 }
 0x6a1   : > { %s5161_s14 = smov %s3703_s15  ;;  %s5162_s15 = smov %s5164_s17 }
 0x6a2   :  { %12 = sbr.rel (!%p10_p10) target bundleno = 3 (0x3), region = 223 }

</bundles_post_ra>
